<compile_context>
chip_gen: v7x
topology: tpu7x:2x2x1
jax: 0.10.0
libtpu: 0.0.40
codegen_flags: <defaults>
</compile_context>

<pallas_src>
import functools

import jax
import jax.numpy as jnp
from jax.experimental import pallas as pl
from jax.experimental.pallas import tpu as pltpu


def _round_up(x, m):
    return (x + m - 1) // m * m


def _merge_kernel(p_ref, f_ref, a_ref, b_ref, w1p_ref, w1f_ref, w2_ref, out_ref,
                  *, inv_refer):
    """One (tm, H) output tile.  View axis (n_refer) is folded into the block and
    statically unrolled; encoder + MLP + mean are all fused."""
    cdt = w1p_ref.dtype                             # bf16 compute dtype for MXU
    n_refer, _, pos_dim = p_ref.shape
    tm = out_ref.shape[0]
    pe_dim = a_ref.shape[-1]

    # Hoisted small loads / broadcasts (shared across all view iterations).
    a_rows = [a_ref[d:d + 1, :] for d in range(pos_dim)]     # (1, pe_dim) f32 each
    b_row = jnp.broadcast_to(b_ref[...], (tm, pe_dim))       # (tm, pe_dim) f32
    w1p = w1p_ref[...]                                       # (pe_dim, H) bf16
    w1f = w1f_ref[...]                                       # (F, H)      bf16
    w2 = w2_ref[...]                                         # (H, H)      bf16

    acc = jnp.zeros(out_ref.shape, jnp.float32)
    for r in range(n_refer):                                 # static unroll (small R)
        p_blk = p_ref[r]                                     # (tm, pos_dim) f32
        # Fused encoder: bound-normalization, frequencies and sin/cos phases are
        # all folded into (A, b);  pe = sin(p @ A + b)  computed via VPU
        # broadcast-MACs (K=3 is too small to bother the MXU) + EUP sin.
        ang = b_row
        for d in range(pos_dim):
            ang = ang + p_blk[:, d:d + 1] * a_rows[d]
        pe = jnp.sin(ang)                                    # (tm, pe_dim) f32

        # Hidden layer: x @ W1 without materializing x = cat(pe, features).
        h = jnp.dot(pe.astype(cdt), w1p, preferred_element_type=jnp.float32)
        h = h + jnp.dot(f_ref[r].astype(cdt), w1f,
                        preferred_element_type=jnp.float32)
        h = jnp.maximum(h, 0.0)                              # ReLU, f32

        acc = acc + jnp.dot(h.astype(cdt), w2, preferred_element_type=jnp.float32)

    out_ref[...] = acc * inv_refer                           # mean; single store


@functools.partial(jax.jit, static_argnames=("n_bins", "tm"))
def merge_forward(p, features, bound, params, *, n_bins=4, tm=8192):
    """p: (n_refer, n_points, D) f32, features: (n_refer, n_points, F),
    bound: (D, 2).  Returns latents (n_points, hidden_dim) f32."""
    w1_pe, w1_f, w2 = params
    n_refer, n_points, pos_dim = p.shape
    F = features.shape[-1]
    pe_dim = w1_pe.shape[0]
    H = w2.shape[-1]
    assert pe_dim == 2 * n_bins * pos_dim

    # ---- tiny encoder constants: ang = p @ A + b (normalization folded in) ----
    lo = bound[:, 0].astype(jnp.float32)
    inv = 1.0 / (bound[:, 1] - bound[:, 0]).astype(jnp.float32)
    freqs = (2.0 ** jnp.arange(n_bins, dtype=jnp.float32)) * jnp.pi       # (n_bins,)
    eye = jnp.eye(pos_dim, dtype=jnp.float32)
    sel = jnp.concatenate([eye, eye], axis=1)                             # (D, 2D): [sin | cos]
    S = (sel[:, None, :] * freqs[None, :, None]).reshape(pos_dim, pe_dim) # (D, pe_dim)
    phase = jnp.tile(
        jnp.concatenate([jnp.zeros((pos_dim,), jnp.float32),
                         jnp.full((pos_dim,), jnp.pi / 2.0, jnp.float32)]),
        n_bins)                                                           # (pe_dim,)
    A = inv[:, None] * S                                                  # (D, pe_dim)
    b = (phase - (lo * inv) @ S)[None, :]                                 # (1, pe_dim)

    # ---- tile size: big row tiles, >=2 tiles (v7x 2x TC), VMEM-budget clamp ----
    bytes_per_row = 2 * n_refer * (pos_dim + F) * 4 + 2 * H * 4   # dbl-buffered in+out
    vmem_budget = 36 << 20
    tm_budget = max(16, (vmem_budget // bytes_per_row) // 16 * 16)
    tm_two = _round_up(max(pl.cdiv(n_points, 2), 16), 16)         # keep >= 2 point tiles
    tm_eff = max(16, min(tm, tm_two, tm_budget))
    num_tiles = pl.cdiv(n_points, tm_eff)                         # no whole-array pad

    footprint = tm_eff * bytes_per_row
    vmem_limit = int(min(48 << 20, max(footprint + (4 << 20), 16 << 20)))

    cdt = jnp.bfloat16    # weights only (tiny, one-time); activations stay f32 in HBM

    flops = 2 * n_refer * n_points * (pos_dim * pe_dim + (pe_dim + F) * H + H * H)
    bytes_accessed = (n_refer * n_points * (pos_dim + F) * 4      # p + features (f32)
                      + n_points * H * 4                          # f32 output
                      + (pe_dim + F + H) * H * 2                  # bf16 weights
                      + (pos_dim + 1) * pe_dim * 4)               # encoder constants
    cost = pl.CostEstimate(flops=flops,
                           transcendentals=n_refer * n_points * pe_dim,
                           bytes_accessed=bytes_accessed)

    out = pl.pallas_call(
        functools.partial(_merge_kernel, inv_refer=1.0 / n_refer),
        out_shape=jax.ShapeDtypeStruct((n_points, H), jnp.float32),
        grid_spec=pltpu.PrefetchScalarGridSpec(
            num_scalar_prefetch=0,
            grid=(num_tiles,),
            in_specs=[
                pl.BlockSpec((n_refer, tm_eff, pos_dim), lambda i: (0, i, 0)),  # raw p
                pl.BlockSpec((n_refer, tm_eff, F),       lambda i: (0, i, 0)),  # features
                pl.BlockSpec((pos_dim, pe_dim),          lambda i: (0, 0)),     # encoder A
                pl.BlockSpec((1, pe_dim),                lambda i: (0, 0)),     # encoder b
                pl.BlockSpec((pe_dim, H),                lambda i: (0, 0)),     # W1 (pe rows)
                pl.BlockSpec((F, H),                     lambda i: (0, 0)),     # W1 (feat rows)
                pl.BlockSpec((H, H),                     lambda i: (0, 0)),     # W2
            ],
            out_specs=pl.BlockSpec((tm_eff, H), lambda i: (i, 0)),
        ),
        compiler_params=pltpu.CompilerParams(
            dimension_semantics=("parallel",),
            vmem_limit_bytes=vmem_limit),
        cost_estimate=cost,
    )(p, features, A, b,
      w1_pe.astype(cdt), w1_f.astype(cdt), w2.astype(cdt))

    return out                                                    # (n_points, H) f32


def init_params(key, pe_dim, feature_dim, hidden_dim, dtype=jnp.bfloat16):
    # tcnn CutlassMLP is bias-free; weights stored as (in, out) for x @ W.
    k1, k2, k3 = jax.random.split(key, 3)
    scale = 0.1
    w1_pe = (scale * jax.random.normal(k1, (pe_dim, hidden_dim), jnp.float32)).astype(dtype)
    w1_f = (scale * jax.random.normal(k2, (feature_dim, hidden_dim), jnp.float32)).astype(dtype)
    w2 = (scale * jax.random.normal(k3, (hidden_dim, hidden_dim), jnp.float32)).astype(dtype)
    return (w1_pe, w1_f, w2)


# -------------------------- pure-JAX reference --------------------------------
def _positional_encoding(p, bound, n_bins):
    lo = bound[:, 0]
    inv = 1.0 / (bound[:, 1] - bound[:, 0])
    pn = (p - lo) * inv                                           # (R, N, D)
    freqs = (2.0 ** jnp.arange(n_bins, dtype=jnp.float32)) * jnp.pi
    ang = pn[..., None, :] * freqs[:, None]                       # (R, N, n_bins, D)
    pe = jnp.concatenate([jnp.sin(ang), jnp.cos(ang)], axis=-1)   # (R, N, n_bins, 2D)
    return pe.reshape(*p.shape[:-1], 2 * n_bins * p.shape[-1])


def _reference(p, features, bound, params, n_bins):
    w1_pe, w1_f, w2 = params
    cdt = w1_pe.dtype
    pe = _positional_encoding(p, bound, n_bins).astype(cdt)
    x = jnp.concatenate((pe, features.astype(cdt)), axis=-1)
    w1 = jnp.concatenate((w1_pe, w1_f), axis=0)
    h = jnp.maximum(jnp.dot(x, w1, preferred_element_type=jnp.float32), 0.0)
    out = jnp.dot(h.astype(cdt), w2, preferred_element_type=jnp.float32)
    return jnp.mean(out, axis=0)                                  # (n_points, H)


if __name__ == "__main__":
    # Small shapes consistent with the module defaults (hidden=32, feature=64).
    n_refer, n_points, pos_dim = 2, 200, 3       # 200 exercises the ragged-tile path
    feature_dim, hidden_dim, n_bins = 64, 32, 4
    pe_dim = 2 * n_bins * pos_dim                # 24

    key = jax.random.PRNGKey(0)
    kp, kf, kw = jax.random.split(key, 3)
    p = jax.random.uniform(kp, (n_refer, n_points, pos_dim), jnp.float32, -1.0, 1.0)
    features = jax.random.normal(kf, (n_refer, n_points, feature_dim), jnp.float32)
    bound = jnp.array([[-1.0, 1.0]] * pos_dim, jnp.float32)   # `o` arg of forward is unused upstream
    params = init_params(kw, pe_dim, feature_dim, hidden_dim)

    latents = merge_forward(p, features, bound, params, n_bins=n_bins, tm=8192)
    jax.block_until_ready(latents)

    ref = _reference(p, features, bound, params, n_bins)
    assert latents.shape == (n_points, hidden_dim)
    assert jnp.allclose(latents, ref, atol=1e-2, rtol=1e-2), \
        f"max abs err {float(jnp.max(jnp.abs(latents - ref)))}"

    print("KERNEL_OK")
</pallas_src>

<mosaic_0001>
module attributes {stable_mosaic.version = 11 : i64} {
  func.func @_merge_kernel(%arg0: i32, %arg1: memref<2x112x3xf32, #tpu.memory_space<vmem>>, %arg2: memref<2x112x64xf32, #tpu.memory_space<vmem>>, %arg3: memref<3x24xf32, #tpu.memory_space<vmem>>, %arg4: memref<1x24xf32, #tpu.memory_space<vmem>>, %arg5: memref<24x32xbf16, #tpu.memory_space<vmem>>, %arg6: memref<64x32xbf16, #tpu.memory_space<vmem>>, %arg7: memref<32x32xbf16, #tpu.memory_space<vmem>>, %arg8: memref<112x32xf32, #tpu.memory_space<vmem>>) attributes {dimension_semantics = [#tpu.dimension_semantics<parallel>], iteration_bounds = array<i64: 2>, scalar_prefetch = 0 : i64, scratch_operands = 0 : i64, tpu.core_type = #tpu.core_type<tc>, window_params = [{transform_indices = @transform_0, window_bounds = array<i64: 2, 112, 3>}, {transform_indices = @transform_1, window_bounds = array<i64: 2, 112, 64>}, {pipeline_mode = #tpu.pipeline_mode<synchronous>, transform_indices = @transform_2, window_bounds = array<i64: 3, 24>}, {pipeline_mode = #tpu.pipeline_mode<synchronous>, transform_indices = @transform_3, window_bounds = array<i64: 1, 24>}, {pipeline_mode = #tpu.pipeline_mode<synchronous>, transform_indices = @transform_4, window_bounds = array<i64: 24, 32>}, {pipeline_mode = #tpu.pipeline_mode<synchronous>, transform_indices = @transform_5, window_bounds = array<i64: 64, 32>}, {pipeline_mode = #tpu.pipeline_mode<synchronous>, transform_indices = @transform_6, window_bounds = array<i64: 32, 32>}, {transform_indices = @transform_7, window_bounds = array<i64: 112, 32>}]} {
    %c0 = arith.constant 0 : index
    %c0_0 = arith.constant 0 : index
    %0 = vector.load %arg3[%c0, %c0_0] : memref<3x24xf32, #tpu.memory_space<vmem>>, vector<1x24xf32>
    %c1 = arith.constant 1 : index
    %c0_1 = arith.constant 0 : index
    %1 = vector.load %arg3[%c1, %c0_1] : memref<3x24xf32, #tpu.memory_space<vmem>>, vector<1x24xf32>
    %c2 = arith.constant 2 : index
    %c0_2 = arith.constant 0 : index
    %2 = vector.load %arg3[%c2, %c0_2] : memref<3x24xf32, #tpu.memory_space<vmem>>, vector<1x24xf32>
    %c0_3 = arith.constant 0 : index
    %c0_4 = arith.constant 0 : index
    %3 = vector.load %arg4[%c0_3, %c0_4] : memref<1x24xf32, #tpu.memory_space<vmem>>, vector<1x24xf32>
    %4 = vector.shape_cast %3 : vector<1x24xf32> to vector<1x24xf32>
    %5 = vector.broadcast %4 : vector<1x24xf32> to vector<112x24xf32>
    %c0_5 = arith.constant 0 : index
    %c0_6 = arith.constant 0 : index
    %6 = vector.load %arg5[%c0_5, %c0_6] : memref<24x32xbf16, #tpu.memory_space<vmem>>, vector<24x32xbf16>
    %c0_7 = arith.constant 0 : index
    %c0_8 = arith.constant 0 : index
    %7 = vector.load %arg6[%c0_7, %c0_8] : memref<64x32xbf16, #tpu.memory_space<vmem>>, vector<64x32xbf16>
    %c0_9 = arith.constant 0 : index
    %c0_10 = arith.constant 0 : index
    %8 = vector.load %arg7[%c0_9, %c0_10] : memref<32x32xbf16, #tpu.memory_space<vmem>>, vector<32x32xbf16>
    %cst = arith.constant 0.000000e+00 : f32
    %9 = vector.broadcast %cst : f32 to vector<112x32xf32>
    %c0_11 = arith.constant 0 : index
    %c0_12 = arith.constant 0 : index
    %c0_13 = arith.constant 0 : index
    %10 = vector.load %arg1[%c0_11, %c0_12, %c0_13] : memref<2x112x3xf32, #tpu.memory_space<vmem>>, vector<1x112x3xf32>
    %11 = vector.shape_cast %10 : vector<1x112x3xf32> to vector<112x3xf32>
    %12 = vector.extract_strided_slice %11 {offsets = [0, 0], sizes = [112, 1], strides = [1, 1]} : vector<112x3xf32> to vector<112x1xf32>
    %13 = vector.broadcast %12 : vector<112x1xf32> to vector<112x24xf32>
    %14 = vector.broadcast %0 : vector<1x24xf32> to vector<112x24xf32>
    %15 = arith.mulf %13, %14 : vector<112x24xf32>
    %16 = arith.addf %5, %15 : vector<112x24xf32>
    %17 = vector.extract_strided_slice %11 {offsets = [0, 1], sizes = [112, 1], strides = [1, 1]} : vector<112x3xf32> to vector<112x1xf32>
    %18 = vector.broadcast %17 : vector<112x1xf32> to vector<112x24xf32>
    %19 = vector.broadcast %1 : vector<1x24xf32> to vector<112x24xf32>
    %20 = arith.mulf %18, %19 : vector<112x24xf32>
    %21 = arith.addf %16, %20 : vector<112x24xf32>
    %22 = vector.extract_strided_slice %11 {offsets = [0, 2], sizes = [112, 1], strides = [1, 1]} : vector<112x3xf32> to vector<112x1xf32>
    %23 = vector.broadcast %22 : vector<112x1xf32> to vector<112x24xf32>
    %24 = vector.broadcast %2 : vector<1x24xf32> to vector<112x24xf32>
    %25 = arith.mulf %23, %24 : vector<112x24xf32>
    %26 = arith.addf %21, %25 : vector<112x24xf32>
    %27 = math.sin %26 : vector<112x24xf32>
    %28 = arith.truncf %27 : vector<112x24xf32> to vector<112x24xbf16>
    %cst_14 = arith.constant dense<0.000000e+00> : vector<112x32xf32>
    %29 = tpu.matmul %28, %6, %cst_14 {dimension_numbers = #tpu.dot_dimension_numbers<[1], [0], [0], [1], [0, 0, 1, 1], [], []>} : vector<112x24xbf16>, vector<24x32xbf16>, vector<112x32xf32> -> vector<112x32xf32>
    %c0_15 = arith.constant 0 : index
    %c0_16 = arith.constant 0 : index
    %c0_17 = arith.constant 0 : index
    %30 = vector.load %arg2[%c0_15, %c0_16, %c0_17] : memref<2x112x64xf32, #tpu.memory_space<vmem>>, vector<1x112x64xf32>
    %31 = vector.shape_cast %30 : vector<1x112x64xf32> to vector<112x64xf32>
    %32 = arith.truncf %31 : vector<112x64xf32> to vector<112x64xbf16>
    %cst_18 = arith.constant dense<0.000000e+00> : vector<112x32xf32>
    %33 = tpu.matmul %32, %7, %cst_18 {dimension_numbers = #tpu.dot_dimension_numbers<[1], [0], [0], [1], [0, 0, 1, 1], [], []>} : vector<112x64xbf16>, vector<64x32xbf16>, vector<112x32xf32> -> vector<112x32xf32>
    %34 = arith.addf %29, %33 : vector<112x32xf32>
    %cst_19 = arith.constant 0.000000e+00 : f32
    %35 = vector.broadcast %cst_19 : f32 to vector<112x32xf32>
    %36 = arith.maximumf %34, %35 : vector<112x32xf32>
    %37 = arith.truncf %36 : vector<112x32xf32> to vector<112x32xbf16>
    %cst_20 = arith.constant dense<0.000000e+00> : vector<112x32xf32>
    %38 = tpu.matmul %37, %8, %cst_20 {dimension_numbers = #tpu.dot_dimension_numbers<[1], [0], [0], [1], [0, 0, 1, 1], [], []>} : vector<112x32xbf16>, vector<32x32xbf16>, vector<112x32xf32> -> vector<112x32xf32>
    %39 = arith.addf %9, %38 : vector<112x32xf32>
    %c1_21 = arith.constant 1 : index
    %c0_22 = arith.constant 0 : index
    %c0_23 = arith.constant 0 : index
    %40 = vector.load %arg1[%c1_21, %c0_22, %c0_23] : memref<2x112x3xf32, #tpu.memory_space<vmem>>, vector<1x112x3xf32>
    %41 = vector.shape_cast %40 : vector<1x112x3xf32> to vector<112x3xf32>
    %42 = vector.extract_strided_slice %41 {offsets = [0, 0], sizes = [112, 1], strides = [1, 1]} : vector<112x3xf32> to vector<112x1xf32>
    %43 = vector.broadcast %42 : vector<112x1xf32> to vector<112x24xf32>
    %44 = vector.broadcast %0 : vector<1x24xf32> to vector<112x24xf32>
    %45 = arith.mulf %43, %44 : vector<112x24xf32>
    %46 = arith.addf %5, %45 : vector<112x24xf32>
    %47 = vector.extract_strided_slice %41 {offsets = [0, 1], sizes = [112, 1], strides = [1, 1]} : vector<112x3xf32> to vector<112x1xf32>
    %48 = vector.broadcast %47 : vector<112x1xf32> to vector<112x24xf32>
    %49 = vector.broadcast %1 : vector<1x24xf32> to vector<112x24xf32>
    %50 = arith.mulf %48, %49 : vector<112x24xf32>
    %51 = arith.addf %46, %50 : vector<112x24xf32>
    %52 = vector.extract_strided_slice %41 {offsets = [0, 2], sizes = [112, 1], strides = [1, 1]} : vector<112x3xf32> to vector<112x1xf32>
    %53 = vector.broadcast %52 : vector<112x1xf32> to vector<112x24xf32>
    %54 = vector.broadcast %2 : vector<1x24xf32> to vector<112x24xf32>
    %55 = arith.mulf %53, %54 : vector<112x24xf32>
    %56 = arith.addf %51, %55 : vector<112x24xf32>
    %57 = math.sin %56 : vector<112x24xf32>
    %58 = arith.truncf %57 : vector<112x24xf32> to vector<112x24xbf16>
    %cst_24 = arith.constant dense<0.000000e+00> : vector<112x32xf32>
    %59 = tpu.matmul %58, %6, %cst_24 {dimension_numbers = #tpu.dot_dimension_numbers<[1], [0], [0], [1], [0, 0, 1, 1], [], []>} : vector<112x24xbf16>, vector<24x32xbf16>, vector<112x32xf32> -> vector<112x32xf32>
    %c1_25 = arith.constant 1 : index
    %c0_26 = arith.constant 0 : index
    %c0_27 = arith.constant 0 : index
    %60 = vector.load %arg2[%c1_25, %c0_26, %c0_27] : memref<2x112x64xf32, #tpu.memory_space<vmem>>, vector<1x112x64xf32>
    %61 = vector.shape_cast %60 : vector<1x112x64xf32> to vector<112x64xf32>
    %62 = arith.truncf %61 : vector<112x64xf32> to vector<112x64xbf16>
    %cst_28 = arith.constant dense<0.000000e+00> : vector<112x32xf32>
    %63 = tpu.matmul %62, %7, %cst_28 {dimension_numbers = #tpu.dot_dimension_numbers<[1], [0], [0], [1], [0, 0, 1, 1], [], []>} : vector<112x64xbf16>, vector<64x32xbf16>, vector<112x32xf32> -> vector<112x32xf32>
    %64 = arith.addf %59, %63 : vector<112x32xf32>
    %cst_29 = arith.constant 0.000000e+00 : f32
    %65 = vector.broadcast %cst_29 : f32 to vector<112x32xf32>
    %66 = arith.maximumf %64, %65 : vector<112x32xf32>
    %67 = arith.truncf %66 : vector<112x32xf32> to vector<112x32xbf16>
    %cst_30 = arith.constant dense<0.000000e+00> : vector<112x32xf32>
    %68 = tpu.matmul %67, %8, %cst_30 {dimension_numbers = #tpu.dot_dimension_numbers<[1], [0], [0], [1], [0, 0, 1, 1], [], []>} : vector<112x32xbf16>, vector<32x32xbf16>, vector<112x32xf32> -> vector<112x32xf32>
    %69 = arith.addf %39, %68 : vector<112x32xf32>
    %cst_31 = arith.constant 5.000000e-01 : f32
    %70 = vector.broadcast %cst_31 : f32 to vector<112x32xf32>
    %71 = arith.mulf %69, %70 : vector<112x32xf32>
    %c0_32 = arith.constant 0 : index
    %c0_33 = arith.constant 0 : index
    %72 = vector.load %arg8[%c0_32, %c0_33] : memref<112x32xf32, #tpu.memory_space<vmem>>, vector<112x32xf32>
    tpu.vector_store %arg8[%c0_32, %c0_33], %71 {strides = array<i32>} : memref<112x32xf32, #tpu.memory_space<vmem>>, vector<112x32xf32>,
    return
  }
  func.func @transform_0(%arg0: i32) -> (i32, i32, i32) {
    %c0_i32 = arith.constant 0 : i32
    %c0_i32_0 = arith.constant 0 : i32
    %c0_i32_1 = arith.constant 0 : i32
    return %c0_i32, %arg0, %c0_i32_0 : i32, i32, i32
  }
  func.func @transform_1(%arg0: i32) -> (i32, i32, i32) {
    %c0_i32 = arith.constant 0 : i32
    %c0_i32_0 = arith.constant 0 : i32
    %c0_i32_1 = arith.constant 0 : i32
    return %c0_i32, %arg0, %c0_i32_0 : i32, i32, i32
  }
  func.func @transform_2(%arg0: i32) -> (i32, i32) {
    %c0_i32 = arith.constant 0 : i32
    %c0_i32_0 = arith.constant 0 : i32
    %c0_i32_1 = arith.constant 0 : i32
    return %c0_i32, %c0_i32_0 : i32, i32
  }
  func.func @transform_3(%arg0: i32) -> (i32, i32) {
    %c0_i32 = arith.constant 0 : i32
    %c0_i32_0 = arith.constant 0 : i32
    %c0_i32_1 = arith.constant 0 : i32
    return %c0_i32, %c0_i32_0 : i32, i32
  }
  func.func @transform_4(%arg0: i32) -> (i32, i32) {
    %c0_i32 = arith.constant 0 : i32
    %c0_i32_0 = arith.constant 0 : i32
    %c0_i32_1 = arith.constant 0 : i32
    return %c0_i32, %c0_i32_0 : i32, i32
  }
  func.func @transform_5(%arg0: i32) -> (i32, i32) {
    %c0_i32 = arith.constant 0 : i32
    %c0_i32_0 = arith.constant 0 : i32
    %c0_i32_1 = arith.constant 0 : i32
    return %c0_i32, %c0_i32_0 : i32, i32
  }
  func.func @transform_6(%arg0: i32) -> (i32, i32) {
    %c0_i32 = arith.constant 0 : i32
    %c0_i32_0 = arith.constant 0 : i32
    %c0_i32_1 = arith.constant 0 : i32
    return %c0_i32, %c0_i32_0 : i32, i32
  }
  func.func @transform_7(%arg0: i32) -> (i32, i32) {
    %c0_i32 = arith.constant 0 : i32
    %c0_i32_0 = arith.constant 0 : i32
    return %arg0, %c0_i32 : i32, i32
  }
}

</mosaic_0001>

<bundles_post_ra>
// kernel: tile.6
= control target key start
LH: loop header
LB: loop body
LE: loop exit
PB: predicated region body
PF: predicated region fallthrough
CT: control target
= control target key end

     0   :  { %s22_s0 = inlined_call_operand.vmem [shape: f32[6], index: 0, kind: input, shape index: {}]   ;;  %s23_s1 = inlined_call_operand.vmem [shape: f32[4,6], index: 1, kind: output, shape index: {}]  }
   0x1   :  { %v4_v0 = vld [vmem:[%s22_s0] ss:$0 sm:$0xff] }
   0x2   :  { %5 = vst [vmem:[%s23_s1] sm:$0xf] %v4_v0 }

// kernel: merge_forward.1
= control target key start
LH: loop header
LB: loop body
LE: loop exit
PB: predicated region body
PF: predicated region fallthrough
CT: control target
= control target key end

     0   :  { %s6867_s24 = smov 0   ;;  %s6869_s25 = smov 0   ;;  %s10869_s0 = inlined_call_operand.vmem [shape: f32[2,200,3], index: 0, kind: input, shape index: {}]   ;;  %s10870_s1 = inlined_call_operand.vmem [shape: f32[2,200,64], index: 1, kind: input, shape index: {}]   ;;  %s10871_s2 = inlined_call_operand.vmem [shape: f32[3,24], index: 2, kind: input, shape index: {}]   ;;  %s10872_s3 = inlined_call_operand.vmem [shape: f32[1,24], index: 3, kind: input, shape index: {}]   ;;  %s10873_s4 = inlined_call_operand.vmem [shape: bf16[24,32], index: 4, kind: input, shape index: {}]   ;;  %s10874_s5 = inlined_call_operand.vmem [shape: bf16[64,32], index: 5, kind: input, shape index: {}]   ;;  %s10875_s6 = inlined_call_operand.vmem [shape: bf16[32,32], index: 6, kind: input, shape index: {}]   ;;  %s10876_s7 = inlined_call_operand.vmem [shape: f32[200,32], index: 7, kind: output, shape index: {}]  }
   0x1   :  { %s6871_s26 = smov 0  }
   0x2 LB: > { %s6883_s27 = sadd.s32 4294967295, %s6718_s26   ;;  %s6886_s28 = sadd.s32 1, %s6718_s26   ;;  %s6718_s26 = sphi %s6871_s26, %s11345_s26   ;;  %s6714_s25 = sphi %s6869_s25, %s11344_s25   ;;  %s6710_s24 = sphi %s6867_s24, %s11343_s24  }
   0x3   : > { %s21_s29 = ssub.s32 %s6718_s26, %s6886_s28  ;;  %s24_s30 = sadd.s32 1, %s6714_s25 }
   0x4   : > { %p22_p0 = scmp.eq.s32.totalorder %s21_s29, 0  ;;  %p31_p1 = scmp.ne.s32.totalorder %s6714_s25, %s6710_s24 }
   0x5   : > { %p32_p2 = scmp.eq.s32.totalorder %s6718_s26, 0  ;;  %p192_p3 = scmp.eq.s32.totalorder %s6883_s27, 1 }
   0x6   : > { %s6896_s8 = scalar_select %p22_p0, %s6714_s25, %s24_s30  }
   0x7   : > { %p6898_p4 = por %p32_p2, %p31_p1  ;;  %p6902_p5 = por %p192_p3, %p31_p1 }
   0x8   : > { %p5495_p6 = scmp.ge.s32.totalorder %s6718_s26, 2 }
   0xa   : > { %229 = sbr.rel (%p5495_p6) target bundleno = 163 (0xa3), region = 36 }
  0x11   : > { %232 = sbr.rel (!%p6898_p4) target bundleno = 90 (0x5a), region = 40  ;;  %s234_s11 = sand.u32 (%p6898_p4), 1, %s6714_s25  }
  0x12   : > { %s237_s12 = smul.u32 (%p6898_p4), 14, %s6718_s26 }
  0x13   : > { %s6054_s13 = smul.u32 (%p6898_p4), 224, %s234_s11 }
  0x14   : > { %s238_s14 = ssub.s32 (%p6898_p4), 25, %s237_s12  ;;  %s5723_s15 = smul.u32 (%p6898_p4), 112, %s6718_s26 }
  0x15   : > { %p239_p7 = scmp.lt.s32.totalorder (%p6898_p4), %s238_s14, 14  ;;  %s6920_s20 = scalar_lea.vmem (%p6898_p4), [#allocation2], %s6054_s13  }
  0x16   : > { %s6915_s18 = scalar_lea.vmem (%p6898_p4), %s10869_s0, %s5723_s15  }
  0x18   : > { %s11347_s14 = smov (!%p239_p7, %s238_s14), 14 }
  0x19   : > { %s5496_s19 = sshll.u32 %s11347_s14, 8 }
  0x1a   : > { %p5499_p8 = scmp.eq.s32.totalorder %s5496_s19, 0 }
  0x1b   : > { %6400 = sdivrem.u32 (!%p5499_p8), %s11347_s14, 14 }
  0x1c   : > { %247 = sbr.rel (%p5499_p8) target bundleno = 90 (0x5a), region = 44 }
  0x24   : > { %s6923_s21 = spop.drf %6400 }
  0x25   : > { %p5500_p9 = scmp.le.s32.totalorder %s6923_s21, 0 }
  0x26   : > { %s11011_s22 = smov (!%p5500_p9), %s6920_s20  ;;  %s11012_s23 = smov (!%p5500_p9), %s6915_s18 }
  0x27   : > { %5387 = sbr.rel (%p5500_p9) target bundleno = 61 (0x3d), region = 267  ;;  %s6932_s29 = smov (!%p5500_p9), 0  }
  0x28   : > { %s6934_s30 = smov (!%p5500_p9), 0  }
  0x2e LB: >> { %v367_v0 = vld [vmem:[%s6726_s23] sm:$0xff]  ;;  %v369_v1 = vld [vmem:[%s6726_s23 + $0x8] sm:$0xff]  ;;  %v371_v2 = vld [vmem:[%s6726_s23 + $0x10] sm:$0xff]  ;;  %s423_s11 = sadd.s32 1, %s6730_s29  ;;  %s361_s30 = sadd.s32 1, %s6734_s30   ;;  %s6734_s30 = sphi %s6934_s30, %s361_s30   ;;  %s6730_s29 = sphi %s6932_s29, %s11015_s29   ;;  %s6726_s23 = sphi %s11012_s23, %s11014_s23   ;;  %s6722_s22 = sphi %s11011_s22, %s11013_s22  }
  0x2f   : >> { %368 = vst [vmem:[%s6722_s22] sm:$0xff] %v367_v0  ;;  %370 = vst [vmem:[%s6722_s22 + $0x8] sm:$0xff] %v369_v1  ;;  %v373_v3 = vld [vmem:[%s6726_s23 + $0x18] sm:$0xff]  ;;  %v375_v4 = vld [vmem:[%s6726_s23 + $0x20] sm:$0xff]  ;;  %p424_p10 = scmp.ge.s32.totalorder %s423_s11, %s6923_s21  ;;  %p360_p11 = scmp.ge.s32.totalorder %s361_s30, %s6923_s21 }
  0x30   : >> { %372 = vst [vmem:[%s6722_s22 + $0x10] sm:$0xff] %v371_v2  ;;  %v377_v5 = vld [vmem:[%s6726_s23 + $0x28] sm:$0xff]  ;;  %374 = vst [vmem:[%s6722_s22 + $0x18] sm:$0xff] %v373_v3  ;;  %v379_v6 = vld [vmem:[%s6726_s23 + $0x30] sm:$0xff] }
  0x31   : >> { %376 = vst [vmem:[%s6722_s22 + $0x20] sm:$0xff] %v375_v4  ;;  %378 = vst [vmem:[%s6722_s22 + $0x28] sm:$0xff] %v377_v5  ;;  %v381_v7 = vld [vmem:[%s6726_s23 + $0x38] sm:$0xff]  ;;  %v383_v8 = vld [vmem:[%s6726_s23 + $0x40] sm:$0xff]  ;;  %s11349_s11 = smov (%p424_p10, %s423_s11), 0 }
  0x32   : >> { %380 = vst [vmem:[%s6722_s22 + $0x30] sm:$0xff] %v379_v6  ;;  %382 = vst [vmem:[%s6722_s22 + $0x38] sm:$0xff] %v381_v7  ;;  %v385_v9 = vld [vmem:[%s6726_s23 + $0x48] sm:$0xff]  ;;  %v387_v10 = vld [vmem:[%s6726_s23 + $0x50] sm:$0xff]  ;;  %s426_s12 = smul.u32 112, %s11349_s11  ;;  %s11015_s29 = smov %s11349_s11 }
  0x33   : >> { %384 = vst [vmem:[%s6722_s22 + $0x40] sm:$0xff] %v383_v8  ;;  %v389_v11 = vld [vmem:[%s6726_s23 + $0x58] sm:$0xff]  ;;  %386 = vst [vmem:[%s6722_s22 + $0x48] sm:$0xff] %v385_v9  ;;  %v391_v12 = vld [vmem:[%s6726_s23 + $0x60] sm:$0xff] }
  0x34   : >> { %388 = vst [vmem:[%s6722_s22 + $0x50] sm:$0xff] %v387_v10  ;;  %390 = vst [vmem:[%s6722_s22 + $0x58] sm:$0xff] %v389_v11  ;;  %v393_v13 = vld [vmem:[%s6726_s23 + $0x68] sm:$0xff]  ;;  %v397_v15 = vld [vmem:[%s6726_s23 + $0xd0] sm:$0xff]  ;;  %s428_s13 = scalar_lea.vmem %s6915_s18, %s426_s12   ;;  %s429_s15 = scalar_lea.vmem %s6920_s20, %s426_s12 [#allocation2]  }
  0x35   : >> { %v395_v14 = vld [vmem:[%s6726_s23 + $0xc8] sm:$0xff]  ;;  %392 = vst [vmem:[%s6722_s22 + $0x60] sm:$0xff] %v391_v12  ;;  %394 = vst [vmem:[%s6722_s22 + $0x68] sm:$0xff] %v393_v13  ;;  %v399_v16 = vld [vmem:[%s6726_s23 + $0xd8] sm:$0xff] }
  0x36   : >> { %396 = vst [vmem:[%s6722_s22 + $0x70] sm:$0xff] %v395_v14  ;;  %v401_v17 = vld [vmem:[%s6726_s23 + $0xe0] sm:$0xff]  ;;  %398 = vst [vmem:[%s6722_s22 + $0x78] sm:$0xff] %v397_v15  ;;  %v403_v18 = vld [vmem:[%s6726_s23 + $0xe8] sm:$0xff]  ;;  %363 = sbr.rel (!%p360_p11) target bundleno = 46 (0x2e), region = 273 }
  0x37   : >> { %400 = vst [vmem:[%s6722_s22 + $0x80] sm:$0xff] %v399_v16  ;;  %402 = vst [vmem:[%s6722_s22 + $0x88] sm:$0xff] %v401_v17  ;;  %v405_v19 = vld [vmem:[%s6726_s23 + $0xf0] sm:$0xff]  ;;  %v407_v20 = vld [vmem:[%s6726_s23 + $0xf8] sm:$0xff] }
  0x38   : >> { %404 = vst [vmem:[%s6722_s22 + $0x90] sm:$0xff] %v403_v18  ;;  %406 = vst [vmem:[%s6722_s22 + $0x98] sm:$0xff] %v405_v19  ;;  %v409_v21 = vld [vmem:[%s6726_s23 + $0x100] sm:$0xff]  ;;  %v411_v22 = vld [vmem:[%s6726_s23 + $0x108] sm:$0xff] }
  0x39   : >> { %408 = vst [vmem:[%s6722_s22 + $0xa0] sm:$0xff] %v407_v20  ;;  %v413_v23 = vld [vmem:[%s6726_s23 + $0x110] sm:$0xff]  ;;  %410 = vst [vmem:[%s6722_s22 + $0xa8] sm:$0xff] %v409_v21  ;;  %v415_v24 = vld [vmem:[%s6726_s23 + $0x118] sm:$0xff] }
  0x3a   : >> { %412 = vst [vmem:[%s6722_s22 + $0xb0] sm:$0xff] %v411_v22  ;;  %414 = vst [vmem:[%s6722_s22 + $0xb8] sm:$0xff] %v413_v23  ;;  %v417_v25 = vld [vmem:[%s6726_s23 + $0x120] sm:$0xff]  ;;  %v419_v26 = vld [vmem:[%s6726_s23 + $0x128] sm:$0xff] }
  0x3b   : >> { %416 = vst [vmem:[%s6722_s22 + $0xc0] sm:$0xff] %v415_v24  ;;  %418 = vst [vmem:[%s6722_s22 + $0xc8] sm:$0xff] %v417_v25  ;;  %v421_v27 = vld [vmem:[%s6726_s23 + $0x130] sm:$0xff]  ;;  %s11014_s23 = smov %s428_s13 }
  0x3c   : >> { %420 = vst [vmem:[%s6722_s22 + $0xd0] sm:$0xff] %v419_v26  ;;  %422 = vst [vmem:[%s6722_s22 + $0xd8] sm:$0xff] %v421_v27  ;;  %s11013_s22 = smov %s429_s15 }
  0x3d PF: > { %6402 = sdivrem.u32 %s11347_s14, 14 }
  0x3e   : > { %s5501_s16 = smul.u32 112, %s6923_s21 }
  0x40   : > { %s7022_s17 = scalar_lea.vmem %s6915_s18, %s5501_s16   ;;  %s7025_s19 = scalar_lea.vmem %s6920_s20, %s5501_s16 [#allocation2]  }
  0x46   : > { %s6403_s12 = spop.drf %6402 }
  0x47   : > { %p5503_p12 = scmp.le.s32.totalorder %s6403_s12, 0 }
  0x48   : > { %s6736_s11 = smov (!%p5503_p12), %s7025_s19   ;;  %s6740_s13 = smov (!%p5503_p12), %s7022_s17  }
  0x49   : > { %5401 = sbr.rel (%p5503_p12) target bundleno = 90 (0x5a), region = 278  ;;  %s6744_s30 = smov (!%p5503_p12), 0  }
  0x4a   : > { %s6748_s15 = smov (!%p5503_p12), 0  }
  0x50 LB: >> { %v446_v28 = vld [vmem:[%s6742_s13] sm:$0xff]  ;;  %v448_v29 = vld [vmem:[%s6742_s13 + $0xc8] sm:$0xff]  ;;  %s450_s14 = sadd.s32 1, %s6746_s30  ;;  %s440_s15 = sadd.s32 1, %s6750_s15   ;;  %s6750_s15 = sphi %s6748_s15, %s440_s15   ;;  %s6746_s30 = sphi %s6744_s30, %s6745_s30   ;;  %s6742_s13 = sphi %s6740_s13, %s455_s13   ;;  %s6738_s11 = sphi %s6736_s11, %s456_s11  }
  0x51   : >> { %447 = vst [vmem:[%s6738_s11] sm:$0xff] %v446_v28  ;;  %449 = vst [vmem:[%s6738_s11 + $0x70] sm:$0xff] %v448_v29  ;;  %p451_p13 = scmp.ge.s32.totalorder %s450_s14, %s6403_s12  ;;  %p439_p0 = scmp.ge.s32.totalorder %s440_s15, %s6403_s12 }
  0x53   : >> { %s11351_s14 = smov (%p451_p13, %s450_s14), 0  ;;  %442 = sbr.rel (!%p439_p0) target bundleno = 80 (0x50), region = 284 }
  0x54   : >> { %s5504_s18 = sshll.u32 %s11351_s14, 3  ;;  %s6745_s30 = smov %s11351_s14  }
  0x55   : >> { %s455_s13 = scalar_lea.vmem %s7022_s17, %s5504_s18   ;;  %s456_s11 = scalar_lea.vmem %s7025_s19, %s5504_s18 [#allocation2]  }
  0x5a PF: > { %462 = sbr.rel (!%p6898_p4) target bundleno = 163 (0xa3), region = 92  ;;  %s464_s20 = sand.u32 (%p6898_p4), 1, %s6714_s25  }
  0x5b   : > { %s467_s21 = smul.u32 (%p6898_p4), 14, %s6718_s26 }
  0x5c   : > { %s6055_s22 = smul.u32 (%p6898_p4), 224, %s464_s20 }
  0x5d   : > { %s468_s23 = ssub.s32 (%p6898_p4), 25, %s467_s21  ;;  %s5724_s29 = smul.u32 (%p6898_p4), 112, %s6718_s26 }
  0x5e   : > { %p469_p1 = scmp.lt.s32.totalorder (%p6898_p4), %s468_s23, 14  ;;  %s7044_s9 = scalar_lea.vmem (%p6898_p4), [#allocation3], %s6055_s22  }
  0x5f   : > { %s7039_s13 = scalar_lea.vmem (%p6898_p4), %s10870_s1, %s5724_s29  }
  0x61   : > { %s11353_s23 = smov (!%p469_p1, %s468_s23), 14 }
  0x62   : > { %s5506_s17 = sshll.u32 %s11353_s23, 8 }
  0x63   : > { %p5509_p2 = scmp.eq.s32.totalorder %s5506_s17, 0 }
  0x64   : > { %6404 = sdivrem.u32 (!%p5509_p2), %s11353_s23, 14 }
  0x65   : > { %477 = sbr.rel (%p5509_p2) target bundleno = 163 (0xa3), region = 96 }
  0x6d   : > { %s7047_s19 = spop.drf %6404 }
  0x6e   : > { %p5510_p3 = scmp.le.s32.totalorder %s7047_s19, 0 }
  0x6f   : > { %s11016_s12 = smov (!%p5510_p3), %s7044_s9  ;;  %s11017_s30 = smov (!%p5510_p3), %s7039_s13 }
  0x70   : > { %5415 = sbr.rel (%p5510_p3) target bundleno = 134 (0x86), region = 289  ;;  %s7056_s15 = smov (!%p5510_p3), 0  }
  0x71   : > { %s7058_s14 = smov (!%p5510_p3), 0  }
  0x77 LB: >> { %v597_v30 = vld [vmem:[%s6758_s30] sm:$0xff]  ;;  %v599_v31 = vld [vmem:[%s6758_s30 + $0x8] sm:$0xff]  ;;  %v601_v32 = vld [vmem:[%s6758_s30 + $0x10] sm:$0xff]  ;;  %s653_s18 = sadd.s32 1, %s6762_s15  ;;  %s591_s14 = sadd.s32 1, %s6766_s14   ;;  %s6766_s14 = sphi %s7058_s14, %s591_s14   ;;  %s6762_s15 = sphi %s7056_s15, %s11020_s15   ;;  %s6758_s30 = sphi %s11017_s30, %s11019_s30   ;;  %s6754_s12 = sphi %s11016_s12, %s11018_s12  }
  0x78   : >> { %598 = vst [vmem:[%s6754_s12] sm:$0xff] %v597_v30  ;;  %600 = vst [vmem:[%s6754_s12 + $0x8] sm:$0xff] %v599_v31  ;;  %v603_v33 = vld [vmem:[%s6758_s30 + $0x18] sm:$0xff]  ;;  %v605_v34 = vld [vmem:[%s6758_s30 + $0x20] sm:$0xff]  ;;  %p654_p4 = scmp.ge.s32.totalorder %s653_s18, %s7047_s19  ;;  %p590_p6 = scmp.ge.s32.totalorder %s591_s14, %s7047_s19 }
  0x79   : >> { %602 = vst [vmem:[%s6754_s12 + $0x10] sm:$0xff] %v601_v32  ;;  %v607_v35 = vld [vmem:[%s6758_s30 + $0x28] sm:$0xff]  ;;  %604 = vst [vmem:[%s6754_s12 + $0x18] sm:$0xff] %v603_v33  ;;  %v609_v36 = vld [vmem:[%s6758_s30 + $0x30] sm:$0xff] }
  0x7a   : >> { %606 = vst [vmem:[%s6754_s12 + $0x20] sm:$0xff] %v605_v34  ;;  %608 = vst [vmem:[%s6754_s12 + $0x28] sm:$0xff] %v607_v35  ;;  %v611_v37 = vld [vmem:[%s6758_s30 + $0x38] sm:$0xff]  ;;  %v613_v38 = vld [vmem:[%s6758_s30 + $0x40] sm:$0xff]  ;;  %s11355_s18 = smov (%p654_p4, %s653_s18), 0 }
  0x7b   : >> { %610 = vst [vmem:[%s6754_s12 + $0x30] sm:$0xff] %v609_v36  ;;  %612 = vst [vmem:[%s6754_s12 + $0x38] sm:$0xff] %v611_v37  ;;  %v615_v39 = vld [vmem:[%s6758_s30 + $0x48] sm:$0xff]  ;;  %v617_v40 = vld [vmem:[%s6758_s30 + $0x50] sm:$0xff]  ;;  %s656_s20 = smul.u32 112, %s11355_s18  ;;  %s11020_s15 = smov %s11355_s18 }
  0x7c   : >> { %614 = vst [vmem:[%s6754_s12 + $0x40] sm:$0xff] %v613_v38  ;;  %v619_v41 = vld [vmem:[%s6758_s30 + $0x58] sm:$0xff]  ;;  %616 = vst [vmem:[%s6754_s12 + $0x48] sm:$0xff] %v615_v39  ;;  %v621_v42 = vld [vmem:[%s6758_s30 + $0x60] sm:$0xff] }
  0x7d   : >> { %618 = vst [vmem:[%s6754_s12 + $0x50] sm:$0xff] %v617_v40  ;;  %620 = vst [vmem:[%s6754_s12 + $0x58] sm:$0xff] %v619_v41  ;;  %v623_v43 = vld [vmem:[%s6758_s30 + $0x68] sm:$0xff]  ;;  %v627_v45 = vld [vmem:[%s6758_s30 + $0xd0] sm:$0xff]  ;;  %s658_s21 = scalar_lea.vmem %s7039_s13, %s656_s20   ;;  %s659_s22 = scalar_lea.vmem %s7044_s9, %s656_s20 [#allocation3]  }
  0x7e   : >> { %v625_v44 = vld [vmem:[%s6758_s30 + $0xc8] sm:$0xff]  ;;  %622 = vst [vmem:[%s6754_s12 + $0x60] sm:$0xff] %v621_v42  ;;  %624 = vst [vmem:[%s6754_s12 + $0x68] sm:$0xff] %v623_v43  ;;  %v629_v46 = vld [vmem:[%s6758_s30 + $0xd8] sm:$0xff] }
  0x7f   : >> { %626 = vst [vmem:[%s6754_s12 + $0x70] sm:$0xff] %v625_v44  ;;  %v631_v47 = vld [vmem:[%s6758_s30 + $0xe0] sm:$0xff]  ;;  %628 = vst [vmem:[%s6754_s12 + $0x78] sm:$0xff] %v627_v45  ;;  %v633_v48 = vld [vmem:[%s6758_s30 + $0xe8] sm:$0xff]  ;;  %593 = sbr.rel (!%p590_p6) target bundleno = 119 (0x77), region = 295 }
  0x80   : >> { %630 = vst [vmem:[%s6754_s12 + $0x80] sm:$0xff] %v629_v46  ;;  %632 = vst [vmem:[%s6754_s12 + $0x88] sm:$0xff] %v631_v47  ;;  %v635_v49 = vld [vmem:[%s6758_s30 + $0xf0] sm:$0xff]  ;;  %v637_v50 = vld [vmem:[%s6758_s30 + $0xf8] sm:$0xff] }
  0x81   : >> { %634 = vst [vmem:[%s6754_s12 + $0x90] sm:$0xff] %v633_v48  ;;  %636 = vst [vmem:[%s6754_s12 + $0x98] sm:$0xff] %v635_v49  ;;  %v639_v51 = vld [vmem:[%s6758_s30 + $0x100] sm:$0xff]  ;;  %v641_v52 = vld [vmem:[%s6758_s30 + $0x108] sm:$0xff] }
  0x82   : >> { %638 = vst [vmem:[%s6754_s12 + $0xa0] sm:$0xff] %v637_v50  ;;  %v643_v53 = vld [vmem:[%s6758_s30 + $0x110] sm:$0xff]  ;;  %640 = vst [vmem:[%s6754_s12 + $0xa8] sm:$0xff] %v639_v51  ;;  %v645_v54 = vld [vmem:[%s6758_s30 + $0x118] sm:$0xff] }
  0x83   : >> { %642 = vst [vmem:[%s6754_s12 + $0xb0] sm:$0xff] %v641_v52  ;;  %644 = vst [vmem:[%s6754_s12 + $0xb8] sm:$0xff] %v643_v53  ;;  %v647_v55 = vld [vmem:[%s6758_s30 + $0x120] sm:$0xff]  ;;  %v649_v56 = vld [vmem:[%s6758_s30 + $0x128] sm:$0xff] }
  0x84   : >> { %646 = vst [vmem:[%s6754_s12 + $0xc0] sm:$0xff] %v645_v54  ;;  %648 = vst [vmem:[%s6754_s12 + $0xc8] sm:$0xff] %v647_v55  ;;  %v651_v57 = vld [vmem:[%s6758_s30 + $0x130] sm:$0xff]  ;;  %s11019_s30 = smov %s658_s21 }
  0x85   : >> { %650 = vst [vmem:[%s6754_s12 + $0xd0] sm:$0xff] %v649_v56  ;;  %652 = vst [vmem:[%s6754_s12 + $0xd8] sm:$0xff] %v651_v57  ;;  %s11018_s12 = smov %s659_s22 }
  0x86 PF: > { %6406 = sdivrem.u32 %s11353_s23, 14 }
  0x87   : > { %s5511_s29 = smul.u32 112, %s7047_s19 }
  0x89   : > { %s7146_s16 = scalar_lea.vmem %s7039_s13, %s5511_s29   ;;  %s7149_s11 = scalar_lea.vmem %s7044_s9, %s5511_s29 [#allocation3]  }
  0x8f   : > { %s6407_s17 = spop.drf %6406 }
  0x90   : > { %p5513_p7 = scmp.le.s32.totalorder %s6407_s17, 0 }
  0x91   : > { %s6768_s18 = smov (!%p5513_p7), %s7149_s11   ;;  %s6772_s20 = smov (!%p5513_p7), %s7146_s16  }
  0x92   : > { %5429 = sbr.rel (%p5513_p7) target bundleno = 163 (0xa3), region = 300  ;;  %s6776_s14 = smov (!%p5513_p7), 0  }
  0x93   : > { %s6780_s21 = smov (!%p5513_p7), 0  }
  0x99 LB: >> { %v676_v58 = vld [vmem:[%s6774_s20] sm:$0xff]  ;;  %v678_v59 = vld [vmem:[%s6774_s20 + $0xc8] sm:$0xff]  ;;  %s680_s23 = sadd.s32 1, %s6778_s14  ;;  %s670_s21 = sadd.s32 1, %s6782_s21   ;;  %s6782_s21 = sphi %s6780_s21, %s670_s21   ;;  %s6778_s14 = sphi %s6776_s14, %s6777_s14   ;;  %s6774_s20 = sphi %s6772_s20, %s685_s20   ;;  %s6770_s18 = sphi %s6768_s18, %s686_s18  }
  0x9a   : >> { %677 = vst [vmem:[%s6770_s18] sm:$0xff] %v676_v58  ;;  %679 = vst [vmem:[%s6770_s18 + $0x70] sm:$0xff] %v678_v59  ;;  %p681_p8 = scmp.ge.s32.totalorder %s680_s23, %s6407_s17  ;;  %p669_p9 = scmp.ge.s32.totalorder %s670_s21, %s6407_s17 }
  0x9c   : >> { %s11357_s23 = smov (%p681_p8, %s680_s23), 0  ;;  %672 = sbr.rel (!%p669_p9) target bundleno = 153 (0x99), region = 306 }
  0x9d   : >> { %s5514_s13 = sshll.u32 %s11357_s23, 3  ;;  %s6777_s14 = smov %s11357_s23  }
  0x9e   : >> { %s685_s20 = scalar_lea.vmem %s7146_s16, %s5514_s13   ;;  %s686_s18 = scalar_lea.vmem %s7149_s11, %s5514_s13 [#allocation3]  }
  0xa3 PF: > { %p5516_p10 = scmp.ge.s32.totalorder %s6718_s26, 1  ;;  %p691_p11 = scmp.lt.s32.totalorder %s6718_s26, 3 }
  0xa5   : > { %p692_p12 = pnand %p5516_p10, %p691_p11 }
  0xa7   : > { %695 = sbr.rel (%p692_p12) target bundleno = 1593 (0x639), region = 144 }
  0xae   : > { %s698_s9 = sand.u32 1, %s6710_s24   ;;  %v6456_v60 = vld [vmem:[%s10874_s5] sm:$0xff]   ;;  %v10882_v61 = vmov 2   ;;  %v10880_v62 = vmov 1   ;;  %v10895_v63 = vmov 0.0   ;;  %v6457_v0 = vld [vmem:[%s10874_s5 + $0x8] sm:$0xff]  }
  0xaf   : > { %6409 = vset.pattern.permute.xlu0 %v10882_v61  ;;  %6408 = vset.pattern.permute.xlu1 %v10880_v62  ;;  %s6056_s30 = smul.u32 224, %s698_s9  ;;  %vm11000_vm0 = vmmov 0   ;;  %v6458_v3 = vld [vmem:[%s10874_s5 + $0x10] sm:$0xff]   ;;  %v10881_v4 = vmov 0   ;;  %v6459_v5 = vld [vmem:[%s10874_s5 + $0x18] sm:$0xff]   ;;  %vm2580_vm1 = vcmask 523264  }
  0xb0   : > { %5784 = vmatprep.subr.bf16.mxu1 %v10895_v63  ;;  %5820 = vmatprep.subr.bf16.mxu0 %v10895_v63  ;;  %v7324_v55 = vld [vmem:[%s10871_s2] ss:$0 sm:$0xff]  ;;  %v7331_v56 = vld [vmem:[%s10871_s2 + $0x1] ss:$0 sm:$0xff]  ;;  %v7336_v57 = vld [vmem:[%s10871_s2 + $0x2] ss:$0 sm:$0xff] }
  0xb1   : > { %5785 = vmatpush3.bf16.msra.mxu1 %v6456_v60  ;;  %s7170_s22 = scalar_lea.vmem [#allocation2], %s6056_s30  ;;  %5792 = vmatprep.mubr.msk.bf16.mxu1 %vm11000_vm0, %v10895_v63  ;;  %s7188_s18 = scalar_lea.vmem [#allocation3], %s6056_s30  ;;  %v7341_v58 = vld [vmem:[%s10872_s3] ss:$0 sm:$0xff] }
  0xb2   : > { %v5597_v1 = vld [vmem:[%s7170_s22 + $0x70] sm:$0xff]  ;;  %5786 = vmatprep.subr.bf16.mxu1 %v10895_v63  ;;  %v5598_v2 = vld [vmem:[%s7170_s22 + $0x78] sm:$0xff]  ;;  %5824 = vmatprep.mubr.msk.bf16.mxu0 %vm11000_vm0, %v10895_v63  ;;  %v2535_v6 = vld [vmem:[%s7188_s18] sm:$0xff]  ;;  %s6057_s26 = smul.u32 112, %s698_s9 }
  0xb3   : > { %3034 = vperm.xlu0 %6409, %v5597_v1   ;;  %2950 = vperm.xlu1 %6408, %v5597_v1   ;;  %v2536_v7 = vld [vmem:[%s7188_s18 + $0x8] sm:$0xff]  ;;  %v5599_v9 = vld [vmem:[%s7170_s22 + $0x80] sm:$0xff]  ;;  %v5602_v11 = vld [vmem:[%s7170_s22 + $0x98] sm:$0xff]  ;;  %s5111_s24 = smul.u32 (%p6902_p5), 14, %s6883_s27 }
  0xb4   : > { %v5600_v8 = vld [vmem:[%s7170_s22 + $0x88] sm:$0xff]  ;;  %v2549_v10 = vpack.c.bf16 %v2536_v7, %v2535_v6  ;;  %v2537_v12 = vld [vmem:[%s7188_s18 + $0x10] sm:$0xff]  ;;  %v2538_v13 = vld [vmem:[%s7188_s18 + $0x18] sm:$0xff]  ;;  %s10748_s15 = scalar_lea.vmem [#allocation4], %s6057_s26   ;;  %s5725_s9 = smul.u32 (%p6902_p5), 112, %s6883_s27 }
  0xb5   : > { %5787 = vmatpush3.bf16.msra.mxu1 %v6457_v0  ;;  %v7206_v14 = vld [vmem:[%s7170_s22 + $0xa8] sm:$0xff]  ;;  %v2550_v15 = vpack.c.bf16 %v2538_v13, %v2537_v12  ;;  %v7211_v16 = vld [vmem:[%s7170_s22 + $0xb8] sm:$0xff]  ;;  %v2539_v17 = vld [vmem:[%s7188_s18 + $0x20] sm:$0xff]  ;;  %s5112_s29 = ssub.s32 (%p6902_p5), 25, %s5111_s24 }
  0xb6   : > { %5788 = vmatprep.subr.bf16.mxu1 %v10895_v63  ;;  %v2540_v18 = vld [vmem:[%s7188_s18 + $0x28] sm:$0xff]  ;;  %v5601_v21 = vld [vmem:[%s7170_s22 + $0x90] sm:$0xff]  ;;  %v2542_v23 = vld [vmem:[%s7188_s18 + $0x38] sm:$0xff]  ;;  %p5113_p13 = scmp.lt.s32.totalorder (%p6902_p5), %s5112_s29, 14  ;;  %s10785_s17 = scalar_lea.vmem (%p6902_p5), %s10876_s7, %s5725_s9  }
  0xb7   : > { %6410 = vset.pattern.permute.xlu0 %v10881_v4  ;;  %2954 = vperm.xlu1 %6408, %v5598_v2   ;;  %v7221_v19 = vld [vmem:[%s7170_s22 + $0xc8] sm:$0xff]  ;;  %v2551_v20 = vpack.c.bf16 %v2540_v18, %v2539_v17  ;;  %v2541_v22 = vld [vmem:[%s7188_s18 + $0x30] sm:$0xff]  ;;  %v2543_v25 = vld [vmem:[%s7188_s18 + $0x40] sm:$0xff] }
  0xb8   : > { %2853 = vperm.xlu0 %6410, %v5597_v1   ;;  %v2552_v24 = vpack.c.bf16 %v2542_v23, %v2541_v22  ;;  %v2544_v26 = vld [vmem:[%s7188_s18 + $0x48] sm:$0xff]  ;;  %v5603_v27 = vld [vmem:[%s7170_s22 + $0xa0] sm:$0xff]  ;;  %v5605_v29 = vld [vmem:[%s7170_s22 + $0xb0] sm:$0xff] }
  0xb9   : > { %5789 = vmatpush3.bf16.msra.mxu1 %v6458_v3  ;;  %v2553_v28 = vpack.c.bf16 %v2544_v26, %v2543_v25  ;;  %v2545_v30 = vld [vmem:[%s7188_s18 + $0x50] sm:$0xff]  ;;  %v2546_v31 = vld [vmem:[%s7188_s18 + $0x58] sm:$0xff]  ;;  %v5607_v32 = vld [vmem:[%s7170_s22 + $0xc0] sm:$0xff] }
  0xba   : > { %5790 = vmatprep.subr.bf16.mxu1 %v10895_v63  ;;  %v5609_v33 = vld [vmem:[%s7170_s22 + $0xd0] sm:$0xff]  ;;  %v2554_v34 = vpack.c.bf16 %v2546_v31, %v2545_v30  ;;  %v7252_v35 = vld [vmem:[%s7170_s22] sm:$0xff]  ;;  %v5610_v37 = vld [vmem:[%s7170_s22 + $0xd8] sm:$0xff] }
  0xbb   : > { %6411 = vset.pattern.permute.xlu1 %v10882_v61  ;;  %v7260_v36 = vld [vmem:[%s7170_s22 + $0x10] sm:$0xff]  ;;  %v7269_v38 = vld [vmem:[%s7170_s22 + $0x8] sm:$0xff]  ;;  %v7274_v39 = vld [vmem:[%s7170_s22 + $0x18] sm:$0xff] }
  0xbc   : > { %2858 = vperm.xlu0 %6410, %v5598_v2   ;;  %3038 = vperm.xlu1 %6411, %v5598_v2   ;;  %v2547_v40 = vld [vmem:[%s7188_s18 + $0x60] sm:$0xff]  ;;  %v2548_v41 = vld [vmem:[%s7188_s18 + $0x68] sm:$0xff]  ;;  %v7289_v44 = vld [vmem:[%s7170_s22 + $0x38] sm:$0xff] }
  0xbd   : > { %5791 = vmatpush3.bf16.msra.mxu1 %v6459_v5  ;;  %v2555_v42 = vpack.c.bf16 %v2548_v41, %v2547_v40  ;;  %v7281_v43 = vld [vmem:[%s7170_s22 + $0x28] sm:$0xff]  ;;  %v5667_v46 = vld [vmem:[%s7188_s18 + $0x70] sm:$0xff]  ;;  %v5668_v47 = vld [vmem:[%s7188_s18 + $0x78] sm:$0xff] }
  0xbe   : > { %5852 = vmatprep.subr.bf16.mxu1 %v10895_v63  ;;  %v7297_v45 = vld [vmem:[%s7170_s22 + $0x48] sm:$0xff]  ;;  %v4595_v48 = vpack.c.bf16 %v5668_v47, %v5667_v46  ;;  %v7305_v49 = vld [vmem:[%s7170_s22 + $0x20] sm:$0xff]  ;;  %v7347_v1 = vld [vmem:[%s7170_s22 + $0x30] sm:$0xff]  ;;  %v10891_v46 = vmov 683565275  }
  0xbf   : > { %v5669_v50 = vld [vmem:[%s7188_s18 + $0x80] sm:$0xff]  ;;  %v5670_v51 = vld [vmem:[%s7188_s18 + $0x88] sm:$0xff] }
  0xc0   : > { %2868 = vperm.xlu0 %6410, %v5600_v8   ;;  %6412 = vset.pattern.permute.xlu1 %v10881_v4  ;;  %v4596_v54 = vpack.c.bf16 %v5670_v51, %v5669_v50 }
  0xc1   : > { %2863 = vperm.xlu1 %6412, %v5599_v9   ;;  %5793 = vmatmul.mubr.msk.bf16.vlgmr.msra.gmra.mrb[0].mxu1 %vm2580_vm1, %v2549_v10 }
  0xc2   : > { %5796 = vmatprep.mubr.msk.bf16.mxu1 %vm11000_vm0, %v10895_v63  ;;  %5853 = vmatpush3.bf16.msra.mxu1 %v6456_v60 }
  0xc3   : > { %5854 = vmatprep.subr.bf16.mxu1 %v10895_v63 }
  0xc4   : > { %2878 = vperm.xlu0 %6410, %v5602_v11  }
  0xc5   : > { %6413 = vset.pattern.permute.xlu1 %v10880_v62 }
  0xc6   : > { %2958 = vperm.xlu1 %6413, %v5599_v9   ;;  %5855 = vmatpush3.bf16.msra.mxu1 %v6457_v0 }
  0xc7   : > { %5856 = vmatprep.subr.bf16.mxu1 %v10895_v63 }
  0xc8   : > { %2888 = vperm.xlu0 %6410, %v7206_v14  }
  0xc9   : > { %5797 = vmatmul.mubr.msk.bf16.gmra.mrb[4].mxu1 %vm2580_vm1, %v2550_v15  ;;  %v5671_v15 = vld [vmem:[%s7188_s18 + $0x90] sm:$0xff] }
  0xca   : > { %2962 = vperm.xlu1 %6413, %v5600_v8   ;;  %5800 = vmatprep.mubr.msk.bf16.mxu1 %vm11000_vm0, %v10895_v63 }
  0xcb   : > { %5857 = vmatpush3.bf16.msra.mxu1 %v6458_v3 }
  0xcc   : > { %2898 = vperm.xlu0 %6410, %v7211_v16   ;;  %5858 = vmatprep.subr.bf16.mxu1 %v10895_v63 }
  0xce   : > { %6414 = vset.pattern.permute.xlu1 %v10882_v61 }
  0xcf   : > { %3046 = vperm.xlu1 %6414, %v5600_v8   ;;  %5859 = vmatpush3.bf16.msra.mxu1 %v6459_v5 }
  0xd0   : > { %2908 = vperm.xlu0 %6410, %v7221_v19   ;;  %5888 = vmatprep.subr.bf16.mxu1 %v10895_v63 }
  0xd1   : > { %5801 = vmatmul.mubr.msk.bf16.gmra.mrb[8].mxu1 %vm2580_vm1, %v2551_v20 }
  0xd2   : > { %5804 = vmatprep.mubr.msk.bf16.mxu1 %vm11000_vm0, %v10895_v63 }
  0xd3   : > { %6415 = vset.pattern.permute.xlu1 %v10881_v4 }
  0xd4   : > { %6425 = vset.pattern.permute.xlu0 %v10882_v61  ;;  %2873 = vperm.xlu1 %6415, %v5601_v21  }
  0xd5   : > { %3042 = vperm.xlu0 %6425, %v5599_v9  }
  0xd8   : > { %6416 = vset.pattern.permute.xlu1 %v10880_v62 }
  0xd9   : > { %2966 = vperm.xlu1 %6416, %v5601_v21   ;;  %3050 = vperm.xlu0 %6425, %v5601_v21  }
  0xda   : > { %5805 = vmatmul.mubr.msk.bf16.gmra.mrb[12].mxu1 %vm2580_vm1, %v2552_v24 }
  0xdb   : > { %5808 = vmatprep.mubr.msk.bf16.mxu1 %vm11000_vm0, %v10895_v63 }
  0xdd   : > { %2970 = vperm.xlu1 %6416, %v5602_v11   ;;  %3058 = vperm.xlu0 %6425, %v5603_v27  }
  0xe1   : > { %6417 = vset.pattern.permute.xlu1 %v10882_v61  ;;  %3066 = vperm.xlu0 %6425, %v5605_v29  }
  0xe2   : > { %3054 = vperm.xlu1 %6417, %v5602_v11   ;;  %5809 = vmatmul.mubr.msk.bf16.gmra.mrb[16].mxu1 %vm2580_vm1, %v2553_v28 }
  0xe3   : > { %5812 = vmatprep.mubr.msk.bf16.mxu1 %vm11000_vm0, %v10895_v63 }
  0xe5   : > { %3074 = vperm.xlu0 %6425, %v5607_v32  }
  0xe6   : > { %6418 = vset.pattern.permute.xlu1 %v10881_v4 }
  0xe7   : > { %2883 = vperm.xlu1 %6418, %v5603_v27  }
  0xe9   : > { %3082 = vperm.xlu0 %6425, %v5609_v33  }
  0xea   : > { %5813 = vmatmul.mubr.msk.bf16.gmra.mrb[20].mxu1 %vm2580_vm1, %v2554_v34 }
  0xeb   : > { %6419 = vset.pattern.permute.xlu1 %v10880_v62  ;;  %5816 = vmatprep.mubr.msk.bf16.mxu1 %vm11000_vm0, %v10895_v63 }
  0xec   : > { %2974 = vperm.xlu1 %6419, %v5603_v27  }
  0xed   : > { %985 = vperm.xlu0 %6425, %v7252_v35  }
  0xf0   : > { %2978 = vperm.xlu1 %6419, %v7206_v14  }
  0xf1   : > { %993 = vperm.xlu0 %6425, %v7260_v36  }
  0xf2   : > { %5817 = vmatmul.mubr.msk.bf16.gmra.mrb[24].mxu1 %vm2580_vm1, %v2555_v42 }
  0xf3   : > { %5860 = vmatprep.mubr.msk.bf16.mxu1 %vm11000_vm0, %v10895_v63 }
  0xf4   : > { %6420 = vset.pattern.permute.xlu1 %v10882_v61 }
  0xf5   : > { %3062 = vperm.xlu1 %6420, %v7206_v14   ;;  %6436 = vset.pattern.permute.xlu0 %v10881_v4 }
  0xf6   : > { %2918 = vperm.xlu0 %6436, %v5610_v37  }
  0xf9   : > { %6421 = vset.pattern.permute.xlu1 %v10881_v4 }
  0xfa   : > { %2893 = vperm.xlu1 %6421, %v5605_v29   ;;  %801 = vperm.xlu0 %6436, %v7269_v38  }
  0xfb   : > { %5861 = vmatmul.mubr.msk.bf16.vlgmr.msra.gmra.mrb[28].mxu1 %vm2580_vm1, %v4595_v48  ;;  %v10889_v48 = vmov 2475754826  }
  0xfc   : > { %5864 = vmatprep.mubr.msk.bf16.mxu1 %vm11000_vm0, %v10895_v63 }
  0xfe   : > { %6422 = vset.pattern.permute.xlu1 %v10880_v62  ;;  %811 = vperm.xlu0 %6436, %v7274_v39  }
  0xff   : > { %2982 = vperm.xlu1 %6422, %v5605_v29  }
 0x102   : > { %821 = vperm.xlu0 %6436, %v7281_v43  }
 0x103   : > { %2986 = vperm.xlu1 %6422, %v7211_v16   ;;  %5865 = vmatmul.mubr.msk.bf16.gmra.mrb[32].mxu1 %vm2580_vm1, %v4596_v54 }
 0x104   : > { %5868 = vmatprep.mubr.msk.bf16.mxu1 %vm11000_vm0, %v10895_v63 }
 0x106   : > { %831 = vperm.xlu0 %6436, %v7289_v44  }
 0x107   : > { %6423 = vset.pattern.permute.xlu1 %v10882_v61 }
 0x108   : > { %3070 = vperm.xlu1 %6423, %v7211_v16   ;;  %v5672_v16 = vld [vmem:[%s7188_s18 + $0x98] sm:$0xff] }
 0x10a   : > { %841 = vperm.xlu0 %6436, %v7297_v45  }
 0x10c   : > { %6424 = vset.pattern.permute.xlu1 %v10881_v4 }
 0x10d   : > { %2903 = vperm.xlu1 %6424, %v5607_v32  }
 0x10e   : > { %6445 = vset.pattern.permute.xlu0 %v10882_v61 }
 0x10f   : > { %1001 = vperm.xlu0 %6445, %v7305_v49  }
 0x111   : > { %6426 = vset.pattern.permute.xlu1 %v10880_v62 }
 0x112   : > { %2990 = vperm.xlu1 %6426, %v5607_v32  }
 0x113   : > { %1009 = vperm.xlu0 %6445, %v7347_v1  }
 0x116   : > { %2994 = vperm.xlu1 %6426, %v7221_v19  }
 0x11a   : > { %6427 = vset.pattern.permute.xlu1 %v10882_v61 }
 0x11b   : > { %3078 = vperm.xlu1 %6427, %v7221_v19   ;;  %v4597_v19 = vpack.c.bf16 %v5672_v16, %v5671_v15 }
 0x11d   : > { %5869 = vmatmul.mubr.msk.bf16.gmra.mrb[36].mxu1 %vm2580_vm1, %v4597_v19 }
 0x11e   : > { %5872 = vmatprep.mubr.msk.bf16.mxu1 %vm11000_vm0, %v10895_v63 }
 0x11f   : > { %6428 = vset.pattern.permute.xlu1 %v10881_v4 }
 0x120   : > { %2913 = vperm.xlu1 %6428, %v5609_v33  }
 0x124   : > { %6429 = vset.pattern.permute.xlu1 %v10880_v62 }
 0x125   : > { %2998 = vperm.xlu1 %6429, %v5609_v33  }
 0x129   : > { %3002 = vperm.xlu1 %6429, %v5610_v37  }
 0x12d   : > { %6430 = vset.pattern.permute.xlu1 %v10882_v61 }
 0x12e   : > { %3086 = vperm.xlu1 %6430, %v5610_v37  }
 0x132   : > { %6431 = vset.pattern.permute.xlu1 %v10881_v4  ;;  %v2951_v52 = vpop.permute.xlu1 %2950  ;;  %v3035_v53 = vpop.permute.xlu0 %3034 }
 0x133   : > { %796 = vperm.xlu1 %6431, %v7252_v35   ;;  %v3005_v2 = vmul.f32 %v7331_v56, %v2951_v52  ;;  %v3089_v3 = vmul.f32 %v7336_v57, %v3035_v53  ;;  %v10897_v53 = vmov 2131351028  }
 0x136   : > { %v2955_v60 = vpop.permute.xlu1 %2954 }
 0x137   : > { %v2854_v59 = vpop.permute.xlu0 %2853  ;;  %6432 = vset.pattern.permute.xlu1 %v10880_v62  ;;  %v3006_v12 = vmul.f32 %v7331_v56, %v2955_v60  ;;  %v10901_v60 = vmov 2102212464  }
 0x138   : > { %v2921_v0 = vmul.f32 %v7324_v55, %v2854_v59  ;;  %897 = vperm.xlu1 %6432, %v7252_v35  }
 0x13a   : > { %v2935_v5 = vadd.f32 %v7341_v58, %v2921_v0 }
 0x13b   : > { %v2859_v6 = vpop.permute.xlu0 %2858  ;;  %v3039_v11 = vpop.permute.xlu1 %3038 }
 0x13c   : > { %v3019_v7 = vadd.f32 %v3005_v2, %v2935_v5  ;;  %v2922_v8 = vmul.f32 %v7324_v55, %v2859_v6  ;;  %901 = vperm.xlu1 %6432, %v7269_v38   ;;  %v3090_v18 = vmul.f32 %v7336_v57, %v3039_v11 }
 0x13e   : > { %v7355_v9 = vadd.f32 %v3089_v3, %v3019_v7  ;;  %v2936_v10 = vadd.f32 %v7341_v58, %v2922_v8  ;;  %v10899_v3 = vmov 920167782   ;;  %v10886_v7 = vmov 1326507024  }
 0x13f   : > { %v2869_v28 = vpop.permute.xlu0 %2868 }
 0x140   : > { %v3117_v13 = vand.u32 2147483647, %v7355_v9  ;;  %v3120_v14 = vand.u32 2139095040, %v7355_v9  ;;  %6433 = vset.pattern.permute.xlu1 %v10882_v61  ;;  %v3020_v17 = vadd.f32 %v3006_v12, %v2936_v10  ;;  %v7375_v26 = vpop.permute.xlu1 %2863  ;;  %v2924_v30 = vmul.f32 %v7324_v55, %v2869_v28 }
 0x141   : > { %989 = vperm.xlu1 %6433, %v7269_v38  }
 0x142   : > { %v3121_v20 = vshrl.u32 %v3120_v14, 23  ;;  %v7366_v21 = vadd.f32 %v3090_v18, %v3020_v17  ;;  %v3124_v23 = vand.u32 8388607, %v3117_v13  ;;  %v7385_v40 = vadd.f32 %v7341_v58, %v2924_v30 }
 0x143   : > { %v7395_v51 = vpop.permute.xlu0 %2878 }
 0x144   : > { %v5611_v22 = vadd.s32 4294967169, %v3121_v20  ;;  %v3224_v24 = vand.u32 2139095040, %v7366_v21  ;;  %v3125_v29 = vor.u32 8388608, %v3124_v23  ;;  %v3221_v32 = vand.u32 2147483647, %v7366_v21 }
 0x145   : > { %6434 = vset.pattern.permute.xlu1 %v10881_v4  ;;  %v7387_v41 = vpop.permute.xlu1 %2958 }
 0x146   : > { %v3127_v25 = vadd.s32 1, %v5611_v22  ;;  %806 = vperm.xlu1 %6434, %v7260_v36   ;;  %v3225_v27 = vshrl.u32 %v3224_v24, 23  ;;  %v7382_v37 = vshll.u32 %v3125_v29, 8 }
 0x147   : > { %v7414_v24 = vpop.permute.xlu0 %2888 }
 0x148   : > { %vm3128_vm2 = vcmp.gt.s32.totalorder %v3127_v25, 0  ;;  %v5615_v33 = vadd.s32 4294967169, %v3225_v27 }
 0x149   : > { %v3129_v31 = vsel %vm3128_vm2, %v3127_v25, 0  ;;  %v2963_v20 = vpop.permute.xlu1 %2962 }
 0x14a   : > { %v3131_v34 = vand.u32 31, %v3129_v31  ;;  %6435 = vset.pattern.permute.xlu1 %v10880_v62  ;;  %v3231_v38 = vadd.s32 1, %v5615_v33  ;;  %v7389_v42 = vshrl.u32 %v3129_v31, 5 }
 0x14b   : > { %905 = vperm.xlu1 %6435, %v7260_v36   ;;  %v3228_v36 = vand.u32 8388607, %v3221_v32 }
 0x14c   : > { %v3132_v35 = vsub.s32 32, %v3131_v34  ;;  %v3134_v47 = vshll.u32 %v10891_v46, %v3131_v34  ;;  %v3137_v50 = vshll.u32 %v10889_v48, %v3131_v34  ;;  %v3140_v59 = vshll.u32 %v10897_v53, %v3131_v34 }
 0x14d   : > { %v3143_v2 = vshll.u32 %v10901_v60, %v3131_v34  ;;  %v3146_v6 = vshll.u32 %v10899_v3, %v3131_v34  ;;  %vm3232_vm3 = vcmp.gt.s32.totalorder %v3231_v38, 0  ;;  %vm3149_vm4 = vcmp.lt.s32.totalorder %v7389_v42, 1 }
 0x14e   : > { %v3135_v52 = vshrl.u32 %v10889_v48, %v3132_v35  ;;  %v3138_v54 = vshrl.u32 %v10897_v53, %v3132_v35  ;;  %v3141_v0 = vshrl.u32 %v10901_v60, %v3132_v35  ;;  %v3144_v5 = vshrl.u32 %v10899_v3, %v3132_v35 }
 0x14f   : > { %v3147_v8 = vshrl.u32 %v10886_v7, %v3132_v35  ;;  %909 = vperm.xlu1 %6435, %v7274_v39   ;;  %v3233_v16 = vsel %vm3232_vm3, %v3231_v38, 0  ;;  %vm3152_vm5 = vcmp.lt.s32.totalorder %v7389_v42, 4  ;;  %v3229_v19 = vor.u32 8388608, %v3228_v36 }
 0x150   : > { %v3136_v10 = vor.u32 %v3135_v52, %v3134_v47  ;;  %v3139_v11 = vor.u32 %v3138_v54, %v3137_v50  ;;  %v3142_v12 = vor.u32 %v3141_v0, %v3140_v59  ;;  %v3145_v14 = vor.u32 %v3144_v5, %v3143_v2 }
 0x151   : > { %v3148_v15 = vor.u32 %v3147_v8, %v3146_v6  ;;  %vm3150_vm6 = vcmp.lt.s32.totalorder %v7389_v42, 2  ;;  %vm3151_vm7 = vcmp.lt.s32.totalorder %v7389_v42, 3  ;;  %v3235_v29 = vand.u32 31, %v3233_v16 }
 0x152   : > { %v3157_v17 = vsel %vm3149_vm4, %v3136_v10, %v3139_v11  ;;  %v3161_v18 = vsel %vm3149_vm4, %v3139_v11, %v3142_v12  ;;  %v3158_v22 = vsel %vm3152_vm5, %v3145_v14, 920167782  ;;  %v3154_v25 = vsel %vm3152_vm5, %v3142_v12, 2102212464 }
 0x153   : > { %v3162_v23 = vsel %vm3152_vm5, %v3148_v15, 1326507024  ;;  %6437 = vset.pattern.permute.xlu1 %v10882_v61  ;;  %v3159_v27 = vsel %vm3151_vm7, %v3142_v12, %v3158_v22  ;;  %v3133_v30 = vshrl.u32 %v10891_v46, %v3132_v35  ;;  %v3008_v34 = vmul.f32 %v7331_v56, %v2963_v20  ;;  %v7451_v12 = vpop.permute.xlu0 %2898 }
 0x154   : > { %v3163_v28 = vsel %vm3151_vm7, %v3145_v14, %v3162_v23  ;;  %997 = vperm.xlu1 %6437, %v7274_v39   ;;  %v3160_v31 = vsel %vm3150_vm6, %v3157_v17, %v3159_v27  ;;  %v3155_v35 = vsel %vm3151_vm7, %v3139_v11, %v3154_v25  ;;  %v3236_v52 = vsub.s32 32, %v3235_v29 }
 0x155   : > { %v3164_v33 = vsel %vm3150_vm6, %v3161_v18, %v3163_v28  ;;  %v7433_v50 = vmul.u32.u64.low %v7382_v37, %v3160_v31  ;;  %v7434_v36 = vmul.u32.u64.high %v7382_v37, %v3160_v31, %v7433_v50  ;;  %v3153_v39 = vsel %vm3149_vm4, %v3133_v30, %v3136_v10 }
 0x156   : > { %v7429_v38 = vmul.u32.u64.low %v7382_v37, %v3164_v33  ;;  %v7430_v47 = vmul.u32.u64.high %v7382_v37, %v3164_v33, %v7429_v38  ;;  %v7441_v54 = vshll.u32 %v3229_v19, 8  ;;  %v3234_v59 = vshrl.u32 %v3233_v16, 5 }
 0x157   : > { %v3238_v0 = vshll.u32 %v10891_v46, %v3235_v29  ;;  %v3241_v2 = vshll.u32 %v10889_v48, %v3235_v29  ;;  %v3244_v5 = vshll.u32 %v10897_v53, %v3235_v29  ;;  %v3239_v6 = vshrl.u32 %v10889_v48, %v3236_v52 }
 0x158   : > { %6438 = vset.pattern.permute.xlu1 %v10881_v4  ;;  %v3242_v8 = vshrl.u32 %v10897_v53, %v3236_v52  ;;  %v3245_v10 = vshrl.u32 %v10901_v60, %v3236_v52  ;;  %v3247_v11 = vshll.u32 %v10901_v60, %v3235_v29  ;;  %vm3174_vm8 = vc.u32 %v7430_v47, %v7433_v50 }
 0x159   : > { %816 = vperm.xlu1 %6438, %v7305_v49   ;;  %v3175_v14 = vadd.s32 1, %v7434_v36  ;;  %v3248_v15 = vshrl.u32 %v10899_v3, %v3236_v52  ;;  %v3250_v16 = vshll.u32 %v10899_v3, %v3235_v29  ;;  %v3240_v17 = vor.u32 %v3239_v6, %v3238_v0 }
 0x15a   : > { %v3243_v18 = vor.u32 %v3242_v8, %v3241_v2  ;;  %v3246_v19 = vor.u32 %v3245_v10, %v3244_v5  ;;  %v3251_v20 = vshrl.u32 %v10886_v7, %v3236_v52  ;;  %v3156_v22 = vsel %vm3150_vm6, %v3153_v39, %v3155_v35  ;;  %v3047_v35 = vpop.permute.xlu1 %3046 }
 0x15b   : > { %v3249_v23 = vor.u32 %v3248_v15, %v3247_v11  ;;  %vm3253_vm9 = vcmp.lt.s32.totalorder %v3234_v59, 1  ;;  %vm3256_vm10 = vcmp.lt.s32.totalorder %v3234_v59, 4  ;;  %v3237_v25 = vshrl.u32 %v10891_v46, %v3236_v52  ;;  %v7473_v52 = vpop.permute.xlu0 %2908 }
 0x15c   : > { %v3252_v27 = vor.u32 %v3251_v20, %v3250_v16  ;;  %vm3255_vm11 = vcmp.lt.s32.totalorder %v3234_v59, 3  ;;  %v3258_v28 = vsel %vm3256_vm10, %v3246_v19, 2102212464  ;;  %v3176_v29 = vsel %vm3174_vm8, %v3175_v14, %v7434_v36 }
 0x15d   : > { %6439 = vset.pattern.permute.xlu1 %v10880_v62  ;;  %v3261_v30 = vsel %vm3253_vm9, %v3240_v17, %v3243_v18  ;;  %v3262_v31 = vsel %vm3256_vm10, %v3249_v23, 920167782  ;;  %v3265_v42 = vsel %vm3253_vm9, %v3243_v18, %v3246_v19  ;;  %v3172_v33 = vmul.u32 %v7382_v37, %v3156_v22 }
 0x15e   : > { %913 = vperm.xlu1 %6439, %v7305_v49   ;;  %vm3254_vm12 = vcmp.lt.s32.totalorder %v3234_v59, 2  ;;  %v3263_v38 = vsel %vm3255_vm11, %v3246_v19, %v3262_v31  ;;  %v3266_v39 = vsel %vm3256_vm10, %v3252_v27, 1326507024  ;;  %v3257_v0 = vsel %vm3253_vm9, %v3237_v25, %v3240_v17  ;;  %v7494_v17 = vld [vmem:[%s7170_s22 + $0x40] sm:$0xff] }
 0x15f   : > { %v3259_v36 = vsel %vm3255_vm11, %v3243_v18, %v3258_v28  ;;  %v3264_v2 = vsel %vm3254_vm12, %v3261_v30, %v3263_v38  ;;  %v3267_v5 = vsel %vm3255_vm11, %v3249_v23, %v3266_v39  ;;  %v3177_v6 = vadd.s32 %v3176_v29, %v3172_v33  ;;  %1017 = vperm.xlu0 %6445, %v7494_v17   ;;  %v3043_v23 = vpop.permute.xlu0 %3042  ;;  %v2874_v39 = vpop.permute.xlu1 %2873 }
 0x160   : > { %v3268_v49 = vsel %vm3254_vm12, %v3265_v42, %v3267_v5  ;;  %v7481_v37 = vmul.u32.u64.low %v7441_v54, %v3264_v2  ;;  %v7482_v8 = vmul.u32.u64.high %v7441_v54, %v3264_v2, %v7481_v37  ;;  %v3022_v14 = vadd.f32 %v3008_v34, %v7385_v40 }
 0x161   : > { %v7486_v10 = vmul.u32.u64.low %v7441_v54, %v3268_v49  ;;  %v7487_v11 = vmul.u32.u64.high %v7441_v54, %v3268_v49, %v7486_v10  ;;  %v3092_v15 = vmul.f32 %v7336_v57, %v3047_v35  ;;  %v3260_v16 = vsel %vm3254_vm12, %v3257_v0, %v3259_v36 }
 0x162   : > { %917 = vperm.xlu1 %6439, %v7281_v43   ;;  %v2923_v18 = vmul.f32 %v7324_v55, %v7375_v26  ;;  %v3178_v20 = vadd.s32 536870912, %v3177_v6  ;;  %v3279_v22 = vadd.s32 1, %v7482_v8  ;;  %v3276_v40 = vmul.u32 %v7441_v54, %v3260_v16 }
 0x163   : > { %v7498_v19 = vadd.f32 %v3092_v15, %v3022_v14  ;;  %vm3278_vm13 = vc.u32 %v7487_v11, %v7481_v37  ;;  %v3007_v34 = vmul.f32 %v7331_v56, %v7387_v41  ;;  %v3091_v28 = vmul.f32 %v7336_v57, %v3043_v23  ;;  %v2967_v14 = vpop.permute.xlu1 %2966 }
 0x164   : > { %v3280_v26 = vsel %vm3278_vm13, %v3279_v22, %v7482_v8  ;;  %v2937_v25 = vadd.f32 %v7341_v58, %v2923_v18  ;;  %v7513_v54 = vshrl.u32 %v3178_v20, 30  ;;  %v2925_v18 = vmul.f32 %v7324_v55, %v2874_v39  ;;  %v3051_v39 = vpop.permute.xlu0 %3050 }
 0x165   : > { %11021 = vst [vmem:[#allocation5_spill] sm:$0xff] %v7498_v19  ;;  %v3281_v59 = vadd.s32 %v3280_v26, %v3276_v40  ;;  %v3432_v27 = vand.u32 2139095040, %v7498_v19  ;;  %v10877_v8 = vand.u32 2147483647, %v7498_v19  ;;  %v3009_v20 = vmul.f32 %v7331_v56, %v2967_v14 }
 0x166   : > { %6440 = vset.pattern.permute.xlu1 %v10882_v61  ;;  %v3021_v30 = vadd.f32 %v3007_v34, %v2937_v25  ;;  %v2939_v25 = vadd.f32 %v7341_v58, %v2925_v18  ;;  %vm3119_vm13 = vcmp.lt.s32.totalorder %v7355_v9, 0 }
 0x167   : > { %1005 = vperm.xlu1 %6440, %v7281_v43   ;;  %v3282_v29 = vadd.s32 536870912, %v3281_v59  ;;  %v3433_v31 = vshrl.u32 %v3432_v27, 23  ;;  %v3180_v43 = vshll.u32 %v7513_v54, 30 }
 0x168   : > { %v7518_v33 = vadd.f32 %v3091_v28, %v3021_v30 }
 0x169   : > { %v7516_v41 = vshrl.u32 %v3282_v29, 30  ;;  %v5623_v42 = vadd.s32 4294967169, %v3433_v31  ;;  %v7525_v36 = vsub.s32 %v3177_v6, %v3180_v43 }
 0x16a   : > { %v3328_v0 = vand.u32 2139095040, %v7518_v33 }
 0x16b   : > { %6441 = vset.pattern.permute.xlu1 %v10881_v4  ;;  %v3439_v38 = vadd.s32 1, %v5623_v42  ;;  %v3284_v35 = vshll.u32 %v7516_v41, 30  ;;  %v3183_v15 = vsub.s32 0, %v7525_v36 }
 0x16c   : > { %826 = vperm.xlu1 %6441, %v7347_v1   ;;  %v3329_v10 = vshrl.u32 %v3328_v0, 23 }
 0x16d   : > { %vm3440_vm14 = vcmp.gt.s32.totalorder %v3439_v38, 0  ;;  %v7528_v5 = vsub.s32 %v3281_v59, %v3284_v35  ;;  %v5612_v34 = vmin.u32 %v3183_v15, %v7525_v36 }
 0x16e   : > { %v3441_v2 = vsel %vm3440_vm14, %v3439_v38, 0  ;;  %v5619_v40 = vadd.s32 4294967169, %v3329_v10 }
 0x16f   : > { %v3443_v49 = vand.u32 31, %v3441_v2  ;;  %v3287_v6 = vsub.s32 0, %v7528_v5  ;;  %v3442_v27 = vshrl.u32 %v3441_v2, 5  ;;  %v3185_v14 = vclz %v5612_v34 }
 0x170   : > { %6442 = vset.pattern.permute.xlu1 %v10880_v62  ;;  %v3335_v2 = vadd.s32 1, %v5619_v40 }
 0x171   : > { %921 = vperm.xlu1 %6442, %v7347_v1   ;;  %v3444_v16 = vsub.s32 32, %v3443_v49  ;;  %v3436_v1 = vand.u32 8388607, %v10877_v8  ;;  %v3452_v26 = vshll.u32 %v10897_v53, %v3443_v49  ;;  %v3446_v28 = vshll.u32 %v10891_v46, %v3443_v49 }
 0x172   : > { %v3449_v29 = vshll.u32 %v10889_v48, %v3443_v49  ;;  %v5616_v31 = vmin.u32 %v3287_v6, %v7528_v5  ;;  %v3455_v43 = vshll.u32 %v10901_v60, %v3443_v49  ;;  %v3458_v18 = vshll.u32 %v10899_v3, %v3443_v49 }
 0x173   : > { %v3447_v22 = vshrl.u32 %v10889_v48, %v3444_v16  ;;  %v3450_v23 = vshrl.u32 %v10897_v53, %v3444_v16  ;;  %v3453_v59 = vshrl.u32 %v10901_v60, %v3444_v16  ;;  %v3456_v30 = vshrl.u32 %v10899_v3, %v3444_v16 }
 0x174   : > { %v3459_v38 = vshrl.u32 %v10886_v7, %v3444_v16  ;;  %v3437_v35 = vor.u32 8388608, %v3436_v1  ;;  %vm3464_vm15 = vcmp.lt.s32.totalorder %v3442_v27, 4  ;;  %v10878_v8 = vand.u32 2147483647, %v7518_v33 }
 0x175   : > { %925 = vperm.xlu1 %6442, %v7289_v44   ;;  %v3454_v42 = vor.u32 %v3453_v59, %v3452_v26  ;;  %v3448_v0 = vor.u32 %v3447_v22, %v3446_v28  ;;  %v3451_v10 = vor.u32 %v3450_v23, %v3449_v29  ;;  %v3457_v15 = vor.u32 %v3456_v30, %v3455_v43 }
 0x176   : > { %v3093_v6 = vmul.f32 %v7336_v57, %v3051_v39  ;;  %v3289_v26 = vclz %v5616_v31  ;;  %v3460_v59 = vor.u32 %v3459_v38, %v3458_v18  ;;  %vm3461_vm2 = vcmp.lt.s32.totalorder %v3442_v27, 1 }
 0x177   : > { %v3466_v1 = vsel %vm3464_vm15, %v3454_v42, 2102212464  ;;  %v3445_v22 = vshrl.u32 %v10891_v46, %v3444_v16  ;;  %v3469_v23 = vsel %vm3461_vm2, %v3448_v0, %v3451_v10  ;;  %v3477_v40 = vshll.u32 %v3437_v35, 8 }
 0x178   : > { %vm3336_vm3 = vcmp.gt.s32.totalorder %v3335_v2, 0  ;;  %v5613_v49 = vadd.s32 4294967294, %v3185_v14  ;;  %vm3462_vm4 = vcmp.lt.s32.totalorder %v3442_v27, 2  ;;  %vm3463_vm5 = vcmp.lt.s32.totalorder %v3442_v27, 3 }
 0x179   : > { %6443 = vset.pattern.permute.xlu1 %v10882_v61  ;;  %v3465_v34 = vsel %vm3461_vm2, %v3445_v22, %v3448_v0  ;;  %v3473_v29 = vsel %vm3461_vm2, %v3451_v10, %v3454_v42  ;;  %v5617_v30 = vadd.s32 4294967294, %v3289_v26  ;;  %v3474_v43 = vsel %vm3464_vm15, %v3460_v59, 1326507024 }
 0x17a   : > { %1013 = vperm.xlu1 %6443, %v7289_v44   ;;  %v3023_v44 = vadd.f32 %v3009_v20, %v2939_v25  ;;  %v3470_v20 = vsel %vm3464_vm15, %v3457_v15, 920167782  ;;  %v3467_v25 = vsel %vm3463_vm5, %v3451_v10, %v3466_v1  ;;  %v3337_v38 = vsel %vm3336_vm3, %v3335_v2, 0 }
 0x17b   : > { %v3471_v28 = vsel %vm3463_vm5, %v3454_v42, %v3470_v20  ;;  %v3475_v16 = vsel %vm3463_vm5, %v3457_v15, %v3474_v43  ;;  %v3468_v0 = vsel %vm3462_vm4, %v3465_v34, %v3467_v25  ;;  %v3339_v42 = vand.u32 31, %v3337_v38 }
 0x17c   : > { %v3472_v31 = vsel %vm3462_vm4, %v3469_v23, %v3471_v28  ;;  %v3476_v14 = vsel %vm3462_vm4, %v3473_v29, %v3475_v16  ;;  %v7573_v26 = vadd.f32 %v3093_v6, %v3023_v44  ;;  %vm5614_vm6 = vcmp.lt.s32.totalorder %v5613_v49, 0 }
 0x17d   : > { %v7563_v39 = vmul.u32.u64.low %v3477_v40, %v3472_v31  ;;  %v7564_v35 = vmul.u32.u64.high %v3477_v40, %v3472_v31, %v7563_v39  ;;  %v7570_v10 = vmul.u32.u64.low %v3477_v40, %v3476_v14  ;;  %v7571_v18 = vmul.u32.u64.high %v3477_v40, %v3476_v14, %v7570_v10 }
 0x17e   : > { %6444 = vset.pattern.permute.xlu1 %v10881_v4  ;;  %11022 = vst [vmem:[#allocation6_spill] sm:$0xff] %v7573_v26  ;;  %vm5618_vm7 = vcmp.lt.s32.totalorder %v5617_v30, 0  ;;  %v3332_v2 = vand.u32 8388607, %v10878_v8  ;;  %v7577_v15 = vsub.s32 32, %v3339_v42  ;;  %v3484_v59 = vmul.u32 %v3477_v40, %v3468_v0 }
 0x17f   : > { %836 = vperm.xlu1 %6444, %v7494_v17   ;;  %v7580_v1 = vshrl.u32 %v3337_v38, 5  ;;  %v3342_v27 = vshll.u32 %v10891_v46, %v3339_v42  ;;  %v3345_v6 = vshll.u32 %v10889_v48, %v3339_v42  ;;  %vm3486_vm8 = vc.u32 %v7571_v18, %v7563_v39 }
 0x180   : > { %v3343_v44 = vshrl.u32 %v10889_v48, %v7577_v15  ;;  %v3346_v22 = vshrl.u32 %v10897_v53, %v7577_v15  ;;  %v3349_v23 = vshrl.u32 %v10901_v60, %v7577_v15  ;;  %v3348_v40 = vshll.u32 %v10897_v53, %v3339_v42 }
 0x181   : > { %v3351_v20 = vshll.u32 %v10901_v60, %v3339_v42  ;;  %v3352_v34 = vshrl.u32 %v10899_v3, %v7577_v15  ;;  %v7598_v25 = vsel %vm5618_vm7, 0, %v5617_v30  ;;  %v3333_v38 = vor.u32 8388608, %v3332_v2  ;;  %v6460_v2 = vld [vmem:[%s10873_s4] sm:$0xff]  }
 0x182   : > { %v7601_v29 = vor.u32 %v3343_v44, %v3342_v27  ;;  %v7603_v31 = vor.u32 %v3346_v22, %v3345_v6  ;;  %v3350_v16 = vor.u32 %v3349_v23, %v3348_v40  ;;  %v7607_v14 = vsel %vm5614_vm6, 0, %v5613_v49  ;;  %5889 = vmatpush3.bf16.msra.mxu1 %v6460_v2  ;;  %5821 = vmatpush3.bf16.msra.mxu0 %v6460_v2 }
 0x183   : > { %6446 = vset.pattern.permute.xlu1 %v10880_v62  ;;  %v3353_v0 = vor.u32 %v3352_v34, %v3351_v20  ;;  %v3354_v10 = vshll.u32 %v10899_v3, %v3339_v42  ;;  %v3355_v30 = vshrl.u32 %v10886_v7, %v7577_v15  ;;  %vm3357_vm9 = vcmp.lt.s32.totalorder %v7580_v1, 1  ;;  %5890 = vmatprep.subr.bf16.mxu1 %v10895_v63  ;;  %v790_v20 = vld [vmem:[%s7170_s22 + $0x50] sm:$0xff] }
 0x184   : > { %929 = vperm.xlu1 %6446, %v7494_v17   ;;  %v3487_v17 = vadd.s32 1, %v7564_v35  ;;  %vm3360_vm10 = vcmp.lt.s32.totalorder %v7580_v1, 4  ;;  %vm3359_vm11 = vcmp.lt.s32.totalorder %v7580_v1, 3  ;;  %vm3358_vm12 = vcmp.lt.s32.totalorder %v7580_v1, 2  ;;  %5822 = vmatprep.subr.bf16.mxu0 %v10895_v63 }
 0x185   : > { %v3356_v49 = vor.u32 %v3355_v30, %v3354_v10  ;;  %v3366_v42 = vsel %vm3360_vm10, %v3353_v0, 920167782  ;;  %v3369_v6 = vsel %vm3357_vm9, %v7603_v31, %v3350_v16  ;;  %v3193_v34 = vsub.s32 4294967266, %v7607_v14  ;;  %1025 = vperm.xlu0 %6445, %v790_v20  }
 0x186   : > { %v3488_v28 = vsel %vm3486_vm8, %v3487_v17, %v7564_v35  ;;  %v3536_v35 = vand.u32 2139095040, %v7573_v26  ;;  %v3367_v44 = vsel %vm3359_vm11, %v3350_v16, %v3366_v42  ;;  %v7647_v30 = vshll.u32 %v3333_v38, 8 }
 0x187   : > { %v3489_v43 = vadd.s32 %v3488_v28, %v3484_v59  ;;  %v3297_v59 = vsub.s32 4294967266, %v7598_v25  ;;  %v3370_v23 = vsel %vm3360_vm10, %v3356_v49, 1326507024  ;;  %v3189_v2 = vsub.s32 32, %v7607_v14 }
 0x188   : > { %933 = vperm.xlu1 %6446, %v7297_v45   ;;  %v3537_v40 = vshrl.u32 %v3536_v35, 23  ;;  %v3371_v10 = vsel %vm3359_vm11, %v3353_v0, %v3370_v23  ;;  %v3173_v49 = vadd.s32 %v7433_v50, %v7430_v47  ;;  %v3293_v50 = vsub.s32 32, %v7598_v25 }
 0x189   : > { %v3490_v17 = vadd.s32 536870912, %v3489_v43  ;;  %6450 = vset.pattern.permute.xlu0 %v10881_v4  ;;  %vm3223_vm15 = vcmp.lt.s32.totalorder %v7366_v21, 0  ;;  %vm7734_vm3 = vcmp.le.f32.partialorder %v3117_v13, 0.7853982 }
 0x18a   : > { %v5627_v35 = vadd.s32 4294967169, %v3537_v40  ;;  %v2926_v40 = vmul.f32 %v7324_v55, %v7395_v51  ;;  %v3191_v47 = vshrl.u32 %v3173_v49, %v3189_v2  ;;  %v3341_v51 = vshrl.u32 %v10891_v46, %v7577_v15 }
 0x18b   : > { %v7627_v27 = vshrl.u32 %v3490_v17, 30  ;;  %v3372_v17 = vsel %vm3358_vm12, %v3369_v6, %v3371_v10  ;;  %v3194_v6 = vadd.s32 127, %v3193_v34  ;;  %v3190_v34 = vshll.u32 %v7525_v36, %v7607_v14 }
 0x18c   : > { %6447 = vset.pattern.permute.xlu1 %v10882_v61  ;;  %v7662_v38 = vmul.u32.u64.low %v7647_v30, %v3372_v17  ;;  %v7663_v23 = vmul.u32.u64.high %v7647_v30, %v3372_v17, %v7662_v38  ;;  %v3543_v8 = vadd.s32 1, %v5627_v35  ;;  %v3361_v35 = vsel %vm3357_vm9, %v3341_v51, %v7601_v29 }
 0x18d   : > { %1021 = vperm.xlu1 %6447, %v7297_v45   ;;  %v3365_v45 = vsel %vm3357_vm9, %v7601_v29, %v7603_v31  ;;  %v3492_v28 = vshll.u32 %v7627_v27, 30  ;;  %v3195_v17 = vshll.u32 %v3194_v6, 23  ;;  %v7689_v49 = vor.u32 %v3191_v47, %v3190_v34 }
 0x18e   : > { %v3368_v22 = vsel %vm3358_vm12, %v3365_v45, %v3367_v44  ;;  %v3298_v45 = vadd.s32 127, %v3297_v59  ;;  %vm3544_vm14 = vcmp.gt.s32.totalorder %v3543_v8, 0  ;;  %v3203_v59 = vsub.s32 4, %v7513_v54 }
 0x18f   : > { %v7655_v42 = vmul.u32.u64.low %v7647_v30, %v3368_v22  ;;  %v7656_v44 = vmul.u32.u64.high %v7647_v30, %v3368_v22, %v7655_v42  ;;  %v7659_v0 = vsub.s32 %v3489_v43, %v3492_v28  ;;  %v3362_v43 = vsel %vm3360_vm10, %v3350_v16, 2102212464  ;;  %v2971_v16 = vpop.permute.xlu1 %2970 }
 0x190   : > { %v3299_v22 = vshll.u32 %v3298_v45, 23  ;;  %v3277_v28 = vadd.s32 %v7481_v37, %v7487_v11  ;;  %v3545_v2 = vsel %vm3544_vm14, %v3543_v8, 0  ;;  %v3363_v15 = vsel %vm3359_vm11, %v7603_v31, %v3362_v43 }
 0x191   : > { %6448 = vset.pattern.permute.xlu1 %v10881_v4  ;;  %v3495_v10 = vsub.s32 0, %v7659_v0  ;;  %v2940_v37 = vadd.f32 %v7341_v58, %v2926_v40  ;;  %v3547_v11 = vand.u32 31, %v3545_v2  ;;  %v3294_v8 = vshll.u32 %v7528_v5, %v7598_v25 }
 0x192   : > { %846 = vperm.xlu1 %6448, %v790_v20   ;;  %v3295_v36 = vshrl.u32 %v3277_v28, %v3293_v50  ;;  %v3300_v14 = vor.u32 4788187, %v3299_v22  ;;  %v3383_v45 = vadd.s32 1, %v7656_v44  ;;  %v10879_v38 = vand.u32 2147483647, %v7573_v26 }
 0x193   : > { %v5624_v29 = vmin.u32 %v3495_v10, %v7659_v0  ;;  %v3364_v6 = vsel %vm3358_vm12, %v3361_v35, %v3363_v15  ;;  %vm3382_vm2 = vc.u32 %v7663_v23, %v7655_v42  ;;  %v3548_v31 = vsub.s32 32, %v3547_v11  ;;  %v3055_v51 = vpop.permute.xlu1 %3054 }
 0x194   : > { %v3196_v47 = vor.u32 4788187, %v3195_v17  ;;  %v7704_v40 = vsel %vm3119_vm13, %v3203_v59, %v7513_v54  ;;  %v3010_v25 = vmul.f32 %v7331_v56, %v2971_v16  ;;  %v3199_v1 = vcvt.s32.f32 %v7689_v49 }
 0x195   : > { %v3296_v50 = vor.u32 %v3295_v36, %v3294_v8  ;;  %v3551_v43 = vshrl.u32 %v10889_v48, %v3548_v31  ;;  %v3554_v22 = vshrl.u32 %v10897_v53, %v3548_v31  ;;  %v3301_v34 = vand.u32 2147483647, %v3300_v14 }
 0x196   : > { %6449 = vset.pattern.permute.xlu1 %v10880_v62  ;;  %v3380_v28 = vmul.u32 %v7647_v30, %v3364_v6  ;;  %v3384_v54 = vsel %vm3382_vm2, %v3383_v45, %v7656_v44  ;;  %v3540_v59 = vand.u32 8388607, %v10879_v38  ;;  %v3550_v10 = vshll.u32 %v10891_v46, %v3547_v11 }
 0x197   : > { %937 = vperm.xlu1 %6449, %v790_v20   ;;  %v3307_v20 = vsub.s32 4, %v7516_v41  ;;  %v3553_v16 = vshll.u32 %v10889_v48, %v3547_v11  ;;  %v3557_v17 = vshrl.u32 %v10901_v60, %v3548_v31  ;;  %v3556_v35 = vshll.u32 %v10897_v53, %v3547_v11  ;;  %v2884_v61 = vpop.permute.xlu1 %2883 }
 0x198   : > { %v3559_v15 = vshll.u32 %v10901_v60, %v3547_v11  ;;  %v3560_v30 = vshrl.u32 %v10899_v3, %v3548_v31  ;;  %v3552_v49 = vor.u32 %v3551_v43, %v3550_v10  ;;  %v3562_v36 = vshll.u32 %v10899_v3, %v3547_v11 }
 0x199   : > { %v7709_v5 = vsel %vm3223_vm15, %v3307_v20, %v7516_v41  ;;  %v3497_v41 = vclz %v5624_v29  ;;  %v7722_v20 = vshrl.u32 %v3545_v2, 5  ;;  %v3555_v44 = vor.u32 %v3554_v22, %v3553_v16 }
 0x19a   : > { %v3563_v8 = vshrl.u32 %v10886_v7, %v3548_v31  ;;  %v3303_v14 = vcvt.s32.f32 %v3296_v50  ;;  %v3541_v45 = vor.u32 8388608, %v3540_v59  ;;  %v3558_v29 = vor.u32 %v3557_v17, %v3556_v35 }
 0x19b   : > { %v3561_v6 = vor.u32 %v3560_v30, %v3559_v15  ;;  %v3197_v38 = vand.u32 2147483647, %v3196_v47  ;;  %v7729_v62 = vadd.s32 %v3384_v54, %v3380_v28  ;;  %v3094_v4 = vmul.f32 %v7336_v57, %v3055_v51 }
 0x19c   : > { %v3564_v2 = vor.u32 %v3563_v8, %v3562_v36  ;;  %v3304_v11 = vmul.f32 %v3303_v14, %v3301_v34  ;;  %v5625_v22 = vadd.s32 4294967294, %v3497_v41  ;;  %vm3565_vm4 = vcmp.lt.s32.totalorder %v7722_v20, 1  ;;  %v2975_v36 = vpop.permute.xlu1 %2974 }
 0x19d   : > { %vm3568_vm5 = vcmp.lt.s32.totalorder %v7722_v20, 4  ;;  %vm3567_vm6 = vcmp.lt.s32.totalorder %v7722_v20, 3  ;;  %v3573_v47 = vsel %vm3565_vm4, %v3552_v49, %v3555_v44  ;;  %v3024_v51 = vadd.f32 %v3010_v25, %v2940_v37 }
 0x19e   : > { %v3574_v50 = vsel %vm3568_vm5, %v3561_v6, 920167782  ;;  %vm3566_vm7 = vcmp.lt.s32.totalorder %v7722_v20, 2  ;;  %v3577_v34 = vsel %vm3565_vm4, %v3555_v44, %v3558_v29  ;;  %v3581_v28 = vshll.u32 %v3541_v45, 8 }
 0x19f   : > { %v3575_v13 = vsel %vm3567_vm6, %v3558_v29, %v3574_v50  ;;  %v3386_v54 = vadd.s32 536870912, %v7729_v62  ;;  %v3578_v41 = vsel %vm3568_vm5, %v3564_v2, 1326507024  ;;  %v7755_v10 = vadd.f32 %v3094_v4, %v3024_v51 }
 0x1a0   : > { %v3576_v59 = vsel %vm3566_vm7, %v3573_v47, %v3575_v13  ;;  %v3200_v37 = vmul.f32 %v3199_v1, %v3197_v38  ;;  %v3305_v25 = vxor.u32 2147483648, %v3304_v11  ;;  %vm5626_vm8 = vcmp.lt.s32.totalorder %v5625_v22, 0 }
 0x1a1   : > { %11025 = vst [vmem:[#allocation7_spill] sm:$0xff] %v7755_v10  ;;  %v3579_v16 = vsel %vm3567_vm6, %v3561_v6, %v3578_v41  ;;  %v3570_v17 = vsel %vm3568_vm5, %v3558_v29, 2102212464  ;;  %v7763_v15 = vmul.u32.u64.low %v3581_v28, %v3576_v59  ;;  %v7764_v30 = vmul.u32.u64.high %v3581_v28, %v3576_v59, %v7763_v15 }
 0x1a2   : > { %v3580_v35 = vsel %vm3566_vm7, %v3577_v34, %v3579_v16  ;;  %v3549_v4 = vshrl.u32 %v10891_v46, %v3548_v31  ;;  %v2927_v1 = vmul.f32 %v7324_v55, %v2884_v61  ;;  %vm7774_vm9 = vcmp.le.f32.partialorder %v3221_v32, 0.7853982 }
 0x1a3   : > { %v7768_v8 = vmul.u32.u64.low %v3581_v28, %v3580_v35  ;;  %v7769_v38 = vmul.u32.u64.high %v3581_v28, %v3580_v35, %v7768_v8  ;;  %v7778_v45 = vsel %vm5626_vm8, 0, %v5625_v22  ;;  %v7780_v29 = vshrl.u32 %v3386_v54, 30  ;;  %v5673_v35 = vld [vmem:[%s7188_s18 + $0xa0] sm:$0xff] }
 0x1a4   : > { %v3640_v6 = vand.u32 2139095040, %v7755_v10  ;;  %v2928_v31 = vmul.f32 %v7324_v55, %v7414_v24  ;;  %v3569_v2 = vsel %vm3565_vm4, %v3549_v4, %v3552_v49  ;;  %v3571_v61 = vsel %vm3567_vm6, %v3555_v44, %v3570_v17  ;;  %v3059_v24 = vpop.permute.xlu0 %3058 }
 0x1a5   : > { %v3011_v32 = vmul.f32 %v7331_v56, %v2975_v36  ;;  %v3206_v22 = vsel %vm7734_vm3, 0, %v7704_v40  ;;  %v3310_v47 = vsel %vm7774_vm9, 0, %v7709_v5  ;;  %v3591_v50 = vadd.s32 1, %v7764_v30  ;;  %v5674_v36 = vld [vmem:[%s7188_s18 + $0xa8] sm:$0xff] }
 0x1a6   : > { %v3641_v51 = vshrl.u32 %v3640_v6, 23  ;;  %v3201_v13 = vxor.u32 2147483648, %v3200_v37  ;;  %v3306_v49 = vsel %vm3223_vm15, %v3305_v25, %v3304_v11  ;;  %v3505_v56 = vsub.s32 4294967266, %v7778_v45 }
 0x1a7   : > { %v2941_v44 = vadd.f32 %v7341_v58, %v2927_v1  ;;  %v3388_v40 = vshll.u32 %v7780_v29, 30  ;;  %v3572_v34 = vsel %vm3566_vm7, %v3569_v2, %v3571_v61  ;;  %vm3590_vm10 = vc.u32 %v7769_v38, %v7763_v15 }
 0x1a8   : > { %v5631_v5 = vadd.s32 4294967169, %v3641_v51  ;;  %v7807_v54 = vadd.f32 %v7341_v58, %v2928_v31  ;;  %v2930_v11 = vmul.f32 %v7324_v55, %v7451_v12  ;;  %v3095_v41 = vmul.f32 %v7336_v57, %v3059_v24 }
 0x1a9   : > { %v3025_v59 = vadd.f32 %v3011_v32, %v2941_v44  ;;  %v3210_v25 = vadd.s32 3, %v3206_v22  ;;  %v2932_v16 = vmul.f32 %v7324_v55, %v7473_v52  ;;  %v3592_v20 = vsel %vm3590_vm10, %v3591_v50, %v7764_v30 }
 0x1aa   : > { %v3647_v17 = vadd.s32 1, %v5631_v5  ;;  %v3202_v4 = vsel %vm3119_vm13, %v3201_v13, %v3200_v37  ;;  %v3309_v8 = vsel %vm7774_vm9, %v7366_v21, %v3306_v49  ;;  %v3314_v12 = vadd.s32 3, %v3310_v47 }
 0x1ab   : > { %v3588_v1 = vmul.u32 %v3581_v28, %v3572_v34  ;;  %v3506_v6 = vadd.s32 127, %v3505_v56  ;;  %v7823_v57 = vsub.s32 %v7729_v62, %v3388_v40  ;;  %v10885_v55 = vand.u32 2147483647, %v7755_v10 }
 0x1ac   : > { %vm3648_vm11 = vcmp.gt.s32.totalorder %v3647_v17, 0  ;;  %v7828_v31 = vadd.f32 %v3095_v41, %v3025_v59  ;;  %v4598_v2 = vpack.c.bf16 %v5674_v36, %v5673_v35  ;;  %v7830_v37 = vand.u32 3, %v3210_v25 }
 0x1ad   : > { %v7826_v52 = vadd.s32 %v3592_v20, %v3588_v1  ;;  %v3649_v30 = vsel %vm3648_vm11, %v3647_v17, 0  ;;  %v7833_v14 = vadd.f32 %v7341_v58, %v2930_v11  ;;  %v7836_v28 = vadd.f32 %v7341_v58, %v2932_v16 }
 0x1ae   : > { %11028 = vst [vmem:[#allocation8_spill] sm:$0xff] %v7828_v31  ;;  %v3651_v61 = vand.u32 31, %v3649_v30  ;;  %v7841_v62 = vsel %vm7734_vm3, %v7355_v9, %v3202_v4  ;;  %6464 = vcosq.f32 %v3309_v8  ;;  %v7843_v32 = vand.u32 3, %v3314_v12  ;;  %5873 = vmatmul.mubr.msk.bf16.gmra.mrb[40].mxu1 %vm2580_vm1, %v4598_v2 }
 0x1af   : > { %v3485_v22 = vadd.s32 %v7563_v39, %v7571_v18  ;;  %v3501_v47 = vsub.s32 32, %v7778_v45  ;;  %v3507_v50 = vshll.u32 %v3506_v6, 23  ;;  %v3391_v58 = vsub.s32 0, %v7823_v57  ;;  %5876 = vmatprep.mubr.msk.bf16.mxu1 %vm11000_vm0, %v10895_v63 }
 0x1b0   : > { %v3652_v51 = vsub.s32 32, %v3651_v61  ;;  %v3594_v43 = vadd.s32 536870912, %v7826_v52  ;;  %v3644_v24 = vand.u32 8388607, %v10885_v55  ;;  %v3650_v13 = vshrl.u32 %v3649_v30, 5 }
 0x1b1   : > { %v3744_v49 = vand.u32 2139095040, %v7828_v31  ;;  %v3654_v39 = vshll.u32 %v10891_v46, %v3651_v61  ;;  %v3657_v56 = vshll.u32 %v10889_v48, %v3651_v61  ;;  %v3660_v44 = vshll.u32 %v10897_v53, %v3651_v61 }
 0x1b2   : > { %v3655_v18 = vshrl.u32 %v10889_v48, %v3652_v51  ;;  %v3658_v40 = vshrl.u32 %v10897_v53, %v3652_v51  ;;  %v3661_v34 = vshrl.u32 %v10901_v60, %v3652_v51  ;;  %v3663_v5 = vshll.u32 %v10901_v60, %v3651_v61 }
 0x1b3   : > { %v3664_v11 = vshrl.u32 %v10899_v3, %v3652_v51  ;;  %6466 = vsinq.f32 %v3309_v8  ;;  %v3502_v59 = vshll.u32 %v7659_v0, %v7778_v45  ;;  %v3503_v41 = vshrl.u32 %v3485_v22, %v3501_v47  ;;  %v2979_v0 = vpop.permute.xlu1 %2978 }
 0x1b4   : > { %v3656_v25 = vor.u32 %v3655_v18, %v3654_v39  ;;  %v3659_v16 = vor.u32 %v3658_v40, %v3657_v56  ;;  %v3662_v20 = vor.u32 %v3661_v34, %v3660_v44  ;;  %v3745_v35 = vshrl.u32 %v3744_v49, 23 }
 0x1b5   : > { %v3665_v17 = vor.u32 %v3664_v11, %v3663_v5  ;;  %v3508_v36 = vor.u32 4788187, %v3507_v50  ;;  %v3645_v4 = vor.u32 8388608, %v3644_v24  ;;  %v3666_v12 = vshll.u32 %v10899_v3, %v3651_v61 }
 0x1b6   : > { %v3667_v1 = vshrl.u32 %v10886_v7, %v3652_v51  ;;  %v5620_v6 = vmin.u32 %v3391_v58, %v7823_v57  ;;  %v7869_v30 = vshrl.u32 %v3594_v43, 30  ;;  %v3653_v8 = vshrl.u32 %v10891_v46, %v3652_v51 }
 0x1b7   : > { %vm3669_vm12 = vcmp.lt.s32.totalorder %v3650_v13, 1  ;;  %vm3671_vm13 = vcmp.lt.s32.totalorder %v3650_v13, 3  ;;  %vm3672_vm14 = vcmp.lt.s32.totalorder %v3650_v13, 4  ;;  %v5635_v24 = vadd.s32 4294967169, %v3745_v35 }
 0x1b8   : > { %v3668_v45 = vor.u32 %v3667_v1, %v3666_v12  ;;  %v3677_v2 = vsel %vm3669_vm12, %v3656_v25, %v3659_v16  ;;  %v7873_v22 = vpop.eup %6464  ;;  %v3674_v47 = vsel %vm3672_vm14, %v3662_v20, 2102212464  ;;  %v3678_v50 = vsel %vm3672_vm14, %v3665_v17, 920167782  ;;  %v3063_v12 = vpop.permute.xlu1 %3062 }
 0x1b9   : > { %v3681_v61 = vsel %vm3669_vm12, %v3659_v16, %v3662_v20  ;;  %vm3670_vm15 = vcmp.lt.s32.totalorder %v3650_v13, 2  ;;  %v3679_v58 = vsel %vm3671_vm13, %v3662_v20, %v3678_v50  ;;  %v3685_v49 = vshll.u32 %v3645_v4, 8 }
 0x1ba   : > { %v3682_v43 = vsel %vm3672_vm14, %v3668_v45, 1326507024  ;;  %v3596_v51 = vshll.u32 %v7869_v30, 30  ;;  %v3673_v39 = vsel %vm3669_vm12, %v3653_v8, %v3656_v25  ;;  %v3680_v18 = vsel %vm3670_vm15, %v3677_v2, %v3679_v58 }
 0x1bb   : > { %v3683_v56 = vsel %vm3671_vm13, %v3665_v17, %v3682_v43  ;;  %v3675_v44 = vsel %vm3671_vm13, %v3659_v16, %v3674_v47  ;;  %v7883_v34 = vmul.u32.u64.low %v3685_v49, %v3680_v18  ;;  %v7884_v5 = vmul.u32.u64.high %v3685_v49, %v3680_v18, %v7883_v34  ;;  %v7895_v16 = vld [vmem:[%s10871_s2 + $0x1] ss:$0 sm:$0xff] }
 0x1bc   : > { %v3684_v40 = vsel %vm3670_vm15, %v3681_v61, %v3683_v56  ;;  %v3504_v11 = vor.u32 %v3503_v41, %v3502_v59  ;;  %v3751_v4 = vadd.s32 1, %v5635_v24  ;;  %6468 = vcosq.f32 %v7841_v62 }
 0x1bd   : > { %v7887_v20 = vmul.u32.u64.low %v3685_v49, %v3684_v40  ;;  %v7888_v35 = vmul.u32.u64.high %v3685_v49, %v3684_v40, %v7887_v20  ;;  %v6467_v1 = vpop.eup %6466  ;;  %v3509_v25 = vand.u32 2147483647, %v3508_v36  ;;  %v3012_v8 = vmul.f32 %v7895_v16, %v2979_v0  ;;  %v7909_v0 = vld [vmem:[%s10871_s2 + $0x2] ss:$0 sm:$0xff] }
 0x1be   : > { %v3393_v45 = vclz %v5620_v6  ;;  %v7899_v59 = vsub.s32 %v7826_v52, %v3596_v51  ;;  %v3676_v41 = vsel %vm3670_vm15, %v3673_v39, %v3675_v44  ;;  %vm3752_vm2 = vcmp.gt.s32.totalorder %v3751_v4, 0 }
 0x1bf   : > { %vm3317_vm3 = vcmp.eq.s32.totalorder %v7843_v32, 0  ;;  %vm3320_vm4 = vcmp.eq.s32.totalorder %v7843_v32, 2  ;;  %v3695_v36 = vadd.s32 1, %v7884_v5  ;;  %v10884_v2 = vand.u32 2147483647, %v7828_v31 }
 0x1c0   : > { %v3753_v47 = vsel %vm3752_vm2, %v3751_v4, 0  ;;  %v3096_v52 = vmul.f32 %v7909_v0, %v3063_v12  ;;  %v3321_v13 = vxor.u32 2147483648, %v7873_v22  ;;  %v3511_v6 = vcvt.s32.f32 %v3504_v11 }
 0x1c1   : > { %vm3694_vm5 = vc.u32 %v7888_v35, %v7883_v34  ;;  %v3755_v50 = vand.u32 31, %v3753_v47  ;;  %v3318_v61 = vxor.u32 2147483648, %v6467_v1  ;;  %v3692_v24 = vmul.u32 %v3685_v49, %v3676_v41 }
 0x1c2   : > { %v3696_v58 = vsel %vm3694_vm5, %v3695_v36, %v7884_v5  ;;  %v3026_v43 = vadd.f32 %v3012_v8, %v7807_v54  ;;  %v7917_v51 = vmul.f32 %v3511_v6, %v3509_v25  ;;  %v5621_v39 = vadd.s32 4294967294, %v3393_v45  ;;  %v791_v6 = vld [vmem:[%s7170_s22 + $0x58] sm:$0xff] }
 0x1c3   : > { %v3599_v18 = vsub.s32 0, %v7899_v59  ;;  %v3756_v56 = vsub.s32 32, %v3755_v50  ;;  %v7920_v44 = vadd.s32 %v3696_v58, %v3692_v24  ;;  %v3748_v40 = vand.u32 8388607, %v10884_v2  ;;  %851 = vperm.xlu0 %6450, %v791_v6   ;;  %941 = vperm.xlu1 %6449, %v791_v6  }
 0x1c4   : > { %v7924_v11 = vshrl.u32 %v3753_v47, 5  ;;  %v7926_v20 = vadd.f32 %v3096_v52, %v3026_v43  ;;  %v3758_v49 = vshll.u32 %v10891_v46, %v3755_v50  ;;  %v3761_v5 = vshll.u32 %v10889_v48, %v3755_v50 }
 0x1c5   : > { %v3759_v54 = vshrl.u32 %v10889_v48, %v3756_v56  ;;  %v3762_v4 = vshrl.u32 %v10897_v53, %v3756_v56  ;;  %v3764_v12 = vshll.u32 %v10897_v53, %v3755_v50  ;;  %v3765_v25 = vshrl.u32 %v10901_v60, %v3756_v56 }
 0x1c6   : > { %11029 = vst [vmem:[#allocation9_spill] sm:$0xff] %v7926_v20  ;;  %v3767_v8 = vshll.u32 %v10901_v60, %v3755_v50  ;;  %v3768_v45 = vshrl.u32 %v10899_v3, %v3756_v56  ;;  %v5628_v41 = vmin.u32 %v3599_v18, %v7899_v59  ;;  %v3771_v52 = vshrl.u32 %v10886_v7, %v3756_v56  ;;  %v7939_v24 = vpop.eup %6468 }
 0x1c7   : > { %v3760_v36 = vor.u32 %v3759_v54, %v3758_v49  ;;  %v3763_v47 = vor.u32 %v3762_v4, %v3761_v5  ;;  %vm3316_vm6 = vcmp.lt.s32.totalorder %v7843_v32, 2  ;;  %vm5622_vm7 = vcmp.lt.s32.totalorder %v5621_v39, 0 }
 0x1c8   : > { %v3766_v58 = vor.u32 %v3765_v25, %v3764_v12  ;;  %v3769_v43 = vor.u32 %v3768_v45, %v3767_v8  ;;  %v3770_v2 = vshll.u32 %v10899_v3, %v3755_v50  ;;  %v3319_v18 = vsel %vm3317_vm3, %v7873_v22, %v3318_v61 }
 0x1c9   : > { %v3322_v49 = vsel %vm3320_vm4, %v3321_v13, %v6467_v1  ;;  %v3513_v54 = vxor.u32 2147483648, %v7917_v51  ;;  %v7951_v5 = vadd.s32 %v7655_v42, %v7663_v23  ;;  %v3698_v4 = vadd.s32 536870912, %v7920_v44 }
 0x1ca   : > { %v3749_v12 = vor.u32 8388608, %v3748_v40  ;;  %v3772_v25 = vor.u32 %v3771_v52, %v3770_v2  ;;  %vm3773_vm8 = vcmp.lt.s32.totalorder %v7924_v11, 1  ;;  %vm3431_vm9 = vcmp.lt.s32.totalorder %v7498_v19, 0  ;;  %v2894_v2 = vpop.permute.xlu1 %2893 }
 0x1cb   : > { %v7956_v50 = vsel %vm5622_vm7, 0, %v5621_v39  ;;  %vm3776_vm10 = vcmp.lt.s32.totalorder %v7924_v11, 4  ;;  %v3781_v22 = vsel %vm3773_vm8, %v3760_v36, %v3763_v47  ;;  %v3848_v1 = vand.u32 2139095040, %v7926_v20 }
 0x1cc   : > { %v3601_v13 = vclz %v5628_v41  ;;  %vm3775_vm11 = vcmp.lt.s32.totalorder %v7924_v11, 3  ;;  %v3778_v42 = vsel %vm3776_vm10, %v3766_v58, 2102212464  ;;  %v3782_v23 = vsel %vm3776_vm10, %v3769_v43, 920167782 }
 0x1cd   : > { %v11030_v61 = vmov 2   ;;  %v3757_v39 = vshrl.u32 %v10891_v46, %v3756_v56  ;;  %vm3774_vm12 = vcmp.lt.s32.totalorder %v7924_v11, 2  ;;  %v3783_v40 = vsel %vm3775_vm11, %v3766_v58, %v3782_v23 }
 0x1ce   : > { %6451 = vset.pattern.permute.xlu1 %v11030_v61  ;;  %v3785_v8 = vsel %vm3773_vm8, %v3763_v47, %v3766_v58  ;;  %v7974_v45 = vshrl.u32 %v3698_v4, 30  ;;  %v3784_v41 = vsel %vm3774_vm12, %v3781_v22, %v3783_v40  ;;  %v3786_v52 = vsel %vm3776_vm10, %v3772_v25, 1326507024  ;;  %v5676_v4 = vld [vmem:[%s7188_s18 + $0xb8] sm:$0xff] }
 0x1cf   : > { %1029 = vperm.xlu1 %6451, %v791_v6   ;;  %v3789_v55 = vshll.u32 %v3749_v12, 8  ;;  %v3777_v56 = vsel %vm3773_vm8, %v3757_v39, %v3760_v36  ;;  %v3779_v17 = vsel %vm3775_vm11, %v3763_v47, %v3778_v42  ;;  %v3787_v23 = vsel %vm3775_vm11, %v3769_v43, %v3786_v52  ;;  %v5675_v6 = vld [vmem:[%s7188_s18 + $0xb0] sm:$0xff]  ;;  %v8045_v52 = vld [vmem:[%s10872_s3] ss:$0 sm:$0xff] }
 0x1d0   : > { %v3849_v58 = vshrl.u32 %v3848_v1, 23  ;;  %v5629_v7 = vadd.s32 4294967294, %v3601_v13  ;;  %v3788_v22 = vsel %vm3774_vm12, %v3785_v8, %v3787_v23  ;;  %v7996_v36 = vsel %vm3316_vm6, %v3319_v18, %v3322_v49  ;;  %v8011_v49 = vld [vmem:[%s10871_s2] ss:$0 sm:$0xff] }
 0x1d1   : > { %v7990_v40 = vmul.u32.u64.low %v3789_v55, %v3784_v41  ;;  %v7991_v25 = vmul.u32.u64.high %v3789_v55, %v3784_v41, %v7990_v40  ;;  %v7998_v47 = vmul.u32.u64.low %v3789_v55, %v3788_v22  ;;  %v7999_v12 = vmul.u32.u64.high %v3789_v55, %v3788_v22, %v7998_v47  ;;  %v2983_v41 = vpop.permute.xlu1 %2982 }
 0x1d2   : > { %v5639_v43 = vadd.s32 4294967169, %v3849_v58  ;;  %v11031_v1 = vmov 0   ;;  %v3397_v13 = vsub.s32 32, %v7956_v50  ;;  %v3401_v42 = vsub.s32 4294967266, %v7956_v50  ;;  %v792_v58 = vld [vmem:[%s7170_s22 + $0x60] sm:$0xff] }
 0x1d3   : > { %6452 = vset.pattern.permute.xlu1 %v11031_v1  ;;  %v3780_v39 = vsel %vm3774_vm12, %v3777_v56, %v3779_v17  ;;  %v4599_v8 = vpack.c.bf16 %v5676_v4, %v5675_v6  ;;  %v3700_v32 = vshll.u32 %v7974_v45, 30  ;;  %v2929_v23 = vmul.f32 %v8011_v49, %v2894_v2  ;;  %v8031_v4 = vld [vmem:[%s7170_s22 + $0x68] sm:$0xff] }
 0x1d4   : > { %v3855_v18 = vadd.s32 1, %v5639_v43  ;;  %v8018_v17 = vsel %vm3431_vm9, %v3513_v54, %v7917_v51  ;;  %vm5630_vm13 = vcmp.lt.s32.totalorder %v5629_v7, 0  ;;  %v3799_v11 = vadd.s32 1, %v7991_v25  ;;  %856 = vperm.xlu1 %6452, %v792_v58   ;;  %v5677_v51 = vld [vmem:[%s7188_s18 + $0xc0] sm:$0xff]  ;;  %v5678_v54 = vld [vmem:[%s7188_s18 + $0xc8] sm:$0xff]  ;;  %861 = vperm.xlu0 %6450, %v8031_v4  }
 0x1d5   : > { %v10888_v56 = vand.u32 2147483647, %v7926_v20  ;;  %5877 = vmatmul.mubr.msk.bf16.gmra.mrb[44].mxu1 %vm2580_vm1, %v4599_v8  ;;  %v3796_v6 = vmul.u32 %v3789_v55, %v3780_v39  ;;  %vm3798_vm14 = vc.u32 %v7999_v12, %v7990_v40  ;;  %v3013_v2 = vmul.f32 %v7895_v16, %v2983_v41  ;;  %v3067_v55 = vpop.permute.xlu0 %3066 }
 0x1d6   : > { %vm3856_vm15 = vcmp.gt.s32.totalorder %v3855_v18, 0  ;;  %5880 = vmatprep.mubr.msk.bf16.mxu1 %vm11000_vm0, %v10895_v63  ;;  %v3399_v22 = vshrl.u32 %v7951_v5, %v3397_v13  ;;  %v3402_v47 = vadd.s32 127, %v3401_v42  ;;  %v3800_v43 = vsel %vm3798_vm14, %v3799_v11, %v7991_v25 }
 0x1d7   : > { %v3857_v1 = vsel %vm3856_vm15, %v3855_v18, 0  ;;  %v8037_v39 = vsel %vm5630_vm13, 0, %v5629_v7  ;;  %v8040_v8 = vsub.s32 %v7920_v44, %v3700_v32  ;;  %v3801_v41 = vadd.s32 %v3800_v43, %v3796_v6 }
 0x1d8   : > { %v2943_v5 = vadd.f32 %v8045_v52, %v2929_v23  ;;  %v3398_v25 = vshll.u32 %v7823_v57, %v7956_v50  ;;  %v3589_v13 = vadd.s32 %v7763_v15, %v7769_v38  ;;  %v3859_v42 = vand.u32 31, %v3857_v1  ;;  %6454 = vset.pattern.permute.xlu0 %v11030_v61 }
 0x1d9   : > { %v4600_v7 = vpack.c.bf16 %v5678_v54, %v5677_v51  ;;  %v11032_v18 = vmov 1   ;;  %v3802_v44 = vadd.s32 536870912, %v3801_v41  ;;  %v3852_v32 = vand.u32 8388607, %v10888_v56  ;;  %1033 = vperm.xlu0 %6454, %v792_v58  }
 0x1da   : > { %6453 = vset.pattern.permute.xlu1 %v11032_v18  ;;  %v3027_v11 = vadd.f32 %v3013_v2, %v2943_v5  ;;  %v3097_v6 = vmul.f32 %v7909_v0, %v3067_v55  ;;  %v8056_v43 = vor.u32 %v3399_v22, %v3398_v25  ;;  %v3403_v23 = vshll.u32 %v3402_v47, 23 }
 0x1db   : > { %945 = vperm.xlu1 %6453, %v792_v58   ;;  %v3605_v57 = vsub.s32 32, %v8037_v39  ;;  %v3860_v50 = vsub.s32 32, %v3859_v42  ;;  %v3609_v15 = vsub.s32 4294967266, %v8037_v39  ;;  %v3703_v38 = vsub.s32 0, %v8040_v8 }
 0x1dc   : > { %v8062_v51 = vshrl.u32 %v3802_v44, 30  ;;  %v3862_v54 = vshll.u32 %v10891_v46, %v3859_v42  ;;  %v3865_v22 = vshll.u32 %v10889_v48, %v3859_v42  ;;  %v3853_v5 = vor.u32 8388608, %v3852_v32 }
 0x1dd   : > { %v3863_v2 = vshrl.u32 %v10889_v48, %v3860_v50  ;;  %v3866_v47 = vshrl.u32 %v10897_v53, %v3860_v50  ;;  %v3869_v55 = vshrl.u32 %v10901_v60, %v3860_v50  ;;  %5881 = vmatmul.mubr.msk.bf16.gmra.mrb[48].mxu1 %vm2580_vm1, %v4600_v7  ;;  %v3858_v25 = vshrl.u32 %v3857_v1, 5 }
 0x1de   : > { %11033 = vst [vmem:[#allocation10_spill] sm:$0xff] %v8062_v51  ;;  %v3868_v18 = vshll.u32 %v10897_v53, %v3859_v42  ;;  %v8071_v56 = vadd.f32 %v3097_v6, %v3027_v11  ;;  %5884 = vmatprep.mubr.msk.bf16.mxu1 %vm11000_vm0, %v10895_v63  ;;  %v3871_v48 = vshll.u32 %v10901_v60, %v3859_v42  ;;  %v8078_v20 = vor.u32 4788187, %v3403_v23 }
 0x1df   : > { %949 = vperm.xlu1 %6453, %v8031_v4   ;;  %v3864_v58 = vor.u32 %v3863_v2, %v3862_v54  ;;  %v3867_v44 = vor.u32 %v3866_v47, %v3865_v22  ;;  %v3872_v46 = vshrl.u32 %v10899_v3, %v3860_v50  ;;  %v3607_v7 = vshrl.u32 %v3589_v13, %v3605_v57 }
 0x1e0   : > { %v3804_v1 = vshll.u32 %v8062_v51, 30  ;;  %v3870_v32 = vor.u32 %v3869_v55, %v3868_v18  ;;  %v11034_v11 = vand.u32 2147483647, %v7498_v19  ;;  %v11035_v6 = vmov 0 }
 0x1e1   : > { %v3610_v63 = vadd.s32 127, %v3609_v15  ;;  %v3873_v53 = vor.u32 %v3872_v46, %v3871_v48  ;;  %v3874_v54 = vshll.u32 %v10899_v3, %v3859_v42  ;;  %v11038_v2 = vmov 1326507024  }
 0x1e2   : > { %vm8083_vm2 = vcmp.le.f32.partialorder %v11034_v11, 0.7853982  ;;  %v3875_v22 = vshrl.u32 %v11038_v2, %v3860_v50  ;;  %vm3313_vm3 = vweird.f32 %v7366_v21  ;;  %v5632_v23 = vmin.u32 %v3703_v38, %v8040_v8 }
 0x1e3   : > { %v11036_v6 = vsel %vm8083_vm2, 4294967295, %v11035_v6  ;;  %vm3877_vm4 = vcmp.lt.s32.totalorder %v3858_v25, 1  ;;  %v3893_v13 = vshll.u32 %v3853_v5, 8  ;;  %v3952_v57 = vand.u32 2139095040, %v8071_v56  ;;  %6455 = vset.pattern.permute.xlu1 %v11030_v61 }
 0x1e4   : > { %11037 = vst [vmem:[#allocation11_spill] sm:$0xff] %v11036_v6  ;;  %vm3327_vm5 = vcmp.lt.s32.totalorder %v7518_v33, 0  ;;  %v11039_v47 = vmov 683565275   ;;  %v3876_v15 = vor.u32 %v3875_v22, %v3874_v54  ;;  %vm3880_vm6 = vcmp.lt.s32.totalorder %v3858_v25, 4  ;;  %1037 = vperm.xlu1 %6455, %v8031_v4  }
 0x1e5   : > { %v3861_v55 = vshrl.u32 %v11039_v47, %v3860_v50  ;;  %v3885_v46 = vsel %vm3877_vm4, %v3864_v58, %v3867_v44  ;;  %v8097_v48 = vsub.s32 %v3801_v41, %v3804_v1  ;;  %vm3879_vm7 = vcmp.lt.s32.totalorder %v3858_v25, 3  ;;  %v2987_v1 = vpop.permute.xlu1 %2986 }
 0x1e6   : > { %v3882_v42 = vsel %vm3880_vm6, %v3870_v32, 2102212464  ;;  %v3886_v38 = vsel %vm3880_vm6, %v3873_v53, 920167782  ;;  %vm3878_vm8 = vcmp.lt.s32.totalorder %v3858_v25, 2  ;;  %v3889_v18 = vsel %vm3877_vm4, %v3867_v44, %v3870_v32 }
 0x1e7   : > { %v3887_v5 = vsel %vm3879_vm7, %v3870_v32, %v3886_v38  ;;  %v3890_v61 = vsel %vm3880_vm6, %v3876_v15, 1326507024  ;;  %v3611_v11 = vshll.u32 %v3610_v63, 23  ;;  %v3881_v3 = vsel %vm3877_vm4, %v3861_v55, %v3864_v58 }
 0x1e8   : > { %v3888_v50 = vsel %vm3878_vm8, %v3885_v46, %v3887_v5  ;;  %v3891_v54 = vsel %vm3879_vm7, %v3873_v53, %v3890_v61  ;;  %v3883_v22 = vsel %vm3879_vm7, %v3867_v44, %v3882_v42  ;;  %v3705_v51 = vclz %v5632_v23 }
 0x1e9   : > { %v3892_v60 = vsel %vm3878_vm8, %v3889_v18, %v3891_v54  ;;  %v8103_v4 = vmul.u32.u64.low %v3893_v13, %v3888_v50  ;;  %v8104_v41 = vmul.u32.u64.high %v3893_v13, %v3888_v50, %v8103_v4  ;;  %v3807_v38 = vsub.s32 0, %v8097_v48  ;;  %v3071_v25 = vpop.permute.xlu1 %3070 }
 0x1ea   : > { %v8108_v31 = vmul.u32.u64.low %v3893_v13, %v3892_v60  ;;  %v8109_v32 = vmul.u32.u64.high %v3893_v13, %v3892_v60, %v8108_v31  ;;  %6470 = vsinq.f32 %v7841_v62  ;;  %v11040_v63 = vsub.s32 4, %v7627_v27 }
 0x1eb   : > { %v3606_v58 = vshll.u32 %v7899_v59, %v8037_v39  ;;  %v3953_v44 = vshrl.u32 %v3952_v57, 23  ;;  %v3517_v23 = vsel %vm8083_vm2, %v7498_v19, %v8018_v17  ;;  %v3405_v60 = vand.u32 2147483647, %v8078_v20 }
 0x1ec   : > { %v8117_v53 = vsel %vm3431_vm9, %v11040_v63, %v7627_v27  ;;  %v3612_v31 = vor.u32 4788187, %v3611_v11  ;;  %v3884_v62 = vsel %vm3878_vm8, %v3881_v3, %v3883_v22  ;;  %v8130_v55 = vsel %vm3313_vm3, nan, %v7996_v36 }
 0x1ed   : > { %11041 = vst [vmem:[#allocation12_spill] sm:$0xff] %v8117_v53  ;;  %v3608_v27 = vor.u32 %v3607_v7, %v3606_v58  ;;  %v3903_v15 = vadd.s32 1, %v8104_v41  ;;  %v5643_v59 = vadd.s32 4294967169, %v3953_v44  ;;  %v3407_v39 = vcvt.s32.f32 %v8056_v43 }
 0x1ee   : > { %v11042_v57 = vsub.s32 4, %v7780_v29  ;;  %v5633_v17 = vadd.s32 4294967294, %v3705_v51  ;;  %v5636_v3 = vmin.u32 %v3807_v38, %v8097_v48  ;;  %6472 = vcosq.f32 %v3517_v23 }
 0x1ef   : > { %v3900_v21 = vmul.u32 %v3893_v13, %v3884_v62  ;;  %vm3902_vm9 = vc.u32 %v8109_v32, %v8103_v4  ;;  %v3959_v36 = vadd.s32 1, %v5643_v59  ;;  %v8144_v7 = vmul.f32 %v3407_v39, %v3405_v60 }
 0x1f0   : > { %v8139_v20 = vsel %vm3327_vm5, %v11042_v57, %v7780_v29  ;;  %v3613_v43 = vand.u32 2147483647, %v3612_v31  ;;  %v3904_v46 = vsel %vm3902_vm9, %v3903_v15, %v8104_v41  ;;  %v3014_v42 = vmul.f32 %v7895_v16, %v2987_v1 }
 0x1f1   : > { %11043 = vst [vmem:[#allocation13_spill] sm:$0xff] %v8139_v20  ;;  %v3615_v5 = vcvt.s32.f32 %v3608_v27  ;;  %v3905_v29 = vadd.s32 %v3904_v46, %v3900_v21  ;;  %v10907_v51 = vand.u32 2147483647, %v8071_v56  ;;  %vm3960_vm10 = vcmp.gt.s32.totalorder %v3959_v36, 0 }
 0x1f2   : > { %vm5634_vm11 = vcmp.lt.s32.totalorder %v5633_v17, 0  ;;  %v3809_v18 = vclz %v5636_v3  ;;  %v3961_v13 = vsel %vm3960_vm10, %v3959_v36, 0  ;;  %v3098_v61 = vmul.f32 %v7909_v0, %v3071_v25 }
 0x1f3   : > { %6474 = vsinq.f32 %v3517_v23  ;;  %v3906_v50 = vadd.s32 536870912, %v3905_v29  ;;  %v3963_v54 = vand.u32 31, %v3961_v13  ;;  %v8152_v41 = vmul.f32 %v3615_v5, %v3613_v43 }
 0x1f4   : > { %v8156_v1 = vadd.s32 %v7883_v34, %v7888_v35  ;;  %v3028_v38 = vadd.f32 %v3014_v42, %v7833_v14  ;;  %v8159_v63 = vpop.eup %6470  ;;  %v8161_v58 = vsel %vm5634_vm11, 0, %v5633_v17  ;;  %v3956_v23 = vand.u32 8388607, %v10907_v51 }
 0x1f5   : > { %v8163_v44 = vshrl.u32 %v3906_v50, 30  ;;  %v3964_v60 = vsub.s32 32, %v3963_v54  ;;  %v5637_v31 = vadd.s32 4294967294, %v3809_v18  ;;  %v8167_v62 = vshrl.u32 %v3961_v13, 5 }
 0x1f6   : > { %v3966_v27 = vshll.u32 %v11039_v47, %v3963_v54  ;;  %v8170_v15 = vadd.f32 %v3098_v61, %v3028_v38  ;;  %v11045_v14 = vmov 2475754826   ;;  %v11046_v39 = vmov 2131351028  }
 0x1f7   : > { %v3908_v34 = vshll.u32 %v8163_v44, 30  ;;  %v3967_v35 = vshrl.u32 %v11045_v14, %v3964_v60  ;;  %v3969_v59 = vshll.u32 %v11045_v14, %v3963_v54  ;;  %v3972_v57 = vshll.u32 %v11046_v39, %v3963_v54 }
 0x1f8   : > { %11044 = vst [vmem:[#allocation14_spill] sm:$0xff] %v8170_v15  ;;  %v3970_v17 = vshrl.u32 %v11046_v39, %v3964_v60  ;;  %v11047_v3 = vmov 2102212464   ;;  %v11048_v25 = vmov 920167782   ;;  %v8180_v46 = vpop.eup %6472  ;;  %v3957_v5 = vor.u32 8388608, %v3956_v23 }
 0x1f9   : > { %v3973_v21 = vshrl.u32 %v11047_v3, %v3964_v60  ;;  %v3975_v36 = vshll.u32 %v11047_v3, %v3963_v54  ;;  %v3976_v43 = vshrl.u32 %v11048_v25, %v3964_v60  ;;  %11049 = vst [vmem:[#allocation15_spill] sm:$0xff] %v8180_v46  ;;  %v8182_v42 = vsub.s32 %v3905_v29, %v3908_v34 }
 0x1fa   : > { %v3968_v18 = vor.u32 %v3967_v35, %v3966_v27  ;;  %v3979_v13 = vshrl.u32 %v11038_v2, %v3964_v60  ;;  %v3971_v61 = vor.u32 %v3970_v17, %v3969_v59  ;;  %v3978_v51 = vshll.u32 %v11048_v25, %v3963_v54  ;;  %v2904_v54 = vpop.permute.xlu1 %2903 }
 0x1fb   : > { %v3974_v50 = vor.u32 %v3973_v21, %v3972_v57  ;;  %v3977_v38 = vor.u32 %v3976_v43, %v3975_v36  ;;  %v3709_v22 = vsub.s32 32, %v8161_v58  ;;  %v3713_v11 = vsub.s32 4294967266, %v8161_v58  ;;  %v5679_v36 = vld [vmem:[%s7188_s18 + $0xd0] sm:$0xff]  ;;  %v5680_v43 = vld [vmem:[%s7188_s18 + $0xd8] sm:$0xff] }
 0x1fc   : > { %v8190_v19 = vadd.s32 %v7990_v40, %v7999_v12  ;;  %v3911_v29 = vsub.s32 0, %v8182_v42  ;;  %v3980_v34 = vor.u32 %v3979_v13, %v3978_v51  ;;  %vm3981_vm12 = vcmp.lt.s32.totalorder %v8167_v62, 1 }
 0x1fd   : > { %vm3984_vm13 = vcmp.lt.s32.totalorder %v8167_v62, 4  ;;  %v4056_v23 = vand.u32 2139095040, %v8170_v15  ;;  %v8196_v27 = vpop.eup %6474  ;;  %v3965_v59 = vshrl.u32 %v11039_v47, %v3964_v60  ;;  %v3989_v12 = vsel %vm3981_vm12, %v3968_v18, %v3971_v61 }
 0x1fe   : > { %11050 = vst [vmem:[#allocation16_spill] sm:$0xff] %v8196_v27  ;;  %v5640_v35 = vmin.u32 %v3911_v29, %v8182_v42  ;;  %v3986_v40 = vsel %vm3984_vm13, %v3974_v50, 2102212464  ;;  %vm5638_vm14 = vcmp.lt.s32.totalorder %v5637_v31, 0  ;;  %vm3983_vm15 = vcmp.lt.s32.totalorder %v8167_v62, 3 }
 0x1ff   : > { %v3990_v51 = vsel %vm3984_vm13, %v3977_v38, 920167782  ;;  %v3997_v57 = vshll.u32 %v3957_v5, 8  ;;  %vm3982_vm3 = vcmp.lt.s32.totalorder %v8167_v62, 2  ;;  %v3985_v17 = vsel %vm3981_vm12, %v3965_v59, %v3968_v18 }
 0x200   : > { %v3991_v21 = vsel %vm3983_vm15, %v3974_v50, %v3990_v51  ;;  %v3993_v60 = vsel %vm3981_vm12, %v3971_v61, %v3974_v50  ;;  %v3987_v13 = vsel %vm3983_vm15, %v3971_v61, %v3986_v40  ;;  %v3994_v46 = vsel %vm3984_vm13, %v3980_v34, 1326507024  ;;  %v2991_v51 = vpop.permute.xlu1 %2990  ;;  %v6461_v34 = vld [vmem:[%s10873_s4 + $0x8] ss:$0 sps:$4 sm:$0xff]  }
 0x201   : > { %v3992_v29 = vsel %vm3982_vm3, %v3989_v12, %v3991_v21  ;;  %v4057_v27 = vshrl.u32 %v4056_v23, 23  ;;  %vm3535_vm4 = vcmp.lt.s32.totalorder %v7573_v26, 0  ;;  %v3913_v5 = vclz %v5640_v35 }
 0x202   : > { %v3995_v6 = vsel %vm3983_vm15, %v3977_v38, %v3994_v46  ;;  %v8219_v53 = vmul.u32.u64.low %v3997_v57, %v3992_v29  ;;  %v8220_v18 = vmul.u32.u64.high %v3997_v57, %v3992_v29, %v8219_v53  ;;  %v3714_v59 = vadd.s32 127, %v3713_v11 }
 0x203   : > { %v3996_v50 = vsel %vm3982_vm3, %v3993_v60, %v3995_v6  ;;  %v5647_v61 = vadd.s32 4294967169, %v4057_v27  ;;  %v4601_v40 = vpack.c.bf16 %v5680_v43, %v5679_v36  ;;  %v8229_v23 = vsel %vm5638_vm14, 0, %v5637_v31  ;;  %v3075_v43 = vpop.permute.xlu0 %3074 }
 0x204   : > { %v8231_v35 = vmul.u32.u64.low %v3997_v57, %v3996_v50  ;;  %v8232_v46 = vmul.u32.u64.high %v3997_v57, %v3996_v50, %v8231_v35  ;;  %v2931_v38 = vmul.f32 %v8011_v49, %v2904_v54  ;;  %v3988_v11 = vsel %vm3982_vm3, %v3985_v17, %v3987_v13 }
 0x205   : > { %v10912_v6 = vand.u32 2147483647, %v8170_v15  ;;  %v4063_v27 = vadd.s32 1, %v5647_v61  ;;  %5885 = vmatmul.mubr.msk.bf16.gmra.mrb[52].mxu1 %vm2580_vm1, %v4601_v40  ;;  %vm2722_vm6 = vcmask 1043456   ;;  %v3710_v12 = vshll.u32 %v8040_v8, %v8161_v58 }
 0x206   : > { %v5641_v21 = vadd.s32 4294967294, %v3913_v5  ;;  %v4007_v31 = vadd.s32 1, %v8220_v18  ;;  %v3015_v60 = vmul.f32 %v7895_v16, %v2991_v51  ;;  %v11051_v36 = vmov 0.0  }
 0x207   : > { %5892 = vmatprep.mubr.msk.bf16.mxu1 %vm11000_vm0, %v11051_v36  ;;  %v3711_v62 = vshrl.u32 %v8156_v1, %v3709_v22  ;;  %v3715_v54 = vshll.u32 %v3714_v59, 23  ;;  %vm4064_vm7 = vcmp.gt.s32.totalorder %v4063_v27, 0  ;;  %v2724_v17 = vsel %vm2722_vm6, %v6461_v34, 0 }
 0x208   : > { %v3813_v13 = vsub.s32 32, %v8229_v23  ;;  %v4004_v29 = vmul.u32 %v3997_v57, %v3988_v11  ;;  %vm4006_vm1 = vc.u32 %v8232_v46, %v8219_v53  ;;  %v2945_v8 = vadd.f32 %v8045_v52, %v2931_v38  ;;  %5891 = vmatpush3.bf16.msra.mxu1 %v2724_v17  ;;  %5823 = vmatpush3.bf16.msra.mxu0 %v2724_v17 }
 0x209   : > { %v3817_v58 = vsub.s32 4294967266, %v8229_v23  ;;  %v4008_v5 = vsel %vm4006_vm1, %v4007_v31, %v8220_v18  ;;  %v4060_v22 = vand.u32 8388607, %v10912_v6  ;;  %v4065_v1 = vsel %vm4064_vm7, %v4063_v27, 0  ;;  %5920 = vmatprep.subr.bf16.mxu0 %v11051_v36 }
 0x20a   : > { %vm5642_vm8 = vcmp.lt.s32.totalorder %v5641_v21, 0  ;;  %v4009_v59 = vadd.s32 %v4008_v5, %v4004_v29  ;;  %v3029_v57 = vadd.f32 %v3015_v60, %v2945_v8  ;;  %v3099_v50 = vmul.f32 %v7909_v0, %v3075_v43 }
 0x20b   : > { %v11052_v40 = vsub.s32 4, %v7869_v30  ;;  %v8264_v18 = vor.u32 %v3711_v62, %v3710_v12  ;;  %v4067_v34 = vand.u32 31, %v4065_v1  ;;  %v8266_v35 = vor.u32 4788187, %v3715_v54 }
 0x20c   : > { %v3814_v38 = vshll.u32 %v8097_v48, %v8229_v23  ;;  %v3815_v11 = vshrl.u32 %v8190_v19, %v3813_v13  ;;  %v4010_v27 = vadd.s32 536870912, %v4009_v59  ;;  %v3818_v31 = vadd.s32 127, %v3817_v58 }
 0x20d   : > { %v8262_v51 = vsel %vm3535_vm4, %v11052_v40, %v7869_v30  ;;  %v8271_v60 = vsel %vm5642_vm8, 0, %v5641_v21  ;;  %v4061_v17 = vor.u32 8388608, %v4060_v22  ;;  %v4068_v43 = vsub.s32 32, %v4067_v34 }
 0x20e   : > { %11053 = vst [vmem:[#allocation17_spill] sm:$0xff] %v8262_v51  ;;  %v8273_v29 = vshrl.u32 %v4010_v27, 30  ;;  %v4066_v30 = vshrl.u32 %v4065_v1, 5  ;;  %v4070_v12 = vshll.u32 %v11039_v47, %v4067_v34  ;;  %v8276_v62 = vadd.f32 %v3099_v50, %v3029_v57 }
 0x20f   : > { %v4071_v54 = vshrl.u32 %v11045_v14, %v4068_v43  ;;  %v4073_v8 = vshll.u32 %v11045_v14, %v4067_v34  ;;  %v4074_v48 = vshrl.u32 %v11046_v39, %v4068_v43  ;;  %v4077_v19 = vshrl.u32 %v11047_v3, %v4068_v43 }
 0x210   : > { %11054 = vst [vmem:[#allocation18_spill] sm:$0xff] %v8273_v29  ;;  %11055 = vst [vmem:[#allocation19_spill] sm:$0xff] %v8276_v62  ;;  %v4012_v23 = vshll.u32 %v8273_v29, 30  ;;  %v4076_v21 = vshll.u32 %v11046_v39, %v4067_v34  ;;  %v4079_v13 = vshll.u32 %v11047_v3, %v4067_v34  ;;  %v4080_v58 = vshrl.u32 %v11048_v25, %v4068_v43 }
 0x211   : > { %v4072_v5 = vor.u32 %v4071_v54, %v4070_v12  ;;  %v4075_v22 = vor.u32 %v4074_v48, %v4073_v8  ;;  %v4082_v1 = vshll.u32 %v11048_v25, %v4067_v34  ;;  %v4083_v57 = vshrl.u32 %v11038_v2, %v4068_v43 }
 0x212   : > { %v3921_v50 = vsub.s32 4294967266, %v8271_v60  ;;  %v8289_v40 = vsub.s32 %v4009_v59, %v4012_v23  ;;  %v4078_v27 = vor.u32 %v4077_v19, %v4076_v21  ;;  %v4081_v6 = vor.u32 %v4080_v58, %v4079_v13 }
 0x213   : > { %v3717_v61 = vand.u32 2147483647, %v8266_v35  ;;  %v8292_v15 = vor.u32 %v3815_v11, %v3814_v38  ;;  %v3819_v51 = vshll.u32 %v3818_v31, 23  ;;  %v4084_v20 = vor.u32 %v4083_v57, %v4082_v1 }
 0x214   : > { %v4015_v29 = vsub.s32 0, %v8289_v40  ;;  %vm4085_vm9 = vcmp.lt.s32.totalorder %v4066_v30, 1  ;;  %vm4088_vm10 = vcmp.lt.s32.totalorder %v4066_v30, 4  ;;  %v4101_v12 = vshll.u32 %v4061_v17, 8 }
 0x215   : > { %vm4087_vm11 = vcmp.lt.s32.totalorder %v4066_v30, 3  ;;  %v4093_v34 = vsel %vm4085_vm9, %v4072_v5, %v4075_v22  ;;  %v4094_v54 = vsel %vm4088_vm10, %v4081_v6, 920167782  ;;  %v4160_v59 = vand.u32 2139095040, %v8276_v62 }
 0x216   : > { %v3922_v8 = vadd.s32 127, %v3921_v50  ;;  %vm4086_vm12 = vcmp.lt.s32.totalorder %v4066_v30, 2  ;;  %v4090_v48 = vsel %vm4088_vm10, %v4078_v27, 2102212464  ;;  %v4095_v35 = vsel %vm4087_vm11, %v4078_v27, %v4094_v54 }
 0x217   : > { %v4069_v38 = vshrl.u32 %v11039_v47, %v4068_v43  ;;  %v4096_v11 = vsel %vm4086_vm12, %v4093_v34, %v4095_v35  ;;  %v4097_v31 = vsel %vm4085_vm9, %v4075_v22, %v4078_v27  ;;  %v4098_v19 = vsel %vm4088_vm10, %v4084_v20, 1326507024 }
 0x218   : > { %v11056_v17 = vand.u32 2147483647, %v7518_v33  ;;  %v5644_v21 = vmin.u32 %v4015_v29, %v8289_v40  ;;  %v4099_v13 = vsel %vm4087_vm11, %v4081_v6, %v4098_v19  ;;  %v11059_v43 = vand.u32 2147483647, %v7573_v26 }
 0x219   : > { %v8309_v58 = vmul.u32.u64.low %v4101_v12, %v4096_v11  ;;  %v8310_v1 = vmul.u32.u64.high %v4101_v12, %v4096_v11, %v8309_v58  ;;  %v4089_v20 = vsel %vm4085_vm9, %v4069_v38, %v4072_v5  ;;  %v4091_v50 = vsel %vm4087_vm11, %v4075_v22, %v4090_v48 }
 0x21a   : > { %vm8303_vm13 = vcmp.le.f32.partialorder %v11056_v17, 0.7853982  ;;  %vm8315_vm14 = vcmp.le.f32.partialorder %v11059_v43, 0.7853982  ;;  %v4100_v27 = vsel %vm4086_vm12, %v4097_v31, %v4099_v13  ;;  %v4161_v34 = vshrl.u32 %v4160_v59, 23 }
 0x21b   : > { %v3820_v29 = vor.u32 4788187, %v3819_v51  ;;  %v3917_v6 = vsub.s32 32, %v8271_v60  ;;  %v8323_v54 = vmul.u32.u64.low %v4101_v12, %v4100_v27  ;;  %v8324_v35 = vmul.u32.u64.high %v4101_v12, %v4100_v27, %v8323_v54 }
 0x21c   : > { %v11062_v11 = vxor.u32 2147483648, %v8144_v7  ;;  %v3719_v17 = vcvt.s32.f32 %v8264_v18  ;;  %v3923_v5 = vshll.u32 %v3922_v8, 23  ;;  %v5651_v38 = vadd.s32 4294967169, %v4161_v34  ;;  %v2995_v8 = vpop.permute.xlu1 %2994 }
 0x21d   : > { %v3901_v22 = vadd.s32 %v8103_v4, %v8109_v32  ;;  %v4017_v59 = vclz %v5644_v21  ;;  %v4092_v51 = vsel %vm4086_vm12, %v4089_v20, %v4091_v50  ;;  %v4111_v48 = vadd.s32 1, %v8310_v1 }
 0x21e   : > { %v3410_v19 = vsel %vm3327_vm5, %v11062_v11, %v8144_v7  ;;  %v11063_v31 = vxor.u32 2147483648, %v8152_v41  ;;  %v8341_v43 = vmul.f32 %v3719_v17, %v3717_v61  ;;  %v3823_v7 = vcvt.s32.f32 %v8292_v15 }
 0x21f   : > { %v4167_v18 = vadd.s32 1, %v5651_v38  ;;  %v3821_v27 = vand.u32 2147483647, %v3820_v29  ;;  %v3918_v4 = vshll.u32 %v8182_v42, %v8271_v60  ;;  %v3919_v32 = vshrl.u32 %v3901_v22, %v3917_v6 }
 0x220   : > { %v3618_v13 = vsel %vm3535_vm4, %v11063_v31, %v8152_v41  ;;  %v10917_v30 = vand.u32 2147483647, %v8276_v62  ;;  %v8347_v21 = vor.u32 4788187, %v3923_v5  ;;  %v4108_v20 = vmul.u32 %v4101_v12, %v4092_v51 }
 0x221   : > { %vm4110_vm5 = vc.u32 %v8324_v35, %v8309_v58  ;;  %vm4168_vm15 = vcmp.gt.s32.totalorder %v4167_v18, 0  ;;  %v5645_v41 = vadd.s32 4294967294, %v4017_v59  ;;  %v3016_v50 = vmul.f32 %v7895_v16, %v2995_v8 }
 0x222   : > { %v4112_v61 = vsel %vm4110_vm5, %v4111_v48, %v8310_v1  ;;  %v4169_v15 = vsel %vm4168_vm15, %v4167_v18, 0  ;;  %v8356_v42 = vsel %vm8303_vm13, %v7518_v33, %v3410_v19  ;;  %v8362_v12 = vsel %vm8315_vm14, %v7573_v26, %v3618_v13 }
 0x223   : > { %v4113_v34 = vadd.s32 %v4112_v61, %v4108_v20  ;;  %v4171_v29 = vand.u32 31, %v4169_v15  ;;  %v3721_v6 = vxor.u32 2147483648, %v8341_v43  ;;  %v8365_v1 = vmul.f32 %v3823_v7, %v3821_v27  ;;  %v3079_v27 = vpop.permute.xlu1 %3078 }
 0x224   : > { %v8367_v54 = vor.u32 %v3919_v32, %v3918_v4  ;;  %v4164_v19 = vand.u32 8388607, %v10917_v30  ;;  %vm5646_vm3 = vcmp.lt.s32.totalorder %v5645_v41, 0  ;;  %v8372_v5 = vshrl.u32 %v4169_v15, 5 }
 0x225   : > { %v4114_v11 = vadd.s32 536870912, %v4113_v34  ;;  %v4172_v17 = vsub.s32 32, %v4171_v29  ;;  %v4174_v38 = vshll.u32 %v11039_v47, %v4171_v29  ;;  %v3030_v22 = vadd.f32 %v3016_v50, %v7836_v28 }
 0x226   : > { %v4177_v51 = vshll.u32 %v11045_v14, %v4171_v29  ;;  %v4180_v31 = vshll.u32 %v11046_v39, %v4171_v29  ;;  %v4183_v18 = vshll.u32 %v11047_v3, %v4171_v29  ;;  %v4165_v4 = vor.u32 8388608, %v4164_v19 }
 0x227   : > { %v4175_v59 = vshrl.u32 %v11045_v14, %v4172_v17  ;;  %v4178_v48 = vshrl.u32 %v11046_v39, %v4172_v17  ;;  %v8380_v13 = vshrl.u32 %v4114_v11, 30  ;;  %v4181_v7 = vshrl.u32 %v11047_v3, %v4172_v17 }
 0x228   : > { %v4184_v8 = vshrl.u32 %v11048_v25, %v4172_v17  ;;  %v3214_v20 = vxor.u32 2147483648, %v8159_v63  ;;  %vm3209_vm4 = vweird.f32 %v7355_v9  ;;  %v4186_v50 = vshll.u32 %v11048_v25, %v4171_v29 }
 0x229   : > { %v4176_v32 = vor.u32 %v4175_v59, %v4174_v38  ;;  %v4179_v28 = vor.u32 %v4178_v48, %v4177_v51  ;;  %v4182_v61 = vor.u32 %v4181_v7, %v4180_v31  ;;  %v4187_v11 = vshrl.u32 %v11038_v2, %v4172_v17  ;;  %v2914_v7 = vpop.permute.xlu1 %2913 }
 0x22a   : > { %v4185_v15 = vor.u32 %v4184_v8, %v4183_v18  ;;  %v8390_v30 = vsel %vm5646_vm3, 0, %v5645_v41  ;;  %vm2700_vm6 = vcmask 195584   ;;  %vm3212_vm7 = vcmp.lt.s32.totalorder %v7830_v37, 2 }
 0x22b   : > { %vm3213_vm1 = vcmp.eq.s32.totalorder %v7830_v37, 0  ;;  %v4116_v19 = vshll.u32 %v8380_v13, 30  ;;  %v4188_v38 = vor.u32 %v4187_v11, %v4186_v50  ;;  %vm4189_vm8 = vcmp.lt.s32.totalorder %v8372_v5, 1 }
 0x22c   : > { %vm3216_vm9 = vcmp.eq.s32.totalorder %v7830_v37, 2  ;;  %vm3639_vm10 = vcmp.lt.s32.totalorder %v7755_v10, 0  ;;  %vm4192_vm11 = vcmp.lt.s32.totalorder %v8372_v5, 4  ;;  %v4197_v41 = vsel %vm4189_vm8, %v4176_v32, %v4179_v28 }
 0x22d   : > { %v8401_v29 = vshll.u32 %v4165_v4, 8  ;;  %v3217_v59 = vxor.u32 2147483648, %v7939_v24  ;;  %vm4191_vm12 = vcmp.lt.s32.totalorder %v8372_v5, 3  ;;  %v4194_v51 = vsel %vm4192_vm11, %v4182_v61, 2102212464 }
 0x22e   : > { %v4198_v48 = vsel %vm4192_vm11, %v4185_v15, 920167782  ;;  %v3215_v31 = vsel %vm3213_vm1, %v7939_v24, %v3214_v20  ;;  %v4173_v18 = vshrl.u32 %v11039_v47, %v4172_v17  ;;  %vm4190_vm5 = vcmp.lt.s32.totalorder %v8372_v5, 2 }
 0x22f   : > { %v4199_v8 = vsel %vm4191_vm12, %v4182_v61, %v4198_v48  ;;  %v4201_v4 = vsel %vm4189_vm8, %v4179_v28, %v4182_v61  ;;  %v8412_v50 = vsub.s32 %v4113_v34, %v4116_v19  ;;  %v4202_v16 = vsel %vm4192_vm11, %v4188_v38, 1326507024 }
 0x230   : > { %v4200_v11 = vsel %vm4190_vm5, %v4197_v41, %v4199_v8  ;;  %v3100_v60 = vmul.f32 %v7909_v0, %v3079_v27  ;;  %v11064_v24 = vand.u32 2147483647, %v7755_v10  ;;  %v11065_v17 = vmov 0  ;;  %v11068_v0 = vld [vmem:[#allocation8_spill] sm:$0xff]  ;;  %v3083_v8 = vpop.permute.xlu0 %3082 }
 0x231   : > { %v4193_v20 = vsel %vm4189_vm8, %v4173_v18, %v4176_v32  ;;  %v4195_v61 = vsel %vm4191_vm12, %v4179_v28, %v4194_v51  ;;  %v4203_v34 = vsel %vm4191_vm12, %v4185_v15, %v4202_v16  ;;  %v3218_v19 = vsel %vm3216_vm9, %v3217_v59, %v8159_v63  ;;  %v2999_v18 = vpop.permute.xlu1 %2998 }
 0x232   : > { %vm8419_vm15 = vcmp.le.f32.partialorder %v11064_v24, 0.7853982  ;;  %vm3743_vm3 = vcmp.lt.s32.totalorder %v11068_v0, 0  ;;  %v4204_v27 = vsel %vm4190_vm5, %v4201_v4, %v4203_v34  ;;  %v3219_v32 = vsel %vm3212_vm7, %v3215_v31, %v3218_v19  ;;  %v8502_v34 = vld [vmem:[%s10871_s2 + $0x2] ss:$0 sm:$0xff] }
 0x233   : > { %v11066_v17 = vsel %vm8419_vm15, 4294967295, %v11065_v17  ;;  %v8436_v38 = vmul.u32.u64.low %v8401_v29, %v4200_v11  ;;  %v8437_v41 = vmul.u32.u64.high %v8401_v29, %v4200_v11, %v8436_v38  ;;  %v4025_v28 = vsub.s32 4294967266, %v8390_v30 }
 0x234   : > { %11067 = vst [vmem:[#allocation20_spill] sm:$0xff] %v11066_v17  ;;  %v8444_v16 = vmul.u32.u64.low %v8401_v29, %v4204_v27  ;;  %v8445_v15 = vmul.u32.u64.high %v8401_v29, %v4204_v27, %v8444_v16  ;;  %v3220_v63 = vsel %vm3209_vm4, nan, %v3219_v32  ;;  %6476 = vcosq.f32 %v8356_v42  ;;  %v11078_v32 = vld [vmem:[#allocation10_spill] sm:$0xff] }
 0x235   : > { %v4119_v59 = vsub.s32 0, %v8412_v50  ;;  %v4573_v51 = vpack.c.bf16 %v8130_v55, %v3220_v63  ;;  %v8452_v48 = vadd.f32 %v3100_v60, %v3030_v22  ;;  %6478 = vsinq.f32 %v8356_v42 }
 0x236   : > { %v3927_v37 = vcvt.s32.f32 %v8367_v54  ;;  %v4196_v31 = vsel %vm4190_vm5, %v4193_v20, %v4195_v61  ;;  %v2933_v9 = vmul.f32 %v8011_v49, %v2914_v7  ;;  %6480 = vcosq.f32 %v8362_v12  ;;  %v11076_v49 = vld [vmem:[#allocation9_spill] sm:$0xff] }
 0x237   : > { %11069 = vst [vmem:[#allocation21_spill] sm:$0xff] %v8452_v48  ;;  %v3722_v55 = vsel %vm3639_vm10, %v3721_v6, %v8341_v43  ;;  %v11070_v60 = vsub.s32 4, %v7974_v45  ;;  %v11072_v54 = vand.u32 2147483647, %v11068_v0  ;;  %v11073_v5 = vmov 0  ;;  %5893 = vmatmul.mubr.msk.bf16.vlgmr.msra.gmra.mrb[28].mxu1 %vm2700_vm6, %v4573_v51 }
 0x238   : > { %vm3847_vm7 = vcmp.lt.s32.totalorder %v11076_v49, 0  ;;  %v4215_v22 = vadd.s32 1, %v8437_v41  ;;  %v3825_v43 = vxor.u32 2147483648, %v8365_v1  ;;  %v11077_v6 = vand.u32 2147483647, %v8347_v21  ;;  %5896 = vmatprep.mubr.msk.bf16.mxu1 %vm11000_vm0, %v11051_v36 }
 0x239   : > { %v8470_v42 = vsel %vm3639_vm10, %v11070_v60, %v7974_v45  ;;  %vm8474_vm4 = vcmp.le.f32.partialorder %v11072_v54, 0.7853982  ;;  %v4026_v4 = vadd.s32 127, %v4025_v28  ;;  %v8487_v45 = vld [vmem:[%s10871_s2 + $0x1] ss:$0 sm:$0xff]  ;;  %v5648_v24 = vmin.u32 %v4119_v59, %v8412_v50 }
 0x23a   : > { %11071 = vst [vmem:[#allocation22_spill] sm:$0xff] %v8470_v42  ;;  %v11074_v5 = vsel %vm8474_vm4, 4294967295, %v11073_v5  ;;  %v3928_v7 = vmul.f32 %v3927_v37, %v11077_v6  ;;  %v3017_v11 = vmul.f32 %v8487_v45, %v2999_v18  ;;  %v4212_v20 = vmul.u32 %v8401_v29, %v4196_v31  ;;  %v8521_v18 = vpop.permute.xlu0 %985 }
 0x23b   : > { %11075 = vst [vmem:[#allocation23_spill] sm:$0xff] %v11074_v5  ;;  %vm4214_vm1 = vc.u32 %v8445_v15, %v8436_v38  ;;  %v4264_v21 = vand.u32 2139095040, %v8452_v48  ;;  %6482 = vsinq.f32 %v8362_v12  ;;  %v3101_v19 = vmul.f32 %v8502_v34, %v3083_v8 }
 0x23c   : > { %v4216_v61 = vsel %vm4214_vm1, %v4215_v22, %v8437_v41  ;;  %v2947_v27 = vadd.f32 %v8045_v52, %v2933_v9  ;;  %v3725_v29 = vsel %vm8419_vm15, %v7755_v10, %v3722_v55  ;;  %v3827_v28 = vsub.s32 4, %v11078_v32 }
 0x23d   : > { %v11079_v16 = vand.u32 2147483647, %v11076_v49  ;;  %v11080_v12 = vmov 0  ;;  %vm3951_vm9 = vcmp.lt.s32.totalorder %v8071_v56, 0  ;;  %v4217_v41 = vadd.s32 %v4216_v61, %v4212_v20  ;;  %v11086_v20 = vld [vmem:[#allocation18_spill] sm:$0xff] }
 0x23e   : > { %v4265_v63 = vshrl.u32 %v4264_v21, 23  ;;  %v3826_v52 = vsel %vm3743_vm3, %v3825_v43, %v8365_v1  ;;  %v3929_v59 = vxor.u32 2147483648, %v3928_v7  ;;  %v4021_v51 = vsub.s32 32, %v8390_v30  ;;  %v8528_v6 = vpop.eup %6476 }
 0x23f   : > { %vm8512_vm8 = vcmp.le.f32.partialorder %v11079_v16, 0.7853982  ;;  %v3031_v37 = vadd.f32 %v3017_v11, %v2947_v27  ;;  %v4027_v31 = vshll.u32 %v4026_v4, 23  ;;  %v4121_v8 = vclz %v5648_v24  ;;  %v8537_v11 = vpop.eup %6478 }
 0x240   : > { %v11081_v12 = vsel %vm8512_vm8, 4294967295, %v11080_v12  ;;  %v4218_v9 = vadd.s32 536870912, %v4217_v41  ;;  %v5655_v55 = vadd.s32 4294967169, %v4265_v63  ;;  %6484 = vcosq.f32 %v3725_v29  ;;  %v8545_v61 = vpop.eup %6480  ;;  %v8554_v63 = vpop.permute.xlu0 %993 }
 0x241   : > { %11082 = vst [vmem:[#allocation10_spill] sm:$0xff] %v11081_v12  ;;  %v3931_v60 = vsub.s32 4, %v8163_v44  ;;  %v4005_v54 = vadd.s32 %v8219_v53, %v8232_v46  ;;  %v8526_v22 = vadd.f32 %v3101_v19, %v3031_v37  ;;  %6486 = vsinq.f32 %v3725_v29 }
 0x242   : > { %v8533_v1 = vsel %vm3743_vm3, %v3827_v28, %v11078_v32  ;;  %v8535_v43 = vshrl.u32 %v4218_v9, 30  ;;  %v4271_v4 = vadd.s32 1, %v5655_v55  ;;  %v3829_v24 = vsel %vm8474_vm4, %v11068_v0, %v3826_v52 }
 0x243   : > { %11083 = vst [vmem:[#allocation24_spill] sm:$0xff] %v8526_v22  ;;  %11084 = vst [vmem:[#allocation25_spill] sm:$0xff] %v8533_v1  ;;  %v3930_v53 = vsel %vm3847_vm7, %v3929_v59, %v3928_v7  ;;  %v4023_v46 = vshrl.u32 %v4005_v54, %v4021_v51  ;;  %v4035_v21 = vsub.s32 4, %v11086_v20  ;;  %v4028_v19 = vor.u32 4788187, %v4027_v31 }
 0x244   : > { %11085 = vst [vmem:[#allocation26_spill] sm:$0xff] %v8535_v43  ;;  %v5649_v27 = vadd.s32 4294967294, %v4121_v8  ;;  %v4220_v29 = vshll.u32 %v8535_v43, 30  ;;  %vm4272_vm10 = vcmp.gt.s32.totalorder %v4271_v4, 0  ;;  %v8551_v32 = vsel %vm3847_vm7, %v3931_v60, %v8163_v44 }
 0x245   : > { %11087 = vst [vmem:[#allocation18_spill] sm:$0xff] %v8551_v32  ;;  %v10918_v28 = vand.u32 2147483647, %v8452_v48  ;;  %v4273_v16 = vsel %vm4272_vm10, %v4271_v4, 0  ;;  %v4368_v7 = vand.u32 2139095040, %v8526_v22  ;;  %6488 = vcosq.f32 %v3829_v24  ;;  %v8561_v37 = vpop.eup %6482 }
 0x246   : > { %v4022_v52 = vshll.u32 %v8289_v40, %v8390_v30  ;;  %v8559_v59 = vsub.s32 %v4217_v41, %v4220_v29  ;;  %v4275_v51 = vand.u32 31, %v4273_v16  ;;  %6490 = vsinq.f32 %v3829_v24  ;;  %v2919_v29 = vpop.permute.xlu0 %2918 }
 0x247   : > { %v8566_v44 = vsel %vm8512_vm8, %v11076_v49, %v3930_v53  ;;  %v8571_v31 = vsel %vm3951_vm9, %v4035_v21, %v11086_v20  ;;  %v8575_v8 = vadd.s32 %v8309_v58, %v8324_v35  ;;  %v4029_v30 = vand.u32 2147483647, %v4028_v19 }
 0x248   : > { %11088 = vst [vmem:[#allocation27_spill] sm:$0xff] %v8571_v31  ;;  %v4024_v40 = vor.u32 %v4023_v46, %v4022_v52  ;;  %vm5650_vm11 = vcmp.lt.s32.totalorder %v5649_v27, 0  ;;  %v4276_v41 = vsub.s32 32, %v4275_v51  ;;  %v4223_v9 = vsub.s32 0, %v8559_v59 }
 0x249   : > { %v4268_v55 = vand.u32 8388607, %v10918_v28  ;;  %v8580_v60 = vshrl.u32 %v4273_v16, 5  ;;  %v4369_v54 = vshrl.u32 %v4368_v7, 23  ;;  %v4278_v4 = vshll.u32 %v11039_v47, %v4275_v51 }
 0x24a   : > { %v4279_v24 = vshrl.u32 %v11045_v14, %v4276_v41  ;;  %v4281_v53 = vshll.u32 %v11045_v14, %v4275_v51  ;;  %v4284_v58 = vshll.u32 %v11046_v39, %v4275_v51  ;;  %v8586_v35 = vpop.eup %6484  ;;  %v4282_v46 = vshrl.u32 %v11046_v39, %v4276_v41 }
 0x24b   : > { %11089 = vst [vmem:[#allocation28_spill] sm:$0xff] %v8586_v35  ;;  %v4285_v20 = vshrl.u32 %v11047_v3, %v4276_v41  ;;  %v4287_v21 = vshll.u32 %v11047_v3, %v4275_v51  ;;  %v4288_v19 = vshrl.u32 %v11048_v25, %v4276_v41  ;;  %v8592_v16 = vpop.eup %6486  ;;  %v4031_v7 = vcvt.s32.f32 %v4024_v40  ;;  %v8605_v40 = vld [vmem:[%s10871_s2] ss:$0 sm:$0xff] }
 0x24c   : > { %11090 = vst [vmem:[#allocation29_spill] sm:$0xff] %v8592_v16  ;;  %v4280_v52 = vor.u32 %v4279_v24, %v4278_v4  ;;  %v4290_v28 = vshll.u32 %v11048_v25, %v4275_v51  ;;  %v4291_v31 = vshrl.u32 %v11038_v2, %v4276_v41  ;;  %v8597_v49 = vsel %vm5650_vm11, 0, %v5649_v27 }
 0x24d   : > { %v4283_v0 = vor.u32 %v4282_v46, %v4281_v53  ;;  %v4286_v12 = vor.u32 %v4285_v20, %v4284_v58  ;;  %v4289_v32 = vor.u32 %v4288_v19, %v4287_v21  ;;  %v8599_v5 = vmul.f32 %v4031_v7, %v4029_v30 }
 0x24e   : > { %v5652_v1 = vmin.u32 %v4223_v9, %v8559_v59  ;;  %v4292_v43 = vor.u32 %v4291_v31, %v4290_v28  ;;  %v2934_v51 = vmul.f32 %v8605_v40, %v2919_v29  ;;  %v4269_v4 = vor.u32 8388608, %v4268_v55 }
 0x24f   : > { %vm4293_vm12 = vcmp.lt.s32.totalorder %v8580_v60, 1  ;;  %vm4296_vm5 = vcmp.lt.s32.totalorder %v8580_v60, 4  ;;  %v5659_v27 = vadd.s32 4294967169, %v4369_v54  ;;  %v8610_v24 = vpop.eup %6488  ;;  %v4129_v30 = vsub.s32 4294967266, %v8597_v49 }
 0x250   : > { %11091 = vst [vmem:[#allocation30_spill] sm:$0xff] %v8610_v24  ;;  %vm4295_vm3 = vcmp.lt.s32.totalorder %v8580_v60, 3  ;;  %v4301_v28 = vsel %vm4293_vm12, %v4280_v52, %v4283_v0  ;;  %v4302_v31 = vsel %vm4296_vm5, %v4289_v32, 920167782  ;;  %v8616_v9 = vpop.eup %6490  ;;  %v4298_v53 = vsel %vm4296_vm5, %v4286_v12, 2102212464 }
 0x251   : > { %11092 = vst [vmem:[#allocation31_spill] sm:$0xff] %v8616_v9  ;;  %v4303_v55 = vsel %vm4295_vm3, %v4286_v12, %v4302_v31  ;;  %v4305_v58 = vsel %vm4293_vm12, %v4283_v0, %v4286_v12  ;;  %v4306_v54 = vsel %vm4296_vm5, %v4292_v43, 1326507024  ;;  %v4225_v46 = vclz %v5652_v1 }
 0x252   : > { %v4277_v20 = vshrl.u32 %v11039_v47, %v4276_v41  ;;  %vm4294_vm7 = vcmp.lt.s32.totalorder %v8580_v60, 2  ;;  %v4307_v29 = vsel %vm4295_vm3, %v4289_v32, %v4306_v54  ;;  %v4309_v7 = vshll.u32 %v4269_v4, 8 }
 0x253   : > { %v4304_v19 = vsel %vm4294_vm7, %v4301_v28, %v4303_v55  ;;  %v4375_v24 = vadd.s32 1, %v5659_v27  ;;  %v4130_v31 = vadd.s32 127, %v4129_v30  ;;  %v4299_v1 = vsel %vm4295_vm3, %v4283_v0, %v4298_v53  ;;  %v3003_v30 = vpop.permute.xlu1 %3002 }
 0x254   : > { %v4297_v12 = vsel %vm4293_vm12, %v4277_v20, %v4280_v52  ;;  %v4308_v43 = vsel %vm4294_vm7, %v4305_v58, %v4307_v29  ;;  %v8638_v9 = vmul.u32.u64.low %v4309_v7, %v4304_v19  ;;  %v8639_v28 = vmul.u32.u64.high %v4309_v7, %v4304_v19, %v8638_v9  ;;  %v11094_v52 = vld [vmem:[#allocation13_spill] sm:$0xff] }
 0x255   : > { %v8635_v41 = vmul.u32.u64.low %v4309_v7, %v4308_v43  ;;  %v8636_v21 = vmul.u32.u64.high %v4309_v7, %v4308_v43, %v8635_v41  ;;  %v5653_v32 = vadd.s32 4294967294, %v4225_v46  ;;  %v11093_v4 = vand.u32 2147483647, %v8526_v22  ;;  %v8656_v29 = vld [vmem:[%s10872_s3] ss:$0 sm:$0xff] }
 0x256   : > { %vm4376_vm1 = vcmp.gt.s32.totalorder %v4375_v24, 0  ;;  %v3414_v0 = vsel %vm8303_vm13, 0, %v11094_v52  ;;  %v4125_v55 = vsub.s32 32, %v8597_v49  ;;  %v4300_v58 = vsel %vm4294_vm7, %v4297_v12, %v4299_v1 }
 0x257   : > { %v4372_v27 = vand.u32 8388607, %v11093_v4  ;;  %v4377_v54 = vsel %vm4376_vm1, %v4375_v24, 0  ;;  %v4131_v20 = vshll.u32 %v4130_v31, 23  ;;  %v2948_v23 = vadd.f32 %v8656_v29, %v2934_v51 }
 0x258   : > { %v4379_v19 = vand.u32 31, %v4377_v54  ;;  %vm4318_vm13 = vc.u32 %v8636_v21, %v8638_v9  ;;  %v4319_v43 = vadd.s32 1, %v8639_v28  ;;  %v3018_v60 = vmul.f32 %v8487_v45, %v3003_v30 }
 0x259   : > { %v3418_v24 = vadd.s32 3, %v3414_v0  ;;  %vm5654_vm10 = vcmp.lt.s32.totalorder %v5653_v32, 0  ;;  %v4316_v12 = vmul.u32 %v4309_v7, %v4300_v58  ;;  %v4373_v1 = vor.u32 8388608, %v4372_v27 }
 0x25a   : > { %v4380_v31 = vsub.s32 32, %v4379_v19  ;;  %v4320_v41 = vsel %vm4318_vm13, %v4319_v43, %v8639_v28  ;;  %v4378_v4 = vshrl.u32 %v4377_v54, 5  ;;  %v4382_v52 = vshll.u32 %v11039_v47, %v4379_v19 }
 0x25b   : > { %v4385_v46 = vshll.u32 %v11045_v14, %v4379_v19  ;;  %v4321_v51 = vadd.s32 %v4320_v41, %v4316_v12  ;;  %v4388_v22 = vshll.u32 %v11046_v39, %v4379_v19  ;;  %v4391_v48 = vshll.u32 %v11047_v3, %v4379_v19 }
 0x25c   : > { %v4383_v53 = vshrl.u32 %v11045_v14, %v4380_v31  ;;  %v4386_v30 = vshrl.u32 %v11046_v39, %v4380_v31  ;;  %v4389_v7 = vshrl.u32 %v11047_v3, %v4380_v31  ;;  %v4392_v27 = vshrl.u32 %v11048_v25, %v4380_v31 }
 0x25d   : > { %v4395_v28 = vshrl.u32 %v11038_v2, %v4380_v31  ;;  %v8674_v0 = vshrl.u32 %v8575_v8, %v4125_v55  ;;  %v8676_v58 = vor.u32 4788187, %v4131_v20  ;;  %v4322_v54 = vadd.s32 536870912, %v4321_v51 }
 0x25e   : > { %v4384_v43 = vor.u32 %v4383_v53, %v4382_v52  ;;  %v4387_v12 = vor.u32 %v4386_v30, %v4385_v46  ;;  %v4390_v41 = vor.u32 %v4389_v7, %v4388_v22  ;;  %v4393_v62 = vor.u32 %v4392_v27, %v4391_v48  ;;  %v3087_v46 = vpop.permute.xlu1 %3086 }
 0x25f   : > { %v4394_v35 = vshll.u32 %v11048_v25, %v4379_v19  ;;  %v8680_v10 = vsel %vm5654_vm10, 0, %v5653_v32  ;;  %v8682_v16 = vshrl.u32 %v4322_v54, 30  ;;  %v3032_v17 = vadd.f32 %v3018_v60, %v2948_v23  ;;  %v11095_v54 = vld [vmem:[#allocation12_spill] sm:$0xff] }
 0x260   : > { %v3419_v42 = vand.u32 3, %v3418_v24  ;;  %vm4397_vm11 = vcmp.lt.s32.totalorder %v4378_v4, 1  ;;  %vm4400_vm12 = vcmp.lt.s32.totalorder %v4378_v4, 4  ;;  %v4413_v8 = vshll.u32 %v4373_v1, 8 }
 0x261   : > { %v4396_v26 = vor.u32 %v4395_v28, %v4394_v35  ;;  %v4324_v55 = vshll.u32 %v8682_v16, 30  ;;  %v4402_v53 = vsel %vm4400_vm12, %v4390_v41, 2102212464  ;;  %v4405_v22 = vsel %vm4397_vm11, %v4384_v43, %v4387_v12 }
 0x262   : > { %v3422_v48 = vxor.u32 2147483648, %v8537_v11  ;;  %v4381_v32 = vshrl.u32 %v11039_v47, %v4380_v31  ;;  %vm4399_vm5 = vcmp.lt.s32.totalorder %v4378_v4, 3  ;;  %v4406_v20 = vsel %vm4400_vm12, %v4393_v62, 920167782 }
 0x263   : > { %v3425_v19 = vxor.u32 2147483648, %v8528_v6  ;;  %v8691_v35 = vsub.s32 %v4321_v51, %v4324_v55  ;;  %vm4398_vm3 = vcmp.lt.s32.totalorder %v4378_v4, 2  ;;  %v4407_v23 = vsel %vm4399_vm5, %v4390_v41, %v4406_v20 }
 0x264   : > { %v4409_v60 = vsel %vm4397_vm11, %v4387_v12, %v4390_v41  ;;  %v4401_v24 = vsel %vm4397_vm11, %v4381_v32, %v4384_v43  ;;  %v4403_v1 = vsel %vm4399_vm5, %v4387_v12, %v4402_v53  ;;  %v4408_v52 = vsel %vm4398_vm3, %v4405_v22, %v4407_v23  ;;  %v797_v53 = vpop.permute.xlu1 %796 }
 0x265   : > { %v4410_v30 = vsel %vm4400_vm12, %v4396_v26, 1326507024  ;;  %v4327_v31 = vsub.s32 0, %v8691_v35  ;;  %v8698_v27 = vmul.u32.u64.low %v4413_v8, %v4408_v52  ;;  %v8699_v28 = vmul.u32.u64.high %v4413_v8, %v4408_v52, %v8698_v27 }
 0x266   : > { %v4411_v7 = vsel %vm4399_vm5, %v4393_v62, %v4410_v30  ;;  %vm3417_vm7 = vweird.f32 %v7518_v33  ;;  %vm3421_vm1 = vcmp.eq.s32.totalorder %v3419_v42, 0  ;;  %vm3424_vm13 = vcmp.eq.s32.totalorder %v3419_v42, 2  ;;  %v11097_v30 = vld [vmem:[#allocation16_spill] sm:$0xff] }
 0x267   : > { %v4412_v51 = vsel %vm4398_vm3, %v4409_v60, %v4411_v7  ;;  %v3518_v12 = vsel %vm8083_vm2, 0, %v11095_v54  ;;  %v5656_v41 = vmin.u32 %v4327_v31, %v8691_v35  ;;  %v3423_v62 = vsel %vm3421_vm1, %v8528_v6, %v3422_v48  ;;  %v11098_v54 = vld [vmem:[#allocation15_spill] sm:$0xff] }
 0x268   : > { %v8708_v26 = vmul.u32.u64.low %v4413_v8, %v4412_v51  ;;  %v8709_v55 = vmul.u32.u64.high %v4413_v8, %v4412_v51, %v8708_v26  ;;  %v4404_v22 = vsel %vm4398_vm3, %v4401_v24, %v4403_v1  ;;  %v3426_v32 = vsel %vm3424_vm13, %v3425_v19, %v8537_v11 }
 0x269   : > { %v3522_v20 = vadd.s32 3, %v3518_v12  ;;  %v3102_v23 = vmul.f32 %v8502_v34, %v3087_v46  ;;  %v4329_v60 = vclz %v5656_v41  ;;  %v4423_v52 = vadd.s32 1, %v8699_v28 }
 0x26a   : > { %v3526_v7 = vxor.u32 2147483648, %v11097_v30  ;;  %v3529_v31 = vxor.u32 2147483648, %v11098_v54  ;;  %v4229_v51 = vsub.s32 32, %v8680_v10  ;;  %v4233_v43 = vsub.s32 4294967266, %v8680_v10 }
 0x26b   : > { %vm3420_vm2 = vcmp.lt.s32.totalorder %v3419_v42, 2  ;;  %v3523_v6 = vand.u32 3, %v3522_v20  ;;  %v4420_v4 = vmul.u32 %v4413_v8, %v4404_v22  ;;  %vm4422_vm10 = vc.u32 %v8709_v55, %v8698_v27  ;;  %v898_v42 = vpop.permute.xlu1 %897 }
 0x26c   : > { %v3427_v11 = vsel %vm3420_vm2, %v3423_v62, %v3426_v32  ;;  %v8722_v48 = vadd.f32 %v3102_v23, %v3032_v17  ;;  %v5657_v46 = vadd.s32 4294967294, %v4329_v60  ;;  %v4424_v19 = vsel %vm4422_vm10, %v4423_v52, %v8699_v28  ;;  %v11105_v52 = vld [vmem:[#allocation5_spill] sm:$0xff] }
 0x26d   : > { %vm3525_vm11 = vcmp.eq.s32.totalorder %v3523_v6, 0  ;;  %vm3528_vm12 = vcmp.eq.s32.totalorder %v3523_v6, 2  ;;  %v4425_v24 = vadd.s32 %v4424_v19, %v4420_v4  ;;  %vm3524_vm5 = vcmp.lt.s32.totalorder %v3523_v6, 2 }
 0x26e   : > { %11099 = vst [vmem:[#allocation13_spill] sm:$0xff] %v8722_v48  ;;  %v3527_v1 = vsel %vm3525_vm11, %v11098_v54, %v3526_v7  ;;  %v3530_v12 = vsel %vm3528_vm12, %v3529_v31, %v11097_v30  ;;  %v11100_v8 = vand.u32 2147483647, %v8071_v56  ;;  %v4234_v17 = vadd.s32 127, %v4233_v43 }
 0x26f   : > { %v3428_v26 = vsel %vm3417_vm7, nan, %v3427_v11  ;;  %v3531_v28 = vsel %vm3524_vm5, %v3527_v1, %v3530_v12  ;;  %v868_v62 = vmul.f32 %v8605_v40, %v797_v53  ;;  %v11103_v22 = vxor.u32 2147483648, %v8599_v5 }
 0x270   : > { %vm8729_vm3 = vcmp.le.f32.partialorder %v11100_v8, 0.7853982  ;;  %v11104_v20 = vshll.u32 %v8412_v50, %v8597_v49  ;;  %v4426_v60 = vadd.s32 536870912, %v4425_v24  ;;  %vm3521_vm1 = vweird.f32 %v11105_v52 }
 0x271   : > { %v4034_v32 = vsel %vm3951_vm9, %v11103_v22, %v8599_v5  ;;  %v4213_v33 = vadd.s32 %v8436_v38, %v8445_v15  ;;  %v3532_v30 = vsel %vm3521_vm1, nan, %v3531_v28  ;;  %v4472_v53 = vand.u32 2139095040, %v8722_v48 }
 0x272   : > { %v4128_v23 = vor.u32 %v8674_v0, %v11104_v20  ;;  %v956_v7 = vmul.f32 %v8487_v45, %v898_v42  ;;  %v4133_v54 = vand.u32 2147483647, %v8676_v58  ;;  %vm5658_vm7 = vcmp.lt.s32.totalorder %v5657_v46, 0  ;;  %v11107_v42 = vld [vmem:[#allocation17_spill] sm:$0xff] }
 0x273   : > { %v8751_v5 = vshrl.u32 %v4426_v60, 30  ;;  %v4574_v31 = vpack.c.bf16 %v3532_v30, %v3428_v26  ;;  %v4231_v50 = vshrl.u32 %v4213_v33, %v4229_v51  ;;  %v4235_v49 = vshll.u32 %v4234_v17, 23  ;;  %v11109_v33 = vld [vmem:[#allocation6_spill] sm:$0xff] }
 0x274   : > { %v4473_v0 = vshrl.u32 %v4472_v53, 23  ;;  %v882_v43 = vadd.f32 %v8656_v29, %v868_v62  ;;  %v4135_v6 = vcvt.s32.f32 %v4128_v23  ;;  %v4230_v38 = vshll.u32 %v8559_v59, %v8680_v10 }
 0x275   : > { %11106 = vst [vmem:[#allocation12_spill] sm:$0xff] %v8751_v5  ;;  %v1044_v15 = vmul.f32 %v8502_v34, %v8521_v18  ;;  %v4428_v4 = vshll.u32 %v8751_v5, 30  ;;  %5897 = vmatmul.mubr.msk.bf16.gmra.mrb[32].mxu1 %vm2700_vm6, %v4574_v31  ;;  %v8760_v58 = vsel %vm5658_vm7, 0, %v5657_v46  ;;  %v10940_v11 = vand.u32 2147483647, %v8722_v48 }
 0x276   : > { %v5663_v51 = vadd.s32 4294967169, %v4473_v0  ;;  %5900 = vmatprep.mubr.msk.bf16.mxu1 %vm11000_vm0, %v11051_v36  ;;  %v970_v19 = vadd.f32 %v956_v7, %v882_v43  ;;  %6492 = vcosq.f32 %v8566_v44  ;;  %v8766_v1 = vmul.f32 %v4135_v6, %v4133_v54 }
 0x277   : > { %v8769_v18 = vsub.s32 %v4425_v24, %v4428_v4  ;;  %v8771_v59 = vor.u32 %v4231_v50, %v4230_v38  ;;  %v8773_v12 = vor.u32 4788187, %v4235_v49  ;;  %v3622_v8 = vsel %vm8315_vm14, 0, %v11107_v42 }
 0x278   : > { %v4479_v46 = vadd.s32 1, %v5663_v51  ;;  %v8781_v17 = vsel %vm8729_vm3, %v8071_v56, %v4034_v32  ;;  %v4333_v26 = vsub.s32 32, %v8760_v58  ;;  %v8786_v24 = vmul.f32 %v8502_v34, %v8554_v63 }
 0x279   : > { %v4431_v28 = vsub.s32 0, %v8769_v18  ;;  %v4337_v62 = vsub.s32 4294967266, %v8760_v58  ;;  %v4476_v22 = vand.u32 8388607, %v10940_v11  ;;  %v8792_v57 = vadd.f32 %v1044_v15, %v970_v19 }
 0x27a   : > { %vm4480_vm9 = vcmp.gt.s32.totalorder %v4479_v46, 0  ;;  %v4317_v32 = vadd.s32 %v8638_v9, %v8636_v21  ;;  %v3626_v60 = vadd.s32 3, %v3622_v8  ;;  %v4334_v53 = vshll.u32 %v8691_v35, %v8760_v58 }
 0x27b   : > { %11108 = vst [vmem:[#allocation11_spill] sm:$0xff] %v8792_v57  ;;  %v5660_v20 = vmin.u32 %v4431_v28, %v8769_v18  ;;  %v4481_v23 = vsel %vm4480_vm9, %v4479_v46, 0  ;;  %v8806_v54 = vadd.s32 %v8698_v27, %v8709_v55  ;;  %v8808_v21 = vadd.s32 127, %v4337_v62 }
 0x27c   : > { %v4483_v30 = vand.u32 31, %v4481_v23  ;;  %v8802_v7 = vshrl.u32 %v4317_v32, %v4333_v26  ;;  %v4477_v31 = vor.u32 8388608, %v4476_v22  ;;  %v1075_v49 = vand.u32 2139095040, %v8792_v57 }
 0x27d   : > { %v4433_v9 = vclz %v5660_v20  ;;  %v4482_v43 = vshrl.u32 %v4481_v23, 5  ;;  %v10941_v6 = vand.u32 2147483647, %v8792_v57  ;;  %v8812_v38 = vand.u32 3, %v3626_v60 }
 0x27e   : > { %v4484_v50 = vsub.s32 32, %v4483_v30  ;;  %v4486_v15 = vshll.u32 %v11039_v47, %v4483_v30  ;;  %v4489_v27 = vshll.u32 %v11045_v14, %v4483_v30  ;;  %v4492_v19 = vshll.u32 %v11046_v39, %v4483_v30 }
 0x27f   : > { %v5661_v0 = vadd.s32 4294967294, %v4433_v9  ;;  %v4495_v28 = vshll.u32 %v11047_v3, %v4483_v30  ;;  %v1076_v62 = vshrl.u32 %v1075_v49, 23  ;;  %v4517_v32 = vshll.u32 %v4477_v31, 8 }
 0x280   : > { %v4487_v4 = vshrl.u32 %v11045_v14, %v4484_v50  ;;  %v4490_v55 = vshrl.u32 %v11046_v39, %v4484_v50  ;;  %v8818_v51 = vpop.eup %6492  ;;  %v4493_v46 = vshrl.u32 %v11047_v3, %v4484_v50  ;;  %v4496_v42 = vshrl.u32 %v11048_v25, %v4484_v50 }
 0x281   : > { %vm5662_vm14 = vcmp.lt.s32.totalorder %v5661_v0, 0  ;;  %v3630_v20 = vxor.u32 2147483648, %v8561_v37  ;;  %v3633_v23 = vxor.u32 2147483648, %v8545_v61  ;;  %v4498_v11 = vshll.u32 %v11048_v25, %v4483_v30 }
 0x282   : > { %v4488_v8 = vor.u32 %v4487_v4, %v4486_v15  ;;  %v4491_v26 = vor.u32 %v4490_v55, %v4489_v27  ;;  %v4494_v22 = vor.u32 %v4493_v46, %v4492_v19  ;;  %v8826_v60 = vsel %vm5662_vm14, 0, %v5661_v0 }
 0x283   : > { %v4497_v9 = vor.u32 %v4496_v42, %v4495_v28  ;;  %v4499_v63 = vshrl.u32 %v11038_v2, %v4484_v50  ;;  %vm4501_vm13 = vcmp.lt.s32.totalorder %v4482_v43, 1  ;;  %vm4504_vm2 = vcmp.lt.s32.totalorder %v4482_v43, 4 }
 0x284   : > { %v1079_v15 = vand.u32 8388607, %v10941_v6  ;;  %vm3629_vm10 = vcmp.eq.s32.totalorder %v8812_v38, 0  ;;  %v4506_v31 = vsel %vm4504_vm2, %v4494_v22, 2102212464  ;;  %v4509_v4 = vsel %vm4501_vm13, %v4488_v8, %v4491_v26 }
 0x285   : > { %v4500_v49 = vor.u32 %v4499_v63, %v4498_v11  ;;  %v5521_v27 = vadd.s32 4294967169, %v1076_v62  ;;  %v4441_v0 = vsub.s32 4294967266, %v8826_v60  ;;  %v4485_v55 = vshrl.u32 %v11039_v47, %v4484_v50 }
 0x286   : > { %vm4503_vm11 = vcmp.lt.s32.totalorder %v4482_v43, 3  ;;  %v4510_v30 = vsel %vm4504_vm2, %v4497_v9, 920167782  ;;  %vm4502_vm12 = vcmp.lt.s32.totalorder %v4482_v43, 2  ;;  %v4513_v46 = vsel %vm4501_vm13, %v4491_v26, %v4494_v22 }
 0x287   : > { %v4511_v19 = vsel %vm4503_vm11, %v4494_v22, %v4510_v30  ;;  %v4514_v42 = vsel %vm4504_vm2, %v4500_v49, 1326507024  ;;  %v4505_v28 = vsel %vm4501_vm13, %v4485_v55, %v4488_v8  ;;  %v4507_v6 = vsel %vm4503_vm11, %v4491_v26, %v4506_v31  ;;  %v11110_v49 = vld [vmem:[#allocation22_spill] sm:$0xff]  ;;  %v8852_v31 = vpop.permute.xlu1 %901 }
 0x288   : > { %v4512_v11 = vsel %vm4502_vm12, %v4509_v4, %v4511_v19  ;;  %v4515_v63 = vsel %vm4503_vm11, %v4497_v9, %v4514_v42  ;;  %vm3625_vm5 = vweird.f32 %v11109_v33  ;;  %vm3632_vm1 = vcmp.eq.s32.totalorder %v8812_v38, 2 }
 0x289   : > { %v4516_v62 = vsel %vm4502_vm12, %v4513_v46, %v4515_v63  ;;  %v8841_v52 = vmul.u32.u64.low %v4517_v32, %v4512_v11  ;;  %v8842_v10 = vmul.u32.u64.high %v4517_v32, %v4512_v11, %v8841_v52  ;;  %v1082_v22 = vadd.s32 1, %v5521_v27 }
 0x28a   : > { %v8846_v50 = vmul.u32.u64.low %v4517_v32, %v4516_v62  ;;  %v8847_v30 = vmul.u32.u64.high %v4517_v32, %v4516_v62, %v8846_v50  ;;  %v3726_v26 = vsel %vm8419_vm15, 0, %v11110_v49  ;;  %v4339_v9 = vshll.u32 %v8808_v21, 23 }
 0x28b   : > { %v4508_v4 = vsel %vm4502_vm12, %v4505_v28, %v4507_v6  ;;  %v3631_v55 = vsel %vm3629_vm10, %v8545_v61, %v3630_v20  ;;  %v3634_v19 = vsel %vm3632_vm1, %v3633_v23, %v8561_v37  ;;  %v4437_v46 = vsub.s32 32, %v8826_v60  ;;  %v990_v62 = vpop.permute.xlu1 %989 }
 0x28c   : > { %v8861_v42 = vadd.s32 127, %v4441_v0  ;;  %v1080_v27 = vor.u32 8388608, %v1079_v15  ;;  %vm1083_vm7 = vcmp.gt.s32.totalorder %v1082_v22, 0  ;;  %v4527_v11 = vadd.s32 1, %v8842_v10 }
 0x28d   : > { %v1084_v63 = vsel %vm1083_vm7, %v1082_v22, 0  ;;  %vm3628_vm15 = vcmp.lt.s32.totalorder %v8812_v38, 2  ;;  %v3730_v21 = vadd.s32 3, %v3726_v26  ;;  %v4524_v43 = vmul.u32 %v4517_v32, %v4508_v4 }
 0x28e   : > { %vm4526_vm9 = vc.u32 %v8847_v30, %v8841_v52  ;;  %v1085_v6 = vshrl.u32 %v1084_v63, 5  ;;  %v3635_v61 = vsel %vm3628_vm15, %v3631_v55, %v3634_v19  ;;  %v8871_v37 = vor.u32 %v8802_v7, %v4334_v53  ;;  %v11112_v53 = vld [vmem:[#allocation29_spill] sm:$0xff] }
 0x28f   : > { %v8873_v20 = vor.u32 4788187, %v4339_v9  ;;  %v4528_v23 = vsel %vm4526_vm9, %v4527_v11, %v8842_v10  ;;  %v1086_v15 = vand.u32 31, %v1084_v63  ;;  %v8877_v38 = vshrl.u32 %v8806_v54, %v4437_v46 }
 0x290   : > { %v4529_v0 = vadd.s32 %v4528_v23, %v4524_v43  ;;  %v8880_v28 = vshll.u32 %v1080_v27, 8  ;;  %v8884_v35 = vsel %vm3625_vm5, nan, %v3635_v61  ;;  %v8886_v58 = vand.u32 3, %v3730_v21  ;;  %v807_v23 = vpop.permute.xlu1 %806 }
 0x291   : > { %v1087_v50 = vsub.s32 32, %v1086_v15  ;;  %v3734_v7 = vxor.u32 2147483648, %v11112_v53  ;;  %v1089_v22 = vshll.u32 %v11039_v47, %v1086_v15  ;;  %vm1104_vm14 = vcmp.lt.s32.totalorder %v1085_v6, 1 }
 0x292   : > { %v4530_v10 = vadd.s32 536870912, %v4529_v0  ;;  %vm1105_vm13 = vcmp.lt.s32.totalorder %v1085_v6, 2  ;;  %v1092_v49 = vshll.u32 %v11045_v14, %v1086_v15  ;;  %v1095_v26 = vshll.u32 %v11046_v39, %v1086_v15 }
 0x293   : > { %v1090_v54 = vshrl.u32 %v11045_v14, %v1087_v50  ;;  %v1093_v8 = vshrl.u32 %v11046_v39, %v1087_v50  ;;  %v1096_v9 = vshrl.u32 %v11047_v3, %v1087_v50  ;;  %v1098_v4 = vshll.u32 %v11047_v3, %v1086_v15 }
 0x294   : > { %v8894_v33 = vshrl.u32 %v4530_v10, 30  ;;  %v1099_v55 = vshrl.u32 %v11048_v25, %v1087_v50  ;;  %v1101_v27 = vshll.u32 %v11048_v25, %v1086_v15  ;;  %v1102_v11 = vshrl.u32 %v11038_v2, %v1087_v50 }
 0x295   : > { %v1091_v19 = vor.u32 %v1090_v54, %v1089_v22  ;;  %v1094_v46 = vor.u32 %v1093_v8, %v1092_v49  ;;  %v1088_v21 = vshrl.u32 %v11039_v47, %v1087_v50  ;;  %v1097_v43 = vor.u32 %v1096_v9, %v1095_v26  ;;  %v11114_v49 = vld [vmem:[#allocation7_spill] sm:$0xff] }
 0x296   : > { %11113 = vst [vmem:[#allocation16_spill] sm:$0xff] %v8894_v33  ;;  %v4532_v63 = vshll.u32 %v8894_v33, 30  ;;  %v1100_v61 = vor.u32 %v1099_v55, %v1098_v4  ;;  %v1103_v10 = vor.u32 %v1102_v11, %v1101_v27  ;;  %vm1106_vm2 = vcmp.lt.s32.totalorder %v1085_v6, 3  ;;  %v11115_v27 = vld [vmem:[#allocation14_spill] sm:$0xff] }
 0x297   : > { %vm1107_vm10 = vcmp.lt.s32.totalorder %v1085_v6, 4  ;;  %v1112_v32 = vsel %vm1104_vm14, %v1091_v19, %v1094_v46  ;;  %v1108_v22 = vsel %vm1104_vm14, %v1088_v21, %v1091_v19  ;;  %vm3729_vm11 = vweird.f32 %v11114_v49 }
 0x298   : > { %v8904_v5 = vsub.s32 %v4529_v0, %v4532_v63  ;;  %v1109_v54 = vsel %vm1107_vm10, %v1097_v43, 2102212464  ;;  %v1113_v15 = vsel %vm1107_vm10, %v1100_v61, 920167782  ;;  %v1116_v50 = vsel %vm1104_vm14, %v1094_v46, %v1097_v43  ;;  %v802_v0 = vpop.permute.xlu0 %801 }
 0x299   : > { %v1110_v8 = vsel %vm1106_vm2, %v1094_v46, %v1109_v54  ;;  %v1114_v33 = vsel %vm1106_vm2, %v1097_v43, %v1113_v15  ;;  %v1117_v26 = vsel %vm1107_vm10, %v1103_v10, 1326507024  ;;  %vm3732_vm12 = vcmp.lt.s32.totalorder %v8886_v58, 2  ;;  %v906_v43 = vpop.permute.xlu1 %905 }
 0x29a   : > { %v4535_v9 = vsub.s32 0, %v8904_v5  ;;  %v1115_v4 = vsel %vm1105_vm13, %v1112_v32, %v1114_v33  ;;  %v1118_v55 = vsel %vm1106_vm2, %v1100_v61, %v1117_v26  ;;  %vm4055_vm5 = vcmp.lt.s32.totalorder %v11115_v27, 0  ;;  %v11116_v61 = vld [vmem:[#allocation28_spill] sm:$0xff] }
 0x29b   : > { %v1119_v19 = vsel %vm1105_vm13, %v1116_v50, %v1118_v55  ;;  %v8915_v11 = vmul.u32.u64.low %v8880_v28, %v1115_v4  ;;  %v8916_v63 = vmul.u32.u64.high %v8880_v28, %v1115_v4, %v8915_v11  ;;  %vm3733_vm1 = vcmp.eq.s32.totalorder %v8886_v58, 0 }
 0x29c   : > { %v5664_v46 = vmin.u32 %v4535_v9, %v8904_v5  ;;  %v1111_v21 = vsel %vm1105_vm13, %v1108_v22, %v1110_v8  ;;  %v8923_v32 = vmul.u32.u64.low %v8880_v28, %v1119_v19  ;;  %v8924_v33 = vmul.u32.u64.high %v8880_v28, %v1119_v19, %v8923_v32 }
 0x29d   : > { %v3735_v10 = vsel %vm3733_vm1, %v11116_v61, %v3734_v7  ;;  %v3737_v54 = vxor.u32 2147483648, %v11116_v61  ;;  %v869_v15 = vmul.f32 %v8605_v40, %v802_v0  ;;  %v957_v50 = vmul.f32 %v8487_v45, %v8852_v31  ;;  %v11120_v32 = vld [vmem:[#allocation19_spill] sm:$0xff] }
 0x29e   : > { %v4537_v26 = vclz %v5664_v46  ;;  %vm3736_vm7 = vcmp.eq.s32.totalorder %v8886_v58, 2  ;;  %v1045_v6 = vmul.f32 %v8502_v34, %v990_v62  ;;  %v870_v22 = vmul.f32 %v8605_v40, %v807_v23 }
 0x29f   : > { %v11117_v8 = vand.u32 2147483647, %v11115_v27  ;;  %v1130_v7 = vadd.s32 1, %v8916_v63  ;;  %v3738_v4 = vsel %vm3736_vm7, %v3737_v54, %v11112_v53  ;;  %v883_v55 = vadd.f32 %v8656_v29, %v869_v15 }
 0x2a0   : > { %v958_v31 = vmul.f32 %v8487_v45, %v906_v43  ;;  %v5665_v0 = vadd.s32 4294967294, %v4537_v26  ;;  %v1127_v19 = vmul.u32 %v8880_v28, %v1111_v21  ;;  %vm1129_vm9 = vc.u32 %v8924_v33, %v8915_v11 }
 0x2a1   : > { %vm8936_vm15 = vcmp.le.f32.partialorder %v11117_v8, 0.7853982  ;;  %v3739_v34 = vsel %vm3732_vm12, %v3735_v10, %v3738_v4  ;;  %v1131_v40 = vsel %vm1129_vm9, %v1130_v7, %v8916_v63  ;;  %v971_v23 = vadd.f32 %v957_v50, %v883_v55  ;;  %v11133_v8 = vld [vmem:[#allocation21_spill] sm:$0xff]  ;;  %v11134_v4 = vld [vmem:[#allocation26_spill] sm:$0xff] }
 0x2a2   : > { %v3740_v62 = vsel %vm3729_vm11, nan, %v3739_v34  ;;  %v884_v53 = vadd.f32 %v8656_v29, %v870_v22  ;;  %v4341_v46 = vand.u32 2147483647, %v8873_v20  ;;  %v4438_v45 = vshll.u32 %v8769_v18, %v8826_v60 }
 0x2a3   : > { %v1132_v28 = vadd.s32 %v1131_v40, %v1127_v19  ;;  %v4575_v21 = vpack.c.bf16 %v3740_v62, %v8884_v35  ;;  %vm4159_vm14 = vcmp.lt.s32.totalorder %v11120_v32, 0  ;;  %v11121_v58 = vshll.u32 %v8861_v42, 23  ;;  %v11135_v40 = vld [vmem:[#allocation25_spill] sm:$0xff] }
 0x2a4   : > { %vm5666_vm13 = vcmp.lt.s32.totalorder %v5665_v0, 0  ;;  %v8960_v63 = vadd.f32 %v1045_v6, %v971_v23  ;;  %v972_v49 = vadd.f32 %v958_v31, %v884_v53  ;;  %6494 = vsinq.f32 %v8566_v44 }
 0x2a5   : > { %v4444_v43 = vor.u32 4788187, %v11121_v58  ;;  %v11123_v29 = vsub.s32 4, %v8380_v13  ;;  %v11124_v60 = vand.u32 2147483647, %v8773_v12  ;;  %v11125_v20 = vcvt.s32.f32 %v8771_v59  ;;  %5901 = vmatmul.mubr.msk.bf16.gmra.mrb[36].mxu1 %vm2700_vm6, %v4575_v21 }
 0x2a6   : > { %11122 = vst [vmem:[#allocation15_spill] sm:$0xff] %v8960_v63  ;;  %v1133_v42 = vadd.s32 536870912, %v1132_v28  ;;  %v11126_v61 = vxor.u32 2147483648, %v8766_v1  ;;  %v4343_v10 = vcvt.s32.f32 %v8871_v37  ;;  %v4440_v54 = vor.u32 %v8877_v38, %v4438_v45  ;;  %5904 = vmatprep.mubr.msk.bf16.mxu1 %vm11000_vm0, %v11051_v36 }
 0x2a7   : > { %v8968_v18 = vsel %vm4055_vm5, %v11123_v29, %v8380_v13  ;;  %v4240_v35 = vmul.f32 %v11125_v20, %v11124_v60  ;;  %v1179_v13 = vand.u32 2139095040, %v8960_v63  ;;  %6496 = vcosq.f32 %v8781_v17 }
 0x2a8   : > { %v4138_v44 = vsel %vm4055_vm5, %v11126_v61, %v8766_v1  ;;  %v11127_v59 = vand.u32 2147483647, %v11120_v32  ;;  %v11128_v12 = vmov 0  ;;  %v8992_v15 = vsel %vm5666_vm13, 0, %v5665_v0 }
 0x2a9   : > { %v8994_v1 = vshrl.u32 %v1133_v42, 30  ;;  %v8997_v37 = vadd.f32 %v8786_v24, %v972_v49  ;;  %6498 = vsinq.f32 %v8781_v17  ;;  %v4344_v38 = vmul.f32 %v4343_v10, %v4341_v46 }
 0x2aa   : > { %vm8988_vm2 = vcmp.le.f32.partialorder %v11127_v59, 0.7853982  ;;  %v4445_v50 = vand.u32 2147483647, %v4444_v43  ;;  %v1180_v26 = vshrl.u32 %v1179_v13, 23  ;;  %v4141_v6 = vsel %vm8936_vm15, %v11115_v27, %v4138_v44 }
 0x2ab   : > { %v11129_v12 = vsel %vm8988_vm2, 4294967295, %v11128_v12  ;;  %11131 = vst [vmem:[#allocation17_spill] sm:$0xff] %v8994_v1  ;;  %11132 = vst [vmem:[#allocation6_spill] sm:$0xff] %v8997_v37  ;;  %v4241_v22 = vxor.u32 2147483648, %v4240_v35  ;;  %vm4263_vm10 = vcmp.lt.s32.totalorder %v11133_v8, 0  ;;  %v1135_v7 = vshll.u32 %v8994_v1, 30 }
 0x2ac   : > { %11130 = vst [vmem:[#allocation5_spill] sm:$0xff] %v11129_v12  ;;  %v4447_v31 = vcvt.s32.f32 %v4440_v54  ;;  %v4545_v24 = vsub.s32 4294967266, %v8992_v15  ;;  %v5525_v0 = vadd.s32 4294967169, %v1180_v26  ;;  %v10946_v17 = vand.u32 2147483647, %v8960_v63 }
 0x2ad   : > { %v9007_v19 = vsub.s32 %v1132_v28, %v1135_v7  ;;  %v1283_v34 = vand.u32 2139095040, %v8997_v37  ;;  %v3830_v23 = vsel %vm8474_vm4, 0, %v11135_v40  ;;  %6500 = vcosq.f32 %v4141_v6 }
 0x2ae   : > { %v4345_v53 = vxor.u32 2147483648, %v4344_v38  ;;  %v9014_v46 = vmul.f32 %v4447_v31, %v4445_v50  ;;  %v1186_v45 = vadd.s32 1, %v5525_v0  ;;  %6502 = vsinq.f32 %v4141_v6  ;;  %v9022_v60 = vpop.eup %6494 }
 0x2af   : > { %v4242_v21 = vsel %vm4159_vm14, %v4241_v22, %v4240_v35  ;;  %v4541_v28 = vsub.s32 32, %v8992_v15  ;;  %v1138_v58 = vsub.s32 0, %v9007_v19  ;;  %v4525_v43 = vadd.s32 %v8841_v52, %v8847_v30 }
 0x2b0   : > { %v4546_v49 = vadd.s32 127, %v4545_v24  ;;  %vm1187_vm11 = vcmp.gt.s32.totalorder %v1186_v45, 0  ;;  %v3834_v29 = vadd.s32 3, %v3830_v23  ;;  %v1183_v42 = vand.u32 8388607, %v10946_v17 }
 0x2b1   : > { %v5522_v20 = vmin.u32 %v1138_v58, %v9007_v19  ;;  %v1188_v61 = vsel %vm1187_vm11, %v1186_v45, 0  ;;  %v1284_v44 = vshrl.u32 %v1283_v34, 23  ;;  %v9030_v35 = vsel %vm8988_vm2, %v11120_v32, %v4242_v21  ;;  %v9037_v54 = vpop.eup %6496 }
 0x2b2   : > { %v9034_v52 = vsel %vm4263_vm10, %v4345_v53, %v4344_v38  ;;  %v1190_v10 = vand.u32 31, %v1188_v61  ;;  %v4542_v13 = vshll.u32 %v8904_v5, %v8992_v15  ;;  %v4543_v59 = vshrl.u32 %v4525_v43, %v4541_v28 }
 0x2b3   : > { %v9043_v50 = vadd.s32 %v8915_v11, %v8924_v33  ;;  %v1140_v26 = vclz %v5522_v20  ;;  %v9045_v6 = vpop.eup %6498  ;;  %v4547_v22 = vshll.u32 %v4546_v49, 23  ;;  %v10947_v38 = vand.u32 2147483647, %v8997_v37 }
 0x2b4   : > { %v1191_v7 = vsub.s32 32, %v1190_v10  ;;  %v9048_v31 = vand.u32 3, %v3834_v29  ;;  %v1184_v0 = vor.u32 8388608, %v1183_v42  ;;  %v1189_v34 = vshrl.u32 %v1188_v61, 5 }
 0x2b5   : > { %v5523_v24 = vadd.s32 4294967294, %v1140_v26  ;;  %v5529_v40 = vadd.s32 4294967169, %v1284_v44  ;;  %v1193_v5 = vshll.u32 %v11039_v47, %v1190_v10  ;;  %v1196_v11 = vshll.u32 %v11045_v14, %v1190_v10 }
 0x2b6   : > { %v1194_v15 = vshrl.u32 %v11045_v14, %v1191_v7  ;;  %v1197_v33 = vshrl.u32 %v11046_v39, %v1191_v7  ;;  %v1199_v62 = vshll.u32 %v11046_v39, %v1190_v10  ;;  %v1200_v23 = vshrl.u32 %v11047_v3, %v1191_v7 }
 0x2b7   : > { %vm5524_vm4 = vcmp.lt.s32.totalorder %v5523_v24, 0  ;;  %v1203_v53 = vshrl.u32 %v11048_v25, %v1191_v7  ;;  %v9057_v45 = vpop.eup %6500  ;;  %v1202_v43 = vshll.u32 %v11047_v3, %v1190_v10  ;;  %v9064_v29 = vor.u32 %v4543_v59, %v4542_v13 }
 0x2b8   : > { %v9059_v21 = vsel %vm5524_vm4, 0, %v5523_v24  ;;  %v1195_v28 = vor.u32 %v1194_v15, %v1193_v5  ;;  %v1198_v58 = vor.u32 %v1197_v33, %v1196_v11  ;;  %v9062_v49 = vpop.eup %6502  ;;  %v9066_v20 = vor.u32 4788187, %v4547_v22  ;;  %v11137_v15 = vld [vmem:[#allocation31_spill] sm:$0xff] }
 0x2b9   : > { %v1201_v42 = vor.u32 %v1200_v23, %v1199_v62  ;;  %v1224_v61 = vshll.u32 %v1184_v0, 8  ;;  %v1148_v44 = vsub.s32 4294967266, %v9059_v21  ;;  %v1204_v26 = vor.u32 %v1203_v53, %v1202_v43 }
 0x2ba   : > { %v1205_v17 = vshll.u32 %v11048_v25, %v1190_v10  ;;  %v1206_v24 = vshrl.u32 %v11038_v2, %v1191_v7  ;;  %vm1208_vm12 = vcmp.lt.s32.totalorder %v1189_v34, 1  ;;  %vm1211_vm5 = vcmp.lt.s32.totalorder %v1189_v34, 4 }
 0x2bb   : > { %v1287_v5 = vand.u32 8388607, %v10947_v38  ;;  %v3838_v11 = vxor.u32 2147483648, %v11137_v15  ;;  %v1213_v59 = vsel %vm1211_vm5, %v1201_v42, 2102212464  ;;  %v1216_v22 = vsel %vm1208_vm12, %v1195_v28, %v1198_v58 }
 0x2bc   : > { %v1207_v13 = vor.u32 %v1206_v24, %v1205_v17  ;;  %v1290_v33 = vadd.s32 1, %v5529_v40  ;;  %v1192_v0 = vshrl.u32 %v11039_v47, %v1191_v7  ;;  %vm1209_vm1 = vcmp.lt.s32.totalorder %v1189_v34, 2 }
 0x2bd   : > { %vm1210_vm7 = vcmp.lt.s32.totalorder %v1189_v34, 3  ;;  %v1217_v62 = vsel %vm1211_vm5, %v1204_v26, 920167782  ;;  %v1149_v10 = vadd.s32 127, %v1148_v44  ;;  %v1220_v53 = vsel %vm1208_vm12, %v1198_v58, %v1201_v42 }
 0x2be   : > { %v1218_v23 = vsel %vm1210_vm7, %v1201_v42, %v1217_v62  ;;  %v1221_v43 = vsel %vm1211_vm5, %v1207_v13, 1326507024  ;;  %v1212_v30 = vsel %vm1208_vm12, %v1192_v0, %v1195_v28  ;;  %v1214_v38 = vsel %vm1210_vm7, %v1198_v58, %v1213_v59 }
 0x2bf   : > { %v1219_v55 = vsel %vm1209_vm1, %v1216_v22, %v1218_v23  ;;  %v1222_v17 = vsel %vm1210_vm7, %v1204_v26, %v1221_v43  ;;  %v1288_v7 = vor.u32 8388608, %v1287_v5  ;;  %vm1291_vm9 = vcmp.gt.s32.totalorder %v1290_v33, 0  ;;  %v11140_v23 = vld [vmem:[#allocation30_spill] sm:$0xff] }
 0x2c0   : > { %v1223_v24 = vsel %vm1209_vm1, %v1220_v53, %v1222_v17  ;;  %v9080_v1 = vmul.u32.u64.low %v1224_v61, %v1219_v55  ;;  %v9081_v40 = vmul.u32.u64.high %v1224_v61, %v1219_v55, %v9080_v1  ;;  %v1144_v42 = vsub.s32 32, %v9059_v21  ;;  %v11138_v55 = vld [vmem:[#allocation18_spill] sm:$0xff] }
 0x2c1   : > { %v9085_v44 = vmul.u32.u64.low %v1224_v61, %v1223_v24  ;;  %v9086_v62 = vmul.u32.u64.high %v1224_v61, %v1223_v24, %v9085_v44  ;;  %v1150_v28 = vshll.u32 %v1149_v10, 23  ;;  %v1215_v58 = vsel %vm1209_vm1, %v1212_v30, %v1214_v38 }
 0x2c2   : > { %v1292_v13 = vsel %vm1291_vm9, %v1290_v33, 0  ;;  %vm3837_vm13 = vcmp.eq.s32.totalorder %v9048_v31, 0  ;;  %vm3840_vm11 = vcmp.eq.s32.totalorder %v9048_v31, 2  ;;  %v3934_v5 = vsel %vm8512_vm8, 0, %v11138_v55 }
 0x2c3   : > { %v1294_v26 = vand.u32 31, %v1292_v13  ;;  %v1234_v22 = vadd.s32 1, %v9081_v40  ;;  %v9096_v0 = vshll.u32 %v1288_v7, 8  ;;  %v3839_v53 = vsel %vm3837_vm13, %v11140_v23, %v3838_v11 }
 0x2c4   : > { %v3841_v10 = vxor.u32 2147483648, %v11140_v23  ;;  %v1231_v38 = vmul.u32 %v1224_v61, %v1215_v58  ;;  %vm1233_vm4 = vc.u32 %v9086_v62, %v9080_v1  ;;  %v9105_v33 = vshrl.u32 %v9043_v50, %v1144_v42 }
 0x2c5   : > { %v1295_v34 = vsub.s32 32, %v1294_v26  ;;  %v9107_v43 = vor.u32 4788187, %v1150_v28  ;;  %v1235_v17 = vsel %vm1233_vm4, %v1234_v22, %v9081_v40  ;;  %v3938_v24 = vadd.s32 3, %v3934_v5 }
 0x2c6   : > { %v1236_v7 = vadd.s32 %v1235_v17, %v1231_v38  ;;  %v1293_v11 = vshrl.u32 %v1292_v13, 5  ;;  %v1297_v44 = vshll.u32 %v11039_v47, %v1294_v26  ;;  %vm3836_vm8 = vcmp.lt.s32.totalorder %v9048_v31, 2 }
 0x2c7   : > { %v1298_v55 = vshrl.u32 %v11045_v14, %v1295_v34  ;;  %v1300_v61 = vshll.u32 %v11045_v14, %v1294_v26  ;;  %v1301_v58 = vshrl.u32 %v11046_v39, %v1295_v34  ;;  %v1303_v50 = vshll.u32 %v11046_v39, %v1294_v26 }
 0x2c8   : > { %v1304_v42 = vshrl.u32 %v11047_v3, %v1295_v34  ;;  %v1237_v28 = vadd.s32 536870912, %v1236_v7  ;;  %v1306_v40 = vshll.u32 %v11047_v3, %v1294_v26  ;;  %v1307_v13 = vshrl.u32 %v11048_v25, %v1295_v34 }
 0x2c9   : > { %v1299_v59 = vor.u32 %v1298_v55, %v1297_v44  ;;  %v1296_v5 = vshrl.u32 %v11039_v47, %v1295_v34  ;;  %v1302_v22 = vor.u32 %v1301_v58, %v1300_v61  ;;  %v3842_v38 = vsel %vm3840_vm11, %v3841_v10, %v11137_v15  ;;  %v910_v15 = vpop.permute.xlu1 %909 }
 0x2ca   : > { %v1305_v23 = vor.u32 %v1304_v42, %v1303_v50  ;;  %v9123_v17 = vshrl.u32 %v1237_v28, 30  ;;  %v1308_v37 = vor.u32 %v1307_v13, %v1306_v40  ;;  %v1309_v30 = vshll.u32 %v11048_v25, %v1294_v26  ;;  %v11141_v50 = vld [vmem:[#allocation8_spill] sm:$0xff] }
 0x2cb   : > { %v1310_v63 = vshrl.u32 %v11038_v2, %v1295_v34  ;;  %vm1312_vm12 = vcmp.lt.s32.totalorder %v1293_v11, 1  ;;  %vm1314_vm5 = vcmp.lt.s32.totalorder %v1293_v11, 3  ;;  %vm1315_vm1 = vcmp.lt.s32.totalorder %v1293_v11, 4 }
 0x2cc   : > { %v3939_v44 = vand.u32 3, %v3938_v24  ;;  %v1239_v55 = vshll.u32 %v9123_v17, 30  ;;  %v1316_v61 = vsel %vm1312_vm12, %v1296_v5, %v1299_v59  ;;  %v1317_v58 = vsel %vm1315_vm1, %v1305_v23, 2102212464 }
 0x2cd   : > { %v1311_v12 = vor.u32 %v1310_v63, %v1309_v30  ;;  %vm3833_vm7 = vweird.f32 %v11141_v50  ;;  %v1318_v10 = vsel %vm1314_vm5, %v1302_v22, %v1317_v58  ;;  %v1320_v26 = vsel %vm1312_vm12, %v1299_v59, %v1302_v22 }
 0x2ce   : > { %v1321_v34 = vsel %vm1315_vm1, %v1308_v37, 920167782  ;;  %v3942_v42 = vxor.u32 2147483648, %v9022_v60  ;;  %v9135_v28 = vsub.s32 %v1236_v7, %v1239_v55  ;;  %vm1313_vm9 = vcmp.lt.s32.totalorder %v1293_v11, 2  ;;  %v998_v11 = vpop.permute.xlu1 %997 }
 0x2cf   : > { %v1322_v63 = vsel %vm1314_vm5, %v1305_v23, %v1321_v34  ;;  %v1324_v30 = vsel %vm1312_vm12, %v1302_v22, %v1305_v23  ;;  %v1319_v24 = vsel %vm1313_vm9, %v1316_v61, %v1318_v10  ;;  %v1325_v13 = vsel %vm1315_vm1, %v1311_v12, 1326507024  ;;  %v812_v23 = vpop.permute.xlu0 %811  ;;  %v11145_v12 = vld [vmem:[#allocation24_spill] sm:$0xff] }
 0x2d0   : > { %v1323_v40 = vsel %vm1313_vm9, %v1320_v26, %v1322_v63  ;;  %v3843_v5 = vsel %vm3836_vm8, %v3839_v53, %v3842_v38  ;;  %v11142_v59 = vand.u32 2147483647, %v11133_v8  ;;  %v1242_v7 = vsub.s32 0, %v9135_v28  ;;  %v9167_v63 = vld [vmem:[%s10871_s2] ss:$0 sm:$0xff] }
 0x2d1   : > { %v1326_v55 = vsel %vm1314_vm5, %v1308_v37, %v1325_v13  ;;  %v9151_v34 = vmul.u32.u64.low %v9096_v0, %v1323_v40  ;;  %v9152_v22 = vmul.u32.u64.high %v9096_v0, %v1323_v40, %v9151_v34  ;;  %vm10965_vm11 = vcmp.lt.s32.totalorder %v11145_v12, 0  ;;  %v9173_v40 = vld [vmem:[%s10871_s2 + $0x1] ss:$0 sm:$0xff] }
 0x2d2   : > { %vm9144_vm13 = vcmp.le.f32.partialorder %v11142_v59, 0.7853982  ;;  %v1327_v31 = vsel %vm1313_vm9, %v1324_v30, %v1326_v55  ;;  %vm3941_vm4 = vcmp.eq.s32.totalorder %v3939_v44, 0  ;;  %vm3944_vm8 = vcmp.eq.s32.totalorder %v3939_v44, 2  ;;  %v9183_v55 = vld [vmem:[%s10872_s3] ss:$0 sm:$0xff] }
 0x2d3   : > { %v3945_v53 = vxor.u32 2147483648, %v8818_v51  ;;  %v5526_v38 = vmin.u32 %v1242_v7, %v9135_v28  ;;  %v9159_v61 = vmul.u32.u64.low %v9096_v0, %v1327_v31  ;;  %v9160_v10 = vmul.u32.u64.high %v9096_v0, %v1327_v31, %v9159_v61 }
 0x2d4   : > { %v3943_v37 = vsel %vm3941_vm4, %v8818_v51, %v3942_v42  ;;  %vm3940_vm12 = vcmp.lt.s32.totalorder %v3939_v44, 2  ;;  %v871_v30 = vmul.f32 %v9167_v63, %v812_v23  ;;  %v959_v13 = vmul.f32 %v9173_v40, %v910_v15  ;;  %v11146_v44 = vld [vmem:[#allocation9_spill] sm:$0xff] }
 0x2d5   : > { %v3946_v26 = vsel %vm3944_vm8, %v3945_v53, %v9022_v60  ;;  %v1244_v59 = vclz %v5526_v38  ;;  %v1338_v51 = vadd.s32 1, %v9152_v22  ;;  %vm3937_vm5 = vweird.f32 %v11146_v44  ;;  %v9189_v15 = vld [vmem:[%s10871_s2 + $0x2] ss:$0 sm:$0xff] }
 0x2d6   : > { %v3947_v60 = vsel %vm3940_vm12, %v3943_v37, %v3946_v26  ;;  %v3844_v42 = vsel %vm3833_vm7, nan, %v3843_v5  ;;  %v885_v23 = vadd.f32 %v9183_v55, %v871_v30  ;;  %v1047_v31 = vmul.f32 %v9189_v15, %v998_v11 }
 0x2d7   : > { %v3948_v7 = vsel %vm3937_vm5, nan, %v3947_v60  ;;  %v5527_v53 = vadd.s32 4294967294, %v1244_v59  ;;  %v1335_v38 = vmul.u32 %v9096_v0, %v1319_v24  ;;  %vm1337_vm1 = vc.u32 %v9160_v10, %v9151_v34 }
 0x2d8   : > { %v4576_v50 = vpack.c.bf16 %v3948_v7, %v3844_v42  ;;  %v4551_v5 = vcvt.s32.f32 %v9064_v29  ;;  %v11147_v61 = vshll.u32 %v9007_v19, %v9059_v21  ;;  %v1339_v26 = vsel %vm1337_vm1, %v1338_v51, %v9152_v22  ;;  %v817_v29 = vpop.permute.xlu1 %816  ;;  %v11156_v7 = vld [vmem:[#allocation27_spill] sm:$0xff] }
 0x2d9   : > { %v973_v30 = vadd.f32 %v959_v13, %v885_v23  ;;  %6504 = vcosq.f32 %v9030_v35  ;;  %v11148_v11 = vand.u32 2147483647, %v11145_v12  ;;  %v11149_v0 = vmov 0 }
 0x2da   : > { %v1147_v37 = vor.u32 %v9105_v33, %v11147_v61  ;;  %vm5528_vm9 = vcmp.lt.s32.totalorder %v5527_v53, 0  ;;  %v1340_v24 = vadd.s32 %v1339_v26, %v1335_v38  ;;  %5905 = vmatmul.mubr.msk.bf16.gmra.mrb[40].mxu1 %vm2700_vm6, %v4576_v50  ;;  %v4349_v19 = vsel %vm9144_vm13, %v11133_v8, %v9034_v52  ;;  %v822_v26 = vpop.permute.xlu0 %821 }
 0x2db   : > { %vm9204_vm7 = vcmp.le.f32.partialorder %v11148_v11, 0.7853982  ;;  %v11152_v21 = vand.u32 2147483647, %v9066_v20  ;;  %v1152_v22 = vand.u32 2147483647, %v9107_v43  ;;  %v9216_v13 = vadd.f32 %v1047_v31, %v973_v30  ;;  %5908 = vmatprep.mubr.msk.bf16.mxu1 %vm11000_vm0, %v11051_v36 }
 0x2dc   : > { %v11150_v0 = vsel %vm9204_vm7, 4294967295, %v11149_v0  ;;  %v11154_v59 = vsub.s32 4, %v11134_v4  ;;  %6506 = vsinq.f32 %v9030_v35  ;;  %v11155_v52 = vxor.u32 2147483648, %v9014_v46  ;;  %v914_v61 = vpop.permute.xlu1 %913 }
 0x2dd   : > { %11151 = vst [vmem:[#allocation22_spill] sm:$0xff] %v11150_v0  ;;  %v4552_v33 = vmul.f32 %v4551_v5, %v11152_v21  ;;  %11153 = vst [vmem:[#allocation20_spill] sm:$0xff] %v9216_v13  ;;  %v1341_v43 = vadd.s32 536870912, %v1340_v24  ;;  %v1154_v44 = vcvt.s32.f32 %v1147_v37  ;;  %v1247_v60 = vsel %vm5528_vm9, 0, %v5527_v53 }
 0x2de   : > { %v9225_v51 = vsel %vm4159_vm14, %v11154_v59, %v11134_v4  ;;  %v4450_v20 = vsel %vm10965_vm11, %v11155_v52, %v9014_v46  ;;  %v1387_v42 = vand.u32 2139095040, %v9216_v13  ;;  %v4038_v23 = vsel %vm8729_vm3, 0, %v11156_v7 }
 0x2df   : > { %6508 = vcosq.f32 %v4349_v19  ;;  %vm4471_vm14 = vcmp.lt.s32.totalorder %v8722_v48, 0  ;;  %v9239_v35 = vshrl.u32 %v1341_v43, 30  ;;  %v9244_v46 = vsel %vm9204_vm7, %v11145_v12, %v4450_v20 }
 0x2e0   : > { %v4553_v31 = vxor.u32 2147483648, %v4552_v33  ;;  %v9246_v53 = vmul.f32 %v1154_v44, %v1152_v22  ;;  %v1388_v38 = vshrl.u32 %v1387_v42, 23  ;;  %v1248_v50 = vsub.s32 32, %v1247_v60 }
 0x2e1   : > { %11157 = vst [vmem:[#allocation29_spill] sm:$0xff] %v9239_v35  ;;  %v1252_v5 = vsub.s32 4294967266, %v1247_v60  ;;  %v1343_v41 = vshll.u32 %v9239_v35, 30  ;;  %v4042_v37 = vadd.s32 3, %v4038_v23  ;;  %6510 = vsinq.f32 %v4349_v19 }
 0x2e2   : > { %v10955_v30 = vand.u32 2147483647, %v9216_v13  ;;  %v5533_v11 = vadd.s32 4294967169, %v1388_v38  ;;  %v872_v21 = vmul.f32 %v9167_v63, %v817_v29  ;;  %6512 = vcosq.f32 %v9244_v46 }
 0x2e3   : > { %v1232_v22 = vadd.s32 %v9080_v1, %v9086_v62  ;;  %v9254_v59 = vsub.s32 %v1340_v24, %v1343_v41  ;;  %v873_v52 = vmul.f32 %v9167_v63, %v822_v26  ;;  %v9259_v20 = vsel %vm4471_vm14, %v4553_v31, %v4552_v33  ;;  %v9263_v42 = vpop.eup %6504 }
 0x2e4   : > { %v1394_v43 = vadd.s32 1, %v5533_v11  ;;  %v960_v44 = vmul.f32 %v9173_v40, %v914_v61  ;;  %v1253_v7 = vadd.s32 127, %v1252_v5  ;;  %v4043_v1 = vand.u32 3, %v4042_v37 }
 0x2e5   : > { %v1250_v29 = vshrl.u32 %v1232_v22, %v1248_v50  ;;  %v1346_v23 = vsub.s32 0, %v9254_v59  ;;  %v1391_v62 = vand.u32 8388607, %v10955_v30  ;;  %v886_v24 = vadd.f32 %v9183_v55, %v872_v21 }
 0x2e6   : > { %vm1395_vm3 = vcmp.gt.s32.totalorder %v1394_v43, 0  ;;  %v4046_v33 = vxor.u32 2147483648, %v9045_v6  ;;  %v9270_v31 = vpop.eup %6506  ;;  %v1249_v38 = vshll.u32 %v9135_v28, %v1247_v60  ;;  %v9275_v50 = vadd.f32 %v9183_v55, %v873_v52  ;;  %v9290_v52 = vpop.permute.xlu0 %831 }
 0x2e7   : > { %v5530_v41 = vmin.u32 %v1346_v23, %v9254_v59  ;;  %v1396_v5 = vsel %vm1395_vm3, %v1394_v43, 0  ;;  %v9279_v61 = vadd.s32 %v9151_v34, %v9160_v10  ;;  %v9281_v26 = vadd.f32 %v960_v44, %v886_v24 }
 0x2e8   : > { %v1398_v37 = vand.u32 31, %v1396_v5  ;;  %v4142_v11 = vsel %vm8936_vm15, 0, %v8968_v18  ;;  %v9288_v28 = vor.u32 %v1250_v29, %v1249_v38  ;;  %v1254_v60 = vshll.u32 %v1253_v7, 23 }
 0x2e9   : > { %v9286_v21 = vpop.eup %6508  ;;  %v1348_v22 = vclz %v5530_v41  ;;  %vm4045_vm4 = vcmp.eq.s32.totalorder %v4043_v1, 0  ;;  %v1392_v43 = vor.u32 8388608, %v1391_v62  ;;  %v4049_v10 = vxor.u32 2147483648, %v9037_v54 }
 0x2ea   : > { %11158 = vst [vmem:[#allocation7_spill] sm:$0xff] %v9286_v21  ;;  %v1399_v23 = vsub.s32 32, %v1398_v37  ;;  %v4047_v34 = vsel %vm4045_vm4, %v9037_v54, %v4046_v33  ;;  %v1397_v24 = vshrl.u32 %v1396_v5, 5  ;;  %vm4048_vm8 = vcmp.eq.s32.totalorder %v4043_v1, 2  ;;  %v9313_v0 = vpop.permute.xlu0 %841 }
 0x2eb   : > { %v5531_v44 = vadd.s32 4294967294, %v1348_v22  ;;  %v4146_v9 = vadd.s32 3, %v4142_v11  ;;  %v9294_v18 = vpop.eup %6510  ;;  %v1401_v29 = vshll.u32 %v11039_v47, %v1398_v37  ;;  %v1404_v38 = vshll.u32 %v11045_v14, %v1398_v37  ;;  %11160 = vst [vmem:[#allocation28_spill] sm:$0xff] %v9313_v0 }
 0x2ec   : > { %v1402_v7 = vshrl.u32 %v11045_v14, %v1399_v23  ;;  %v1405_v41 = vshrl.u32 %v11046_v39, %v1399_v23  ;;  %v9300_v62 = vpop.eup %6512  ;;  %v1407_v33 = vshll.u32 %v11046_v39, %v1398_v37  ;;  %v1408_v54 = vshrl.u32 %v11047_v3, %v1399_v23 }
 0x2ed   : > { %11159 = vst [vmem:[#allocation14_spill] sm:$0xff] %v9300_v62  ;;  %vm5532_vm15 = vcmp.lt.s32.totalorder %v5531_v44, 0  ;;  %v1411_v5 = vshrl.u32 %v11048_v25, %v1399_v23  ;;  %v1410_v30 = vshll.u32 %v11047_v3, %v1398_v37  ;;  %vm4041_vm12 = vweird.f32 %v8071_v56 }
 0x2ee   : > { %v1403_v11 = vor.u32 %v1402_v7, %v1401_v29  ;;  %v1406_v22 = vor.u32 %v1405_v41, %v1404_v38  ;;  %v4050_v4 = vsel %vm4048_vm8, %v4049_v10, %v9045_v6  ;;  %v9309_v19 = vor.u32 4788187, %v1254_v60  ;;  %v1002_v0 = vpop.permute.xlu0 %1001 }
 0x2ef   : > { %v1409_v35 = vor.u32 %v1408_v54, %v1407_v33  ;;  %v9311_v62 = vshll.u32 %v1392_v43, 8  ;;  %vm4044_vm5 = vcmp.lt.s32.totalorder %v4043_v1, 2  ;;  %v9315_v12 = vsel %vm5532_vm15, 0, %v5531_v44  ;;  %v918_v44 = vpop.permute.xlu1 %917 }
 0x2f0   : > { %v1412_v13 = vor.u32 %v1411_v5, %v1410_v30  ;;  %v1413_v29 = vshll.u32 %v11048_v25, %v1398_v37  ;;  %v1414_v7 = vshrl.u32 %v11038_v2, %v1399_v23  ;;  %vm1416_vm1 = vcmp.lt.s32.totalorder %v1397_v24, 1 }
 0x2f1   : > { %vm1419_vm9 = vcmp.lt.s32.totalorder %v1397_v24, 4  ;;  %v4051_v38 = vsel %vm4044_vm5, %v4047_v34, %v4050_v4  ;;  %v4147_v41 = vand.u32 3, %v4146_v9  ;;  %v1424_v10 = vsel %vm1416_vm1, %v1403_v11, %v1406_v22 }
 0x2f2   : > { %v1415_v6 = vor.u32 %v1414_v7, %v1413_v29  ;;  %v1421_v60 = vsel %vm1419_vm9, %v1409_v35, 2102212464  ;;  %v4150_v43 = vxor.u32 2147483648, %v9062_v49  ;;  %v1356_v33 = vsub.s32 4294967266, %v9315_v12 }
 0x2f3   : > { %v1400_v1 = vshrl.u32 %v11039_v47, %v1399_v23  ;;  %vm1418_vm3 = vcmp.lt.s32.totalorder %v1397_v24, 3  ;;  %v1425_v30 = vsel %vm1419_vm9, %v1412_v13, 920167782  ;;  %vm1417_vm4 = vcmp.lt.s32.totalorder %v1397_v24, 2  ;;  %v1006_v56 = vpop.permute.xlu1 %1005 }
 0x2f4   : > { %v1426_v37 = vsel %vm1418_vm3, %v1409_v35, %v1425_v30  ;;  %v1428_v54 = vsel %vm1416_vm1, %v1406_v22, %v1409_v35  ;;  %v1429_v5 = vsel %vm1419_vm9, %v1415_v6, 1326507024  ;;  %v11161_v4 = vand.u32 2147483647, %v8722_v48 }
 0x2f5   : > { %vm1074_vm15 = vcmp.lt.s32.totalorder %v8792_v57, 0  ;;  %v1420_v9 = vsel %vm1416_vm1, %v1400_v1, %v1403_v11  ;;  %v1422_v29 = vsel %vm1418_vm3, %v1406_v22, %v1421_v60  ;;  %v1427_v23 = vsel %vm1417_vm4, %v1424_v10, %v1426_v37 }
 0x2f6   : > { %vm9326_vm8 = vcmp.le.f32.partialorder %v11161_v4, 0.7853982  ;;  %v1430_v7 = vsel %vm1418_vm3, %v1412_v13, %v1429_v5  ;;  %v9335_v35 = vmul.u32.u64.low %v9311_v62, %v1427_v23  ;;  %v9336_v6 = vmul.u32.u64.high %v9311_v62, %v1427_v23, %v9335_v35 }
 0x2f7   : > { %v1431_v30 = vsel %vm1417_vm4, %v1428_v54, %v1430_v7  ;;  %vm4145_vm5 = vweird.f32 %v11115_v27  ;;  %v1357_v4 = vadd.s32 127, %v1356_v33  ;;  %v4052_v11 = vsel %vm4041_vm12, nan, %v4051_v38 }
 0x2f8   : > { %v9341_v32 = vmul.u32.u64.low %v9311_v62, %v1431_v30  ;;  %v9342_v21 = vmul.u32.u64.high %v9311_v62, %v1431_v30, %v9341_v32  ;;  %v1423_v13 = vsel %vm1417_vm4, %v1420_v9, %v1422_v29  ;;  %vm4149_vm1 = vcmp.eq.s32.totalorder %v4147_v41, 0 }
 0x2f9   : > { %v4153_v22 = vxor.u32 2147483648, %v9057_v45  ;;  %v1048_v60 = vmul.f32 %v9189_v15, %v1002_v0  ;;  %v11164_v10 = vand.u32 2147483647, %v8792_v57  ;;  %v11165_v1 = vmov 0 }
 0x2fa   : > { %v1352_v33 = vsub.s32 32, %v9315_v12  ;;  %vm4148_vm3 = vcmp.lt.s32.totalorder %v4147_v41, 2  ;;  %v4151_v32 = vsel %vm4149_vm1, %v9057_v45, %v4150_v43  ;;  %vm4152_vm11 = vcmp.eq.s32.totalorder %v4147_v41, 2 }
 0x2fb   : > { %vm9351_vm9 = vcmp.le.f32.partialorder %v11164_v10, 0.7853982  ;;  %v1442_v24 = vadd.s32 1, %v9336_v6  ;;  %v4154_v38 = vsel %vm4152_vm11, %v4153_v22, %v9062_v49  ;;  %v9360_v37 = vadd.f32 %v1048_v60, %v9281_v26  ;;  %v827_v22 = vpop.permute.xlu1 %826 }
 0x2fc   : > { %v11166_v1 = vsel %vm9351_vm9, 4294967295, %v11165_v1  ;;  %v961_v0 = vmul.f32 %v9173_v40, %v918_v44  ;;  %v1358_v54 = vshll.u32 %v1357_v4, 23  ;;  %v1439_v5 = vmul.u32 %v9311_v62, %v1423_v13 }
 0x2fd   : > { %11167 = vst [vmem:[#allocation21_spill] sm:$0xff] %v11166_v1  ;;  %11168 = vst [vmem:[#allocation26_spill] sm:$0xff] %v9360_v37  ;;  %vm1441_vm12 = vc.u32 %v9342_v21, %v9335_v35  ;;  %v4155_v9 = vsel %vm4148_vm3, %v4151_v32, %v4154_v38  ;;  %v10966_v43 = vand.u32 2147483647, %v9360_v37  ;;  %v1049_v49 = vmul.f32 %v9189_v15, %v1006_v56 }
 0x2fe   : > { %v1443_v45 = vsel %vm1441_vm12, %v1442_v24, %v9336_v6  ;;  %v4156_v41 = vsel %vm4145_vm5, nan, %v4155_v9  ;;  %v1354_v26 = vshrl.u32 %v9279_v61, %v1352_v33  ;;  %v1491_v23 = vand.u32 2139095040, %v9360_v37 }
 0x2ff   : > { %v1444_v29 = vadd.s32 %v1443_v45, %v1439_v5  ;;  %v4577_v44 = vpack.c.bf16 %v4156_v41, %v4052_v11  ;;  %v4557_v62 = vsel %vm9326_vm8, %v8722_v48, %v9259_v20  ;;  %v11169_v7 = vxor.u32 2147483648, %v9246_v53  ;;  %v11170_v20 = vld [vmem:[#allocation16_spill] sm:$0xff]  ;;  %v922_v41 = vpop.permute.xlu1 %921 }
 0x300   : > { %v1256_v30 = vand.u32 2147483647, %v9309_v19  ;;  %v975_v6 = vadd.f32 %v961_v0, %v9275_v50  ;;  %v1353_v61 = vshll.u32 %v9254_v59, %v9315_v12  ;;  %v1359_v4 = vor.u32 4788187, %v1358_v54 }
 0x301   : > { %v1157_v27 = vsel %vm1074_vm15, %v11169_v7, %v9246_v53  ;;  %v1445_v11 = vadd.s32 536870912, %v1444_v29  ;;  %5909 = vmatmul.mubr.msk.bf16.gmra.mrb[44].mxu1 %vm2700_vm6, %v4577_v44  ;;  %v1492_v13 = vshrl.u32 %v1491_v23, 23  ;;  %6514 = vsinq.f32 %v9244_v46 }
 0x302   : > { %v4555_v60 = vsub.s32 4, %v11170_v20  ;;  %v1495_v53 = vand.u32 8388607, %v10966_v43  ;;  %v9391_v10 = vadd.f32 %v1049_v49, %v975_v6  ;;  %5912 = vmatprep.mubr.msk.bf16.mxu1 %vm11000_vm0, %v11051_v36  ;;  %v1258_v12 = vcvt.s32.f32 %v9288_v28 }
 0x303   : > { %v1355_v59 = vor.u32 %v1354_v26, %v1353_v61  ;;  %v9396_v19 = vshrl.u32 %v1445_v11, 30  ;;  %v5537_v50 = vadd.s32 4294967169, %v1492_v13  ;;  %v11172_v33 = vsub.s32 4, %v8682_v16 }
 0x304   : > { %11171 = vst [vmem:[#allocation25_spill] sm:$0xff] %v9391_v10  ;;  %6516 = vcosq.f32 %v4557_v62  ;;  %v9408_v32 = vsel %vm9351_vm9, %v8792_v57, %v1157_v27  ;;  %v1595_v56 = vand.u32 2139095040, %v9391_v10  ;;  %v9411_v28 = vmul.f32 %v1258_v12, %v1256_v30 }
 0x305   : > { %v9403_v46 = vsel %vm4263_vm10, %v11172_v33, %v8682_v16  ;;  %v1360_v24 = vand.u32 2147483647, %v1359_v4  ;;  %v1447_v38 = vshll.u32 %v9396_v19, 30  ;;  %v1498_v0 = vadd.s32 1, %v5537_v50 }
 0x306   : > { %v9417_v54 = vsel %vm4471_vm14, %v4555_v60, %v11170_v20  ;;  %6518 = vsinq.f32 %v4557_v62  ;;  %v1496_v16 = vor.u32 8388608, %v1495_v53  ;;  %v1596_v5 = vshrl.u32 %v1595_v56, 23 }
 0x307   : > { %6520 = vcosq.f32 %v9408_v32  ;;  %v1362_v9 = vcvt.s32.f32 %v1355_v59  ;;  %v9420_v45 = vsub.s32 %v1444_v29, %v1447_v38  ;;  %vm1499_vm10 = vcmp.gt.s32.totalorder %v1498_v0, 0 }
 0x308   : > { %v9425_v26 = vmul.f32 %v9167_v63, %v9290_v52  ;;  %v1500_v44 = vsel %vm1499_vm10, %v1498_v0, 0  ;;  %v5541_v23 = vadd.s32 4294967169, %v1596_v5  ;;  %v9431_v6 = vshll.u32 %v1496_v16, 8 }
 0x309   : > { %v9428_v62 = vmul.f32 %v1362_v9, %v1360_v24  ;;  %v1450_v27 = vsub.s32 0, %v9420_v45  ;;  %v1502_v30 = vand.u32 31, %v1500_v44  ;;  %v874_v29 = vmul.f32 %v9167_v63, %v827_v22 }
 0x30a   : > { %v9435_v61 = vmul.f32 %v9173_v40, %v922_v41  ;;  %v4246_v52 = vsel %vm8988_vm2, 0, %v9225_v51  ;;  %v1501_v13 = vshrl.u32 %v1500_v44, 5  ;;  %v10968_v60 = vand.u32 2147483647, %v9391_v10 }
 0x30b   : > { %v5534_v11 = vmin.u32 %v1450_v27, %v9420_v45  ;;  %v1503_v20 = vsub.s32 32, %v1502_v30  ;;  %v9442_v53 = vpop.eup %6514  ;;  %v1505_v12 = vshll.u32 %v11039_v47, %v1502_v30  ;;  %v1508_v59 = vshll.u32 %v11045_v14, %v1502_v30 }
 0x30c   : > { %v1511_v22 = vshll.u32 %v11046_v39, %v1502_v30  ;;  %v1602_v50 = vadd.s32 1, %v5541_v23  ;;  %v1514_v24 = vshll.u32 %v11047_v3, %v1502_v30  ;;  %v1517_v5 = vshll.u32 %v11048_v25, %v1502_v30 }
 0x30d   : > { %v1452_v33 = vclz %v5534_v11  ;;  %v1506_v56 = vshrl.u32 %v11045_v14, %v1503_v20  ;;  %v1509_v51 = vshrl.u32 %v11046_v39, %v1503_v20  ;;  %v1512_v0 = vshrl.u32 %v11047_v3, %v1503_v20  ;;  %v11174_v11 = vld [vmem:[#allocation15_spill] sm:$0xff] }
 0x30e   : > { %v9450_v38 = vpop.eup %6516  ;;  %v1515_v16 = vshrl.u32 %v11048_v25, %v1503_v20  ;;  %v1518_v9 = vshrl.u32 %v11038_v2, %v1503_v20  ;;  %v9458_v27 = vand.u32 8388607, %v10968_v60  ;;  %vm1178_vm2 = vcmp.lt.s32.totalorder %v11174_v11, 0 }
 0x30f   : > { %v5535_v41 = vadd.s32 4294967294, %v1452_v33  ;;  %v1507_v44 = vor.u32 %v1506_v56, %v1505_v12  ;;  %v1510_v23 = vor.u32 %v1509_v51, %v1508_v59  ;;  %v1513_v43 = vor.u32 %v1512_v0, %v1511_v22 }
 0x310   : > { %v9460_v4 = vpop.eup %6518  ;;  %v1516_v49 = vor.u32 %v1515_v16, %v1514_v24  ;;  %v1519_v7 = vor.u32 %v1518_v9, %v1517_v5  ;;  %vm1520_vm11 = vcmp.lt.s32.totalorder %v1501_v13, 1  ;;  %v1504_v30 = vshrl.u32 %v11039_v47, %v1503_v20 }
 0x311   : > { %v9463_v1 = vpop.eup %6520  ;;  %vm5536_vm14 = vcmp.lt.s32.totalorder %v5535_v41, 0  ;;  %vm1523_vm4 = vcmp.lt.s32.totalorder %v1501_v13, 4  ;;  %v1528_v12 = vsel %vm1520_vm11, %v1507_v44, %v1510_v23  ;;  %vm1603_vm5 = vcmp.gt.s32.totalorder %v1602_v50, 0 }
 0x312   : > { %11175 = vst [vmem:[#allocation23_spill] sm:$0xff] %v9463_v1  ;;  %v9466_v59 = vsel %vm5536_vm14, 0, %v5535_v41  ;;  %v1525_v33 = vsel %vm1523_vm4, %v1513_v43, 2102212464  ;;  %v1529_v56 = vsel %vm1523_vm4, %v1516_v49, 920167782  ;;  %v1532_v60 = vsel %vm1520_vm11, %v1510_v23, %v1513_v43 }
 0x313   : > { %v1460_v51 = vsub.s32 4294967266, %v9466_v59  ;;  %vm1522_vm1 = vcmp.lt.s32.totalorder %v1501_v13, 3  ;;  %v4250_v22 = vadd.s32 3, %v4246_v52  ;;  %vm1521_vm3 = vcmp.lt.s32.totalorder %v1501_v13, 2 }
 0x314   : > { %v1524_v24 = vsel %vm1520_vm11, %v1504_v30, %v1507_v44  ;;  %v1530_v0 = vsel %vm1522_vm1, %v1513_v43, %v1529_v56  ;;  %v1533_v16 = vsel %vm1523_vm4, %v1519_v7, 1326507024  ;;  %v1526_v5 = vsel %vm1522_vm1, %v1510_v23, %v1525_v33 }
 0x315   : > { %v1531_v9 = vsel %vm1521_vm3, %v1528_v12, %v1530_v0  ;;  %v1534_v20 = vsel %vm1522_vm1, %v1516_v49, %v1533_v16  ;;  %v1604_v1 = vsel %vm1603_vm5, %v1602_v50, 0  ;;  %v1456_v41 = vsub.s32 32, %v9466_v59 }
 0x316   : > { %v1535_v57 = vsel %vm1521_vm3, %v1532_v60, %v1534_v20  ;;  %v9473_v10 = vmul.u32.u64.low %v9431_v6, %v1531_v9  ;;  %v9474_v48 = vmul.u32.u64.high %v9431_v6, %v1531_v9, %v9473_v10  ;;  %v1461_v37 = vadd.s32 127, %v1460_v51 }
 0x317   : > { %v9478_v52 = vmul.u32.u64.low %v9431_v6, %v1535_v57  ;;  %v9479_v44 = vmul.u32.u64.high %v9431_v6, %v1535_v57, %v9478_v52  ;;  %v888_v43 = vadd.f32 %v9183_v55, %v874_v29  ;;  %v1440_v49 = vadd.s32 %v9335_v35, %v9342_v21 }
 0x318   : > { %v9486_v7 = vadd.f32 %v9183_v55, %v9425_v26  ;;  %v1527_v60 = vsel %vm1521_vm3, %v1524_v24, %v1526_v5  ;;  %v1606_v50 = vand.u32 31, %v1604_v1  ;;  %v11176_v23 = vxor.u32 2147483648, %v9411_v28 }
 0x319   : > { %v1600_v29 = vor.u32 8388608, %v9458_v27  ;;  %v9499_v21 = vadd.f32 %v9435_v61, %v888_v43  ;;  %v1458_v35 = vshrl.u32 %v1440_v49, %v1456_v41  ;;  %v1546_v26 = vadd.s32 1, %v9474_v48 }
 0x31a   : > { %v9494_v30 = vsel %vm1178_vm2, %v11176_v23, %v9411_v28  ;;  %v1607_v13 = vsub.s32 32, %v1606_v50  ;;  %v9502_v12 = vand.u32 3, %v4250_v22  ;;  %v1462_v33 = vshll.u32 %v1461_v37, 23 }
 0x31b   : > { %v1543_v56 = vmul.u32 %v9431_v6, %v1527_v60  ;;  %vm1545_vm12 = vc.u32 %v9479_v44, %v9473_v10  ;;  %v1609_v28 = vshll.u32 %v11039_v47, %v1606_v50  ;;  %v1612_v61 = vshll.u32 %v11045_v14, %v1606_v50 }
 0x31c   : > { %v1547_v51 = vsel %vm1545_vm12, %v1546_v26, %v9474_v48  ;;  %v1610_v27 = vshrl.u32 %v11045_v14, %v1607_v13  ;;  %v1613_v24 = vshrl.u32 %v11046_v39, %v1607_v13  ;;  %v1605_v16 = vshrl.u32 %v1604_v1, 5 }
 0x31d   : > { %v1548_v0 = vadd.s32 %v1547_v51, %v1543_v56  ;;  %v1615_v22 = vshll.u32 %v11046_v39, %v1606_v50  ;;  %v1616_v37 = vshrl.u32 %v11047_v3, %v1607_v13  ;;  %v1618_v9 = vshll.u32 %v11047_v3, %v1606_v50 }
 0x31e   : > { %v1611_v6 = vor.u32 %v1610_v27, %v1609_v28  ;;  %v1614_v5 = vor.u32 %v1613_v24, %v1612_v61  ;;  %v1619_v20 = vshrl.u32 %v11048_v25, %v1607_v13  ;;  %v1621_v52 = vshll.u32 %v11048_v25, %v1606_v50 }
 0x31f   : > { %v1549_v41 = vadd.s32 536870912, %v1548_v0  ;;  %v1617_v48 = vor.u32 %v1616_v37, %v1615_v22  ;;  %v1622_v43 = vshrl.u32 %v11038_v2, %v1607_v13  ;;  %v1457_v49 = vshll.u32 %v9420_v45, %v9466_v59 }
 0x320   : > { %v1620_v1 = vor.u32 %v1619_v20, %v1618_v9  ;;  %v4254_v60 = vxor.u32 2147483648, %v9270_v31  ;;  %v4257_v23 = vxor.u32 2147483648, %v9263_v42  ;;  %v1640_v28 = vshll.u32 %v1600_v29, 8 }
 0x321   : > { %v9522_v26 = vshrl.u32 %v1549_v41, 30  ;;  %v1623_v56 = vor.u32 %v1622_v43, %v1621_v52  ;;  %vm4253_vm10 = vcmp.eq.s32.totalorder %v9502_v12, 0  ;;  %v1459_v51 = vor.u32 %v1458_v35, %v1457_v49  ;;  %v1010_v49 = vpop.permute.xlu0 %1009 }
 0x322   : > { %v1463_v27 = vor.u32 4788187, %v1462_v33  ;;  %vm1624_vm11 = vcmp.lt.s32.totalorder %v1605_v16, 1  ;;  %vm1627_vm14 = vcmp.lt.s32.totalorder %v1605_v16, 4  ;;  %v4350_v45 = vsel %vm9144_vm13, 0, %v9403_v46 }
 0x323   : > { %v1551_v50 = vshll.u32 %v9522_v26, 30  ;;  %v1629_v61 = vsel %vm1627_vm14, %v1617_v48, 2102212464  ;;  %v1632_v24 = vsel %vm1624_vm11, %v1611_v6, %v1614_v5  ;;  %v1608_v59 = vshrl.u32 %v11039_v47, %v1607_v13 }
 0x324   : > { %vm1626_vm4 = vcmp.lt.s32.totalorder %v1605_v16, 3  ;;  %v1633_v22 = vsel %vm1627_vm14, %v1620_v1, 920167782  ;;  %v1636_v37 = vsel %vm1624_vm11, %v1614_v5, %v1617_v48  ;;  %vm4252_vm5 = vcmp.lt.s32.totalorder %v9502_v12, 2 }
 0x325   : > { %v9531_v29 = vsub.s32 %v1548_v0, %v1551_v50  ;;  %vm1625_vm1 = vcmp.lt.s32.totalorder %v1605_v16, 2  ;;  %v1634_v35 = vsel %vm1626_vm4, %v1617_v48, %v1633_v22  ;;  %v1637_v33 = vsel %vm1627_vm14, %v1623_v56, 1326507024 }
 0x326   : > { %v1628_v9 = vsel %vm1624_vm11, %v1608_v59, %v1611_v6  ;;  %v1630_v20 = vsel %vm1626_vm4, %v1614_v5, %v1629_v61  ;;  %v1635_v41 = vsel %vm1625_vm1, %v1632_v24, %v1634_v35  ;;  %v1638_v52 = vsel %vm1626_vm4, %v1620_v1, %v1637_v33  ;;  %v926_v5 = vpop.permute.xlu1 %925 }
 0x327   : > { %v1554_v58 = vsub.s32 0, %v9531_v29  ;;  %v1639_v46 = vsel %vm1625_vm1, %v1636_v37, %v1638_v52  ;;  %v9536_v13 = vmul.u32.u64.low %v1640_v28, %v1635_v41  ;;  %v9537_v43 = vmul.u32.u64.high %v1640_v28, %v1635_v41, %v9536_v13 }
 0x328   : > { %v1464_v57 = vand.u32 2147483647, %v1463_v27  ;;  %v9540_v0 = vmul.u32.u64.low %v1640_v28, %v1639_v46  ;;  %v9541_v50 = vmul.u32.u64.high %v1640_v28, %v1639_v46, %v9540_v0  ;;  %v4255_v6 = vsel %vm4253_vm10, %v9263_v42, %v4254_v60  ;;  %v11180_v60 = vld [vmem:[#allocation6_spill] sm:$0xff] }
 0x329   : > { %v5538_v48 = vmin.u32 %v1554_v58, %v9531_v29  ;;  %v1631_v1 = vsel %vm1625_vm1, %v1628_v9, %v1630_v20  ;;  %vm4256_vm13 = vcmp.eq.s32.totalorder %v9502_v12, 2  ;;  %v4354_v56 = vadd.s32 3, %v4350_v45  ;;  %v11181_v45 = vld [vmem:[#allocation7_spill] sm:$0xff] }
 0x32a   : > { %v11177_v61 = vand.u32 2147483647, %v11174_v11  ;;  %v1466_v27 = vcvt.s32.f32 %v1459_v51  ;;  %v4258_v59 = vsel %vm4256_vm13, %v4257_v23, %v9270_v31  ;;  %v4358_v22 = vxor.u32 2147483648, %v9294_v18  ;;  %v1014_v46 = vpop.permute.xlu1 %1013  ;;  %v11186_v0 = vld [vmem:[#allocation19_spill] sm:$0xff] }
 0x32b   : > { %v1050_v42 = vmul.f32 %v9189_v15, %v1010_v49  ;;  %vm10985_vm12 = vcmp.lt.s32.totalorder %v11180_v60, 0  ;;  %v1556_v16 = vclz %v5538_v48  ;;  %v1650_v37 = vadd.s32 1, %v9537_v43  ;;  %v11187_v48 = vld [vmem:[#allocation28_spill] sm:$0xff] }
 0x32c   : > { %vm9551_vm3 = vcmp.le.f32.partialorder %v11177_v61, 0.7853982  ;;  %v4355_v35 = vand.u32 3, %v4354_v56  ;;  %v4361_v33 = vxor.u32 2147483648, %v11181_v45  ;;  %v1467_v9 = vmul.f32 %v1466_v27, %v1464_v57 }
 0x32d   : > { %v1647_v20 = vmul.u32 %v1640_v28, %v1631_v1  ;;  %vm1649_vm10 = vc.u32 %v9541_v50, %v9536_v13  ;;  %v9564_v51 = vadd.f32 %v1050_v42, %v9499_v21  ;;  %v5539_v31 = vadd.s32 4294967294, %v1556_v16 }
 0x32e   : > { %v1651_v23 = vsel %vm1649_vm10, %v1650_v37, %v9537_v43  ;;  %v4259_v41 = vsel %vm4252_vm5, %v4255_v6, %v4258_v59  ;;  %vm4357_vm11 = vcmp.eq.s32.totalorder %v4355_v35, 0  ;;  %v11182_v52 = vand.u32 2147483647, %v11180_v60 }
 0x32f   : > { %v11183_v58 = vmov 0  ;;  %v1652_v57 = vadd.s32 %v1651_v23, %v1647_v20  ;;  %v4359_v28 = vsel %vm4357_vm11, %v11181_v45, %v4358_v22  ;;  %vm4360_vm4 = vcmp.eq.s32.totalorder %v4355_v35, 2 }
 0x330   : > { %vm9571_vm14 = vcmp.le.f32.partialorder %v11182_v52, 0.7853982  ;;  %v963_v21 = vmul.f32 %v9173_v40, %v926_v5  ;;  %vm5540_vm1 = vcmp.lt.s32.totalorder %v5539_v31, 0  ;;  %vm4356_vm13 = vcmp.lt.s32.totalorder %v4355_v35, 2 }
 0x331   : > { %v11184_v58 = vsel %vm9571_vm14, 4294967295, %v11183_v58  ;;  %v4362_v43 = vsel %vm4360_vm4, %v4361_v33, %v9294_v18  ;;  %v1699_v12 = vand.u32 2139095040, %v9564_v51  ;;  %v1653_v49 = vadd.s32 536870912, %v1652_v57 }
 0x332   : > { %11185 = vst [vmem:[#allocation31_spill] sm:$0xff] %v11184_v58  ;;  %vm4249_vm5 = vweird.f32 %v11186_v0  ;;  %vm4353_vm10 = vweird.f32 %v11133_v8  ;;  %v4363_v6 = vsel %vm4356_vm13, %v4359_v28, %v4362_v43  ;;  %v877_v1 = vmul.f32 %v9167_v63, %v11187_v48  ;;  %v837_v48 = vpop.permute.xlu1 %836 }
 0x333   : > { %v4260_v56 = vsel %vm4249_vm5, nan, %v4259_v41  ;;  %v4364_v61 = vsel %vm4353_vm10, nan, %v4363_v6  ;;  %v1051_v5 = vmul.f32 %v9189_v15, %v1014_v46  ;;  %v9584_v27 = vsel %vm5540_vm1, 0, %v5539_v31 }
 0x334   : > { %v9586_v59 = vshrl.u32 %v1653_v49, 30  ;;  %v4578_v18 = vpack.c.bf16 %v4364_v61, %v4260_v56  ;;  %v1700_v22 = vshrl.u32 %v1699_v12, 23  ;;  %6522 = vsinq.f32 %v9408_v32 }
 0x335   : > { %v1264_v8 = vsel %vm9551_vm3, %v11174_v11, %v9494_v30  ;;  %v1468_v42 = vxor.u32 2147483648, %v1467_v9  ;;  %v977_v16 = vadd.f32 %v963_v21, %v9486_v7  ;;  %v11188_v37 = vxor.u32 2147483648, %v9428_v62  ;;  %v11190_v7 = vld [vmem:[#allocation20_spill] sm:$0xff] }
 0x336   : > { %v1655_v35 = vshll.u32 %v9586_v59, 30  ;;  %5913 = vmatmul.mubr.msk.bf16.gmra.mrb[48].mxu1 %vm2700_vm6, %v4578_v18  ;;  %v10977_v32 = vand.u32 2147483647, %v9564_v51  ;;  %v5545_v45 = vadd.s32 4294967169, %v1700_v22  ;;  %v11189_v33 = vsub.s32 4, %v9123_v17 }
 0x337   : > { %v1365_v15 = vsel %vm10985_vm12, %v11188_v37, %v9428_v62  ;;  %vm1386_vm11 = vcmp.lt.s32.totalorder %v11190_v7, 0  ;;  %v1564_v20 = vsub.s32 4294967266, %v9584_v27  ;;  %v9611_v31 = vadd.f32 %v1051_v5, %v977_v16  ;;  %5916 = vmatprep.mubr.msk.bf16.mxu1 %vm11000_vm0, %v11051_v36 }
 0x338   : > { %v9607_v30 = vsel %vm1178_vm2, %v11189_v33, %v9123_v17  ;;  %v11191_v62 = vand.u32 2147483647, %v11190_v7  ;;  %v11192_v23 = vmov 0  ;;  %v9622_v41 = vadd.f32 %v9183_v55, %v877_v1 }
 0x339   : > { %v9624_v17 = vsub.s32 %v1652_v57, %v1655_v35  ;;  %v1706_v52 = vadd.s32 1, %v5545_v45  ;;  %6524 = vcosq.f32 %v1264_v8  ;;  %v1368_v28 = vsel %vm9571_vm14, %v11180_v60, %v1365_v15 }
 0x33a   : > { %vm9617_vm4 = vcmp.le.f32.partialorder %v11191_v62, 0.7853982  ;;  %v1469_v21 = vsel %vm1386_vm11, %v1468_v42, %v1467_v9  ;;  %v1470_v46 = vsub.s32 4, %v9396_v19  ;;  %v1560_v43 = vsub.s32 32, %v9584_v27 }
 0x33b   : > { %v11193_v23 = vsel %vm9617_vm4, 4294967295, %v11192_v23  ;;  %v1658_v12 = vsub.s32 0, %v9624_v17  ;;  %v1703_v49 = vand.u32 8388607, %v10977_v32  ;;  %vm1707_vm2 = vcmp.gt.s32.totalorder %v1706_v52, 0 }
 0x33c   : > { %11194 = vst [vmem:[#allocation18_spill] sm:$0xff] %v11193_v23  ;;  %6526 = vsinq.f32 %v1264_v8  ;;  %v1565_v57 = vadd.s32 127, %v1564_v20  ;;  %v1708_v0 = vsel %vm1707_vm2, %v1706_v52, 0  ;;  %v1803_v6 = vand.u32 2139095040, %v9611_v31 }
 0x33d   : > { %6528 = vcosq.f32 %v1368_v28  ;;  %v1544_v9 = vadd.s32 %v9473_v10, %v9479_v44  ;;  %v5542_v1 = vmin.u32 %v1658_v12, %v9624_v17  ;;  %v1710_v56 = vand.u32 31, %v1708_v0 }
 0x33e   : > { %6530 = vsinq.f32 %v1368_v28  ;;  %v9643_v61 = vsel %vm1386_vm11, %v1470_v46, %v9396_v19  ;;  %v9648_v5 = vsel %vm9617_vm4, %v11190_v7, %v1469_v21  ;;  %v1561_v18 = vshll.u32 %v9531_v29, %v9584_v27  ;;  %v9652_v42 = vpop.eup %6522  ;;  %v930_v28 = vpop.permute.xlu1 %929 }
 0x33f   : > { %11195 = vst [vmem:[#allocation10_spill] sm:$0xff] %v9643_v61  ;;  %v1562_v22 = vshrl.u32 %v1544_v9, %v1560_v43  ;;  %v1660_v8 = vclz %v5542_v1  ;;  %v1704_v10 = vor.u32 8388608, %v1703_v49  ;;  %v1711_v44 = vsub.s32 32, %v1710_v56 }
 0x340   : > { %v1566_v16 = vshll.u32 %v1565_v57, 23  ;;  %v1713_v37 = vshll.u32 %v11039_v47, %v1710_v56  ;;  %v1716_v19 = vshll.u32 %v11045_v14, %v1710_v56  ;;  %v1804_v15 = vshrl.u32 %v1803_v6, 23 }
 0x341   : > { %v5543_v35 = vadd.s32 4294967294, %v1660_v8  ;;  %v1714_v45 = vshrl.u32 %v11045_v14, %v1711_v44  ;;  %v1717_v33 = vshrl.u32 %v11046_v39, %v1711_v44  ;;  %v1719_v20 = vshll.u32 %v11046_v39, %v1710_v56 }
 0x342   : > { %v1720_v29 = vshrl.u32 %v11047_v3, %v1711_v44  ;;  %v1722_v27 = vshll.u32 %v11047_v3, %v1710_v56  ;;  %v1723_v62 = vshrl.u32 %v11048_v25, %v1711_v44  ;;  %v1726_v52 = vshrl.u32 %v11038_v2, %v1711_v44  ;;  %v934_v60 = vpop.permute.xlu1 %933 }
 0x343   : > { %vm5544_vm1 = vcmp.lt.s32.totalorder %v5543_v35, 0  ;;  %v1709_v21 = vshrl.u32 %v1708_v0, 5  ;;  %v1725_v46 = vshll.u32 %v11048_v25, %v1710_v56  ;;  %v9665_v12 = vpop.eup %6524  ;;  %v1715_v49 = vor.u32 %v1714_v45, %v1713_v37 }
 0x344   : > { %v1718_v57 = vor.u32 %v1717_v33, %v1716_v19  ;;  %v1721_v6 = vor.u32 %v1720_v29, %v1719_v20  ;;  %v1724_v9 = vor.u32 %v1723_v62, %v1722_v27  ;;  %6532 = vcosq.f32 %v9648_v5  ;;  %v11199_v20 = vld [vmem:[#allocation12_spill] sm:$0xff] }
 0x345   : > { %v9668_v1 = vor.u32 %v1562_v22, %v1561_v18  ;;  %v876_v8 = vmul.f32 %v9167_v63, %v837_v48  ;;  %v964_v32 = vmul.f32 %v9173_v40, %v930_v28  ;;  %v9674_v0 = vor.u32 4788187, %v1566_v16 }
 0x346   : > { %v9672_v7 = vpop.eup %6526  ;;  %v1727_v56 = vor.u32 %v1726_v52, %v1725_v46  ;;  %v1744_v43 = vshll.u32 %v1704_v10, 8  ;;  %v5549_v58 = vadd.s32 4294967169, %v1804_v15  ;;  %v9679_v37 = vsel %vm5544_vm1, 0, %v5543_v35 }
 0x347   : > { %v9676_v23 = vpop.eup %6528  ;;  %vm1728_vm13 = vcmp.lt.s32.totalorder %v1709_v21, 1  ;;  %vm1731_vm5 = vcmp.lt.s32.totalorder %v1709_v21, 4  ;;  %v11197_v18 = vand.u32 2147483647, %v9611_v31  ;;  %vm1730_vm10 = vcmp.lt.s32.totalorder %v1709_v21, 3 }
 0x348   : > { %11196 = vst [vmem:[#allocation30_spill] sm:$0xff] %v9676_v23  ;;  %v9683_v63 = vpop.eup %6530  ;;  %v1733_v40 = vsel %vm1731_vm5, %v1721_v6, 2102212464  ;;  %v1736_v48 = vsel %vm1728_vm13, %v1715_v49, %v1718_v57  ;;  %v1737_v16 = vsel %vm1731_vm5, %v1724_v9, 920167782  ;;  %v1712_v10 = vshrl.u32 %v11039_v47, %v1711_v44 }
 0x349   : > { %v1807_v22 = vand.u32 8388607, %v11197_v18  ;;  %11198 = vst [vmem:[#allocation8_spill] sm:$0xff] %v9683_v63  ;;  %vm1729_vm11 = vcmp.lt.s32.totalorder %v1709_v21, 2  ;;  %v1738_v19 = vsel %vm1730_vm10, %v1721_v6, %v1737_v16  ;;  %v1740_v15 = vsel %vm1728_vm13, %v1718_v57, %v1721_v6 }
 0x34a   : > { %v1739_v35 = vsel %vm1729_vm11, %v1736_v48, %v1738_v19  ;;  %v1741_v45 = vsel %vm1731_vm5, %v1727_v56, 1326507024  ;;  %v1810_v33 = vadd.s32 1, %v5549_v58  ;;  %v4451_v29 = vsub.s32 4, %v11199_v20 }
 0x34b   : > { %v1668_v27 = vsub.s32 4294967266, %v9679_v37  ;;  %v1732_v62 = vsel %vm1728_vm13, %v1712_v10, %v1715_v49  ;;  %v1734_v52 = vsel %vm1730_vm10, %v1718_v57, %v1733_v40  ;;  %v1742_v28 = vsel %vm1730_vm10, %v1724_v9, %v1741_v45 }
 0x34c   : > { %v1743_v46 = vsel %vm1729_vm11, %v1740_v15, %v1742_v28  ;;  %v9693_v18 = vmul.u32.u64.low %v1744_v43, %v1739_v35  ;;  %v9694_v44 = vmul.u32.u64.high %v1744_v43, %v1739_v35, %v9693_v18  ;;  %vm1811_vm2 = vcmp.gt.s32.totalorder %v1810_v33, 0  ;;  %v11201_v35 = vld [vmem:[#allocation24_spill] sm:$0xff] }
 0x34d   : > { %v9697_v6 = vmul.u32.u64.low %v1744_v43, %v1743_v46  ;;  %v9698_v16 = vmul.u32.u64.high %v1744_v43, %v1743_v46, %v9697_v6  ;;  %v1812_v56 = vsel %vm1811_vm2, %v1810_v33, 0  ;;  %v890_v58 = vadd.f32 %v9183_v55, %v876_v8 }
 0x34e   : > { %v1570_v48 = vcvt.s32.f32 %v9668_v1  ;;  %v9704_v49 = vadd.s32 %v9536_v13, %v9541_v50  ;;  %v1735_v57 = vsel %vm1729_vm11, %v1732_v62, %v1734_v52  ;;  %v1814_v9 = vand.u32 31, %v1812_v56  ;;  %v9707_v40 = vpop.eup %6532 }
 0x34f   : > { %11200 = vst [vmem:[#allocation9_spill] sm:$0xff] %v9707_v40  ;;  %v1568_v10 = vand.u32 2147483647, %v9674_v0  ;;  %v1808_v19 = vor.u32 8388608, %v1807_v22  ;;  %v9710_v15 = vadd.f32 %v964_v32, %v890_v58  ;;  %vm11202_vm1 = vcmp.lt.s32.totalorder %v11201_v35, 0 }
 0x350   : > { %v4452_v55 = vsel %vm11202_vm1, %v4451_v29, %v11199_v20  ;;  %v1664_v1 = vsub.s32 32, %v9679_v37  ;;  %v1669_v8 = vadd.s32 127, %v1668_v27  ;;  %v1754_v13 = vadd.s32 1, %v9694_v44 }
 0x351   : > { %v1815_v50 = vsub.s32 32, %v1814_v9  ;;  %v1751_v21 = vmul.u32 %v1744_v43, %v1735_v57  ;;  %vm1753_vm13 = vc.u32 %v9698_v16, %v9693_v18  ;;  %v1813_v45 = vshrl.u32 %v1812_v56, 5 }
 0x352   : > { %v1817_v0 = vshll.u32 %v11039_v47, %v1814_v9  ;;  %v1755_v32 = vsel %vm1753_vm13, %v1754_v13, %v9694_v44  ;;  %v1820_v33 = vshll.u32 %v11045_v14, %v1814_v9  ;;  %v1823_v27 = vshll.u32 %v11046_v39, %v1814_v9 }
 0x353   : > { %v1818_v22 = vshrl.u32 %v11045_v14, %v1815_v50  ;;  %v1821_v20 = vshrl.u32 %v11046_v39, %v1815_v50  ;;  %v1756_v29 = vadd.s32 %v1755_v32, %v1751_v21  ;;  %v1824_v62 = vshrl.u32 %v11047_v3, %v1815_v50 }
 0x354   : > { %v4454_v52 = vsel %vm9204_vm7, 0, %v4452_v55  ;;  %v1826_v6 = vshll.u32 %v11047_v3, %v1814_v9  ;;  %v1827_v44 = vshrl.u32 %v11048_v25, %v1815_v50  ;;  %v1670_v56 = vshll.u32 %v1669_v8, 23 }
 0x355   : > { %v1819_v28 = vor.u32 %v1818_v22, %v1817_v0  ;;  %v1822_v46 = vor.u32 %v1821_v20, %v1820_v33  ;;  %v1757_v58 = vadd.s32 536870912, %v1756_v29  ;;  %v1825_v57 = vor.u32 %v1824_v62, %v1823_v27 }
 0x356   : > { %v1848_v13 = vshll.u32 %v1808_v19, 8  ;;  %v1828_v40 = vor.u32 %v1827_v44, %v1826_v6  ;;  %v1829_v21 = vshll.u32 %v11048_v25, %v1814_v9  ;;  %v1830_v32 = vshrl.u32 %v11038_v2, %v1815_v50 }
 0x357   : > { %v4458_v23 = vadd.s32 3, %v4454_v52  ;;  %v9732_v63 = vshrl.u32 %v1757_v58, 30  ;;  %v1816_v55 = vshrl.u32 %v11039_v47, %v1815_v50  ;;  %vm1832_vm7 = vcmp.lt.s32.totalorder %v1813_v45, 1 }
 0x358   : > { %vm1835_vm5 = vcmp.lt.s32.totalorder %v1813_v45, 4  ;;  %v1831_v0 = vor.u32 %v1830_v32, %v1829_v21  ;;  %vm1834_vm10 = vcmp.lt.s32.totalorder %v1813_v45, 3  ;;  %v1840_v33 = vsel %vm1832_vm7, %v1819_v28, %v1822_v46 }
 0x359   : > { %v1837_v22 = vsel %vm1835_vm5, %v1825_v57, 2102212464  ;;  %v1759_v8 = vshll.u32 %v9732_v63, 30  ;;  %v1836_v20 = vsel %vm1832_vm7, %v1816_v55, %v1819_v28  ;;  %v1841_v27 = vsel %vm1835_vm5, %v1828_v40, 920167782 }
 0x35a   : > { %v1838_v19 = vsel %vm1834_vm10, %v1822_v46, %v1837_v22  ;;  %vm1833_vm11 = vcmp.lt.s32.totalorder %v1813_v45, 2  ;;  %v1842_v9 = vsel %vm1834_vm10, %v1825_v57, %v1841_v27  ;;  %v1844_v62 = vsel %vm1832_vm7, %v1822_v46, %v1825_v57 }
 0x35b   : > { %v1845_v43 = vsel %vm1835_vm5, %v1831_v0, 1326507024  ;;  %v9736_v52 = vmul.f32 %v1570_v48, %v1568_v10  ;;  %v9738_v6 = vsub.s32 %v1756_v29, %v1759_v8  ;;  %v1843_v50 = vsel %vm1833_vm11, %v1840_v33, %v1842_v9  ;;  %v11204_v33 = vld [vmem:[#allocation14_spill] sm:$0xff] }
 0x35c   : > { %v1846_v44 = vsel %vm1834_vm10, %v1828_v40, %v1845_v43  ;;  %v1839_v58 = vsel %vm1833_vm11, %v1836_v20, %v1838_v19  ;;  %v9740_v32 = vmul.u32.u64.low %v1848_v13, %v1843_v50  ;;  %v9741_v61 = vmul.u32.u64.high %v1848_v13, %v1843_v50, %v9740_v32  ;;  %v1018_v20 = vpop.permute.xlu0 %1017  ;;  %v1022_v19 = vpop.permute.xlu1 %1021  ;;  %v11205_v50 = vld [vmem:[#allocation26_spill] sm:$0xff] }
 0x35d   : > { %v1847_v21 = vsel %vm1833_vm11, %v1844_v62, %v1846_v44  ;;  %v1762_v28 = vsub.s32 0, %v9738_v6  ;;  %v4459_v46 = vand.u32 3, %v4458_v23  ;;  %v1665_v48 = vshll.u32 %v9624_v17, %v9679_v37 }
 0x35e   : > { %v9745_v55 = vmul.u32.u64.low %v1848_v13, %v1847_v21  ;;  %v9746_v45 = vmul.u32.u64.high %v1848_v13, %v1847_v21, %v9745_v55  ;;  %v1666_v10 = vshrl.u32 %v9704_v49, %v1664_v1  ;;  %v9751_v29 = vor.u32 4788187, %v1670_v56  ;;  %v9769_v56 = vld [vmem:[%s10871_s2 + $0x2] ss:$0 sm:$0xff] }
 0x35f   : > { %v4558_v40 = vsel %vm9326_vm8, 0, %v9417_v54  ;;  %v5546_v57 = vmin.u32 %v1762_v28, %v9738_v6  ;;  %v1855_v0 = vmul.u32 %v1848_v13, %v1839_v58  ;;  %v4462_v22 = vxor.u32 2147483648, %v9442_v53 }
 0x360   : > { %v4465_v8 = vxor.u32 2147483648, %v11204_v33  ;;  %v1858_v23 = vadd.s32 1, %v9741_v61  ;;  %vm4457_vm2 = vweird.f32 %v11201_v35  ;;  %v4562_v17 = vadd.s32 3, %v4558_v40 }
 0x361   : > { %v4566_v37 = vxor.u32 2147483648, %v9460_v4  ;;  %v4569_v49 = vxor.u32 2147483648, %v9450_v38  ;;  %v1764_v1 = vclz %v5546_v57  ;;  %vm1857_vm8 = vc.u32 %v9746_v45, %v9740_v32 }
 0x362   : > { %vm4460_vm1 = vcmp.lt.s32.totalorder %v4459_v46, 2  ;;  %vm4461_vm13 = vcmp.eq.s32.totalorder %v4459_v46, 0  ;;  %v1859_v34 = vsel %vm1857_vm8, %v1858_v23, %v9741_v61  ;;  %vm4464_vm7 = vcmp.eq.s32.totalorder %v4459_v46, 2 }
 0x363   : > { %v4563_v54 = vand.u32 3, %v4562_v17  ;;  %v1052_v13 = vmul.f32 %v9769_v56, %v1018_v20  ;;  %v5547_v27 = vadd.s32 4294967294, %v1764_v1  ;;  %v1860_v9 = vadd.s32 %v1859_v34, %v1855_v0  ;;  %v847_v20 = vpop.permute.xlu1 %846 }
 0x364   : > { %v4463_v62 = vsel %vm4461_vm13, %v11204_v33, %v4462_v22  ;;  %v4466_v43 = vsel %vm4464_vm7, %v4465_v8, %v9442_v53  ;;  %vm1490_vm5 = vcmp.lt.s32.totalorder %v11205_v50, 0  ;;  %v9784_v53 = vld [vmem:[%s10871_s2 + $0x1] ss:$0 sm:$0xff]  ;;  %v1667_v0 = vor.u32 %v1666_v10, %v1665_v48 }
 0x365   : > { %vm4564_vm10 = vcmp.lt.s32.totalorder %v4563_v54, 2  ;;  %vm4565_vm11 = vcmp.eq.s32.totalorder %v4563_v54, 0  ;;  %vm4568_vm8 = vcmp.eq.s32.totalorder %v4563_v54, 2  ;;  %v9776_v61 = vadd.f32 %v1052_v13, %v9710_v15  ;;  %v11206_v33 = vld [vmem:[#allocation13_spill] sm:$0xff] }
 0x366   : > { %vm5548_vm12 = vcmp.lt.s32.totalorder %v5547_v27, 0  ;;  %v1861_v44 = vadd.s32 536870912, %v1860_v9  ;;  %v4567_v58 = vsel %vm4565_vm11, %v9450_v38, %v4566_v37  ;;  %v4570_v21 = vsel %vm4568_vm8, %v4569_v49, %v9460_v4 }
 0x367   : > { %v1767_v28 = vsel %vm5548_vm12, 0, %v5547_v27  ;;  %v4467_v55 = vsel %vm4460_vm1, %v4463_v62, %v4466_v43  ;;  %v4571_v40 = vsel %vm4564_vm10, %v4567_v58, %v4570_v21  ;;  %v965_v57 = vmul.f32 %v9784_v53, %v934_v60 }
 0x368   : > { %v1772_v15 = vsub.s32 4294967266, %v1767_v28  ;;  %v9787_v22 = vshrl.u32 %v1861_v44, 30  ;;  %vm4561_vm13 = vweird.f32 %v11206_v33  ;;  %v10987_v4 = vand.u32 2147483647, %v9776_v61 }
 0x369   : > { %v4572_v38 = vsel %vm4561_vm13, nan, %v4571_v40  ;;  %v1907_v46 = vand.u32 2139095040, %v9776_v61  ;;  %v1053_v8 = vmul.f32 %v9769_v56, %v1022_v19  ;;  %v11207_v23 = vand.u32 2147483647, %v11205_v50 }
 0x36a   : > { %v11208_v17 = vmov 0  ;;  %v1574_v60 = vsub.s32 4, %v9522_v26  ;;  %v1773_v48 = vadd.s32 127, %v1772_v15  ;;  %v1863_v10 = vshll.u32 %v9787_v22, 30 }
 0x36b   : > { %vm9795_vm12 = vcmp.le.f32.partialorder %v11207_v23, 0.7853982  ;;  %v4468_v37 = vsel %vm4457_vm2, nan, %v4467_v55  ;;  %v1672_v49 = vand.u32 2147483647, %v9751_v29  ;;  %v1908_v34 = vshrl.u32 %v1907_v46, 23 }
 0x36c   : > { %v11209_v17 = vsel %vm9795_vm12, 4294967295, %v11208_v17  ;;  %v4579_v1 = vpack.c.bf16 %v4572_v38, %v4468_v37  ;;  %v979_v54 = vadd.f32 %v965_v57, %v9622_v41  ;;  %v1572_v13 = vxor.u32 2147483648, %v9736_v52 }
 0x36d   : > { %11210 = vst [vmem:[#allocation27_spill] sm:$0xff] %v11209_v17  ;;  %v1674_v19 = vcvt.s32.f32 %v1667_v0  ;;  %v1768_v27 = vsub.s32 32, %v1767_v28  ;;  %v9806_v62 = vsub.s32 %v1860_v9, %v1863_v10  ;;  %v1774_v43 = vshll.u32 %v1773_v48, 23  ;;  %v938_v0 = vpop.permute.xlu1 %937 }
 0x36e   : > { %5917 = vmatmul.mubr.msk.bf16.gmra.mrb[52].mxu1 %vm2700_vm6, %v4579_v1  ;;  %v5553_v44 = vadd.s32 4294967169, %v1908_v34  ;;  %v1911_v35 = vand.u32 8388607, %v10987_v4  ;;  %v9811_v58 = vadd.f32 %v1053_v8, %v979_v54  ;;  %6534 = vsinq.f32 %v9648_v5  ;;  %v9854_v34 = vld [vmem:[%s10872_s3] ss:$0 sm:$0xff] }
 0x36f   : > { %v9817_v41 = vsel %vm1490_vm5, %v1574_v60, %v9522_v26  ;;  %v1752_v29 = vadd.s32 %v9693_v18, %v9698_v16  ;;  %v1866_v9 = vsub.s32 0, %v9806_v62  ;;  %v9822_v21 = vmul.f32 %v1674_v19, %v1672_v49  ;;  %v9833_v18 = vld [vmem:[%s10871_s2] ss:$0 sm:$0xff]  ;;  %v1026_v60 = vpop.permute.xlu0 %1025 }
 0x370   : > { %11211 = vst [vmem:[#allocation16_spill] sm:$0xff] %v9811_v58  ;;  %11212 = vst [vmem:[#allocation5_spill] sm:$0xff] %v9817_v41  ;;  %v1914_v40 = vadd.s32 1, %v5553_v44  ;;  %v2011_v57 = vand.u32 2139095040, %v9811_v58  ;;  %v1573_v5 = vsel %vm1490_vm5, %v1572_v13, %v9736_v52  ;;  %v878_v16 = vmul.f32 %v9833_v18, %v847_v20 }
 0x371   : > { %v1770_v15 = vshrl.u32 %v1752_v29, %v1768_v27  ;;  %v5550_v26 = vmin.u32 %v1866_v9, %v9806_v62  ;;  %v1769_v33 = vshll.u32 %v9738_v6, %v1767_v28  ;;  %v9837_v38 = vor.u32 4788187, %v1774_v43 }
 0x372   : > { %v1912_v46 = vor.u32 8388608, %v1911_v35  ;;  %vm1915_vm2 = vcmp.gt.s32.totalorder %v1914_v40, 0  ;;  %v10986_v52 = vand.u32 2147483647, %v9811_v58  ;;  %v966_v48 = vmul.f32 %v9784_v53, %v938_v0 }
 0x373   : > { %v1868_v8 = vclz %v5550_v26  ;;  %v1916_v23 = vsel %vm1915_vm2, %v1914_v40, 0  ;;  %v9844_v10 = vsel %vm9795_vm12, %v11205_v50, %v1573_v5  ;;  %v2012_v6 = vshrl.u32 %v2011_v57, 23 }
 0x374   : > { %v1918_v37 = vand.u32 31, %v1916_v23  ;;  %v9847_v28 = vor.u32 %v1770_v15, %v1769_v33  ;;  %v1856_v49 = vadd.s32 %v9740_v32, %v9746_v45  ;;  %v892_v54 = vadd.f32 %v9854_v34, %v878_v16 }
 0x375   : > { %v5551_v1 = vadd.s32 4294967294, %v1868_v8  ;;  %v1776_v13 = vand.u32 2147483647, %v9837_v38  ;;  %v9858_v27 = vshll.u32 %v1912_v46, 8  ;;  %v1054_v43 = vmul.f32 %v9769_v56, %v1026_v60  ;;  %v11213_v8 = vld [vmem:[#allocation25_spill] sm:$0xff] }
 0x376   : > { %v1919_v19 = vsub.s32 32, %v1918_v37  ;;  %v1917_v44 = vshrl.u32 %v1916_v23, 5  ;;  %v9863_v32 = vand.u32 8388607, %v10986_v52  ;;  %v980_v45 = vadd.f32 %v966_v48, %v892_v54 }
 0x377   : > { %vm5552_vm1 = vcmp.lt.s32.totalorder %v5551_v1, 0  ;;  %v1921_v29 = vshll.u32 %v11039_v47, %v1918_v37  ;;  %v5557_v40 = vadd.s32 4294967169, %v2012_v6  ;;  %v1924_v5 = vshll.u32 %v11045_v14, %v1918_v37 }
 0x378   : > { %v1871_v35 = vsel %vm5552_vm1, 0, %v5551_v1  ;;  %v1922_v9 = vshrl.u32 %v11045_v14, %v1919_v19  ;;  %v9867_v57 = vpop.eup %6534  ;;  %v1927_v15 = vshll.u32 %v11046_v39, %v1918_v37  ;;  %v1930_v26 = vshll.u32 %v11047_v3, %v1918_v37 }
 0x379   : > { %v1876_v0 = vsub.s32 4294967266, %v1871_v35  ;;  %v1872_v16 = vsub.s32 32, %v1871_v35  ;;  %v1925_v38 = vshrl.u32 %v11046_v39, %v1919_v19  ;;  %v1928_v46 = vshrl.u32 %v11047_v3, %v1919_v19 }
 0x37a   : > { %v1923_v33 = vor.u32 %v1922_v9, %v1921_v29  ;;  %vm1594_vm7 = vcmp.lt.s32.totalorder %v11213_v8, 0  ;;  %v1931_v60 = vshrl.u32 %v11048_v25, %v1919_v19  ;;  %v1933_v48 = vshll.u32 %v11048_v25, %v1918_v37 }
 0x37b   : > { %v1877_v23 = vadd.s32 127, %v1876_v0  ;;  %v1934_v6 = vshrl.u32 %v11038_v2, %v1919_v19  ;;  %v1920_v1 = vshrl.u32 %v11039_v47, %v1919_v19  ;;  %v1926_v54 = vor.u32 %v1925_v38, %v1924_v5 }
 0x37c   : > { %v1929_v52 = vor.u32 %v1928_v46, %v1927_v15  ;;  %v9879_v4 = vadd.f32 %v1054_v43, %v980_v45  ;;  %v1932_v9 = vor.u32 %v1931_v60, %v1930_v26  ;;  %vm1936_vm5 = vcmp.lt.s32.totalorder %v1917_v44, 1 }
 0x37d   : > { %v1878_v29 = vshll.u32 %v1877_v23, 23  ;;  %v1935_v20 = vor.u32 %v1934_v6, %v1933_v48  ;;  %v1873_v55 = vshll.u32 %v9806_v62, %v1871_v35  ;;  %v1874_v50 = vshrl.u32 %v1856_v49, %v1872_v16 }
 0x37e   : > { %11214 = vst [vmem:[#allocation15_spill] sm:$0xff] %v9879_v4  ;;  %vm1939_vm10 = vcmp.lt.s32.totalorder %v1917_v44, 4  ;;  %v1944_v0 = vsel %vm1936_vm5, %v1923_v33, %v1926_v54  ;;  %v11215_v17 = vand.u32 2147483647, %v11213_v8  ;;  %v11216_v37 = vmov 0 }
 0x37f   : > { %vm1937_vm8 = vcmp.lt.s32.totalorder %v1917_v44, 2  ;;  %vm1938_vm13 = vcmp.lt.s32.totalorder %v1917_v44, 3  ;;  %v1941_v19 = vsel %vm1939_vm10, %v1929_v52, 2102212464  ;;  %v1945_v43 = vsel %vm1939_vm10, %v1932_v9, 920167782 }
 0x380   : > { %vm9884_vm11 = vcmp.le.f32.partialorder %v11215_v17, 0.7853982  ;;  %v1940_v45 = vsel %vm1936_vm5, %v1920_v1, %v1923_v33  ;;  %v1946_v5 = vsel %vm1938_vm13, %v1929_v52, %v1945_v43  ;;  %v1948_v15 = vsel %vm1936_vm5, %v1926_v54, %v1929_v52 }
 0x381   : > { %v11217_v37 = vsel %vm9884_vm11, 4294967295, %v11216_v37  ;;  %v1949_v26 = vsel %vm1939_vm10, %v1935_v20, 1326507024  ;;  %v1879_v38 = vor.u32 4788187, %v1878_v29  ;;  %v1942_v46 = vsel %vm1938_vm13, %v1926_v54, %v1941_v19 }
 0x382   : > { %11218 = vst [vmem:[#allocation7_spill] sm:$0xff] %v11217_v37  ;;  %v1947_v62 = vsel %vm1937_vm8, %v1944_v0, %v1946_v5  ;;  %v1950_v49 = vsel %vm1938_vm13, %v1932_v9, %v1949_v26  ;;  %v1778_v35 = vcvt.s32.f32 %v9847_v28  ;;  %v1875_v60 = vor.u32 %v1874_v50, %v1873_v55 }
 0x383   : > { %v1951_v17 = vsel %vm1937_vm8, %v1948_v15, %v1950_v49  ;;  %v9892_v16 = vmul.u32.u64.low %v9858_v27, %v1947_v62  ;;  %v9893_v23 = vmul.u32.u64.high %v9858_v27, %v1947_v62, %v9892_v16  ;;  %v2018_v52 = vadd.s32 1, %v5557_v40  ;;  %v11222_v15 = vld [vmem:[#allocation17_spill] sm:$0xff] }
 0x384   : > { %v9897_v33 = vmul.u32.u64.low %v9858_v27, %v1951_v17  ;;  %v9898_v48 = vmul.u32.u64.high %v9858_v27, %v1951_v17, %v9897_v33  ;;  %v11219_v20 = vsub.s32 4, %v9586_v59  ;;  %v9907_v28 = vmul.f32 %v1778_v35, %v1776_v13 }
 0x385   : > { %v1943_v1 = vsel %vm1937_vm8, %v1940_v45, %v1942_v46  ;;  %v2115_v54 = vand.u32 2139095040, %v9879_v4  ;;  %v11221_v50 = vxor.u32 2147483648, %v9822_v21  ;;  %v1880_v40 = vand.u32 2147483647, %v1879_v38 }
 0x386   : > { %v9905_v6 = vsel %vm1594_vm7, %v11219_v20, %v9586_v59  ;;  %v2016_v29 = vor.u32 8388608, %v9863_v32  ;;  %vm2019_vm2 = vcmp.gt.s32.totalorder %v2018_v52, 0  ;;  %6536 = vcosq.f32 %v9844_v10 }
 0x387   : > { %11220 = vst [vmem:[#allocation19_spill] sm:$0xff] %v9905_v6  ;;  %v1677_v55 = vsel %vm1594_vm7, %v11221_v50, %v9822_v21  ;;  %v1962_v59 = vadd.s32 1, %v9893_v23  ;;  %v2020_v13 = vsel %vm2019_vm2, %v2018_v52, 0  ;;  %v2116_v9 = vshrl.u32 %v2115_v54, 23 }
 0x388   : > { %6538 = vsinq.f32 %v9844_v10  ;;  %v1882_v44 = vcvt.s32.f32 %v1875_v60  ;;  %v1959_v0 = vmul.u32 %v9858_v27, %v1943_v1  ;;  %vm1961_vm1 = vc.u32 %v9898_v48, %v9892_v16 }
 0x389   : > { %v9926_v21 = vsel %vm9884_vm11, %v11213_v8, %v1677_v55  ;;  %v1780_v32 = vxor.u32 2147483648, %v9907_v28  ;;  %v1963_v19 = vsel %vm1961_vm1, %v1962_v59, %v9893_v23  ;;  %v2022_v43 = vand.u32 31, %v2020_v13 }
 0x38a   : > { %v9930_v45 = vmul.f32 %v1882_v44, %v1880_v40  ;;  %v1964_v5 = vadd.s32 %v1963_v19, %v1959_v0  ;;  %v9932_v10 = vshll.u32 %v2016_v29, 8  ;;  %v1158_v27 = vsub.s32 4, %v11222_v15 }
 0x38b   : > { %v2021_v26 = vshrl.u32 %v2020_v13, 5  ;;  %v2023_v38 = vsub.s32 32, %v2022_v43  ;;  %v5561_v62 = vadd.s32 4294967169, %v2116_v9  ;;  %vm1698_vm7 = vcmp.lt.s32.totalorder %v9564_v51, 0 }
 0x38c   : > { %v1965_v49 = vadd.s32 536870912, %v1964_v5  ;;  %v2025_v35 = vshll.u32 %v11039_v47, %v2022_v43  ;;  %v2028_v17 = vshll.u32 %v11045_v14, %v2022_v43  ;;  %v2031_v23 = vshll.u32 %v11046_v39, %v2022_v43 }
 0x38d   : > { %v2026_v60 = vshrl.u32 %v11045_v14, %v2023_v38  ;;  %v2029_v33 = vshrl.u32 %v11046_v39, %v2023_v38  ;;  %v2032_v52 = vshrl.u32 %v11047_v3, %v2023_v38  ;;  %v2034_v20 = vshll.u32 %v11047_v3, %v2022_v43 }
 0x38e   : > { %v9944_v1 = vshrl.u32 %v1965_v49, 30  ;;  %v2035_v54 = vshrl.u32 %v11048_v25, %v2023_v38  ;;  %v2037_v50 = vshll.u32 %v11048_v25, %v2022_v43  ;;  %v2038_v55 = vshrl.u32 %v11038_v2, %v2023_v38 }
 0x38f   : > { %v2027_v40 = vor.u32 %v2026_v60, %v2025_v35  ;;  %v2030_v29 = vor.u32 %v2029_v33, %v2028_v17  ;;  %v2033_v59 = vor.u32 %v2032_v52, %v2031_v23  ;;  %vm2040_vm5 = vcmp.lt.s32.totalorder %v2021_v26, 1 }
 0x390   : > { %v11223_v13 = vand.u32 2147483647, %v9564_v51  ;;  %v11224_v9 = vmov 0  ;;  %v1967_v44 = vshll.u32 %v9944_v1, 30  ;;  %v2036_v0 = vor.u32 %v2035_v54, %v2034_v20  ;;  %v9956_v49 = vpop.eup %6536 }
 0x391   : > { %v2039_v19 = vor.u32 %v2038_v55, %v2037_v50  ;;  %vm2043_vm8 = vcmp.lt.s32.totalorder %v2021_v26, 4  ;;  %11227 = vst [vmem:[#allocation12_spill] sm:$0xff] %v9956_v49  ;;  %v2024_v43 = vshrl.u32 %v11039_v47, %v2023_v38  ;;  %vm2041_vm13 = vcmp.lt.s32.totalorder %v2021_v26, 2 }
 0x392   : > { %vm9951_vm10 = vcmp.le.f32.partialorder %v11223_v13, 0.7853982  ;;  %v2045_v35 = vsel %vm2043_vm8, %v2033_v59, 2102212464  ;;  %v2048_v17 = vsel %vm2040_vm5, %v2027_v40, %v2030_v29  ;;  %v9960_v23 = vpop.eup %6538  ;;  %vm10997_vm2 = vcmp.lt.s32.totalorder %v9611_v31, 0 }
 0x393   : > { %v11225_v9 = vsel %vm9951_vm10, 4294967295, %v11224_v9  ;;  %11228 = vst [vmem:[#allocation24_spill] sm:$0xff] %v9960_v23  ;;  %v9963_v60 = vsub.s32 %v1964_v5, %v1967_v44  ;;  %vm2042_vm1 = vcmp.lt.s32.totalorder %v2021_v26, 3  ;;  %v2049_v33 = vsel %vm2043_vm8, %v2036_v0, 920167782 }
 0x394   : > { %11226 = vst [vmem:[#allocation28_spill] sm:$0xff] %v11225_v9  ;;  %v2052_v52 = vsel %vm2040_vm5, %v2030_v29, %v2033_v59  ;;  %v2044_v20 = vsel %vm2040_vm5, %v2024_v43, %v2027_v40  ;;  %v2046_v54 = vsel %vm2042_vm1, %v2030_v29, %v2045_v35  ;;  %v2050_v50 = vsel %vm2042_vm1, %v2033_v59, %v2049_v33 }
 0x395   : > { %v2053_v55 = vsel %vm2043_vm8, %v2039_v19, 1326507024  ;;  %v1970_v38 = vsub.s32 0, %v9963_v60  ;;  %v2051_v13 = vsel %vm2041_vm13, %v2048_v17, %v2050_v50  ;;  %v11229_v8 = vand.u32 2147483647, %v9879_v4 }
 0x396   : > { %v2054_v46 = vsel %vm2042_vm1, %v2036_v0, %v2053_v55  ;;  %v1781_v5 = vsel %vm1698_vm7, %v1780_v32, %v9907_v28  ;;  %v9976_v23 = vmul.u32.u64.low %v9932_v10, %v2051_v13  ;;  %v9977_v40 = vmul.u32.u64.high %v9932_v10, %v2051_v13, %v9976_v23  ;;  %v11230_v32 = vld [vmem:[#allocation11_spill] sm:$0xff] }
 0x397   : > { %v2119_v49 = vand.u32 8388607, %v11229_v8  ;;  %v2055_v44 = vsel %vm2041_vm13, %v2052_v52, %v2054_v46  ;;  %v5554_v29 = vmin.u32 %v1970_v38, %v9963_v60  ;;  %v2122_v0 = vadd.s32 1, %v5561_v62 }
 0x398   : > { %v9982_v59 = vmul.u32.u64.low %v9932_v10, %v2055_v44  ;;  %v9983_v19 = vmul.u32.u64.high %v9932_v10, %v2055_v44, %v9982_v59  ;;  %6540 = vcosq.f32 %v9926_v21  ;;  %v1884_v8 = vxor.u32 2147483648, %v9930_v45 }
 0x399   : > { %v2047_v28 = vsel %vm2041_vm13, %v2044_v20, %v2046_v54  ;;  %v1159_v46 = vsel %vm1074_vm15, %v1158_v27, %v11222_v15  ;;  %6542 = vsinq.f32 %v9926_v21  ;;  %v1972_v43 = vclz %v5554_v29 }
 0x39a   : > { %v2120_v35 = vor.u32 8388608, %v2119_v49  ;;  %vm2123_vm5 = vcmp.gt.s32.totalorder %v2122_v0, 0  ;;  %v9996_v62 = vsel %vm9951_vm10, %v9564_v51, %v1781_v5  ;;  %v2066_v33 = vadd.s32 1, %v9977_v40 }
 0x39b   : > { %v2124_v26 = vsel %vm2123_vm5, %v2122_v0, 0  ;;  %v5555_v52 = vadd.s32 4294967294, %v1972_v43  ;;  %v2063_v20 = vmul.u32 %v9932_v10, %v2047_v28  ;;  %vm2065_vm15 = vc.u32 %v9983_v19, %v9976_v23 }
 0x39c   : > { %v1161_v15 = vsel %vm9351_vm9, 0, %v1159_v46  ;;  %v10007_v27 = vsel %vm10997_vm2, %v1884_v8, %v9930_v45  ;;  %v2067_v49 = vsel %vm2065_vm15, %v2066_v33, %v9977_v40  ;;  %v2126_v54 = vand.u32 31, %v2124_v26 }
 0x39d   : > { %v1265_v50 = vsel %vm9551_vm3, 0, %v9607_v30  ;;  %v1960_v10 = vadd.s32 %v9892_v16, %v9898_v48  ;;  %vm5556_vm8 = vcmp.lt.s32.totalorder %v5555_v52, 0  ;;  %v2068_v55 = vadd.s32 %v2067_v49, %v2063_v20 }
 0x39e   : > { %v10015_v38 = vshll.u32 %v2120_v35, 8  ;;  %v1975_v13 = vsel %vm5556_vm8, 0, %v5555_v52  ;;  %v2127_v5 = vsub.s32 32, %v2126_v54  ;;  %v1165_v44 = vadd.s32 3, %v1161_v15 }
 0x39f   : > { %v1976_v29 = vsub.s32 32, %v1975_v13  ;;  %v1980_v59 = vsub.s32 4294967266, %v1975_v13  ;;  %v2069_v40 = vadd.s32 536870912, %v2068_v55  ;;  %v1269_v0 = vadd.s32 3, %v1265_v50 }
 0x3a0   : > { %v2125_v8 = vshrl.u32 %v2124_v26, 5  ;;  %v2129_v24 = vshll.u32 %v11039_v47, %v2126_v54  ;;  %v2130_v30 = vshrl.u32 %v11045_v14, %v2127_v5  ;;  %v2133_v16 = vshrl.u32 %v11046_v39, %v2127_v5 }
 0x3a1   : > { %v1981_v48 = vadd.s32 127, %v1980_v59  ;;  %v10021_v28 = vshrl.u32 %v2069_v40, 30  ;;  %v2132_v46 = vshll.u32 %v11045_v14, %v2126_v54  ;;  %v2136_v43 = vshrl.u32 %v11047_v3, %v2127_v5 }
 0x3a2   : > { %v10025_v35 = vpop.eup %6540  ;;  %v1978_v33 = vshrl.u32 %v1960_v10, %v1976_v29  ;;  %v2135_v52 = vshll.u32 %v11046_v39, %v2126_v54  ;;  %v2138_v26 = vshll.u32 %v11047_v3, %v2126_v54  ;;  %v2139_v20 = vshrl.u32 %v11048_v25, %v2127_v5 }
 0x3a3   : > { %11232 = vst [vmem:[#allocation22_spill] sm:$0xff] %v10025_v35  ;;  %v10030_v21 = vpop.eup %6542  ;;  %v1982_v15 = vshll.u32 %v1981_v48, 23  ;;  %v2071_v49 = vshll.u32 %v10021_v28, 30  ;;  %v2131_v50 = vor.u32 %v2130_v30, %v2129_v24  ;;  %v2134_v59 = vor.u32 %v2133_v16, %v2132_v46 }
 0x3a4   : > { %11233 = vst [vmem:[#allocation14_spill] sm:$0xff] %v10030_v21  ;;  %v2137_v40 = vor.u32 %v2136_v43, %v2135_v52  ;;  %v2140_v17 = vor.u32 %v2139_v20, %v2138_v26  ;;  %v2141_v45 = vshll.u32 %v11048_v25, %v2126_v54  ;;  %v2142_v9 = vshrl.u32 %v11038_v2, %v2127_v5 }
 0x3a5   : > { %v1977_v10 = vshll.u32 %v9963_v60, %v1975_v13  ;;  %v10036_v29 = vsub.s32 %v2068_v55, %v2071_v49  ;;  %vm2144_vm9 = vcmp.lt.s32.totalorder %v2125_v8, 1  ;;  %v1166_v35 = vand.u32 3, %v1165_v44  ;;  %v942_v55 = vpop.permute.xlu1 %941 }
 0x3a6   : > { %v1983_v37 = vor.u32 4788187, %v1982_v15  ;;  %v2128_v21 = vshrl.u32 %v11039_v47, %v2127_v5  ;;  %v2143_v48 = vor.u32 %v2142_v9, %v2141_v45  ;;  %vm2147_vm3 = vcmp.lt.s32.totalorder %v2125_v8, 4  ;;  %v11234_v15 = vld [vmem:[#allocation23_spill] sm:$0xff] }
 0x3a7   : > { %v1979_v6 = vor.u32 %v1978_v33, %v1977_v10  ;;  %v2074_v24 = vsub.s32 0, %v10036_v29  ;;  %v2149_v30 = vsel %vm2147_vm3, %v2137_v40, 2102212464  ;;  %v2152_v16 = vsel %vm2144_vm9, %v2131_v50, %v2134_v59 }
 0x3a8   : > { %vm2146_vm13 = vcmp.lt.s32.totalorder %v2125_v8, 3  ;;  %v2153_v54 = vsel %vm2147_vm3, %v2140_v17, 920167782  ;;  %v2156_v46 = vsel %vm2144_vm9, %v2134_v59, %v2137_v40  ;;  %v2157_v60 = vsel %vm2147_vm3, %v2143_v48, 1326507024 }
 0x3a9   : > { %v5558_v13 = vmin.u32 %v2074_v24, %v10036_v29  ;;  %vm2145_vm1 = vcmp.lt.s32.totalorder %v2125_v8, 2  ;;  %v2148_v44 = vsel %vm2144_vm9, %v2128_v21, %v2131_v50  ;;  %v2154_v5 = vsel %vm2146_vm13, %v2137_v40, %v2153_v54  ;;  %v10054_v8 = vpop.f32.mrb[0].mxu1  ;;  %v1030_v40 = vpop.permute.xlu1 %1029 }
 0x3aa   : > { %v1984_v9 = vand.u32 2147483647, %v1983_v37  ;;  %v2150_v45 = vsel %vm2146_vm13, %v2134_v59, %v2149_v30  ;;  %v2155_v43 = vsel %vm2145_vm1, %v2152_v16, %v2154_v5  ;;  %v2158_v33 = vsel %vm2146_vm13, %v2140_v17, %v2157_v60  ;;  %11235 = vst [vmem:[#allocation13_spill] sm:$0xff] %v10054_v8  ;;  %v5794_v17 = vpop.f32.mrb[1].mxu1  ;;  %v852_v5 = vpop.permute.xlu0 %851 }
 0x3ab   : > { %v1986_v52 = vcvt.s32.f32 %v1979_v6  ;;  %v2076_v26 = vclz %v5558_v13  ;;  %v2159_v20 = vsel %vm2145_vm1, %v2156_v46, %v2158_v33  ;;  %v1172_v49 = vxor.u32 2147483648, %v11234_v15  ;;  %v10062_v30 = vpop.f32.mrb[2].mxu1 }
 0x3ac   : > { %v10046_v10 = vmul.u32.u64.low %v10015_v38, %v2159_v20  ;;  %v10047_v41 = vmul.u32.u64.high %v10015_v38, %v2159_v20, %v10046_v10  ;;  %v10050_v48 = vmul.u32.u64.low %v10015_v38, %v2155_v43  ;;  %v10051_v24 = vmul.u32.u64.high %v10015_v38, %v2155_v43, %v10050_v48  ;;  %11236 = vst [vmem:[#allocation17_spill] sm:$0xff] %v10062_v30 }
 0x3ad   : > { %v5559_v37 = vadd.s32 4294967294, %v2076_v26  ;;  %v2151_v21 = vsel %vm2145_vm1, %v2148_v44, %v2150_v45  ;;  %vm1164_vm5 = vweird.f32 %v11230_v32  ;;  %vm1268_vm15 = vweird.f32 %v11174_v11 }
 0x3ae   : > { %v1270_v6 = vand.u32 3, %v1269_v0  ;;  %v10058_v50 = vmul.f32 %v1986_v52, %v1984_v9  ;;  %v2064_v59 = vadd.s32 %v9976_v23, %v9983_v19  ;;  %vm1168_vm8 = vcmp.eq.s32.totalorder %v1166_v35, 0  ;;  %v5795_v19 = vpop.f32.mrb[3].mxu1 }
 0x3af   : > { %vm1171_vm9 = vcmp.eq.s32.totalorder %v1166_v35, 2  ;;  %v11237_v16 = vand.u32 2147483647, %v9611_v31  ;;  %vm5560_vm13 = vcmp.lt.s32.totalorder %v5559_v37, 0  ;;  %v11240_v0 = vxor.u32 2147483648, %v9652_v42  ;;  %v10078_v9 = vpop.f32.mrb[4].mxu1 }
 0x3b0   : > { %v1173_v60 = vsel %vm1171_vm9, %v1172_v49, %v9652_v42  ;;  %v1273_v23 = vxor.u32 2147483648, %v9672_v7  ;;  %v2079_v13 = vsel %vm5560_vm13, 0, %v5559_v37  ;;  %v2167_v44 = vmul.u32 %v10015_v38, %v2151_v21  ;;  %11241 = vst [vmem:[#allocation11_spill] sm:$0xff] %v10078_v9  ;;  %v5798_v52 = vpop.f32.mrb[5].mxu1 }
 0x3b1   : > { %vm10066_vm3 = vcmp.le.f32.partialorder %v11237_v16, 0.7853982  ;;  %v1170_v46 = vsel %vm1168_vm8, %v11234_v15, %v11240_v0  ;;  %vm2169_vm1 = vc.u32 %v10047_v41, %v10050_v48  ;;  %vm1167_vm2 = vcmp.lt.s32.totalorder %v1166_v35, 2  ;;  %v10083_v38 = vpop.f32.mrb[6].mxu1  ;;  %v857_v0 = vpop.permute.xlu1 %856 }
 0x3b2   : > { %v2080_v45 = vsub.s32 32, %v2079_v13  ;;  %v2084_v43 = vsub.s32 4294967266, %v2079_v13  ;;  %v2170_v33 = vadd.s32 1, %v10051_v24  ;;  %vm1272_vm8 = vcmp.eq.s32.totalorder %v1270_v6, 0  ;;  %11242 = vst [vmem:[#allocation21_spill] sm:$0xff] %v10083_v38  ;;  %v5799_v10 = vpop.f32.mrb[7].mxu1 }
 0x3b3   : > { %v1174_v42 = vsel %vm1167_vm2, %v1170_v46, %v1173_v60  ;;  %vm1271_vm9 = vcmp.lt.s32.totalorder %v1270_v6, 2  ;;  %v1274_v26 = vsel %vm1272_vm8, %v9665_v12, %v1273_v23  ;;  %v1276_v20 = vxor.u32 2147483648, %v9665_v12  ;;  %v10089_v46 = vpop.f32.mrb[8].mxu1 }
 0x3b4   : > { %v2085_v15 = vadd.s32 127, %v2084_v43  ;;  %v2171_v35 = vsel %vm2169_vm1, %v2170_v33, %v10051_v24  ;;  %vm1275_vm13 = vcmp.eq.s32.totalorder %v1270_v6, 2  ;;  %v879_v49 = vmul.f32 %v9833_v18, %v852_v5  ;;  %11243 = vst [vmem:[#allocation23_spill] sm:$0xff] %v10089_v46  ;;  %v5802_v19 = vpop.f32.mrb[9].mxu1  ;;  %v11264_v46 = vld [vmem:[#allocation20_spill] sm:$0xff] }
 0x3b5   : > { %v2082_v37 = vshrl.u32 %v2064_v59, %v2080_v45  ;;  %v2172_v21 = vadd.s32 %v2171_v35, %v2167_v44  ;;  %v1277_v17 = vsel %vm1275_vm13, %v1276_v20, %v9672_v7  ;;  %v967_v16 = vmul.f32 %v9784_v53, %v942_v55  ;;  %v10099_v55 = vpop.f32.mrb[10].mxu1  ;;  %v946_v10 = vpop.permute.xlu1 %945  ;;  %v11250_v19 = vld [vmem:[#allocation6_spill] sm:$0xff] }
 0x3b6   : > { %v2086_v60 = vshll.u32 %v2085_v15, 23  ;;  %v1278_v12 = vsel %vm1271_vm9, %v1274_v26, %v1277_v17  ;;  %v893_v23 = vadd.f32 %v9854_v34, %v879_v49  ;;  %v1055_v24 = vmul.f32 %v9769_v56, %v1030_v40  ;;  %11244 = vst [vmem:[#allocation32_spill] sm:$0xff] %v10099_v55  ;;  %v11248_v26 = vld [vmem:[#allocation29_spill] sm:$0xff] }
 0x3b7   : > { %v2081_v5 = vshll.u32 %v10036_v29, %v2079_v13  ;;  %v2173_v43 = vadd.s32 536870912, %v2172_v21  ;;  %v1175_v59 = vsel %vm1164_vm5, nan, %v1174_v42  ;;  %v1279_v7 = vsel %vm1268_vm15, nan, %v1278_v12  ;;  %v5803_v29 = vpop.f32.mrb[11].mxu1 }
 0x3b8   : > { %v11245_v6 = vsub.s32 4, %v9732_v63  ;;  %v2087_v40 = vor.u32 4788187, %v2086_v60  ;;  %v2528_v45 = vpack.c.bf16 %v1279_v7, %v1175_v59  ;;  %v981_v33 = vadd.f32 %v967_v16, %v893_v23  ;;  %v10117_v52 = vpop.f32.mrb[12].mxu1 }
 0x3b9   : > { %v10112_v32 = vsel %vm10066_vm3, %v9611_v31, %v10007_v27  ;;  %vm10999_vm2 = vcmp.lt.s32.totalorder %v9776_v61, 0  ;;  %v2083_v11 = vor.u32 %v2082_v37, %v2081_v5  ;;  %v10115_v13 = vshrl.u32 %v2173_v43, 30  ;;  %11247 = vst [vmem:[#allocation34_spill] sm:$0xff] %v10117_v52  ;;  %v5806_v15 = vpop.f32.mrb[13].mxu1  ;;  %v11252_v43 = vld [vmem:[#allocation10_spill] sm:$0xff] }
 0x3ba   : > { %v10106_v44 = vsel %vm1698_vm7, %v11245_v6, %v9732_v63  ;;  %6544 = vcosq.f32 %v9996_v62  ;;  %v1988_v63 = vxor.u32 2147483648, %v10058_v50  ;;  %5825 = vmatmul.mubr.msk.bf16.vlgmr.msra.gmra.mrb[0].mxu0 %vm2700_vm6, %v2528_v45  ;;  %v10122_v42 = vadd.f32 %v1055_v24, %v981_v33  ;;  %v10130_v37 = vpop.f32.mrb[14].mxu1  ;;  %v862_v24 = vpop.permute.xlu0 %861 }
 0x3bb   : > { %11246 = vst [vmem:[#allocation33_spill] sm:$0xff] %v10115_v13  ;;  %v1366_v20 = vsub.s32 4, %v11248_v26  ;;  %6546 = vsinq.f32 %v9996_v62  ;;  %v2088_v35 = vand.u32 2147483647, %v2087_v40  ;;  %v2175_v49 = vshll.u32 %v10115_v13, 30  ;;  %5828 = vmatprep.mubr.msk.bf16.mxu0 %vm11000_vm0, %v11051_v36  ;;  %11249 = vst [vmem:[#allocation29_spill] sm:$0xff] %v10130_v37 }
 0x3bc   : > { %6548 = vcosq.f32 %v10112_v32  ;;  %v10998_v17 = vand.u32 2147483647, %v10122_v42  ;;  %v2219_v16 = vand.u32 2139095040, %v10122_v42  ;;  %v880_v60 = vmul.f32 %v9833_v18, %v857_v0  ;;  %v5807_v62 = vpop.f32.mrb[15].mxu1 }
 0x3bd   : > { %v2090_v12 = vcvt.s32.f32 %v2083_v11  ;;  %v10136_v23 = vsub.s32 %v2172_v21, %v2175_v49  ;;  %vm11251_vm7 = vcmp.lt.s32.totalorder %v11250_v19, 0  ;;  %v1473_v7 = vsel %vm9617_vm4, 0, %v11252_v43  ;;  %v10144_v6 = vpop.f32.mrb[16].mxu1  ;;  %v11258_v43 = vld [vmem:[#allocation30_spill] sm:$0xff] }
 0x3be   : > { %v1367_v5 = vsel %vm11251_vm7, %v1366_v20, %v11248_v26  ;;  %11254 = vst [vmem:[#allocation6_spill] sm:$0xff] %v10144_v6  ;;  %v10149_v40 = vsel %vm10999_vm2, %v1988_v63, %v10058_v50  ;;  %v2220_v0 = vshrl.u32 %v2219_v16, 23  ;;  %v2223_v21 = vand.u32 8388607, %v10998_v17  ;;  %v5810_v15 = vpop.f32.mrb[17].mxu1  ;;  %v6462_v50 = vld [vmem:[%s10875_s6] sm:$0xff]  }
 0x3bf   : > { %v968_v45 = vmul.f32 %v9784_v53, %v946_v10  ;;  %v10154_v33 = vmul.f32 %v2090_v12, %v2088_v35  ;;  %v2178_v29 = vsub.s32 0, %v10136_v23  ;;  %v1369_v26 = vsel %vm9571_vm14, 0, %v1367_v5  ;;  %v10169_v10 = vpop.f32.mrb[18].mxu1  ;;  %v11257_v12 = vld [vmem:[#allocation8_spill] sm:$0xff]  ;;  %5921 = vmatpush3.bf16.msra.mxu0 %v6462_v50 }
 0x3c0   : > { %v1477_v20 = vadd.s32 3, %v1473_v7  ;;  %v10164_v63 = vadd.s32 %v10050_v48, %v10047_v41  ;;  %v5565_v49 = vadd.s32 4294967169, %v2220_v0  ;;  %v10167_v53 = vmul.f32 %v9833_v18, %v862_v24  ;;  %11256 = vst [vmem:[#allocation10_spill] sm:$0xff] %v10169_v10  ;;  %v5811_v7 = vpop.f32.mrb[19].mxu1  ;;  %v6463_v41 = vld [vmem:[%s10875_s6 + $0x8] sm:$0xff]   ;;  %5922 = vmatprep.subr.bf16.mxu0 %v11051_v36 }
 0x3c1   : > { %v1373_v35 = vadd.s32 3, %v1369_v26  ;;  %v5562_v16 = vmin.u32 %v2178_v29, %v10136_v23  ;;  %v894_v62 = vadd.f32 %v9854_v34, %v880_v60  ;;  %v1377_v5 = vxor.u32 2147483648, %v11257_v12  ;;  %v10180_v11 = vpop.f32.mrb[20].mxu1 }
 0x3c2   : > { %v1380_v59 = vxor.u32 2147483648, %v11258_v43  ;;  %v2224_v48 = vor.u32 8388608, %v2223_v21  ;;  %v2226_v18 = vadd.s32 1, %v5565_v49  ;;  %v10178_v0 = vand.u32 3, %v1477_v20  ;;  %11259 = vst [vmem:[#allocation18_spill] sm:$0xff] %v10180_v11  ;;  %v5814_v50 = vpop.f32.mrb[21].mxu1 }
 0x3c3   : > { %v1374_v24 = vand.u32 3, %v1373_v35  ;;  %v2180_v29 = vclz %v5562_v16  ;;  %v10184_v26 = vadd.f32 %v968_v45, %v894_v62  ;;  %v1481_v15 = vxor.u32 2147483648, %v9867_v57  ;;  %v11260_v21 = vld [vmem:[#allocation9_spill] sm:$0xff]  ;;  %v10190_v49 = vpop.f32.mrb[22].mxu1  ;;  %v1034_v62 = vpop.permute.xlu0 %1033  ;;  %5923 = vmatpush3.bf16.msra.mxu0 %v6463_v41 }
 0x3c4   : > { %v10187_v7 = vpop.eup %6544  ;;  %vm2227_vm14 = vcmp.gt.s32.totalorder %v2226_v18, 0  ;;  %11261 = vst [vmem:[#allocation31_spill] sm:$0xff] %v10190_v49  ;;  %v5815_v60 = vpop.f32.mrb[23].mxu1  ;;  %v10198_v10 = vshll.u32 %v2224_v48, 8  ;;  %vm1480_vm1 = vcmp.eq.s32.totalorder %v10178_v0, 0  ;;  %5952 = vmatprep.subr.bf16.mxu0 %v11051_v36  ;;  %vm1483_vm9 = vcmp.eq.s32.totalorder %v10178_v0, 2 }
 0x3c5   : > { %vm1376_vm4 = vcmp.eq.s32.totalorder %v1374_v24, 0  ;;  %vm1379_vm5 = vcmp.eq.s32.totalorder %v1374_v24, 2  ;;  %v10192_v35 = vpop.eup %6546  ;;  %v5563_v17 = vadd.s32 4294967294, %v2180_v29  ;;  %v2228_v27 = vsel %vm2227_vm14, %v2226_v18, 0  ;;  %v10201_v20 = vpop.f32.mrb[24].mxu1 }
 0x3c6   : > { %v1378_v16 = vsel %vm1376_vm4, %v11258_v43, %v1377_v5  ;;  %v1381_v45 = vsel %vm1379_vm5, %v1380_v59, %v11257_v12  ;;  %v10196_v50 = vpop.eup %6548  ;;  %v2230_v11 = vand.u32 31, %v2228_v27  ;;  %vm1375_vm15 = vcmp.lt.s32.totalorder %v1374_v24, 2  ;;  %11262 = vst [vmem:[#allocation8_spill] sm:$0xff] %v10201_v20  ;;  %v5818_v43 = vpop.f32.mrb[25].mxu1 }
 0x3c7   : > { %vm5564_vm8 = vcmp.lt.s32.totalorder %v5563_v17, 0  ;;  %v10204_v18 = vshrl.u32 %v2228_v27, 5  ;;  %v10206_v5 = vsel %vm1375_vm15, %v1378_v16, %v1381_v45  ;;  %v10209_v12 = vsel %vm1480_vm1, %v11260_v21, %v1481_v15  ;;  %v10215_v60 = vpop.f32.mrb[26].mxu1 }
 0x3c8   : > { %v2183_v59 = vsel %vm5564_vm8, 0, %v5563_v17  ;;  %v2231_v41 = vsub.s32 32, %v2230_v11  ;;  %v2233_v48 = vshll.u32 %v11039_v47, %v2230_v11  ;;  %v10213_v24 = vmul.f32 %v9769_v56, %v1034_v62  ;;  %11263 = vst [vmem:[#allocation30_spill] sm:$0xff] %v10215_v60  ;;  %v5819_v15 = vpop.f32.mrb[27].mxu1 }
 0x3c9   : > { %v2184_v29 = vsub.s32 32, %v2183_v59  ;;  %v2185_v20 = vshll.u32 %v10136_v23, %v2183_v59  ;;  %v2188_v27 = vsub.s32 4294967266, %v2183_v59  ;;  %v2236_v16 = vshll.u32 %v11045_v14, %v2230_v11  ;;  %v10224_v62 = vpop.f32.mrb[28].mxu1 }
 0x3ca   : > { %v2234_v45 = vshrl.u32 %v11045_v14, %v2231_v41  ;;  %v2237_v17 = vshrl.u32 %v11046_v39, %v2231_v41  ;;  %v2239_v43 = vshll.u32 %v11046_v39, %v2230_v11  ;;  %v2240_v56 = vshrl.u32 %v11047_v3, %v2231_v41  ;;  %v5894_v15 = vpop.f32.mrb[29].mxu1 }
 0x3cb   : > { %v2186_v60 = vshrl.u32 %v10164_v63, %v2184_v29  ;;  %v2189_v49 = vadd.s32 127, %v2188_v27  ;;  %v2242_v23 = vshll.u32 %v11047_v3, %v2230_v11  ;;  %v2243_v59 = vshrl.u32 %v11048_v25, %v2231_v41  ;;  %v10233_v38 = vpop.f32.mrb[30].mxu1 }
 0x3cc   : > { %vm1372_vm13 = vweird.f32 %v11250_v19  ;;  %vm1479_vm7 = vcmp.lt.s32.totalorder %v10178_v0, 2  ;;  %v2235_v6 = vor.u32 %v2234_v45, %v2233_v48  ;;  %v2238_v37 = vor.u32 %v2237_v17, %v2236_v16  ;;  %v5895_v48 = vpop.f32.mrb[31].mxu1 }
 0x3cd   : > { %v2241_v52 = vor.u32 %v2240_v56, %v2239_v43  ;;  %v2245_v55 = vshll.u32 %v11048_v25, %v2230_v11  ;;  %vm1476_vm14 = vweird.f32 %v11264_v46  ;;  %v11265_v63 = vand.u32 2147483647, %v9776_v61  ;;  %v10247_v16 = vpop.f32.mrb[32].mxu1 }
 0x3ce   : > { %v2187_v27 = vor.u32 %v2186_v60, %v2185_v20  ;;  %v2190_v9 = vshll.u32 %v2189_v49, 23  ;;  %v2244_v30 = vor.u32 %v2243_v59, %v2242_v23  ;;  %v2246_v15 = vshrl.u32 %v11038_v2, %v2231_v41  ;;  %11268 = vst [vmem:[#allocation9_spill] sm:$0xff] %v10247_v16  ;;  %v950_v49 = vpop.permute.xlu1 %949  ;;  %v5898_v60 = vpop.f32.mrb[33].mxu1 }
 0x3cf   : > { %vm10237_vm4 = vcmp.le.f32.partialorder %v11265_v63, 0.7853982  ;;  %vm2010_vm5 = vcmp.lt.s32.totalorder %v9811_v58, 0  ;;  %v2232_v11 = vshrl.u32 %v11039_v47, %v2231_v41  ;;  %vm2248_vm15 = vcmp.lt.s32.totalorder %v10204_v18, 1  ;;  %v10255_v59 = vpop.f32.mrb[34].mxu1 }
 0x3d0   : > { %vm2249_vm1 = vcmp.lt.s32.totalorder %v10204_v18, 2  ;;  %vm2250_vm8 = vcmp.lt.s32.totalorder %v10204_v18, 3  ;;  %v2191_v45 = vor.u32 4788187, %v2190_v9  ;;  %v2194_v17 = vcvt.s32.f32 %v2187_v27  ;;  %11269 = vst [vmem:[#allocation20_spill] sm:$0xff] %v10255_v59 }
 0x3d1   : > { %v2247_v20 = vor.u32 %v2246_v15, %v2245_v55  ;;  %vm2251_vm2 = vcmp.lt.s32.totalorder %v10204_v18, 4  ;;  %v2256_v41 = vsel %vm2248_vm15, %v2235_v6, %v2238_v37  ;;  %v2260_v23 = vsel %vm2248_vm15, %v2238_v37, %v2241_v52  ;;  %v5899_v15 = vpop.f32.mrb[35].mxu1 }
 0x3d2   : > { %v2253_v43 = vsel %vm2251_vm2, %v2241_v52, 2102212464  ;;  %v2257_v56 = vsel %vm2251_vm2, %v2244_v30, 920167782  ;;  %v2192_v63 = vand.u32 2147483647, %v2191_v45  ;;  %v2252_v9 = vsel %vm2248_vm15, %v2232_v11, %v2235_v6 }
 0x3d3   : > { %v2258_v55 = vsel %vm2250_vm8, %v2241_v52, %v2257_v56  ;;  %v2261_v27 = vsel %vm2251_vm2, %v2247_v20, 1326507024  ;;  %v11270_v48 = vand.u32 2147483647, %v9811_v58  ;;  %v2254_v8 = vsel %vm2250_vm8, %v2238_v37, %v2253_v43  ;;  %v10278_v20 = vpop.f32.mrb[36].mxu1 }
 0x3d4   : > { %v2259_v45 = vsel %vm2249_vm1, %v2256_v41, %v2258_v55  ;;  %v2262_v6 = vsel %vm2250_vm8, %v2244_v30, %v2261_v27  ;;  %v11273_v52 = vxor.u32 2147483648, %v11260_v21  ;;  %11274 = vst [vmem:[#allocation35_spill] sm:$0xff] %v10278_v20  ;;  %v2195_v56 = vmul.f32 %v2194_v17, %v2192_v63  ;;  %v5902_v41 = vpop.f32.mrb[37].mxu1 }
 0x3d5   : > { %vm10263_vm0 = vcmp.le.f32.partialorder %v11270_v48, 0.7853982  ;;  %v2263_v15 = vsel %vm2249_vm1, %v2260_v23, %v2262_v6  ;;  %v10283_v37 = vmul.u32.u64.low %v10198_v10, %v2259_v45  ;;  %v10284_v43 = vmul.u32.u64.high %v10198_v10, %v2259_v45, %v10283_v37  ;;  %v10296_v17 = vpop.f32.mrb[38].mxu1  ;;  %v1038_v45 = vpop.permute.xlu1 %1037 }
 0x3d6   : > { %v1485_v11 = vsel %vm1483_vm9, %v11273_v52, %v9867_v57  ;;  %v10287_v55 = vmul.u32.u64.low %v10198_v10, %v2263_v15  ;;  %v10288_v30 = vmul.u32.u64.high %v10198_v10, %v2263_v15, %v10287_v55  ;;  %v1383_v21 = vsel %vm1372_vm13, nan, %v10206_v5  ;;  %11275 = vst [vmem:[#allocation36_spill] sm:$0xff] %v10296_v17  ;;  %v5903_v19 = vpop.f32.mrb[39].mxu1 }
 0x3d7   : > { %v1486_v57 = vsel %vm1479_vm7, %v10209_v12, %v1485_v11  ;;  %v2196_v23 = vxor.u32 2147483648, %v2195_v56  ;;  %v2255_v63 = vsel %vm2249_vm1, %v2252_v9, %v2254_v8  ;;  %v10304_v48 = vadd.f32 %v10213_v24, %v10184_v26  ;;  %v6592_v8 = vld [vmem:[%s10871_s2 + $0x1] ss:$0 sm:$0xff]  ;;  %v10314_v18 = vpop.f32.mrb[40].mxu1 }
 0x3d8   : > { %v1487_v27 = vsel %vm1476_vm14, nan, %v1486_v57  ;;  %6550 = vsinq.f32 %v10112_v32  ;;  %v1992_v0 = vsel %vm10237_vm4, %v9776_v61, %v10149_v40  ;;  %v969_v46 = vmul.f32 %v6592_v8, %v950_v49  ;;  %11276 = vst [vmem:[#allocation37_spill] sm:$0xff] %v10314_v18  ;;  %v5906_v9 = vpop.f32.mrb[41].mxu1 }
 0x3d9   : > { %v2529_v5 = vpack.c.bf16 %v1487_v27, %v1383_v21  ;;  %v11277_v26 = vxor.u32 2147483648, %v10154_v33  ;;  %v2274_v32 = vadd.s32 1, %v10284_v43  ;;  %v895_v24 = vadd.f32 %v9854_v34, %v10167_v53  ;;  %v10332_v11 = vpop.f32.mrb[42].mxu1 }
 0x3da   : > { %v11002_v40 = vand.u32 2147483647, %v10304_v48  ;;  %v2271_v6 = vmul.u32 %v10198_v10, %v2255_v63  ;;  %vm2273_vm2 = vc.u32 %v10288_v30, %v10283_v37  ;;  %v2323_v49 = vand.u32 2139095040, %v10304_v48  ;;  %11278 = vst [vmem:[#allocation38_spill] sm:$0xff] %v10332_v11  ;;  %v5907_v41 = vpop.f32.mrb[43].mxu1 }
 0x3db   : > { %v2093_v12 = vsel %vm2010_vm5, %v11277_v26, %v10154_v33  ;;  %5829 = vmatmul.mubr.msk.bf16.gmra.mrb[4].mxu0 %vm2700_vm6, %v2529_v5  ;;  %v6593_v33 = vld [vmem:[%s10871_s2 + $0x2] ss:$0 sm:$0xff]  ;;  %v1990_v34 = vsub.s32 4, %v9944_v1  ;;  %v2094_v53 = vsub.s32 4, %v10021_v28  ;;  %vm11279_vm9 = vcmp.lt.s32.totalorder %v9879_v4, 0 }
 0x3dc   : > { %v1057_v52 = vmul.f32 %v6593_v33, %v1038_v45  ;;  %v2197_v10 = vsel %vm11279_vm9, %v2196_v23, %v2195_v56  ;;  %v2275_v15 = vsel %vm2273_vm2, %v2274_v32, %v10284_v43  ;;  %vm11280_vm13 = vmmov 0  }
 0x3dd   : > { %5832 = vmatprep.mubr.msk.bf16.mxu0 %vm11280_vm13, %v11051_v36  ;;  %v2276_v55 = vadd.s32 %v2275_v15, %v2271_v6  ;;  %v2324_v21 = vshrl.u32 %v2323_v49, 23  ;;  %v2327_v57 = vand.u32 8388607, %v11002_v40  ;;  %v983_v63 = vadd.f32 %v969_v46, %v895_v24  ;;  %v11287_v46 = vld [vmem:[#allocation5_spill] sm:$0xff] }
 0x3de   : > { %v11281_v27 = vsub.s32 4, %v9787_v22  ;;  %vm11282_vm7 = vcmp.lt.s32.totalorder %v9611_v31, 0  ;;  %6552 = vcosq.f32 %v1992_v0  ;;  %v2096_v56 = vsel %vm10263_vm0, %v9811_v58, %v2093_v12 }
 0x3df   : > { %v11283_v43 = vand.u32 2147483647, %v9879_v4  ;;  %v11284_v23 = vmov 0  ;;  %v2277_v19 = vadd.s32 536870912, %v2276_v55  ;;  %v5569_v5 = vadd.s32 4294967169, %v2324_v21 }
 0x3e0   : > { %v10348_v45 = vsel %vm11282_vm7, %v11281_v27, %v9787_v22  ;;  %v10359_v8 = vadd.f32 %v1057_v52, %v983_v63  ;;  %v1577_v22 = vsel %vm9795_vm12, 0, %v11287_v46  ;;  %vm11289_vm15 = vcmp.lt.s32.totalorder %v9776_v61, 0  ;;  %v10385_v52 = vpop.f32.mrb[44].mxu1  ;;  %v11294_v63 = vld [vmem:[#allocation12_spill] sm:$0xff] }
 0x3e1   : > { %vm10355_vm14 = vcmp.le.f32.partialorder %v11283_v43, 0.7853982  ;;  %v10367_v32 = vsel %vm11289_vm15, %v1990_v34, %v9944_v1  ;;  %6554 = vsinq.f32 %v1992_v0  ;;  %v10372_v12 = vsel %vm2010_vm5, %v2094_v53, %v10021_v28  ;;  %11290 = vst [vmem:[#allocation5_spill] sm:$0xff] %v10385_v52  ;;  %v11291_v53 = vld [vmem:[#allocation19_spill] sm:$0xff]  ;;  %v5910_v41 = vpop.f32.mrb[45].mxu1 }
 0x3e2   : > { %v11285_v23 = vsel %vm10355_vm14, 4294967295, %v11284_v23  ;;  %v10377_v24 = vsel %vm10355_vm14, %v9879_v4, %v2197_v10  ;;  %6556 = vcosq.f32 %v2096_v56  ;;  %v10379_v9 = vshrl.u32 %v2277_v19, 30  ;;  %v10387_v28 = vpop.eup %6550 }
 0x3e3   : > { %11286 = vst [vmem:[#allocation39_spill] sm:$0xff] %v11285_v23  ;;  %v2328_v6 = vor.u32 8388608, %v2327_v57  ;;  %v2330_v49 = vadd.s32 1, %v5569_v5  ;;  %6558 = vsinq.f32 %v2096_v56  ;;  %v10382_v1 = vadd.s32 %v10283_v37, %v10288_v30  ;;  %v11293_v30 = vld [vmem:[#allocation24_spill] sm:$0xff]  ;;  %v10396_v56 = vpop.f32.mrb[46].mxu1 }
 0x3e4   : > { %v2427_v0 = vand.u32 2139095040, %v10359_v8  ;;  %v1581_v33 = vadd.s32 3, %v1577_v22  ;;  %6560 = vcosq.f32 %v10377_v24  ;;  %v2279_v34 = vshll.u32 %v10379_v9, 30  ;;  %11295 = vst [vmem:[#allocation27_spill] sm:$0xff] %v10396_v56  ;;  %v5911_v26 = vpop.f32.mrb[47].mxu1 }
 0x3e5   : > { %vm2331_vm12 = vcmp.gt.s32.totalorder %v2330_v49, 0  ;;  %v1681_v15 = vsel %vm9884_vm11, 0, %v11291_v53  ;;  %v10400_v46 = vshll.u32 %v2328_v6, 8  ;;  %6562 = vsinq.f32 %v10377_v24 }
 0x3e6   : > { %v2332_v21 = vsel %vm2331_vm12, %v2330_v49, 0  ;;  %v2428_v37 = vshrl.u32 %v2427_v0, 23  ;;  %v10398_v43 = vsub.s32 %v2276_v55, %v2279_v34  ;;  %v10403_v53 = vand.u32 3, %v1581_v33 }
 0x3e7   : > { %v2333_v19 = vshrl.u32 %v2332_v21, 5  ;;  %v2334_v5 = vand.u32 31, %v2332_v21  ;;  %v10405_v49 = vadd.s32 3, %v1681_v15 }
 0x3e8   : > { %v5573_v10 = vadd.s32 4294967169, %v2428_v37  ;;  %v2282_v0 = vsub.s32 0, %v10398_v43  ;;  %v10410_v34 = vpop.eup %6552  ;;  %vm1584_vm8 = vcmp.eq.s32.totalorder %v10403_v53, 0  ;;  %vm1583_vm9 = vcmp.lt.s32.totalorder %v10403_v53, 2 }
 0x3e9   : > { %v2335_v41 = vsub.s32 32, %v2334_v5  ;;  %v2337_v40 = vshll.u32 %v11039_v47, %v2334_v5  ;;  %v2340_v55 = vshll.u32 %v11045_v14, %v2334_v5  ;;  %v2343_v6 = vshll.u32 %v11046_v39, %v2334_v5 }
 0x3ea   : > { %v2346_v21 = vshll.u32 %v11047_v3, %v2334_v5  ;;  %v2349_v26 = vshll.u32 %v11048_v25, %v2334_v5  ;;  %vm2352_vm11 = vcmp.lt.s32.totalorder %v2333_v19, 1  ;;  %v5566_v33 = vmin.u32 %v2282_v0, %v10398_v43 }
 0x3eb   : > { %v2336_v15 = vshrl.u32 %v11039_v47, %v2335_v41  ;;  %v2338_v37 = vshrl.u32 %v11045_v14, %v2335_v41  ;;  %v2341_v27 = vshrl.u32 %v11046_v39, %v2335_v41  ;;  %v10419_v57 = vpop.eup %6554  ;;  %v2344_v22 = vshrl.u32 %v11047_v3, %v2335_v41 }
 0x3ec   : > { %v2347_v56 = vshrl.u32 %v11048_v25, %v2335_v41  ;;  %v2350_v52 = vshrl.u32 %v11038_v2, %v2335_v41  ;;  %vm2353_vm5 = vcmp.lt.s32.totalorder %v2333_v19, 2  ;;  %v10424_v11 = vpop.eup %6556  ;;  %v2284_v5 = vclz %v5566_v33 }
 0x3ed   : > { %v2339_v18 = vor.u32 %v2338_v37, %v2337_v40  ;;  %v2342_v0 = vor.u32 %v2341_v27, %v2340_v55  ;;  %vm2354_vm1 = vcmp.lt.s32.totalorder %v2333_v19, 3  ;;  %v10427_v17 = vpop.eup %6558  ;;  %v2345_v20 = vor.u32 %v2344_v22, %v2343_v6 }
 0x3ee   : > { %v2348_v59 = vor.u32 %v2347_v56, %v2346_v21  ;;  %v2351_v16 = vor.u32 %v2350_v52, %v2349_v26  ;;  %vm2355_vm2 = vcmp.lt.s32.totalorder %v2333_v19, 4  ;;  %v10429_v23 = vpop.eup %6560  ;;  %v5567_v4 = vadd.s32 4294967294, %v2284_v5 }
 0x3ef   : > { %v2356_v41 = vsel %vm2352_vm11, %v2336_v15, %v2339_v18  ;;  %v2360_v58 = vsel %vm2352_vm11, %v2339_v18, %v2342_v0  ;;  %v2434_v13 = vadd.s32 1, %v5573_v10  ;;  %v2357_v33 = vsel %vm2355_vm2, %v2345_v20, 2102212464 }
 0x3f0   : > { %v2361_v40 = vsel %vm2355_vm2, %v2348_v59, 920167782  ;;  %v2364_v27 = vsel %vm2352_vm11, %v2342_v0, %v2345_v20  ;;  %v2365_v55 = vsel %vm2355_vm2, %v2351_v16, 1326507024  ;;  %vm5568_vm7 = vcmp.lt.s32.totalorder %v5567_v4, 0 }
 0x3f1   : > { %v2358_v56 = vsel %vm2354_vm1, %v2342_v0, %v2357_v33  ;;  %v2362_v52 = vsel %vm2354_vm1, %v2345_v20, %v2361_v40  ;;  %v2366_v22 = vsel %vm2354_vm1, %v2348_v59, %v2365_v55  ;;  %v2287_v6 = vsel %vm5568_vm7, 0, %v5567_v4 }
 0x3f2   : > { %v2363_v21 = vsel %vm2353_vm5, %v2360_v58, %v2362_v52  ;;  %v2367_v18 = vsel %vm2353_vm5, %v2364_v27, %v2366_v22  ;;  %vm1587_vm15 = vcmp.eq.s32.totalorder %v10403_v53, 2  ;;  %v2288_v10 = vsub.s32 32, %v2287_v6 }
 0x3f3   : > { %v2292_v26 = vsub.s32 4294967266, %v2287_v6  ;;  %v2359_v16 = vsel %vm2353_vm5, %v2356_v41, %v2358_v56  ;;  %v11296_v15 = vand.u32 2147483647, %v10359_v8  ;;  %v2289_v58 = vshll.u32 %v10398_v43, %v2287_v6 }
 0x3f4   : > { %v10445_v5 = vmul.u32.u64.low %v10400_v46, %v2367_v18  ;;  %v10446_v0 = vmul.u32.u64.high %v10400_v46, %v2367_v18, %v10445_v5  ;;  %v10449_v59 = vmul.u32.u64.low %v10400_v46, %v2363_v21  ;;  %v10450_v4 = vmul.u32.u64.high %v10400_v46, %v2363_v21, %v10449_v59  ;;  %v11299_v21 = vld [vmem:[#allocation26_spill] sm:$0xff] }
 0x3f5   : > { %v2431_v37 = vand.u32 8388607, %v11296_v15  ;;  %v2290_v20 = vshrl.u32 %v10382_v1, %v2288_v10  ;;  %v2293_v33 = vadd.s32 127, %v2292_v26  ;;  %vm2435_vm12 = vcmp.gt.s32.totalorder %v2434_v13, 0 }
 0x3f6   : > { %vm2218_vm11 = vcmp.lt.s32.totalorder %v10122_v42, 0  ;;  %v2302_v19 = vsub.s32 4, %v10379_v9  ;;  %v2436_v41 = vsel %vm2435_vm12, %v2434_v13, 0  ;;  %v11297_v40 = vxor.u32 2147483648, %v11293_v30 }
 0x3f7   : > { %v11298_v55 = vxor.u32 2147483648, %v11294_v63  ;;  %v2291_v1 = vor.u32 %v2290_v20, %v2289_v58  ;;  %v2294_v56 = vshll.u32 %v2293_v33, 23  ;;  %v2432_v52 = vor.u32 8388608, %v2431_v37 }
 0x3f8   : > { %v1586_v27 = vsel %vm1584_vm8, %v11294_v63, %v11297_v40  ;;  %v2438_v22 = vand.u32 31, %v2436_v41  ;;  %v2375_v6 = vmul.u32 %v10400_v46, %v2359_v16  ;;  %vm2377_vm5 = vc.u32 %v10446_v0, %v10449_v59 }
 0x3f9   : > { %v1589_v43 = vsel %vm1587_vm15, %v11298_v55, %v11293_v30  ;;  %v2378_v13 = vadd.s32 1, %v10450_v4  ;;  %vm1580_vm1 = vweird.f32 %v11299_v21  ;;  %v10471_v18 = vand.u32 3, %v10405_v49 }
 0x3fa   : > { %v2295_v10 = vor.u32 4788187, %v2294_v56  ;;  %v2437_v63 = vshrl.u32 %v2436_v41, 5  ;;  %v2439_v26 = vsub.s32 32, %v2438_v22  ;;  %v1590_v30 = vsel %vm1583_vm9, %v1586_v27, %v1589_v43 }
 0x3fb   : > { %v2298_v15 = vcvt.s32.f32 %v2291_v1  ;;  %v2379_v37 = vsel %vm2377_vm5, %v2378_v13, %v10450_v4  ;;  %v2441_v46 = vshll.u32 %v11039_v47, %v2438_v22  ;;  %v2444_v16 = vshll.u32 %v11045_v14, %v2438_v22 }
 0x3fc   : > { %v2296_v5 = vand.u32 2147483647, %v2295_v10  ;;  %v2380_v58 = vadd.s32 %v2379_v37, %v2375_v6  ;;  %v2442_v20 = vshrl.u32 %v11045_v14, %v2439_v26  ;;  %v2447_v49 = vshll.u32 %v11046_v39, %v2438_v22  ;;  %v11300_v37 = vld [vmem:[#allocation25_spill] sm:$0xff] }
 0x3fd   : > { %v2445_v33 = vshrl.u32 %v11046_v39, %v2439_v26  ;;  %v2448_v41 = vshrl.u32 %v11047_v3, %v2439_v26  ;;  %v2450_v53 = vshll.u32 %v11047_v3, %v2438_v22  ;;  %v2451_v40 = vshrl.u32 %v11048_v25, %v2439_v26 }
 0x3fe   : > { %v2299_v27 = vmul.f32 %v2298_v15, %v2296_v5  ;;  %v2381_v4 = vadd.s32 536870912, %v2380_v58  ;;  %v2453_v55 = vshll.u32 %v11048_v25, %v2438_v22  ;;  %v2454_v43 = vshrl.u32 %v11038_v2, %v2439_v26 }
 0x3ff   : > { %v2443_v1 = vor.u32 %v2442_v20, %v2441_v46  ;;  %v2446_v56 = vor.u32 %v2445_v33, %v2444_v16  ;;  %v2449_v6 = vor.u32 %v2448_v41, %v2447_v49  ;;  %v2452_v14 = vor.u32 %v2451_v40, %v2450_v53  ;;  %v11304_v49 = vld [vmem:[#allocation14_spill] sm:$0xff] }
 0x400   : > { %v10490_v39 = vsel %vm2218_vm11, %v2302_v19, %v10379_v9  ;;  %v10492_v3 = vshrl.u32 %v2381_v4, 30  ;;  %v2472_v13 = vshll.u32 %v2432_v52, 8  ;;  %v10495_v10 = vadd.s32 %v10449_v59, %v10446_v0 }
 0x401   : > { %v2455_v25 = vor.u32 %v2454_v43, %v2453_v55  ;;  %vm2459_vm8 = vcmp.lt.s32.totalorder %v2437_v63, 4  ;;  %vm1688_vm2 = vcmp.eq.s32.totalorder %v10471_v18, 0  ;;  %vm2456_vm9 = vcmp.lt.s32.totalorder %v2437_v63, 1 }
 0x402   : > { %v2383_v2 = vshll.u32 %v10492_v3, 30  ;;  %v2461_v24 = vsel %vm2459_vm8, %v2449_v6, 2102212464  ;;  %v1591_v22 = vsel %vm1580_vm1, nan, %v1590_v30  ;;  %v2300_v9 = vxor.u32 2147483648, %v2299_v27 }
 0x403   : > { %v2440_v19 = vshrl.u32 %v11039_v47, %v2439_v26  ;;  %v2464_v15 = vsel %vm2456_vm9, %v2443_v1, %v2446_v56  ;;  %v2465_v52 = vsel %vm2459_vm8, %v2452_v14, 920167782  ;;  %vm1687_vm7 = vcmp.lt.s32.totalorder %v10471_v18, 2 }
 0x404   : > { %v10505_v0 = vsub.s32 %v2380_v58, %v2383_v2  ;;  %vm2457_vm15 = vcmp.lt.s32.totalorder %v2437_v63, 2  ;;  %vm2458_vm12 = vcmp.lt.s32.totalorder %v2437_v63, 3  ;;  %v2468_v59 = vsel %vm2456_vm9, %v2446_v56, %v2449_v6 }
 0x405   : > { %vm1684_vm5 = vweird.f32 %v11300_v37  ;;  %v2460_v46 = vsel %vm2456_vm9, %v2440_v19, %v2443_v1  ;;  %v2462_v16 = vsel %vm2458_vm12, %v2446_v56, %v2461_v24  ;;  %v2466_v5 = vsel %vm2458_vm12, %v2449_v6, %v2465_v52 }
 0x406   : > { %v2469_v21 = vsel %vm2459_vm8, %v2455_v25, 1326507024  ;;  %v11301_v30 = vand.u32 2147483647, %v10122_v42  ;;  %v2386_v26 = vsub.s32 0, %v10505_v0  ;;  %v2467_v58 = vsel %vm2457_vm15, %v2464_v15, %v2466_v5 }
 0x407   : > { %v2470_v20 = vsel %vm2458_vm12, %v2452_v14, %v2469_v21  ;;  %v1689_v33 = vxor.u32 2147483648, %v11304_v49  ;;  %v2301_v41 = vsel %vm2218_vm11, %v2300_v9, %v2299_v27  ;;  %v2463_v43 = vsel %vm2457_vm15, %v2460_v46, %v2462_v16  ;;  %v11305_v14 = vld [vmem:[#allocation22_spill] sm:$0xff]  ;;  %v10538_v9 = vpop.eup %6562 }
 0x408   : > { %vm10511_vm1 = vcmp.le.f32.partialorder %v11301_v30, 0.7853982  ;;  %v2471_v53 = vsel %vm2457_vm15, %v2468_v59, %v2470_v20  ;;  %v10521_v40 = vmul.u32.u64.low %v2472_v13, %v2467_v58  ;;  %v10522_v4 = vmul.u32.u64.high %v2472_v13, %v2467_v58, %v10521_v40 }
 0x409   : > { %v5570_v55 = vmin.u32 %v2386_v26, %v10505_v0  ;;  %v10527_v1 = vmul.u32.u64.low %v2472_v13, %v2471_v53  ;;  %v10528_v56 = vmul.u32.u64.high %v2472_v13, %v2471_v53, %v10527_v1  ;;  %v2406_v6 = vsub.s32 4, %v10492_v3 }
 0x40a   : > { %v1690_v25 = vsel %vm1688_vm2, %v11305_v14, %v1689_v33  ;;  %v1692_v27 = vxor.u32 2147483648, %v11305_v14  ;;  %v1785_v24 = vsel %vm9951_vm10, 0, %v10106_v44  ;;  %vm1691_vm11 = vcmp.eq.s32.totalorder %v10471_v18, 2 }
 0x40b   : > { %v2388_v19 = vclz %v5570_v55  ;;  %v1789_v63 = vadd.s32 3, %v1785_v24  ;;  %v1889_v15 = vsel %vm10066_vm3, 0, %v10348_v45  ;;  %v2479_v52 = vmul.u32 %v2472_v13, %v2463_v43 }
 0x40c   : > { %v2482_v59 = vadd.s32 1, %v10522_v4  ;;  %v1693_v46 = vsel %vm1691_vm11, %v1692_v27, %v11304_v49  ;;  %v1893_v16 = vadd.s32 3, %v1889_v15  ;;  %vm2481_vm10 = vc.u32 %v10528_v56, %v10521_v40 }
 0x40d   : > { %v5571_v5 = vadd.s32 4294967294, %v2388_v19  ;;  %v1694_v44 = vsel %vm1687_vm7, %v1690_v25, %v1693_v46  ;;  %v1793_v21 = vxor.u32 2147483648, %v10192_v35  ;;  %v1790_v45 = vand.u32 3, %v1789_v63 }
 0x40e   : > { %v2483_v30 = vsel %vm2481_vm10, %v2482_v59, %v10522_v4  ;;  %v1695_v54 = vsel %vm1684_vm5, nan, %v1694_v44  ;;  %v1796_v13 = vxor.u32 2147483648, %v10187_v7  ;;  %v1894_v20 = vand.u32 3, %v1893_v16 }
 0x40f   : > { %vm5572_vm3 = vcmp.lt.s32.totalorder %v5571_v5, 0  ;;  %v2484_v26 = vadd.s32 %v2483_v30, %v2479_v52  ;;  %v2530_v58 = vpack.c.bf16 %v1695_v54, %v1591_v22  ;;  %v2304_v49 = vsel %vm10511_vm1, %v10122_v42, %v2301_v41 }
 0x410   : > { %v2391_v18 = vsel %vm5572_vm3, 0, %v5571_v5  ;;  %vm1792_vm8 = vcmp.eq.s32.totalorder %v1790_v45, 0  ;;  %v1897_v33 = vxor.u32 2147483648, %v10387_v28  ;;  %vm1795_vm2 = vcmp.eq.s32.totalorder %v1790_v45, 2 }
 0x411   : > { %v2392_v53 = vsub.s32 32, %v2391_v18  ;;  %v2396_v4 = vsub.s32 4294967266, %v2391_v18  ;;  %v2485_v55 = vadd.s32 536870912, %v2484_v26  ;;  %5833 = vmatmul.mubr.msk.bf16.gmra.mrb[8].mxu0 %vm2700_vm6, %v2530_v58  ;;  %v2393_v37 = vshll.u32 %v10505_v0, %v2391_v18 }
 0x412   : > { %5836 = vmatprep.mubr.msk.bf16.mxu0 %vm11280_vm13, %v11051_v36  ;;  %vm1791_vm9 = vcmp.lt.s32.totalorder %v1790_v45, 2  ;;  %v1794_v22 = vsel %vm1792_vm8, %v10187_v7, %v1793_v21  ;;  %v1797_v41 = vsel %vm1795_vm2, %v1796_v13, %v10192_v35  ;;  %vm1896_vm7 = vcmp.eq.s32.totalorder %v1894_v20, 0 }
 0x413   : > { %v2394_v43 = vshrl.u32 %v10495_v10, %v2392_v53  ;;  %v2397_v1 = vadd.s32 127, %v2396_v4  ;;  %v10566_v14 = vshrl.u32 %v2485_v55, 30  ;;  %vm1788_vm15 = vweird.f32 %v9564_v51  ;;  %v10577_v51 = vpop.f32.mrb[48].mxu1 }
 0x414   : > { %v1798_v25 = vsel %vm1791_vm9, %v1794_v22, %v1797_v41  ;;  %v1898_v27 = vsel %vm1896_vm7, %v10196_v50, %v1897_v33  ;;  %v1900_v0 = vxor.u32 2147483648, %v10196_v50  ;;  %vm1899_vm12 = vcmp.eq.s32.totalorder %v1894_v20, 2  ;;  %v5914_v52 = vpop.f32.mrb[49].mxu1 }
 0x415   : > { %v2395_v2 = vor.u32 %v2394_v43, %v2393_v37  ;;  %v2398_v24 = vshll.u32 %v2397_v1, 23  ;;  %v2487_v19 = vshll.u32 %v10566_v14, 30  ;;  %vm1892_vm5 = vweird.f32 %v9611_v31  ;;  %v10586_v29 = vpop.f32.mrb[50].mxu1 }
 0x416   : > { %vm1895_vm11 = vcmp.lt.s32.totalorder %v1894_v20, 2  ;;  %v1901_v7 = vsel %vm1899_vm12, %v1900_v0, %v10387_v28  ;;  %v1993_v35 = vsel %vm10237_vm4, 0, %v10367_v32  ;;  %v1799_v50 = vsel %vm1788_vm15, nan, %v1798_v25  ;;  %v5915_v30 = vpop.f32.mrb[51].mxu1  ;;  %v11310_v25 = vld [vmem:[#allocation33_spill] sm:$0xff] }
 0x417   : > { %v2399_v10 = vor.u32 4788187, %v2398_v24  ;;  %v10579_v63 = vsub.s32 %v2484_v26, %v2487_v19  ;;  %v2001_v15 = vxor.u32 2147483648, %v10419_v57  ;;  %vm2322_vm10 = vcmp.lt.s32.totalorder %v10304_v48, 0 }
 0x418   : > { %v2402_v59 = vcvt.s32.f32 %v2395_v2  ;;  %v1902_v46 = vsel %vm1895_vm11, %v1898_v27, %v1901_v7  ;;  %v1997_v16 = vadd.s32 3, %v1993_v35  ;;  %v2097_v28 = vsel %vm10263_vm0, 0, %v10372_v12  ;;  %v11311_v27 = vld [vmem:[#allocation16_spill] sm:$0xff] }
 0x419   : > { %v2400_v32 = vand.u32 2147483647, %v2399_v10  ;;  %v2490_v5 = vsub.s32 0, %v10579_v63  ;;  %v1903_v44 = vsel %vm1892_vm5, nan, %v1902_v46  ;;  %v2004_v21 = vxor.u32 2147483648, %v10410_v34 }
 0x41a   : > { %6564 = vcosq.f32 %v2304_v49  ;;  %v2531_v54 = vpack.c.bf16 %v1903_v44, %v1799_v50  ;;  %v1998_v45 = vand.u32 3, %v1997_v16  ;;  %v2101_v13 = vadd.s32 3, %v2097_v28  ;;  %v11312_v50 = vld [vmem:[#allocation15_spill] sm:$0xff]  ;;  %v11315_v44 = vld [vmem:[#allocation9_spill] sm:$0xff] }
 0x41b   : > { %6566 = vsinq.f32 %v2304_v49  ;;  %v11307_v26 = vand.u32 2147483647, %v10304_v48  ;;  %v2403_v12 = vmul.f32 %v2402_v59, %v2400_v32  ;;  %v5574_v58 = vmin.u32 %v2490_v5, %v10579_v63 }
 0x41c   : > { %v2105_v31 = vxor.u32 2147483648, %v10427_v17  ;;  %5837 = vmatmul.mubr.msk.bf16.gmra.mrb[12].mxu0 %vm2700_vm6, %v2531_v54  ;;  %vm2000_vm0 = vcmp.eq.s32.totalorder %v1998_v45, 0  ;;  %vm2003_vm3 = vcmp.eq.s32.totalorder %v1998_v45, 2  ;;  %v2102_v20 = vand.u32 3, %v2101_v13 }
 0x41d   : > { %vm10594_vm4 = vcmp.le.f32.partialorder %v11307_v26, 0.7853982  ;;  %v2108_v18 = vxor.u32 2147483648, %v10424_v11  ;;  %v2404_v33 = vxor.u32 2147483648, %v2403_v12  ;;  %v2492_v49 = vclz %v5574_v58  ;;  %5840 = vmatprep.mubr.msk.bf16.mxu0 %vm11280_vm13, %v11051_v36 }
 0x41e   : > { %v2002_v53 = vsel %vm2000_vm0, %v10410_v34, %v2001_v15  ;;  %v2005_v4 = vsel %vm2003_vm3, %v2004_v21, %v10419_v57  ;;  %vm1996_vm8 = vweird.f32 %v9776_v61  ;;  %vm1999_vm2 = vcmp.lt.s32.totalorder %v1998_v45, 2  ;;  %v11316_v21 = vld [vmem:[#allocation20_spill] sm:$0xff] }
 0x41f   : > { %vm2104_vm9 = vcmp.eq.s32.totalorder %v2102_v20, 0  ;;  %v4822_v55 = vmax.f32 %v10224_v62, 0.0  ;;  %v5575_v37 = vadd.s32 4294967294, %v2492_v49  ;;  %v2006_v22 = vsel %vm1999_vm2, %v2002_v53, %v2005_v4 }
 0x420   : > { %v2106_v41 = vsel %vm2104_vm9, %v10424_v11, %v2105_v31  ;;  %vm2107_vm7 = vcmp.eq.s32.totalorder %v2102_v20, 2  ;;  %vm2103_vm15 = vcmp.lt.s32.totalorder %v2102_v20, 2  ;;  %v4823_v1 = vmax.f32 %v10233_v38, 0.0 }
 0x421   : > { %v2109_v43 = vsel %vm2107_vm7, %v2108_v18, %v10427_v17  ;;  %v2198_v34 = vsub.s32 4, %v11310_v25  ;;  %v2405_v57 = vsel %vm2322_vm10, %v2404_v33, %v2403_v12  ;;  %vm5576_vm12 = vcmp.lt.s32.totalorder %v5575_v37, 0 }
 0x422   : > { %vm2100_vm5 = vweird.f32 %v11311_v27  ;;  %v2110_v0 = vsel %vm2103_vm15, %v2106_v41, %v2109_v43  ;;  %v2495_v62 = vsel %vm5576_vm12, 0, %v5575_v37  ;;  %v2007_v2 = vsel %vm1996_vm8, nan, %v2006_v22 }
 0x423   : > { %v2111_v11 = vsel %vm2100_vm5, nan, %v2110_v0  ;;  %v10617_v24 = vpack.c.bf16 %v4823_v1, %v4822_v55  ;;  %v2480_v17 = vadd.s32 %v10521_v40, %v10528_v56  ;;  %v2496_v38 = vsub.s32 32, %v2495_v62  ;;  %v11320_v0 = vld [vmem:[#allocation35_spill] sm:$0xff] }
 0x424   : > { %v2500_v19 = vsub.s32 4294967266, %v2495_v62  ;;  %v2532_v7 = vpack.c.bf16 %v2111_v11, %v2007_v2  ;;  %v6565_v35 = vpop.eup %6564  ;;  %v2407_v10 = vsel %vm2322_vm10, %v2406_v6, %v10492_v3  ;;  %v2408_v61 = vsel %vm10594_vm4, %v10304_v48, %v2405_v57 }
 0x425   : > { %vm11313_vm11 = vcmp.lt.s32.totalorder %v11312_v50, 0  ;;  %v2305_v40 = vsel %vm10511_vm1, 0, %v10490_v39  ;;  %v6567_v56 = vpop.eup %6566  ;;  %v2497_v52 = vshll.u32 %v10579_v63, %v2495_v62  ;;  %v2498_v59 = vshrl.u32 %v2480_v17, %v2496_v38 }
 0x426   : > { %v2199_v15 = vsel %vm11313_vm11, %v2198_v34, %v11310_v25  ;;  %v2501_v46 = vadd.s32 127, %v2500_v19  ;;  %5841 = vmatmul.mubr.msk.bf16.gmra.mrb[16].mxu0 %vm2700_vm6, %v2532_v7  ;;  %v2209_v28 = vxor.u32 2147483648, %v10538_v9  ;;  %v2212_v32 = vxor.u32 2147483648, %v10429_v23  ;;  %v11322_v19 = vld [vmem:[#allocation37_spill] sm:$0xff] }
 0x427   : > { %v2201_v6 = vsel %vm10355_vm14, 0, %v2199_v15  ;;  %5844 = vmatprep.mubr.msk.bf16.mxu0 %vm11280_vm13, %v11051_v36  ;;  %v2309_v47 = vadd.s32 3, %v2305_v40  ;;  %v2499_v39 = vor.u32 %v2498_v59, %v2497_v52  ;;  %v4824_v63 = vmax.f32 %v11315_v44, 0.0  ;;  %v11325_v15 = vld [vmem:[#allocation27_spill] sm:$0xff] }
 0x428   : > { %v2205_v16 = vadd.s32 3, %v2201_v6  ;;  %v2502_v5 = vshll.u32 %v2501_v46, 23  ;;  %v4825_v30 = vmax.f32 %v11316_v21, 0.0  ;;  %v2510_v54 = vsub.s32 4, %v10566_v14 }
 0x429   : > { %v2310_v13 = vand.u32 3, %v2309_v47  ;;  %v2313_v26 = vxor.u32 2147483648, %v6567_v56  ;;  %6568 = vcosq.f32 %v2408_v61  ;;  %v2316_v58 = vxor.u32 2147483648, %v6565_v35 }
 0x42a   : > { %v2206_v45 = vand.u32 3, %v2205_v16  ;;  %v2503_v12 = vor.u32 4788187, %v2502_v5  ;;  %v10646_v31 = vpack.c.bf16 %v4825_v30, %v4824_v63  ;;  %v2506_v20 = vcvt.s32.f32 %v2499_v39 }
 0x42b   : > { %vm2312_vm0 = vcmp.eq.s32.totalorder %v2310_v13, 0  ;;  %6570 = vsinq.f32 %v2408_v61  ;;  %vm2315_vm3 = vcmp.eq.s32.totalorder %v2310_v13, 2  ;;  %vm2311_vm8 = vcmp.lt.s32.totalorder %v2310_v13, 2  ;;  %v11324_v61 = vld [vmem:[#allocation5_spill] sm:$0xff] }
 0x42c   : > { %vm2207_vm14 = vcmp.lt.s32.totalorder %v2206_v45, 2  ;;  %vm2208_vm1 = vcmp.eq.s32.totalorder %v2206_v45, 0  ;;  %vm2211_vm10 = vcmp.eq.s32.totalorder %v2206_v45, 2  ;;  %v2504_v18 = vand.u32 2147483647, %v2503_v12 }
 0x42d   : > { %v2210_v33 = vsel %vm2208_vm1, %v10429_v23, %v2209_v28  ;;  %v2213_v49 = vsel %vm2211_vm10, %v2212_v32, %v10538_v9  ;;  %v2314_v4 = vsel %vm2312_vm0, %v6565_v35, %v2313_v26  ;;  %v2317_v37 = vsel %vm2315_vm3, %v2316_v58, %v6567_v56  ;;  %v11323_v35 = vld [vmem:[#allocation38_spill] sm:$0xff] }
 0x42e   : > { %v2214_v53 = vsel %vm2207_vm14, %v2210_v33, %v2213_v49  ;;  %v2507_v55 = vmul.f32 %v2506_v20, %v2504_v18  ;;  %vm2426_vm2 = vcmp.lt.s32.totalorder %v10359_v8, 0  ;;  %vm2204_vm9 = vweird.f32 %v11312_v50 }
 0x42f   : > { %vm2308_vm7 = vweird.f32 %v10122_v42  ;;  %v2318_v22 = vsel %vm2311_vm8, %v2314_v4, %v2317_v37  ;;  %v2215_v43 = vsel %vm2204_vm9, nan, %v2214_v53  ;;  %v2409_v9 = vsel %vm10594_vm4, 0, %v2407_v10  ;;  %v11321_v42 = vld [vmem:[#allocation36_spill] sm:$0xff] }
 0x430   : > { %v2508_v41 = vxor.u32 2147483648, %v2507_v55  ;;  %v2319_v23 = vsel %vm2308_vm7, nan, %v2318_v22  ;;  %v2511_v1 = vsel %vm2426_vm2, %v2510_v54, %v10566_v14  ;;  %v11317_v34 = vand.u32 2147483647, %v10359_v8 }
 0x431   : > { %v2533_v25 = vpack.c.bf16 %v2319_v23, %v2215_v43  ;;  %v4826_v62 = vmax.f32 %v11320_v0, 0.0  ;;  %v4827_v2 = vmax.f32 %v11321_v42, 0.0  ;;  %v2413_v60 = vadd.s32 3, %v2409_v9  ;;  %v11327_v43 = vld [vmem:[#allocation17_spill] sm:$0xff] }
 0x432   : > { %vm10658_vm15 = vcmp.le.f32.partialorder %v11317_v34, 0.7853982  ;;  %v2509_v27 = vsel %vm2426_vm2, %v2508_v41, %v2507_v55  ;;  %v4828_v7 = vmax.f32 %v11322_v19, 0.0  ;;  %v4829_v10 = vmax.f32 %v11323_v35, 0.0  ;;  %v6595_v55 = vld [vmem:[%s10875_s6 + $0x8] sm:$0xff]  }
 0x433   : > { %v2512_v11 = vsel %vm10658_vm15, %v10359_v8, %v2509_v27  ;;  %5845 = vmatmul.mubr.msk.bf16.gmra.mrb[20].mxu0 %vm2700_vm6, %v2533_v25  ;;  %v6569_v14 = vpop.eup %6568  ;;  %v2513_v17 = vsel %vm10658_vm15, 0, %v2511_v1  ;;  %v4838_v38 = vpack.c.bf16 %v4827_v2, %v4826_v62  ;;  %v4830_v50 = vmax.f32 %v11324_v61, 0.0  ;;  %v11328_v27 = vld [vmem:[#allocation11_spill] sm:$0xff]  ;;  %v11329_v2 = vld [vmem:[#allocation21_spill] sm:$0xff] }
 0x434   : > { %6572 = vcosq.f32 %v2512_v11  ;;  %5848 = vmatprep.mubr.msk.bf16.mxu0 %vm11280_vm13, %v11051_v36  ;;  %v4831_v40 = vmax.f32 %v11325_v15, 0.0  ;;  %v4839_v52 = vpack.c.bf16 %v4829_v10, %v4828_v7  ;;  %v4832_v46 = vmax.f32 %v10577_v51, 0.0  ;;  %v11330_v7 = vld [vmem:[#allocation23_spill] sm:$0xff] }
 0x435   : > { %6574 = vsinq.f32 %v2512_v11  ;;  %v6571_v56 = vpop.eup %6570  ;;  %v4833_v3 = vmax.f32 %v10586_v29, 0.0  ;;  %v2517_v6 = vadd.s32 3, %v2513_v17  ;;  %v2414_v16 = vand.u32 3, %v2413_v60 }
 0x436   : > { %v4840_v59 = vpack.c.bf16 %v4831_v40, %v4830_v50  ;;  %v2417_v32 = vxor.u32 2147483648, %v6571_v56  ;;  %v2420_v47 = vxor.u32 2147483648, %v6569_v14  ;;  %vm2412_vm10 = vweird.f32 %v10304_v48  ;;  %v11331_v50 = vld [vmem:[#allocation32_spill] sm:$0xff] }
 0x437   : > { %v4841_v28 = vpack.c.bf16 %v4833_v3, %v4832_v46  ;;  %v2518_v39 = vand.u32 3, %v2517_v6  ;;  %vm2416_vm4 = vcmp.eq.s32.totalorder %v2414_v16, 0  ;;  %vm2419_vm12 = vcmp.eq.s32.totalorder %v2414_v16, 2  ;;  %v11332_v3 = vld [vmem:[#allocation34_spill] sm:$0xff] }
 0x438   : > { %v2418_v44 = vsel %vm2416_vm4, %v6569_v14, %v2417_v32  ;;  %v2421_v63 = vsel %vm2419_vm12, %v2420_v47, %v6571_v56  ;;  %vm2415_vm5 = vcmp.lt.s32.totalorder %v2414_v16, 2  ;;  %vm2516_vm0 = vweird.f32 %v10359_v8  ;;  %v6594_v8 = vld [vmem:[%s10875_s6] sm:$0xff]  }
 0x439   : > { %vm2523_vm11 = vcmp.eq.s32.totalorder %v2518_v39, 2  ;;  %v2422_v45 = vsel %vm2415_vm5, %v2418_v44, %v2421_v63  ;;  %vm2520_vm14 = vcmp.eq.s32.totalorder %v2518_v39, 0  ;;  %vm2519_vm1 = vcmp.lt.s32.totalorder %v2518_v39, 2  ;;  %v11333_v32 = vld [vmem:[#allocation29_spill] sm:$0xff] }
 0x43a   : > { %v2423_v26 = vsel %vm2412_vm10, nan, %v2422_v45  ;;  %vm4855_vm3 = vcmask 261120  }
 0x43e   : > { %v6573_v5 = vpop.eup %6572 }
 0x43f   : > { %v6575_v21 = vpop.eup %6574  ;;  %v2524_v30 = vxor.u32 2147483648, %v6573_v5 }
 0x440   : > { %v2521_v54 = vxor.u32 2147483648, %v6575_v21 }
 0x441   : > { %v2525_v51 = vsel %vm2523_vm11, %v2524_v30, %v6575_v21  ;;  %v4815_v20 = vpop.f32.mrb[52].mxu1  ;;  %v11334_v30 = vld [vmem:[#allocation6_spill] sm:$0xff] }
 0x442   : > { %v2522_v29 = vsel %vm2520_vm14, %v6573_v5, %v2521_v54  ;;  %v5918_v18 = vpop.f32.mrb[53].mxu1  ;;  %v4834_v49 = vmax.f32 %v4815_v20, 0.0 }
 0x443   : > { %v2526_v13 = vsel %vm2519_vm1, %v2522_v29, %v2525_v51  ;;  %v4818_v33 = vpop.f32.mrb[54].mxu1  ;;  %v11335_v29 = vld [vmem:[#allocation10_spill] sm:$0xff] }
 0x444   : > { %v2527_v12 = vsel %vm2516_vm0, nan, %v2526_v13  ;;  %v4835_v48 = vmax.f32 %v4818_v33, 0.0  ;;  %v5919_v53 = vpop.f32.mrb[55].mxu1  ;;  %v11336_v33 = vld [vmem:[#allocation18_spill] sm:$0xff] }
 0x445   : > { %v2534_v58 = vpack.c.bf16 %v2527_v12, %v2423_v26 }
 0x446   : > { %v4842_v4 = vpack.c.bf16 %v4835_v48, %v4834_v49 }
 0x447   : > { %5849 = vmatmul.mubr.msk.bf16.gmra.mrb[24].mxu0 %vm2700_vm6, %v2534_v58 }
 0x448   : > { %5924 = vmatprep.mubr.msk.bf16.mxu0 %vm11280_vm13, %v11051_v36 }
 0x44f   : > { %5925 = vmatmul.mubr.msk.bf16.vlgmr.msra.gmra.mrb[28].mxu0 %vm4855_vm3, %v10617_v24 }
 0x450   : > { %5928 = vmatprep.mubr.msk.bf16.mxu0 %vm11280_vm13, %v11051_v36  ;;  %5953 = vmatpush3.bf16.msra.mxu0 %v6594_v8  ;;  %v11337_v8 = vld [vmem:[#allocation31_spill] sm:$0xff] }
 0x451   : > { %5954 = vmatprep.subr.bf16.mxu0 %v11051_v36 }
 0x454   : > { %5955 = vmatpush3.bf16.msra.mxu0 %v6595_v55 }
 0x457   : > { %5929 = vmatmul.mubr.msk.bf16.gmra.mrb[32].mxu0 %vm4855_vm3, %v10646_v31  ;;  %v11326_v31 = vld [vmem:[#allocation13_spill] sm:$0xff] }
 0x458   : > { %5932 = vmatprep.mubr.msk.bf16.mxu0 %vm11280_vm13, %v11051_v36 }
 0x45f   : > { %5933 = vmatmul.mubr.msk.bf16.gmra.mrb[36].mxu0 %vm4855_vm3, %v4838_v38 }
 0x460   : > { %5936 = vmatprep.mubr.msk.bf16.mxu0 %vm11280_vm13, %v11051_v36 }
 0x467   : > { %5937 = vmatmul.mubr.msk.bf16.gmra.mrb[40].mxu0 %vm4855_vm3, %v4839_v52 }
 0x468   : > { %5940 = vmatprep.mubr.msk.bf16.mxu0 %vm11280_vm13, %v11051_v36 }
 0x46f   : > { %5941 = vmatmul.mubr.msk.bf16.gmra.mrb[44].mxu0 %vm4855_vm3, %v4840_v59 }
 0x470   : > { %5944 = vmatprep.mubr.msk.bf16.mxu0 %vm11280_vm13, %v11051_v36 }
 0x477   : > { %5945 = vmatmul.mubr.msk.bf16.gmra.mrb[48].mxu0 %vm4855_vm3, %v4841_v28 }
 0x478   : > { %5948 = vmatprep.mubr.msk.bf16.mxu0 %vm11280_vm13, %v11051_v36 }
 0x47f   : > { %5949 = vmatmul.mubr.msk.bf16.gmra.mrb[52].mxu0 %vm4855_vm3, %v4842_v4 }
 0x480   : > { %5956 = vmatprep.mubr.msk.bf16.mxu0 %vm11280_vm13, %v11051_v36 }
 0x48d   : > { %v2760_v24 = vpop.f32.mrb[0].mxu0 }
 0x48e   : > { %v2761_v37 = vadd.f32 %v2760_v24, %v11326_v31  ;;  %v5826_v22 = vpop.f32.mrb[1].mxu0 }
 0x48f   : > { %v2763_v41 = vpop.f32.mrb[2].mxu0 }
 0x490   : > { %v2764_v23 = vadd.f32 %v2763_v41, %v11327_v43  ;;  %v5827_v9 = vpop.f32.mrb[3].mxu0  ;;  %v2815_v1 = vmax.f32 %v2761_v37, 0.0  ;;  %v11338_v41 = vld [vmem:[#allocation8_spill] sm:$0xff] }
 0x492   : > { %v2816_v25 = vmax.f32 %v2764_v23, 0.0 }
 0x494   : > { %v2829_v34 = vpack.c.bf16 %v2816_v25, %v2815_v1  ;;  %v11339_v1 = vld [vmem:[#allocation30_spill] sm:$0xff] }
 0x496   : > { %5957 = vmatmul.mubr.msk.bf16.vlgmr.msra.gmra.mrb[28].mxu0 %vm4855_vm3, %v2829_v34 }
 0x497   : > { %5960 = vmatprep.mubr.msk.bf16.mxu0 %vm11280_vm13, %v11051_v36 }
 0x4ae   : > { %v2768_v57 = vpop.f32.mrb[4].mxu0 }
 0x4af   : > { %v2769_v0 = vadd.f32 %v2768_v57, %v11328_v27  ;;  %v5830_v62 = vpop.f32.mrb[5].mxu0 }
 0x4b0   : > { %v2771_v42 = vpop.f32.mrb[6].mxu0 }
 0x4b1   : > { %v2772_v11 = vadd.f32 %v2771_v42, %v11329_v2  ;;  %v5831_v60 = vpop.f32.mrb[7].mxu0  ;;  %v2817_v14 = vmax.f32 %v2769_v0, 0.0 }
 0x4b3   : > { %v2818_v17 = vmax.f32 %v2772_v11, 0.0 }
 0x4b5   : > { %v2830_v38 = vpack.c.bf16 %v2818_v17, %v2817_v14 }
 0x4b7   : > { %5961 = vmatmul.mubr.msk.bf16.gmra.mrb[32].mxu0 %vm4855_vm3, %v2830_v38 }
 0x4b8   : > { %5964 = vmatprep.mubr.msk.bf16.mxu0 %vm11280_vm13, %v11051_v36 }
 0x4e4   : > { %v2776_v19 = vpop.f32.mrb[8].mxu0 }
 0x4e5   : > { %v2777_v35 = vadd.f32 %v2776_v19, %v11330_v7  ;;  %v5834_v10 = vpop.f32.mrb[9].mxu0 }
 0x4e6   : > { %v2779_v61 = vpop.f32.mrb[10].mxu0 }
 0x4e7   : > { %v2780_v15 = vadd.f32 %v2779_v61, %v11331_v50  ;;  %v5835_v40 = vpop.f32.mrb[11].mxu0  ;;  %v2819_v56 = vmax.f32 %v2777_v35, 0.0 }
 0x4e9   : > { %v2820_v52 = vmax.f32 %v2780_v15, 0.0 }
 0x4eb   : > { %v2831_v59 = vpack.c.bf16 %v2820_v52, %v2819_v56 }
 0x4ed   : > { %5965 = vmatmul.mubr.msk.bf16.gmra.mrb[36].mxu0 %vm4855_vm3, %v2831_v59 }
 0x4ee   : > { %5968 = vmatprep.mubr.msk.bf16.mxu0 %vm11280_vm13, %v11051_v36 }
 0x4ef   : > { %v2784_v46 = vpop.f32.mrb[12].mxu0 }
 0x4f0   : > { %v2785_v6 = vadd.f32 %v2784_v46, %v11332_v3  ;;  %v5838_v16 = vpop.f32.mrb[13].mxu0 }
 0x4f1   : > { %v2787_v28 = vpop.f32.mrb[14].mxu0 }
 0x4f2   : > { %v2788_v47 = vadd.f32 %v2787_v28, %v11333_v32  ;;  %v5839_v39 = vpop.f32.mrb[15].mxu0  ;;  %v2821_v5 = vmax.f32 %v2785_v6, 0.0 }
 0x4f4   : > { %v2822_v44 = vmax.f32 %v2788_v47, 0.0 }
 0x4f6   : > { %v2832_v63 = vpack.c.bf16 %v2822_v44, %v2821_v5 }
 0x4f8   : > { %5969 = vmatmul.mubr.msk.bf16.gmra.mrb[40].mxu0 %vm4855_vm3, %v2832_v63 }
 0x4f9   : > { %v2792_v21 = vpop.f32.mrb[16].mxu0  ;;  %5972 = vmatprep.mubr.msk.bf16.mxu0 %vm11280_vm13, %v11051_v36 }
 0x4fa   : > { %v2793_v54 = vadd.f32 %v2792_v21, %v11334_v30  ;;  %v5842_v45 = vpop.f32.mrb[17].mxu0 }
 0x4fb   : > { %v2795_v51 = vpop.f32.mrb[18].mxu0 }
 0x4fc   : > { %v2796_v13 = vadd.f32 %v2795_v51, %v11335_v29  ;;  %v5843_v26 = vpop.f32.mrb[19].mxu0  ;;  %v2823_v12 = vmax.f32 %v2793_v54, 0.0 }
 0x4fe   : > { %v2824_v58 = vmax.f32 %v2796_v13, 0.0 }
 0x500   : > { %v2833_v20 = vpack.c.bf16 %v2824_v58, %v2823_v12 }
 0x502   : > { %5973 = vmatmul.mubr.msk.bf16.gmra.mrb[44].mxu0 %vm4855_vm3, %v2833_v20 }
 0x503   : > { %5976 = vmatprep.mubr.msk.bf16.mxu0 %vm11280_vm13, %v11051_v36 }
 0x506   : > { %v2800_v18 = vpop.f32.mrb[20].mxu0 }
 0x507   : > { %v2801_v49 = vadd.f32 %v2800_v18, %v11336_v33  ;;  %v5846_v48 = vpop.f32.mrb[21].mxu0 }
 0x508   : > { %v2803_v53 = vpop.f32.mrb[22].mxu0 }
 0x509   : > { %v2804_v4 = vadd.f32 %v2803_v53, %v11337_v8  ;;  %v5847_v55 = vpop.f32.mrb[23].mxu0  ;;  %v2825_v24 = vmax.f32 %v2801_v49, 0.0 }
 0x50b   : > { %v2826_v31 = vmax.f32 %v2804_v4, 0.0 }
 0x50d   : > { %v2834_v37 = vpack.c.bf16 %v2826_v31, %v2825_v24 }
 0x50f   : > { %5977 = vmatmul.mubr.msk.bf16.gmra.mrb[48].mxu0 %vm4855_vm3, %v2834_v37 }
 0x510   : > { %5980 = vmatprep.mubr.msk.bf16.mxu0 %vm11280_vm13, %v11051_v36 }
 0x51a   : > { %v2808_v22 = vpop.f32.mrb[24].mxu0 }
 0x51b   : > { %v2809_v43 = vadd.f32 %v2808_v22, %v11338_v41  ;;  %v5850_v23 = vpop.f32.mrb[25].mxu0 }
 0x51c   : > { %v2811_v9 = vpop.f32.mrb[26].mxu0 }
 0x51d   : > { %v2812_v25 = vadd.f32 %v2811_v9, %v11339_v1  ;;  %v5851_v34 = vpop.f32.mrb[27].mxu0  ;;  %v2827_v57 = vmax.f32 %v2809_v43, 0.0 }
 0x51f   : > { %v2828_v27 = vmax.f32 %v2812_v25, 0.0 }
 0x521   : > { %v2835_v0 = vpack.c.bf16 %v2828_v27, %v2827_v57 }
 0x523   : > { %5981 = vmatmul.mubr.msk.bf16.gmra.mrb[52].mxu0 %vm4855_vm3, %v2835_v0 }
 0x569   : > { %v5021_v62 = vpop.f32.mrb[28].mxu0 }
 0x56a   : > { %v5076_v42 = vmul.f32 0.5, %v5021_v62  ;;  %v5958_v2 = vpop.f32.mrb[29].mxu0 }
 0x56b   : > { %v5024_v11 = vpop.f32.mrb[30].mxu0 }
 0x56c   : > { %5090 = vst.msk [vmem:[%s10748_s15] sm:$0xff] %vm4855_vm3, %v5076_v42  ;;  %v5077_v36 = vmul.f32 0.5, %v5024_v11  ;;  %v5959_v60 = vpop.f32.mrb[31].mxu0 }
 0x56e   : > { %5091 = vst.msk [vmem:[%s10748_s15 + $0x8] sm:$0xff] %vm4855_vm3, %v5077_v36 }
 0x58a   : > { %v5029_v14 = vpop.f32.mrb[32].mxu0 }
 0x58b   : > { %v5078_v17 = vmul.f32 0.5, %v5029_v14  ;;  %v5962_v38 = vpop.f32.mrb[33].mxu0 }
 0x58c   : > { %v5032_v19 = vpop.f32.mrb[34].mxu0 }
 0x58d   : > { %5092 = vst.msk [vmem:[%s10748_s15 + $0x10] sm:$0xff] %vm4855_vm3, %v5078_v17  ;;  %v5079_v7 = vmul.f32 0.5, %v5032_v19  ;;  %v5963_v35 = vpop.f32.mrb[35].mxu0 }
 0x58f   : > { %5093 = vst.msk [vmem:[%s10748_s15 + $0x18] sm:$0xff] %vm4855_vm3, %v5079_v7 }
 0x5c0   : > { %v5037_v10 = vpop.f32.mrb[36].mxu0 }
 0x5c1   : > { %v5080_v61 = vmul.f32 0.5, %v5037_v10  ;;  %v5966_v50 = vpop.f32.mrb[37].mxu0 }
 0x5c2   : > { %v5040_v15 = vpop.f32.mrb[38].mxu0 }
 0x5c3   : > { %5094 = vst.msk [vmem:[%s10748_s15 + $0x20] sm:$0xff] %vm4855_vm3, %v5080_v61  ;;  %v5081_v40 = vmul.f32 0.5, %v5040_v15  ;;  %v5967_v56 = vpop.f32.mrb[39].mxu0 }
 0x5c5   : > { %5095 = vst.msk [vmem:[%s10748_s15 + $0x28] sm:$0xff] %vm4855_vm3, %v5081_v40 }
 0x5cb   : > { %v5045_v52 = vpop.f32.mrb[40].mxu0 }
 0x5cc   : > { %v5082_v59 = vmul.f32 0.5, %v5045_v52  ;;  %v5970_v46 = vpop.f32.mrb[41].mxu0 }
 0x5cd   : > { %v5048_v3 = vpop.f32.mrb[42].mxu0 }
 0x5ce   : > { %5096 = vst.msk [vmem:[%s10748_s15 + $0x30] sm:$0xff] %vm4855_vm3, %v5082_v59  ;;  %v5083_v6 = vmul.f32 0.5, %v5048_v3  ;;  %v5971_v16 = vpop.f32.mrb[43].mxu0 }
 0x5d0   : > { %5097 = vst.msk [vmem:[%s10748_s15 + $0x38] sm:$0xff] %vm4855_vm3, %v5083_v6 }
 0x5d5   : > { %v5053_v28 = vpop.f32.mrb[44].mxu0 }
 0x5d6   : > { %v5084_v32 = vmul.f32 0.5, %v5053_v28  ;;  %v5974_v47 = vpop.f32.mrb[45].mxu0 }
 0x5d7   : > { %v5056_v39 = vpop.f32.mrb[46].mxu0 }
 0x5d8   : > { %5098 = vst.msk [vmem:[%s10748_s15 + $0x40] sm:$0xff] %vm4855_vm3, %v5084_v32  ;;  %v5085_v5 = vmul.f32 0.5, %v5056_v39  ;;  %v5975_v44 = vpop.f32.mrb[47].mxu0 }
 0x5da   : > { %5099 = vst.msk [vmem:[%s10748_s15 + $0x48] sm:$0xff] %vm4855_vm3, %v5085_v5 }
 0x5e2   : > { %v5061_v63 = vpop.f32.mrb[48].mxu0 }
 0x5e3   : > { %v5086_v21 = vmul.f32 0.5, %v5061_v63  ;;  %v5978_v30 = vpop.f32.mrb[49].mxu0 }
 0x5e4   : > { %v5064_v54 = vpop.f32.mrb[50].mxu0 }
 0x5e5   : > { %5100 = vst.msk [vmem:[%s10748_s15 + $0x50] sm:$0xff] %vm4855_vm3, %v5086_v21  ;;  %v5087_v45 = vmul.f32 0.5, %v5064_v54  ;;  %v5979_v51 = vpop.f32.mrb[51].mxu0 }
 0x5e7   : > { %5101 = vst.msk [vmem:[%s10748_s15 + $0x58] sm:$0xff] %vm4855_vm3, %v5087_v45 }
 0x5f5   : > { %5110 = sbr.rel (!%p6902_p5) target bundleno = 1593 (0x639), region = 156 }
 0x5f6   : > { %v5069_v29 = vpop.f32.mrb[52].mxu0 }
 0x5f7   : > { %v5088_v13 = vmul.f32 0.5, %v5069_v29  ;;  %v5982_v26 = vpop.f32.mrb[53].mxu0 }
 0x5f8   : > { %v5072_v12 = vpop.f32.mrb[54].mxu0 }
 0x5f9   : > { %5102 = vst.msk [vmem:[%s10748_s15 + $0x60] sm:$0xff] %vm4855_vm3, %v5088_v13  ;;  %v5089_v58 = vmul.f32 0.5, %v5072_v12  ;;  %v5983_v20 = vpop.f32.mrb[55].mxu0 }
 0x5fb   : > { %5103 = vst.msk [vmem:[%s10748_s15 + $0x68] sm:$0xff] %vm4855_vm3, %v5089_v58 }
 0x5fc   : > { %s11359_s29 = smov (!%p5113_p13, %s5112_s29), 14 }
 0x5fd   : > { %s5711_s20 = sshll.u32 %s11359_s29, 7 }
 0x5fe   : > { %p5714_p0 = scmp.eq.s32.totalorder %s5711_s20, 0 }
 0x5ff   : > { %6596 = sdivrem.u32 (!%p5714_p0), %s11359_s29, 14 }
 0x600   : > { %5121 = sbr.rel (%p5714_p0) target bundleno = 1593 (0x639), region = 160 }
 0x608   : > { %s10791_s10 = spop.drf %6596 }
 0x609   : > { %p5715_p5 = scmp.le.s32.totalorder %s10791_s10, 0 }
 0x60a   : > { %s11340_s27 = smov (!%p5715_p5), %s10785_s17  ;;  %s11341_s14 = smov (!%p5715_p5), %s10748_s15 }
 0x60b   : > { %5443 = sbr.rel (%p5715_p5) target bundleno = 1564 (0x61c), region = 311  ;;  %s10800_s21 = smov (!%p5715_p5), 0  }
 0x60c   : > { %s10802_s23 = smov (!%p5715_p5), 0  }
 0x612 LB: >> { %v5211_v18 = vld [vmem:[%s6790_s14] sm:$0xff]  ;;  %v5213_v33 = vld [vmem:[%s6790_s14 + $0x8] sm:$0xff]  ;;  %v5215_v49 = vld [vmem:[%s6790_s14 + $0x10] sm:$0xff]  ;;  %s5239_s22 = sadd.s32 1, %s6794_s21  ;;  %s5205_s23 = sadd.s32 1, %s6798_s23   ;;  %s6798_s23 = sphi %s10802_s23, %s5205_s23   ;;  %s6794_s21 = sphi %s10800_s21, %s11342_s21   ;;  %s6790_s14 = sphi %s11341_s14, %s5244_s14   ;;  %s6786_s27 = sphi %s11340_s27, %s5245_s27  }
 0x613   : >> { %5212 = vst [vmem:[%s6786_s27] sm:$0xff] %v5211_v18  ;;  %5214 = vst [vmem:[%s6786_s27 + $0x8] sm:$0xff] %v5213_v33  ;;  %v5217_v48 = vld [vmem:[%s6790_s14 + $0x18] sm:$0xff]  ;;  %v5219_v53 = vld [vmem:[%s6790_s14 + $0x20] sm:$0xff]  ;;  %p5240_p1 = scmp.ge.s32.totalorder %s5239_s22, %s10791_s10  ;;  %p5204_p2 = scmp.ge.s32.totalorder %s5205_s23, %s10791_s10 }
 0x614   : >> { %5216 = vst [vmem:[%s6786_s27 + $0x10] sm:$0xff] %v5215_v49  ;;  %v5221_v8 = vld [vmem:[%s6790_s14 + $0x28] sm:$0xff]  ;;  %5218 = vst [vmem:[%s6786_s27 + $0x18] sm:$0xff] %v5217_v48  ;;  %v5223_v4 = vld [vmem:[%s6790_s14 + $0x30] sm:$0xff] }
 0x615   : >> { %5220 = vst [vmem:[%s6786_s27 + $0x20] sm:$0xff] %v5219_v53  ;;  %5222 = vst [vmem:[%s6786_s27 + $0x28] sm:$0xff] %v5221_v8  ;;  %v5225_v55 = vld [vmem:[%s6790_s14 + $0x38] sm:$0xff]  ;;  %v5227_v24 = vld [vmem:[%s6790_s14 + $0x40] sm:$0xff]  ;;  %s11361_s22 = smov (%p5240_p1, %s5239_s22), 0  ;;  %5207 = sbr.rel (!%p5204_p2) target bundleno = 1554 (0x612), region = 317 }
 0x616   : >> { %5224 = vst [vmem:[%s6786_s27 + $0x30] sm:$0xff] %v5223_v4  ;;  %5226 = vst [vmem:[%s6786_s27 + $0x38] sm:$0xff] %v5225_v55  ;;  %v5229_v31 = vld [vmem:[%s6790_s14 + $0x48] sm:$0xff]  ;;  %v5231_v37 = vld [vmem:[%s6790_s14 + $0x50] sm:$0xff]  ;;  %s5242_s18 = smul.u32 112, %s11361_s22  ;;  %s11342_s21 = smov %s11361_s22 }
 0x617   : >> { %5228 = vst [vmem:[%s6786_s27 + $0x40] sm:$0xff] %v5227_v24  ;;  %v5233_v22 = vld [vmem:[%s6790_s14 + $0x58] sm:$0xff]  ;;  %5230 = vst [vmem:[%s6786_s27 + $0x48] sm:$0xff] %v5229_v31  ;;  %v5235_v41 = vld [vmem:[%s6790_s14 + $0x60] sm:$0xff] }
 0x618   : >> { %5232 = vst [vmem:[%s6786_s27 + $0x50] sm:$0xff] %v5231_v37  ;;  %5234 = vst [vmem:[%s6786_s27 + $0x58] sm:$0xff] %v5233_v22  ;;  %v5237_v43 = vld [vmem:[%s6790_s14 + $0x68] sm:$0xff]  ;;  %s5244_s14 = scalar_lea.vmem %s10748_s15, %s5242_s18 [#allocation4]  }
 0x619   : >> { %5236 = vst [vmem:[%s6786_s27 + $0x60] sm:$0xff] %v5235_v41  ;;  %5238 = vst [vmem:[%s6786_s27 + $0x68] sm:$0xff] %v5237_v43  ;;  %s5245_s27 = scalar_lea.vmem %s10785_s17, %s5242_s18  }
 0x61c PF: > { %6598 = sdivrem.u32 %s11359_s29, 14 }
 0x61d   : > { %s5716_s13 = smul.u32 112, %s10791_s10 }
 0x61f   : > { %s5250_s19 = scalar_lea.vmem %s10748_s15, %s5716_s13 [#allocation4]   ;;  %s5252_s12 = scalar_lea.vmem %s10785_s17, %s5716_s13  }
 0x625   : > { %s6599_s30 = spop.drf %6598 }
 0x626   : > { %p5718_p3 = scmp.le.s32.totalorder %s6599_s30, 0 }
 0x627   : > { %s6800_s26 = smov (!%p5718_p3), %s5252_s12   ;;  %s6804_s24 = smov (!%p5718_p3), %s5250_s19  }
 0x628   : > { %5457 = sbr.rel (%p5718_p3) target bundleno = 1593 (0x639), region = 322  ;;  %s6808_s9 = smov (!%p5718_p3), 0  }
 0x629   : > { %s6812_s16 = smov (!%p5718_p3), 0  }
 0x62f LB: >> { %v5262_v23 = vld [vmem:[%s6806_s24] sm:$0xff]  ;;  %s5264_s11 = sadd.s32 1, %s6810_s9  ;;  %s5256_s16 = sadd.s32 1, %s6814_s16   ;;  %s6814_s16 = sphi %s6812_s16, %s5256_s16   ;;  %s6810_s9 = sphi %s6808_s9, %s6809_s9   ;;  %s6806_s24 = sphi %s6804_s24, %s5269_s24   ;;  %s6802_s26 = sphi %s6800_s26, %s5270_s26  }
 0x630   : >> { %5263 = vst [vmem:[%s6802_s26] sm:$0xff] %v5262_v23  ;;  %p5265_p4 = scmp.ge.s32.totalorder %s5264_s11, %s6599_s30  ;;  %p5255_p6 = scmp.ge.s32.totalorder %s5256_s16, %s6599_s30 }
 0x632   : >> { %s11363_s11 = smov (%p5265_p4, %s5264_s11), 0  ;;  %5258 = sbr.rel (!%p5255_p6) target bundleno = 1583 (0x62f), region = 328 }
 0x633   : >> { %s5719_s15 = sshll.u32 %s11363_s11, 3  ;;  %s6809_s9 = smov %s11363_s11  }
 0x634   : >> { %s5269_s24 = scalar_lea.vmem %s5250_s19, %s5719_s15 [#allocation4]   ;;  %s5270_s26 = scalar_lea.vmem %s5252_s12, %s5719_s15  }
 0x639 PF: > { %p14_p7 = scmp.ge.s32.totalorder %s6886_s28, 4   ;;  %s11343_s24 = smov %s6714_s25 }
 0x63a   : > { %s11344_s25 = smov %s6896_s8  ;;  %s11345_s26 = smov %s6886_s28 }
 0x63b   :  { %16 = sbr.rel (!%p14_p7) target bundleno = 2 (0x2), region = 339 }

</bundles_post_ra>
